<compile_context>
chip_gen: v5e
topology: v5e:2x2
jax: 0.10.0
libtpu: 0.0.40
codegen_flags: <defaults>
</compile_context>

<pallas_src>
import functools

import jax
import jax.numpy as jnp
from jax.experimental import pallas as pl
from jax.experimental.pallas import tpu as pltpu

IN_DIM, HID, LATENT = 2000, 500, 20        # logical (PyTorch) sizes
IN_P, HID_P, LAT_P = 2048, 512, 128        # lane/sublane padded sizes
LV_OFF = 64                                # lane offset of logvar inside the packed head
NEG = -1e30                                # bias for padded logit lanes (ignored by log_softmax)


def _vae_kernel(x_ref, eps_ref,
                w1_ref, b1_ref,
                wenc_ref, benc_ref,
                w3_ref, b3_ref,
                w4_ref, b4_ref,
                recon_ref, mulv_ref):
    # --- encode: fc1 + relu (bf16 weights, f32 MXU accumulate) ---
    x = x_ref[...]                                                        # [Bp, 2048] f32
    h1 = jnp.dot(x.astype(jnp.bfloat16), w1_ref[...],
                 preferred_element_type=jnp.float32) + b1_ref[...]
    h1 = jnp.maximum(h1, 0.0)                                             # [Bp, 512]

    # --- fused fc21 || fc22 head: mu in lanes [0,20), logvar in lanes [64,84) ---
    head = jnp.dot(h1, wenc_ref[...],
                   preferred_element_type=jnp.float32) + benc_ref[...]    # [Bp, 128]
    mulv_ref[...] = head                                                  # one lane-dense store

    # --- reparameterize, fully lane-aligned ---
    # roll logvar lanes onto lanes [0,20); padded lanes of `head` are exact zeros.
    lv_aligned = pltpu.roll(head, shift=LAT_P - LV_OFF, axis=1)
    # lanes [0,20): mu + eps*exp(0.5*logvar); lanes [20,64): 0; lanes >=64: garbage
    # (killed below by the zero rows of the padded w3).
    z = head + eps_ref[...] * jnp.exp(0.5 * lv_aligned)                   # [Bp, 128]

    # --- decode: fc3 + relu, fc4 (bf16), log_softmax over the last axis ---
    h3 = jnp.maximum(jnp.dot(z, w3_ref[...],
                             preferred_element_type=jnp.float32) + b3_ref[...], 0.0)
    logits = jnp.dot(h3.astype(jnp.bfloat16), w4_ref[...],
                     preferred_element_type=jnp.float32) + b4_ref[...]    # [Bp, 2048]
    m = jnp.max(logits, axis=-1, keepdims=True)
    shifted = logits - m
    lse = jnp.log(jnp.sum(jnp.exp(shifted), axis=-1, keepdims=True))
    recon_ref[...] = shifted - lse


def init_params(key):
    """f32 params mimicking nn.Linear default init, stored as [in, out]."""
    def linear(key, fan_in, fan_out):
        kw, kb = jax.random.split(key)
        bound = 1.0 / jnp.sqrt(fan_in)
        w = jax.random.uniform(kw, (fan_in, fan_out), jnp.float32, -bound, bound)
        b = jax.random.uniform(kb, (1, fan_out), jnp.float32, -bound, bound)
        return w, b

    k1, k21, k22, k3, k4 = jax.random.split(key, 5)
    w1, b1 = linear(k1, IN_DIM, HID)
    w21, b21 = linear(k21, HID, LATENT)
    w22, b22 = linear(k22, HID, LATENT)
    w3, b3 = linear(k3, LATENT, HID)
    w4, b4 = linear(k4, HID, IN_DIM)
    return dict(w1=w1, b1=b1, w21=w21, b21=b21, w22=w22, b22=b22,
                w3=w3, b3=b3, w4=w4, b4=b4)


def pack_params(p):
    """One-time conversion of natural f32 params into the padded kernel layout."""
    w1 = jnp.zeros((IN_P, HID_P), jnp.float32).at[:IN_DIM, :HID].set(p["w1"])
    b1 = jnp.zeros((1, HID_P), jnp.float32).at[:, :HID].set(p["b1"])
    wenc = (jnp.zeros((HID_P, LAT_P), jnp.float32)
            .at[:HID, :LATENT].set(p["w21"])
            .at[:HID, LV_OFF:LV_OFF + LATENT].set(p["w22"]))
    benc = (jnp.zeros((1, LAT_P), jnp.float32)
            .at[:, :LATENT].set(p["b21"])
            .at[:, LV_OFF:LV_OFF + LATENT].set(p["b22"]))
    w3 = jnp.zeros((LAT_P, HID_P), jnp.float32).at[:LATENT, :HID].set(p["w3"])
    b3 = jnp.zeros((1, HID_P), jnp.float32).at[:, :HID].set(p["b3"])
    w4 = jnp.zeros((HID_P, IN_P), jnp.float32).at[:HID, :IN_DIM].set(p["w4"])
    b4 = jnp.full((1, IN_P), NEG, jnp.float32).at[:, :IN_DIM].set(p["b4"])
    return dict(w1=w1.astype(jnp.bfloat16), b1=b1, wenc=wenc, benc=benc,
                w3=w3, b3=b3, w4=w4.astype(jnp.bfloat16), b4=b4)


@jax.jit
def vae_forward(x, eps, kp):
    """x: [..., 2000] f32, eps: [B, 20] f32, kp: pack_params(...) output.
    Returns (recon log-probs [B,2000], mu [B,20], logvar [B,20])."""
    x = x.reshape(-1, IN_DIM)
    B = x.shape[0]
    Bp = ((B + 7) // 8) * 8                       # pad batch to sublane granule
    xp = jnp.zeros((Bp, IN_P), jnp.float32).at[:B, :IN_DIM].set(x)
    epsp = jnp.zeros((Bp, LAT_P), jnp.float32).at[:B, :LATENT].set(eps)

    args = (xp, epsp, kp["w1"], kp["b1"], kp["wenc"], kp["benc"],
            kp["w3"], kp["b3"], kp["w4"], kp["b4"])
    vmem = pl.BlockSpec(memory_space=pltpu.MemorySpace.VMEM)

    bytes_accessed = (sum(a.size * a.dtype.itemsize for a in args)
                      + Bp * IN_P * 4 + Bp * LAT_P * 4)
    cost = pl.CostEstimate(
        flops=2 * Bp * (IN_P * HID_P + HID_P * LAT_P + LAT_P * HID_P + HID_P * IN_P),
        transcendentals=Bp * (LAT_P + IN_P),
        bytes_accessed=bytes_accessed)

    recon_p, mulv = pl.pallas_call(
        _vae_kernel,
        out_shape=(jax.ShapeDtypeStruct((Bp, IN_P), jnp.float32),   # padded log-probs
                   jax.ShapeDtypeStruct((Bp, LAT_P), jnp.float32)), # packed mu|logvar slab
        in_specs=[vmem] * len(args),
        out_specs=(vmem, vmem),
        compiler_params=pltpu.CompilerParams(vmem_limit_bytes=32 * 1024 * 1024),
        cost_estimate=cost,
    )(*args)

    recon = recon_p[:B, :IN_DIM]
    mu = mulv[:B, :LATENT]
    logvar = mulv[:B, LV_OFF:LV_OFF + LATENT]
    return recon, mu, logvar


def vae_forward_ref(x, eps, p):
    """Pure-JAX reference with matching numerics (bf16 fc1/fc4, f32 accumulate)."""
    x = x.reshape(-1, IN_DIM)
    hi = jax.lax.Precision.HIGHEST
    h1 = jnp.maximum(
        jnp.dot(x.astype(jnp.bfloat16), p["w1"].astype(jnp.bfloat16),
                preferred_element_type=jnp.float32) + p["b1"], 0.0)
    mu = jnp.dot(h1, p["w21"], precision=hi) + p["b21"]
    logvar = jnp.dot(h1, p["w22"], precision=hi) + p["b22"]
    z = mu + eps * jnp.exp(0.5 * logvar)
    h3 = jnp.maximum(jnp.dot(z, p["w3"], precision=hi) + p["b3"], 0.0)
    logits = jnp.dot(h3.astype(jnp.bfloat16), p["w4"].astype(jnp.bfloat16),
                     preferred_element_type=jnp.float32) + p["b4"]
    return jax.nn.log_softmax(logits, axis=-1), mu, logvar


if __name__ == "__main__":
    key = jax.random.PRNGKey(0)
    kparam, kx, ke = jax.random.split(key, 3)

    B = 4
    params = init_params(kparam)
    packed = pack_params(params)        # done once, outside the forward

    # Input shaped like a flattened batch; forward does x.view(-1, 2000).
    x = jax.random.normal(kx, (B, IN_DIM), jnp.float32)
    # eps corresponds to torch.randn_like(std) in reparameterize (explicit -> deterministic).
    eps = jax.random.normal(ke, (B, LATENT), jnp.float32)

    recon, mu, logvar = vae_forward(x, eps, packed)
    jax.block_until_ready((recon, mu, logvar))

    r_ref, mu_ref, lv_ref = vae_forward_ref(x, eps, params)
    assert recon.shape == (B, IN_DIM) and mu.shape == (B, LATENT) and logvar.shape == (B, LATENT)
    assert jnp.allclose(recon, r_ref, atol=5e-3, rtol=5e-3), float(jnp.max(jnp.abs(recon - r_ref)))
    assert jnp.allclose(mu, mu_ref, atol=5e-3, rtol=5e-3), float(jnp.max(jnp.abs(mu - mu_ref)))
    assert jnp.allclose(logvar, lv_ref, atol=5e-3, rtol=5e-3), float(jnp.max(jnp.abs(logvar - lv_ref)))

    print("KERNEL_OK")
</pallas_src>

<mosaic_0001>
module attributes {stable_mosaic.version = 11 : i64} {
  func.func @_vae_kernel(%arg0: memref<8x2048xf32, #tpu.memory_space<vmem>>, %arg1: memref<8x128xf32, #tpu.memory_space<vmem>>, %arg2: memref<2048x512xbf16, #tpu.memory_space<vmem>>, %arg3: memref<1x512xf32, #tpu.memory_space<vmem>>, %arg4: memref<512x128xf32, #tpu.memory_space<vmem>>, %arg5: memref<1x128xf32, #tpu.memory_space<vmem>>, %arg6: memref<128x512xf32, #tpu.memory_space<vmem>>, %arg7: memref<1x512xf32, #tpu.memory_space<vmem>>, %arg8: memref<512x2048xbf16, #tpu.memory_space<vmem>>, %arg9: memref<1x2048xf32, #tpu.memory_space<vmem>>, %arg10: memref<8x2048xf32, #tpu.memory_space<vmem>>, %arg11: memref<8x128xf32, #tpu.memory_space<vmem>>) attributes {dimension_semantics = [], scalar_prefetch = 0 : i64, scratch_operands = 0 : i64, tpu.core_type = #tpu.core_type<tc>} {
    %c0 = arith.constant 0 : index
    %c0_0 = arith.constant 0 : index
    %0 = vector.load %arg0[%c0, %c0_0] : memref<8x2048xf32, #tpu.memory_space<vmem>>, vector<8x2048xf32>
    %1 = arith.truncf %0 : vector<8x2048xf32> to vector<8x2048xbf16>
    %c0_1 = arith.constant 0 : index
    %c0_2 = arith.constant 0 : index
    %2 = vector.load %arg2[%c0_1, %c0_2] : memref<2048x512xbf16, #tpu.memory_space<vmem>>, vector<2048x512xbf16>
    %cst = arith.constant dense<0.000000e+00> : vector<8x512xf32>
    %3 = tpu.matmul %1, %2, %cst {dimension_numbers = #tpu.dot_dimension_numbers<[1], [0], [0], [1], [0, 0, 1, 1], [], []>} : vector<8x2048xbf16>, vector<2048x512xbf16>, vector<8x512xf32> -> vector<8x512xf32>
    %c0_3 = arith.constant 0 : index
    %c0_4 = arith.constant 0 : index
    %4 = vector.load %arg3[%c0_3, %c0_4] : memref<1x512xf32, #tpu.memory_space<vmem>>, vector<1x512xf32>
    %5 = vector.broadcast %4 : vector<1x512xf32> to vector<8x512xf32>
    %6 = arith.addf %3, %5 : vector<8x512xf32>
    %cst_5 = arith.constant 0.000000e+00 : f32
    %7 = vector.broadcast %cst_5 : f32 to vector<8x512xf32>
    %8 = arith.maximumf %6, %7 : vector<8x512xf32>
    %c0_6 = arith.constant 0 : index
    %c0_7 = arith.constant 0 : index
    %9 = vector.load %arg4[%c0_6, %c0_7] : memref<512x128xf32, #tpu.memory_space<vmem>>, vector<512x128xf32>
    %cst_8 = arith.constant dense<0.000000e+00> : vector<8x128xf32>
    %10 = tpu.matmul %8, %9, %cst_8 {dimension_numbers = #tpu.dot_dimension_numbers<[1], [0], [0], [1], [0, 0, 1, 1], [], []>} : vector<8x512xf32>, vector<512x128xf32>, vector<8x128xf32> -> vector<8x128xf32>
    %c0_9 = arith.constant 0 : index
    %c0_10 = arith.constant 0 : index
    %11 = vector.load %arg5[%c0_9, %c0_10] : memref<1x128xf32, #tpu.memory_space<vmem>>, vector<1x128xf32>
    %12 = vector.broadcast %11 : vector<1x128xf32> to vector<8x128xf32>
    %13 = arith.addf %10, %12 : vector<8x128xf32>
    %c0_11 = arith.constant 0 : index
    %c0_12 = arith.constant 0 : index
    %14 = vector.load %arg11[%c0_11, %c0_12] : memref<8x128xf32, #tpu.memory_space<vmem>>, vector<8x128xf32>
    tpu.vector_store %arg11[%c0_11, %c0_12], %13 {strides = array<i32>} : memref<8x128xf32, #tpu.memory_space<vmem>>, vector<8x128xf32>,
    %c64_i32 = arith.constant 64 : i32
    %15 = tpu.dynamic_rotate %13 by %c64_i32 dim 1 : vector<8x128xf32>, i32 -> vector<8x128xf32>
    %c0_13 = arith.constant 0 : index
    %c0_14 = arith.constant 0 : index
    %16 = vector.load %arg1[%c0_13, %c0_14] : memref<8x128xf32, #tpu.memory_space<vmem>>, vector<8x128xf32>
    %cst_15 = arith.constant 5.000000e-01 : f32
    %17 = vector.broadcast %cst_15 : f32 to vector<8x128xf32>
    %18 = arith.mulf %17, %15 : vector<8x128xf32>
    %19 = math.exp %18 : vector<8x128xf32>
    %20 = arith.mulf %16, %19 : vector<8x128xf32>
    %21 = arith.addf %13, %20 : vector<8x128xf32>
    %c0_16 = arith.constant 0 : index
    %c0_17 = arith.constant 0 : index
    %22 = vector.load %arg6[%c0_16, %c0_17] : memref<128x512xf32, #tpu.memory_space<vmem>>, vector<128x512xf32>
    %cst_18 = arith.constant dense<0.000000e+00> : vector<8x512xf32>
    %23 = tpu.matmul %21, %22, %cst_18 {dimension_numbers = #tpu.dot_dimension_numbers<[1], [0], [0], [1], [0, 0, 1, 1], [], []>} : vector<8x128xf32>, vector<128x512xf32>, vector<8x512xf32> -> vector<8x512xf32>
    %c0_19 = arith.constant 0 : index
    %c0_20 = arith.constant 0 : index
    %24 = vector.load %arg7[%c0_19, %c0_20] : memref<1x512xf32, #tpu.memory_space<vmem>>, vector<1x512xf32>
    %25 = vector.broadcast %24 : vector<1x512xf32> to vector<8x512xf32>
    %26 = arith.addf %23, %25 : vector<8x512xf32>
    %cst_21 = arith.constant 0.000000e+00 : f32
    %27 = vector.broadcast %cst_21 : f32 to vector<8x512xf32>
    %28 = arith.maximumf %26, %27 : vector<8x512xf32>
    %29 = arith.truncf %28 : vector<8x512xf32> to vector<8x512xbf16>
    %c0_22 = arith.constant 0 : index
    %c0_23 = arith.constant 0 : index
    %30 = vector.load %arg8[%c0_22, %c0_23] : memref<512x2048xbf16, #tpu.memory_space<vmem>>, vector<512x2048xbf16>
    %cst_24 = arith.constant dense<0.000000e+00> : vector<8x2048xf32>
    %31 = tpu.matmul %29, %30, %cst_24 {dimension_numbers = #tpu.dot_dimension_numbers<[1], [0], [0], [1], [0, 0, 1, 1], [], []>} : vector<8x512xbf16>, vector<512x2048xbf16>, vector<8x2048xf32> -> vector<8x2048xf32>
    %c0_25 = arith.constant 0 : index
    %c0_26 = arith.constant 0 : index
    %32 = vector.load %arg9[%c0_25, %c0_26] : memref<1x2048xf32, #tpu.memory_space<vmem>>, vector<1x2048xf32>
    %33 = vector.broadcast %32 : vector<1x2048xf32> to vector<8x2048xf32>
    %34 = arith.addf %31, %33 : vector<8x2048xf32>
    %cst_27 = arith.constant dense<0xFF800000> : vector<8xf32>
    %35 = vector.multi_reduction <maximumf>, %34, %cst_27 [1] : vector<8x2048xf32> to vector<8xf32>
    %36 = vector.shape_cast %35 : vector<8xf32> to vector<8x1xf32>
    %37 = vector.broadcast %36 : vector<8x1xf32> to vector<8x2048xf32>
    %38 = arith.subf %34, %37 : vector<8x2048xf32>
    %39 = math.exp %38 : vector<8x2048xf32>
    %cst_28 = arith.constant dense<0.000000e+00> : vector<8xf32>
    %40 = vector.multi_reduction <add>, %39, %cst_28 [1] : vector<8x2048xf32> to vector<8xf32>
    %41 = vector.shape_cast %40 : vector<8xf32> to vector<8x1xf32>
    %42 = math.log %41 : vector<8x1xf32>
    %43 = vector.broadcast %42 : vector<8x1xf32> to vector<8x2048xf32>
    %44 = arith.subf %38, %43 : vector<8x2048xf32>
    %c0_29 = arith.constant 0 : index
    %c0_30 = arith.constant 0 : index
    %45 = vector.load %arg10[%c0_29, %c0_30] : memref<8x2048xf32, #tpu.memory_space<vmem>>, vector<8x2048xf32>
    tpu.vector_store %arg10[%c0_29, %c0_30], %44 {strides = array<i32>} : memref<8x2048xf32, #tpu.memory_space<vmem>>, vector<8x2048xf32>,
    return
  }
}

</mosaic_0001>

<bundles_post_ra>
// kernel: vae_forward.1
= control target key start
LH: loop header
LB: loop body
LE: loop exit
PB: predicated region body
PF: predicated region fallthrough
CT: control target
= control target key end

     0   :  { %17 = vsyncpa [#allocation3], 0  ;;  %s14449_s0 = inlined_call_operand.vmem [shape: f32[8,2048], index: 0, kind: input, shape index: {}]   ;;  %s14450_s1 = inlined_call_operand.vmem [shape: f32[8,128], index: 1, kind: input, shape index: {}]   ;;  %s14451_s2 = inlined_call_operand.hbm [shape: bf16[2048,512], index: 2, kind: input, shape index: {}]   ;;  %s14452_s3 = inlined_call_operand.hbm [shape: f32[1,512], index: 3, kind: input, shape index: {}]   ;;  %s14453_s4 = inlined_call_operand.hbm [shape: f32[512,128], index: 4, kind: input, shape index: {}]   ;;  %s14454_s5 = inlined_call_operand.hbm [shape: f32[1,128], index: 5, kind: input, shape index: {}]   ;;  %s14455_s6 = inlined_call_operand.hbm [shape: f32[128,512], index: 6, kind: input, shape index: {}]   ;;  %s14456_s7 = inlined_call_operand.hbm [shape: f32[1,512], index: 7, kind: input, shape index: {}]   ;;  %s14457_s8 = inlined_call_operand.hbm [shape: bf16[512,2048], index: 8, kind: input, shape index: {}]   ;;  %s14458_s9 = inlined_call_operand.hbm [shape: f32[1,2048], index: 9, kind: input, shape index: {}]   ;;  %s14459_s10 = inlined_call_operand.vmem [shape: f32[8,2048], index: 10, kind: output, shape index: {0}]   ;;  %s14460_s11 = inlined_call_operand.vmem [shape: f32[8,128], index: 11, kind: output, shape index: {1}]  }
   0x1   :  { %18 = vsyncpa [#allocation5], 0 }
   0x2   :  { %19 = vsyncpa [#allocation8], 0 }
   0x3   :  { %20 = vsyncpa [#allocation11], 0  ;;  %s44_s19 = sshll.u32 %s14452_s3, 4  ;;  %s45_s19 = int_to_ptr.hbm [resolvable:$true] %s44_s19 }
   0x4   :  { %21 = vsyncpa [#allocation14], 0  ;;  %s13870_s20 = smov [#allocation4]   ;;  %s68_s24 = sshll.u32 %s14454_s5, 4  ;;  %s69_s24 = int_to_ptr.hbm [resolvable:$true] %s68_s24 }
   0x5   :  { %s46_s21 = sshll.u32 %s13870_s20, 4  ;;  %s13871_s25 = smov [#allocation7]   ;;  %s47_s21 = int_to_ptr.vmem [resolvable:$true] %s46_s21 }
   0x6   :  { %49 = dma.hbm_to_vmem [thread:$0]  %s45_s19, 64, %s47_s21, [#allocation5]  }
   0x7   :  { %s70_s26 = sshll.u32 %s13871_s25, 4  ;;  %s92_s29 = sshll.u32 %s14456_s7, 4  ;;  %s71_s26 = int_to_ptr.vmem [resolvable:$true] %s70_s26  ;;  %s93_s29 = int_to_ptr.hbm [resolvable:$true] %s92_s29 }
   0x8   :  { %73 = dma.hbm_to_vmem [thread:$0]  %s69_s24, 16, %s71_s26, [#allocation8]  }
   0x9   :  { %s30_s12 = sshll.u32 %s14451_s2, 4  ;;  %s13872_s13 = smov [#allocation10]   ;;  %s31_s12 = int_to_ptr.hbm [resolvable:$true] %s30_s12 }
   0xa   :  { %s94_s14 = sshll.u32 %s13872_s13, 4  ;;  %s13873_s5 = smov [#allocation2]   ;;  %s95_s14 = int_to_ptr.vmem [resolvable:$true] %s94_s14 }
   0xb   :  { %97 = dma.hbm_to_vmem [thread:$0]  %s93_s29, 64, %s95_s14, [#allocation11]  }
   0xc   :  { %s32_s15 = sshll.u32 %s13873_s5, 4  ;;  %s13874_s16 = smov 256   ;;  %s33_s15 = int_to_ptr.vmem [resolvable:$true] %s32_s15 }
   0xd   :  { %s13875_s17 = smov 16   ;;  %s54_s19 = sshll.u32 %s14453_s4, 4  ;;  %s55_s19 = int_to_ptr.hbm [resolvable:$true] %s54_s19 }
   0xe   :  { %38 = dma.hbm_to_vmem [thread:$0]  %s31_s12, 65536, %s33_s15, [#allocation3], %s13874_s16, %s13874_s16, %s13875_s17  }
   0xf   :  { %s13876_s20 = smov [#allocation6]   ;;  %s78_s23 = sshll.u32 %s14455_s6, 4  ;;  %s79_s23 = int_to_ptr.hbm [resolvable:$true] %s78_s23 }
  0x10   :  { %s56_s21 = sshll.u32 %s13876_s20, 4  ;;  %s13877_s24 = smov 128   ;;  %s57_s21 = int_to_ptr.vmem [resolvable:$true] %s56_s21 }
  0x11   :  { %s13878_s25 = smov 8   ;;  %s13879_s26 = smov [#allocation9]  }
  0x12   :  { %62 = dma.hbm_to_vmem [thread:$0]  %s55_s19, 8192, %s57_s21, [#allocation5], %s13877_s24, %s13877_s24, %s13878_s25  }
  0x13   :  { %s80_s27 = sshll.u32 %s13879_s26, 4  ;;  %s13880_s28 = smov 512   ;;  %s81_s27 = int_to_ptr.vmem [resolvable:$true] %s80_s27 }
  0x14   :  { %s13881_s29 = smov 32   ;;  %s102_s30 = sshll.u32 %s14457_s8, 4  ;;  %s103_s30 = int_to_ptr.hbm [resolvable:$true] %s102_s30 }
  0x15   :  { %86 = dma.hbm_to_vmem [thread:$0]  %s79_s23, 8192, %s81_s27, [#allocation8], %s13880_s28, %s13880_s28, %s13881_s29  }
  0x16   :  { %s13882_s12 = smov [#allocation12]   ;;  %s116_s5 = sshll.u32 %s14458_s9, 4  ;;  %s117_s5 = int_to_ptr.hbm [resolvable:$true] %s116_s5 }
  0x17   :  { %s104_s13 = sshll.u32 %s13882_s12, 4  ;;  %s13883_s15 = smov 1024   ;;  %s105_s13 = int_to_ptr.vmem [resolvable:$true] %s104_s13 }
  0x18   :  { %s13884_s16 = smov 64   ;;  %s13885_s17 = smov [#allocation13]  }
  0x19   :  { %110 = dma.hbm_to_vmem [thread:$0]  %s103_s30, 65536, %s105_s13, [#allocation11], %s13883_s15, %s13883_s15, %s13884_s16  }
  0x1a   :  { %s118_s18 = sshll.u32 %s13885_s17, 4  ;;  %s119_s18 = int_to_ptr.vmem [resolvable:$true] %s118_s18 }
  0x1b   :  { %121 = dma.hbm_to_vmem [thread:$0]  %s117_s5, 256, %s119_s18, [#allocation14]  }
  0x1c   :  { %13860 = dma.done.wait [#allocation3], 65536  }
  0x1d   :  { %13861 = vsyncadd [#allocation3], 4294901760 }
  0x1e   :  { %13862 = dma.done.wait [#allocation5], 8256  }
  0x1f   :  { %13863 = vsyncadd [#allocation5], 4294959040 }
  0x20   :  { %13864 = dma.done.wait [#allocation8], 8208  }
  0x21   :  { %13865 = vsyncadd [#allocation8], 4294959088 }
  0x22   :  { %13866 = dma.done.wait [#allocation11], 65600  }
  0x23   :  { %13867 = vsyncadd [#allocation11], 4294901696 }
  0x24   :  { %13868 = dma.done.wait [#allocation14], 256  }
  0x25   :  { %13869 = vsyncadd [#allocation14], 4294967040  ;;  %v8606_v0 = vld [vmem:[#allocation2 + $0xe0] sm:$0xf]  ;;  %v12618_v1 = vld [vmem:[#allocation2 + $0xec] sm:$0xf0] }
  0x26   :  { %v8734_v2 = vld [vmem:[#allocation2 + $0x1e0] sm:$0xf]  ;;  %v8607_v3 = vor.u32 %v12618_v1, %v8606_v0  ;;  %v12650_v4 = vld [vmem:[#allocation2 + $0x1ec] sm:$0xf0] }
  0x27   :  { %v8862_v5 = vld [vmem:[#allocation2 + $0x2e0] sm:$0xf]  ;;  %v12682_v6 = vld [vmem:[#allocation2 + $0x2ec] sm:$0xf0]  ;;  %v8735_v7 = vor.u32 %v12650_v4, %v8734_v2 }
  0x28   :  { %v8863_v8 = vor.u32 %v12682_v6, %v8862_v5  ;;  %v8990_v9 = vld [vmem:[#allocation2 + $0x3e0] sm:$0xf]  ;;  %v12714_v10 = vld [vmem:[#allocation2 + $0x3ec] sm:$0xf0]  ;;  %3268 = vmatpush.bf16.msra.mxu0 %v8607_v3 }
  0x29   :  { %v8590_v11 = vld [vmem:[#allocation2 + $0xc0] sm:$0xf]  ;;  %v8991_v12 = vor.u32 %v12714_v10, %v8990_v9  ;;  %v12614_v13 = vld [vmem:[#allocation2 + $0xcc] sm:$0xf0]  ;;  %3281 = vmatpush.bf16.msra.mxu1 %v8735_v7 }
  0x2a   :  { %v8718_v14 = vld [vmem:[#allocation2 + $0x1c0] sm:$0xf]  ;;  %v12646_v15 = vld [vmem:[#allocation2 + $0x1cc] sm:$0xf0]  ;;  %3294 = vmatpush.bf16.msra.mxu2 %v8863_v8  ;;  %v8591_v16 = vor.u32 %v12614_v13, %v8590_v11 }
  0x2b   :  { %v8719_v17 = vor.u32 %v12646_v15, %v8718_v14  ;;  %v8846_v18 = vld [vmem:[#allocation2 + $0x2c0] sm:$0xf]  ;;  %v12678_v19 = vld [vmem:[#allocation2 + $0x2cc] sm:$0xf0]  ;;  %3307 = vmatpush.bf16.msra.mxu3 %v8991_v12 }
  0x2c   :  { %v8974_v20 = vld [vmem:[#allocation2 + $0x3c0] sm:$0xf]  ;;  %v8847_v21 = vor.u32 %v12678_v19, %v8846_v18  ;;  %v12710_v22 = vld [vmem:[#allocation2 + $0x3cc] sm:$0xf0]  ;;  %3269 = vmatpush.bf16.msra.mxu0 %v8591_v16 }
  0x2d   :  { %v8574_v23 = vld [vmem:[#allocation2 + $0xa0] sm:$0xf]  ;;  %v12610_v24 = vld [vmem:[#allocation2 + $0xac] sm:$0xf0]  ;;  %v8975_v25 = vor.u32 %v12710_v22, %v8974_v20  ;;  %3282 = vmatpush.bf16.msra.mxu1 %v8719_v17 }
  0x2e   :  { %v8702_v26 = vld [vmem:[#allocation2 + $0x1a0] sm:$0xf]  ;;  %v12642_v27 = vld [vmem:[#allocation2 + $0x1ac] sm:$0xf0]  ;;  %v8575_v29 = vor.u32 %v12610_v24, %v8574_v23  ;;  %3295 = vmatpush.bf16.msra.mxu2 %v8847_v21 }
  0x2f   :  { %v8830_v28 = vld [vmem:[#allocation2 + $0x2a0] sm:$0xf]  ;;  %v12674_v30 = vld [vmem:[#allocation2 + $0x2ac] sm:$0xf0]  ;;  %v8703_v33 = vor.u32 %v12642_v27, %v8702_v26  ;;  %3308 = vmatpush.bf16.msra.mxu3 %v8975_v25 }
  0x30   :  { %v8958_v31 = vld [vmem:[#allocation2 + $0x3a0] sm:$0xf]  ;;  %v12706_v32 = vld [vmem:[#allocation2 + $0x3ac] sm:$0xf0]  ;;  %v8831_v34 = vor.u32 %v12674_v30, %v8830_v28  ;;  %3270 = vmatpush.bf16.msra.mxu0 %v8575_v29 }
  0x31   :  { %v8558_v35 = vld [vmem:[#allocation2 + $0x80] sm:$0xf]  ;;  %v12606_v36 = vld [vmem:[#allocation2 + $0x8c] sm:$0xf0]  ;;  %v8959_v38 = vor.u32 %v12706_v32, %v8958_v31  ;;  %3283 = vmatpush.bf16.msra.mxu1 %v8703_v33 }
  0x32   :  { %v8686_v37 = vld [vmem:[#allocation2 + $0x180] sm:$0xf]  ;;  %v12638_v39 = vld [vmem:[#allocation2 + $0x18c] sm:$0xf0]  ;;  %v8559_v44 = vor.u32 %v12606_v36, %v8558_v35  ;;  %3296 = vmatpush.bf16.msra.mxu2 %v8831_v34 }
  0x33   :  { %v8814_v40 = vld [vmem:[#allocation2 + $0x280] sm:$0xf]  ;;  %v12670_v41 = vld [vmem:[#allocation2 + $0x28c] sm:$0xf0]  ;;  %v8687_v45 = vor.u32 %v12638_v39, %v8686_v37  ;;  %3309 = vmatpush.bf16.msra.mxu3 %v8959_v38 }
  0x34   :  { %v8942_v42 = vld [vmem:[#allocation2 + $0x380] sm:$0xf]  ;;  %v12702_v43 = vld [vmem:[#allocation2 + $0x38c] sm:$0xf0]  ;;  %v8815_v46 = vor.u32 %v12670_v41, %v8814_v40  ;;  %3271 = vmatpush.bf16.msra.mxu0 %v8559_v44 }
  0x35   :  { %v8542_v47 = vld [vmem:[#allocation2 + $0x60] sm:$0xf]  ;;  %v12602_v48 = vld [vmem:[#allocation2 + $0x6c] sm:$0xf0]  ;;  %v8943_v50 = vor.u32 %v12702_v43, %v8942_v42  ;;  %3284 = vmatpush.bf16.msra.mxu1 %v8687_v45 }
  0x36   :  { %v8670_v49 = vld [vmem:[#allocation2 + $0x160] sm:$0xf]  ;;  %v12634_v51 = vld [vmem:[#allocation2 + $0x16c] sm:$0xf0]  ;;  %v8543_v56 = vor.u32 %v12602_v48, %v8542_v47  ;;  %3297 = vmatpush.bf16.msra.mxu2 %v8815_v46 }
  0x37   :  { %v8798_v52 = vld [vmem:[#allocation2 + $0x260] sm:$0xf]  ;;  %v12666_v53 = vld [vmem:[#allocation2 + $0x26c] sm:$0xf0]  ;;  %v8671_v57 = vor.u32 %v12634_v51, %v8670_v49  ;;  %3310 = vmatpush.bf16.msra.mxu3 %v8943_v50 }
  0x38   :  { %v8926_v54 = vld [vmem:[#allocation2 + $0x360] sm:$0xf]  ;;  %v12698_v55 = vld [vmem:[#allocation2 + $0x36c] sm:$0xf0]  ;;  %v8799_v58 = vor.u32 %v12666_v53, %v8798_v52  ;;  %3272 = vmatpush.bf16.msra.mxu0 %v8543_v56 }
  0x39   :  { %v8526_v59 = vld [vmem:[#allocation2 + $0x40] sm:$0xf]  ;;  %v12598_v60 = vld [vmem:[#allocation2 + $0x4c] sm:$0xf0]  ;;  %v8927_v62 = vor.u32 %v12698_v55, %v8926_v54  ;;  %3285 = vmatpush.bf16.msra.mxu1 %v8671_v57 }
  0x3a   :  { %v8654_v61 = vld [vmem:[#allocation2 + $0x140] sm:$0xf]  ;;  %v12630_v63 = vld [vmem:[#allocation2 + $0x14c] sm:$0xf0]  ;;  %v8527_v4 = vor.u32 %v12598_v60, %v8526_v59  ;;  %3298 = vmatpush.bf16.msra.mxu2 %v8799_v58 }
  0x3b   :  { %v8782_v0 = vld [vmem:[#allocation2 + $0x240] sm:$0xf]  ;;  %v12662_v1 = vld [vmem:[#allocation2 + $0x24c] sm:$0xf0]  ;;  %v8655_v5 = vor.u32 %v12630_v63, %v8654_v61  ;;  %3311 = vmatpush.bf16.msra.mxu3 %v8927_v62 }
  0x3c   :  { %v8910_v2 = vld [vmem:[#allocation2 + $0x340] sm:$0xf]  ;;  %v12694_v3 = vld [vmem:[#allocation2 + $0x34c] sm:$0xf0]  ;;  %v8783_v6 = vor.u32 %v12662_v1, %v8782_v0  ;;  %3273 = vmatpush.bf16.msra.mxu0 %v8527_v4 }
  0x3d   :  { %v8510_v7 = vld [vmem:[#allocation2 + $0x20] sm:$0xf]  ;;  %v12594_v8 = vld [vmem:[#allocation2 + $0x2c] sm:$0xf0]  ;;  %v8911_v10 = vor.u32 %v12694_v3, %v8910_v2  ;;  %3286 = vmatpush.bf16.msra.mxu1 %v8655_v5 }
  0x3e   :  { %v8638_v9 = vld [vmem:[#allocation2 + $0x120] sm:$0xf]  ;;  %v12626_v11 = vld [vmem:[#allocation2 + $0x12c] sm:$0xf0]  ;;  %v8511_v16 = vor.u32 %v12594_v8, %v8510_v7  ;;  %3299 = vmatpush.bf16.msra.mxu2 %v8783_v6 }
  0x3f   :  { %v8766_v12 = vld [vmem:[#allocation2 + $0x220] sm:$0xf]  ;;  %v12658_v13 = vld [vmem:[#allocation2 + $0x22c] sm:$0xf0]  ;;  %v8639_v19 = vor.u32 %v12626_v11, %v8638_v9  ;;  %3312 = vmatpush.bf16.msra.mxu3 %v8911_v10  ;;  %v157_v10 = vld [vmem:[%s14449_s0 + $0x18] sm:$0xff] }
  0x40   :  { %v8894_v14 = vld [vmem:[#allocation2 + $0x320] sm:$0xf]  ;;  %v12690_v15 = vld [vmem:[#allocation2 + $0x32c] sm:$0xf0]  ;;  %v8767_v20 = vor.u32 %v12658_v13, %v8766_v12  ;;  %3274 = vmatpush.bf16.msra.mxu0 %v8511_v16 }
  0x41   :  { %v8494_v17 = vld [vmem:[#allocation2] sm:$0xf]  ;;  %v12590_v18 = vld [vmem:[#allocation2 + $0xc] sm:$0xf0]  ;;  %v8895_v24 = vor.u32 %v12690_v15, %v8894_v14  ;;  %3287 = vmatpush.bf16.msra.mxu1 %v8639_v19  ;;  %v13984_v15 = vpack.c.bf16 %v157_v10, %v157_v10  ;;  %v155_v19 = vld [vmem:[%s14449_s0 + $0x8] sm:$0xff] }
  0x42   :  { %v8622_v21 = vld [vmem:[#allocation2 + $0x100] sm:$0xf]  ;;  %v12622_v22 = vld [vmem:[#allocation2 + $0x10c] sm:$0xf0]  ;;  %v8495_v31 = vor.u32 %v12590_v18, %v8494_v17  ;;  %3300 = vmatpush.bf16.msra.mxu2 %v8767_v20 }
  0x43   :  { %v8750_v23 = vld [vmem:[#allocation2 + $0x200] sm:$0xf]  ;;  %v12654_v25 = vld [vmem:[#allocation2 + $0x20c] sm:$0xf0]  ;;  %v8623_v35 = vor.u32 %v12622_v22, %v8622_v21  ;;  %3313 = vmatpush.bf16.msra.mxu3 %v8895_v24 }
  0x44   :  { %v8878_v26 = vld [vmem:[#allocation2 + $0x300] sm:$0xf]  ;;  %v12686_v27 = vld [vmem:[#allocation2 + $0x30c] sm:$0xf0]  ;;  %v8751_v36 = vor.u32 %v12654_v25, %v8750_v23  ;;  %3275 = vmatpush.bf16.msra.mxu0 %v8495_v31  ;;  %v13992_v25 = vpack.c.bf16 %v155_v19, %v155_v19 }
  0x45   :  { %v9118_v28 = vld [vmem:[#allocation2 + $0x4e0] sm:$0xf]  ;;  %v12746_v29 = vld [vmem:[#allocation2 + $0x4ec] sm:$0xf0]  ;;  %v8879_v39 = vor.u32 %v12686_v27, %v8878_v26  ;;  %3288 = vmatpush.bf16.msra.mxu1 %v8623_v35 }
  0x46   :  { %v9246_v30 = vld [vmem:[#allocation2 + $0x5e0] sm:$0xf]  ;;  %v12778_v32 = vld [vmem:[#allocation2 + $0x5ec] sm:$0xf0]  ;;  %v9119_v40 = vor.u32 %v12746_v29, %v9118_v28  ;;  %3301 = vmatpush.bf16.msra.mxu2 %v8751_v36 }
  0x47   :  { %v9374_v33 = vld [vmem:[#allocation2 + $0x6e0] sm:$0xf]  ;;  %v12810_v34 = vld [vmem:[#allocation2 + $0x6ec] sm:$0xf0]  ;;  %v9247_v41 = vor.u32 %v12778_v32, %v9246_v30  ;;  %3314 = vmatpush.bf16.msra.mxu3 %v8879_v39 }
  0x48   :  { %v9502_v37 = vld [vmem:[#allocation2 + $0x7e0] sm:$0xf]  ;;  %v12842_v38 = vld [vmem:[#allocation2 + $0x7ec] sm:$0xf0]  ;;  %v9375_v42 = vor.u32 %v12810_v34, %v9374_v33  ;;  %3320 = vmatpush.bf16.msrb.mxu0 %v9119_v40  ;;  %3289 = vmatmul.bf16.vlgmr.msra.gmra.mxu1 %v13992_v25 }
  0x49   :  { %v9102_v43 = vld [vmem:[#allocation2 + $0x4c0] sm:$0xf]  ;;  %v12742_v44 = vld [vmem:[#allocation2 + $0x4cc] sm:$0xf0]  ;;  %v9503_v46 = vor.u32 %v12842_v38, %v9502_v37  ;;  %3333 = vmatpush.bf16.msrb.mxu1 %v9247_v41 }
  0x4a   :  { %v9230_v45 = vld [vmem:[#allocation2 + $0x5c0] sm:$0xf]  ;;  %v12774_v47 = vld [vmem:[#allocation2 + $0x5cc] sm:$0xf0]  ;;  %v9103_v52 = vor.u32 %v12742_v44, %v9102_v43  ;;  %3346 = vmatpush.bf16.msrb.mxu2 %v9375_v42  ;;  %3315 = vmatmul.bf16.vlgmr.msra.gmra.mxu3 %v13984_v15 }
  0x4b   :  { %v9358_v48 = vld [vmem:[#allocation2 + $0x6c0] sm:$0xf]  ;;  %v12806_v49 = vld [vmem:[#allocation2 + $0x6cc] sm:$0xf0]  ;;  %v9231_v54 = vor.u32 %v12774_v47, %v9230_v45  ;;  %3359 = vmatpush.bf16.msrb.mxu3 %v9503_v46 }
  0x4c   :  { %v9486_v50 = vld [vmem:[#allocation2 + $0x7c0] sm:$0xf]  ;;  %v12838_v51 = vld [vmem:[#allocation2 + $0x7cc] sm:$0xf0]  ;;  %v9359_v55 = vor.u32 %v12806_v49, %v9358_v48  ;;  %3321 = vmatpush.bf16.msrb.mxu0 %v9103_v52 }
  0x4d   :  { %v9086_v53 = vld [vmem:[#allocation2 + $0x4a0] sm:$0xf]  ;;  %v12738_v56 = vld [vmem:[#allocation2 + $0x4ac] sm:$0xf0]  ;;  %v9487_v59 = vor.u32 %v12838_v51, %v9486_v50  ;;  %3334 = vmatpush.bf16.msrb.mxu1 %v9231_v54 }
  0x4e   :  { %v9214_v57 = vld [vmem:[#allocation2 + $0x5a0] sm:$0xf]  ;;  %v12770_v58 = vld [vmem:[#allocation2 + $0x5ac] sm:$0xf0]  ;;  %v9087_v0 = vor.u32 %v12738_v56, %v9086_v53  ;;  %3347 = vmatpush.bf16.msrb.mxu2 %v9359_v55 }
  0x4f   :  { %v9342_v60 = vld [vmem:[#allocation2 + $0x6a0] sm:$0xf]  ;;  %v12802_v61 = vld [vmem:[#allocation2 + $0x6ac] sm:$0xf0]  ;;  %v9215_v1 = vor.u32 %v12770_v58, %v9214_v57  ;;  %3360 = vmatpush.bf16.msrb.mxu3 %v9487_v59 }
  0x50   :  { %v9470_v62 = vld [vmem:[#allocation2 + $0x7a0] sm:$0xf]  ;;  %v12834_v63 = vld [vmem:[#allocation2 + $0x7ac] sm:$0xf0]  ;;  %v9343_v5 = vor.u32 %v12802_v61, %v9342_v60  ;;  %3322 = vmatpush.bf16.msrb.mxu0 %v9087_v0 }
  0x51   :  { %v9070_v2 = vld [vmem:[#allocation2 + $0x480] sm:$0xf]  ;;  %v156_v3 = vld [vmem:[%s14449_s0 + $0x10] sm:$0xff]  ;;  %v9471_v11 = vor.u32 %v12834_v63, %v9470_v62  ;;  %3335 = vmatpush.bf16.msrb.mxu1 %v9215_v1 }
  0x52   :  { %v154_v4 = vld [vmem:[%s14449_s0] sm:$0xff]  ;;  %v12734_v6 = vld [vmem:[#allocation2 + $0x48c] sm:$0xf0]  ;;  %v13977_v8 = vpack.c.bf16 %v156_v3, %v156_v3  ;;  %3348 = vmatpush.bf16.msrb.mxu2 %v9343_v5 }
  0x53   :  { %v9198_v7 = vld [vmem:[#allocation2 + $0x580] sm:$0xf]  ;;  %v13979_v9 = vpack.c.bf16 %v154_v4, %v154_v4  ;;  %v12766_v12 = vld [vmem:[#allocation2 + $0x58c] sm:$0xf0]  ;;  %v9071_v18 = vor.u32 %v12734_v6, %v9070_v2  ;;  %3361 = vmatpush.bf16.msrb.mxu3 %v9471_v11 }
  0x54   :  { %v9326_v13 = vld [vmem:[#allocation2 + $0x680] sm:$0xf]  ;;  %v12798_v14 = vld [vmem:[#allocation2 + $0x68c] sm:$0xf0]  ;;  %3302 = vmatmul.bf16.vlgmr.msra.gmra.mxu2 %v13977_v8  ;;  %v9199_v20 = vor.u32 %v12766_v12, %v9198_v7 }
  0x55   :  { %v9454_v16 = vld [vmem:[#allocation2 + $0x780] sm:$0xf]  ;;  %v12830_v17 = vld [vmem:[#allocation2 + $0x78c] sm:$0xf0]  ;;  %3276 = vmatmul.bf16.vlgmr.msra.gmra.mxu0 %v13979_v9  ;;  %v9327_v21 = vor.u32 %v12798_v14, %v9326_v13 }
  0x56   :  { %v9054_v22 = vld [vmem:[#allocation2 + $0x460] sm:$0xf]  ;;  %v12730_v23 = vld [vmem:[#allocation2 + $0x46c] sm:$0xf0]  ;;  %v9455_v26 = vor.u32 %v12830_v17, %v9454_v16  ;;  %3323 = vmatpush.bf16.msrb.mxu0 %v9071_v18  ;;  %3336 = vmatpush.bf16.msrb.mxu1 %v9199_v20 }
  0x57   :  { %v9182_v24 = vld [vmem:[#allocation2 + $0x560] sm:$0xf]  ;;  %v12762_v27 = vld [vmem:[#allocation2 + $0x56c] sm:$0xf0]  ;;  %v9055_v32 = vor.u32 %v12730_v23, %v9054_v22  ;;  %3349 = vmatpush.bf16.msrb.mxu2 %v9327_v21  ;;  %v161_v23 = vld [vmem:[%s14449_s0 + $0x38] sm:$0xff] }
  0x58   :  { %v9310_v28 = vld [vmem:[#allocation2 + $0x660] sm:$0xf]  ;;  %v12794_v29 = vld [vmem:[#allocation2 + $0x66c] sm:$0xf0]  ;;  %v9183_v33 = vor.u32 %v12762_v27, %v9182_v24  ;;  %3362 = vmatpush.bf16.msrb.mxu3 %v9455_v26 }
  0x59   :  { %v9438_v30 = vld [vmem:[#allocation2 + $0x760] sm:$0xf]  ;;  %v12826_v31 = vld [vmem:[#allocation2 + $0x76c] sm:$0xf0]  ;;  %v9311_v34 = vor.u32 %v12794_v29, %v9310_v28  ;;  %v159_v29 = vld [vmem:[%s14449_s0 + $0x28] sm:$0xff] }
  0x5a   :  { %v9038_v35 = vld [vmem:[#allocation2 + $0x440] sm:$0xf]  ;;  %v12726_v36 = vld [vmem:[#allocation2 + $0x44c] sm:$0xf0]  ;;  %v9439_v38 = vor.u32 %v12826_v31, %v9438_v30  ;;  %3324 = vmatpush.bf16.msrb.mxu0 %v9055_v32  ;;  %3337 = vmatpush.bf16.msrb.mxu1 %v9183_v33 }
  0x5b   :  { %v9166_v37 = vld [vmem:[#allocation2 + $0x540] sm:$0xf]  ;;  %v12758_v39 = vld [vmem:[#allocation2 + $0x54c] sm:$0xf0]  ;;  %v9039_v44 = vor.u32 %v12726_v36, %v9038_v35  ;;  %3350 = vmatpush.bf16.msrb.mxu2 %v9311_v34 }
  0x5c   :  { %v9294_v40 = vld [vmem:[#allocation2 + $0x640] sm:$0xf]  ;;  %v12790_v41 = vld [vmem:[#allocation2 + $0x64c] sm:$0xf0]  ;;  %v9167_v45 = vor.u32 %v12758_v39, %v9166_v37  ;;  %3363 = vmatpush.bf16.msrb.mxu3 %v9439_v38  ;;  %v14011_v38 = vpack.c.bf16 %v161_v23, %v161_v23 }
  0x5d   :  { %v9422_v42 = vld [vmem:[#allocation2 + $0x740] sm:$0xf]  ;;  %v12822_v43 = vld [vmem:[#allocation2 + $0x74c] sm:$0xf0]  ;;  %v9295_v46 = vor.u32 %v12790_v41, %v9294_v40  ;;  %v14013_v40 = vpack.c.bf16 %v159_v29, %v159_v29 }
  0x5e   :  { %v9022_v47 = vld [vmem:[#allocation2 + $0x420] sm:$0xf]  ;;  %v12722_v48 = vld [vmem:[#allocation2 + $0x42c] sm:$0xf0]  ;;  %v9423_v50 = vor.u32 %v12822_v43, %v9422_v42  ;;  %3325 = vmatpush.bf16.msrb.mxu0 %v9039_v44  ;;  %3338 = vmatpush.bf16.msrb.mxu1 %v9167_v45 }
  0x5f   :  { %v9150_v49 = vld [vmem:[#allocation2 + $0x520] sm:$0xf]  ;;  %v12754_v51 = vld [vmem:[#allocation2 + $0x52c] sm:$0xf0]  ;;  %v9023_v56 = vor.u32 %v12722_v48, %v9022_v47  ;;  %3351 = vmatpush.bf16.msrb.mxu2 %v9295_v46 }
  0x60   :  { %v9278_v52 = vld [vmem:[#allocation2 + $0x620] sm:$0xf]  ;;  %v12786_v53 = vld [vmem:[#allocation2 + $0x62c] sm:$0xf0]  ;;  %v9151_v59 = vor.u32 %v12754_v51, %v9150_v49  ;;  %3364 = vmatpush.bf16.msrb.mxu3 %v9423_v50 }
  0x61   :  { %v9406_v54 = vld [vmem:[#allocation2 + $0x720] sm:$0xf]  ;;  %v12818_v55 = vld [vmem:[#allocation2 + $0x72c] sm:$0xf0]  ;;  %v9279_v60 = vor.u32 %v12786_v53, %v9278_v52 }
  0x62   :  { %v9006_v57 = vld [vmem:[#allocation2 + $0x400] sm:$0xf]  ;;  %v12718_v58 = vld [vmem:[#allocation2 + $0x40c] sm:$0xf0]  ;;  %v9407_v0 = vor.u32 %v12818_v55, %v9406_v54  ;;  %3326 = vmatpush.bf16.msrb.mxu0 %v9023_v56  ;;  %3339 = vmatpush.bf16.msrb.mxu1 %v9151_v59 }
  0x63   :  { %v9134_v61 = vld [vmem:[#allocation2 + $0x500] sm:$0xf]  ;;  %v12750_v62 = vld [vmem:[#allocation2 + $0x50c] sm:$0xf0]  ;;  %v9007_v7 = vor.u32 %v12718_v58, %v9006_v57  ;;  %3352 = vmatpush.bf16.msrb.mxu2 %v9279_v60 }
  0x64   :  { %v9262_v63 = vld [vmem:[#allocation2 + $0x600] sm:$0xf]  ;;  %v12782_v1 = vld [vmem:[#allocation2 + $0x60c] sm:$0xf0]  ;;  %v9135_v13 = vor.u32 %v12750_v62, %v9134_v61  ;;  %3365 = vmatpush.bf16.msrb.mxu3 %v9407_v0 }
  0x65   :  { %v9390_v2 = vld [vmem:[#allocation2 + $0x700] sm:$0xf]  ;;  %v12814_v3 = vld [vmem:[#allocation2 + $0x70c] sm:$0xf0]  ;;  %v9263_v14 = vor.u32 %v12782_v1, %v9262_v63 }
  0x66   :  { %v9630_v4 = vld [vmem:[#allocation2 + $0x8e0] sm:$0xf]  ;;  %v12874_v5 = vld [vmem:[#allocation2 + $0x8ec] sm:$0xf0]  ;;  %v9391_v19 = vor.u32 %v12814_v3, %v9390_v2  ;;  %3327 = vmatpush.bf16.msrb.mxu0 %v9007_v7  ;;  %3340 = vmatpush.bf16.msrb.mxu1 %v9135_v13 }
  0x67   :  { %v9758_v6 = vld [vmem:[#allocation2 + $0x9e0] sm:$0xf]  ;;  %v12906_v10 = vld [vmem:[#allocation2 + $0x9ec] sm:$0xf0]  ;;  %v9631_v20 = vor.u32 %v12874_v5, %v9630_v4  ;;  %3353 = vmatpush.bf16.msrb.mxu2 %v9263_v14 }
  0x68   :  { %v9886_v11 = vld [vmem:[#allocation2 + $0xae0] sm:$0xf]  ;;  %v12938_v12 = vld [vmem:[#allocation2 + $0xaec] sm:$0xf0]  ;;  %v9759_v24 = vor.u32 %v12906_v10, %v9758_v6  ;;  %3366 = vmatpush.bf16.msrb.mxu3 %v9391_v19 }
  0x69   :  { %v10014_v16 = vld [vmem:[#allocation2 + $0xbe0] sm:$0xf]  ;;  %v12970_v17 = vld [vmem:[#allocation2 + $0xbec] sm:$0xf0]  ;;  %v9887_v26 = vor.u32 %v12938_v12, %v9886_v11  ;;  %3341 = vmatmul.bf16.vlgmr.msrb.gmra.mxu1 %v14013_v40 }
  0x6a   :  { %v160_v18 = vld [vmem:[%s14449_s0 + $0x30] sm:$0xff]  ;;  %v9614_v21 = vld [vmem:[#allocation2 + $0x8c0] sm:$0xf]  ;;  %v10015_v30 = vor.u32 %v12970_v17, %v10014_v16  ;;  %3372 = vmatpush.bf16.msra.mxu0 %v9631_v20  ;;  %3385 = vmatpush.bf16.msra.mxu1 %v9759_v24 }
  0x6b   :  { %v158_v22 = vld [vmem:[%s14449_s0 + $0x20] sm:$0xff]  ;;  %v12870_v27 = vld [vmem:[#allocation2 + $0x8cc] sm:$0xf0]  ;;  %v14007_v34 = vpack.c.bf16 %v160_v18, %v160_v18  ;;  %3398 = vmatpush.bf16.msra.mxu2 %v9887_v26  ;;  %3367 = vmatmul.bf16.vlgmr.msrb.gmra.mxu3 %v14011_v38 }
  0x6c   :  { %v9742_v28 = vld [vmem:[#allocation2 + $0x9c0] sm:$0xf]  ;;  %v12902_v31 = vld [vmem:[#allocation2 + $0x9cc] sm:$0xf0]  ;;  %v14009_v37 = vpack.c.bf16 %v158_v22, %v158_v22  ;;  %v9615_v39 = vor.u32 %v12870_v27, %v9614_v21  ;;  %3411 = vmatpush.bf16.msra.mxu3 %v10015_v30 }
  0x6d   :  { %v9870_v32 = vld [vmem:[#allocation2 + $0xac0] sm:$0xf]  ;;  %v12934_v33 = vld [vmem:[#allocation2 + $0xacc] sm:$0xf0]  ;;  %v9743_v41 = vor.u32 %v12902_v31, %v9742_v28  ;;  %3354 = vmatmul.bf16.vlgmr.msrb.gmra.mxu2 %v14007_v34 }
  0x6e   :  { %v9998_v35 = vld [vmem:[#allocation2 + $0xbc0] sm:$0xf]  ;;  %v12966_v36 = vld [vmem:[#allocation2 + $0xbcc] sm:$0xf0]  ;;  %v9871_v42 = vor.u32 %v12934_v33, %v9870_v32  ;;  %3328 = vmatmul.bf16.vlgmr.msrb.gmra.mxu0 %v14009_v37 }
  0x6f   :  { %v9598_v43 = vld [vmem:[#allocation2 + $0x8a0] sm:$0xf]  ;;  %v12866_v44 = vld [vmem:[#allocation2 + $0x8ac] sm:$0xf0]  ;;  %v9999_v46 = vor.u32 %v12966_v36, %v9998_v35  ;;  %3373 = vmatpush.bf16.msra.mxu0 %v9615_v39  ;;  %3386 = vmatpush.bf16.msra.mxu1 %v9743_v41 }
  0x70   :  { %v9726_v45 = vld [vmem:[#allocation2 + $0x9a0] sm:$0xf]  ;;  %v12898_v47 = vld [vmem:[#allocation2 + $0x9ac] sm:$0xf0]  ;;  %v9599_v52 = vor.u32 %v12866_v44, %v9598_v43  ;;  %3399 = vmatpush.bf16.msra.mxu2 %v9871_v42 }
  0x71   :  { %v9854_v48 = vld [vmem:[#allocation2 + $0xaa0] sm:$0xf]  ;;  %v12930_v49 = vld [vmem:[#allocation2 + $0xaac] sm:$0xf0]  ;;  %v9727_v53 = vor.u32 %v12898_v47, %v9726_v45  ;;  %3412 = vmatpush.bf16.msra.mxu3 %v9999_v46 }
  0x72   :  { %v9982_v50 = vld [vmem:[#allocation2 + $0xba0] sm:$0xf]  ;;  %v12962_v51 = vld [vmem:[#allocation2 + $0xbac] sm:$0xf0]  ;;  %v9855_v54 = vor.u32 %v12930_v49, %v9854_v48 }
  0x73   :  { %v9582_v55 = vld [vmem:[#allocation2 + $0x880] sm:$0xf]  ;;  %v12862_v56 = vld [vmem:[#allocation2 + $0x88c] sm:$0xf0]  ;;  %v9983_v58 = vor.u32 %v12962_v51, %v9982_v50  ;;  %3374 = vmatpush.bf16.msra.mxu0 %v9599_v52  ;;  %3387 = vmatpush.bf16.msra.mxu1 %v9727_v53 }
  0x74   :  { %v9710_v57 = vld [vmem:[#allocation2 + $0x980] sm:$0xf]  ;;  %v12894_v59 = vld [vmem:[#allocation2 + $0x98c] sm:$0xf0]  ;;  %v9583_v0 = vor.u32 %v12862_v56, %v9582_v55  ;;  %3400 = vmatpush.bf16.msra.mxu2 %v9855_v54 }
  0x75   :  { %v9838_v60 = vld [vmem:[#allocation2 + $0xa80] sm:$0xf]  ;;  %v12926_v61 = vld [vmem:[#allocation2 + $0xa8c] sm:$0xf0]  ;;  %v9711_v1 = vor.u32 %v12894_v59, %v9710_v57  ;;  %3413 = vmatpush.bf16.msra.mxu3 %v9983_v58 }
  0x76   :  { %v9966_v62 = vld [vmem:[#allocation2 + $0xb80] sm:$0xf]  ;;  %v12958_v63 = vld [vmem:[#allocation2 + $0xb8c] sm:$0xf0]  ;;  %v9839_v2 = vor.u32 %v12926_v61, %v9838_v60 }
  0x77   :  { %v9566_v3 = vld [vmem:[#allocation2 + $0x860] sm:$0xf]  ;;  %v12858_v4 = vld [vmem:[#allocation2 + $0x86c] sm:$0xf0]  ;;  %v9967_v6 = vor.u32 %v12958_v63, %v9966_v62  ;;  %3375 = vmatpush.bf16.msra.mxu0 %v9583_v0  ;;  %3388 = vmatpush.bf16.msra.mxu1 %v9711_v1 }
  0x78   :  { %v9694_v5 = vld [vmem:[#allocation2 + $0x960] sm:$0xf]  ;;  %v12890_v7 = vld [vmem:[#allocation2 + $0x96c] sm:$0xf0]  ;;  %v9567_v14 = vor.u32 %v12858_v4, %v9566_v3  ;;  %3401 = vmatpush.bf16.msra.mxu2 %v9839_v2 }
  0x79   :  { %v9822_v10 = vld [vmem:[#allocation2 + $0xa60] sm:$0xf]  ;;  %v12922_v11 = vld [vmem:[#allocation2 + $0xa6c] sm:$0xf0]  ;;  %v9695_v16 = vor.u32 %v12890_v7, %v9694_v5  ;;  %3414 = vmatpush.bf16.msra.mxu3 %v9967_v6  ;;  %v163_v7 = vld [vmem:[%s14449_s0 + $0x48] sm:$0xff] }
  0x7a   :  { %v9950_v12 = vld [vmem:[#allocation2 + $0xb60] sm:$0xf]  ;;  %v12954_v13 = vld [vmem:[#allocation2 + $0xb6c] sm:$0xf0]  ;;  %v9823_v17 = vor.u32 %v12922_v11, %v9822_v10  ;;  %v165_v10 = vld [vmem:[%s14449_s0 + $0x58] sm:$0xff] }
  0x7b   :  { %v9550_v18 = vld [vmem:[#allocation2 + $0x840] sm:$0xf]  ;;  %v12854_v19 = vld [vmem:[#allocation2 + $0x84c] sm:$0xf0]  ;;  %v9951_v21 = vor.u32 %v12954_v13, %v9950_v12  ;;  %3376 = vmatpush.bf16.msra.mxu0 %v9567_v14  ;;  %3389 = vmatpush.bf16.msra.mxu1 %v9695_v16 }
  0x7c   :  { %v9678_v20 = vld [vmem:[#allocation2 + $0x940] sm:$0xf]  ;;  %v12886_v22 = vld [vmem:[#allocation2 + $0x94c] sm:$0xf0]  ;;  %v9551_v28 = vor.u32 %v12854_v19, %v9550_v18  ;;  %3402 = vmatpush.bf16.msra.mxu2 %v9823_v17 }
  0x7d   :  { %v9806_v23 = vld [vmem:[#allocation2 + $0xa40] sm:$0xf]  ;;  %v12918_v24 = vld [vmem:[#allocation2 + $0xa4c] sm:$0xf0]  ;;  %v9679_v29 = vor.u32 %v12886_v22, %v9678_v20  ;;  %3415 = vmatpush.bf16.msra.mxu3 %v9951_v21 }
  0x7e   :  { %v9934_v26 = vld [vmem:[#allocation2 + $0xb40] sm:$0xf]  ;;  %v12950_v27 = vld [vmem:[#allocation2 + $0xb4c] sm:$0xf0]  ;;  %v9807_v30 = vor.u32 %v12918_v24, %v9806_v23  ;;  %v14035_v23 = vpack.c.bf16 %v163_v7, %v163_v7 }
  0x7f   :  { %v9534_v31 = vld [vmem:[#allocation2 + $0x820] sm:$0xf]  ;;  %v12850_v32 = vld [vmem:[#allocation2 + $0x82c] sm:$0xf0]  ;;  %v9935_v35 = vor.u32 %v12950_v27, %v9934_v26  ;;  %3377 = vmatpush.bf16.msra.mxu0 %v9551_v28  ;;  %3390 = vmatpush.bf16.msra.mxu1 %v9679_v29  ;;  %v14037_v27 = vpack.c.bf16 %v165_v10, %v165_v10 }
  0x80   :  { %v9662_v33 = vld [vmem:[#allocation2 + $0x920] sm:$0xf]  ;;  %v12882_v36 = vld [vmem:[#allocation2 + $0x92c] sm:$0xf0]  ;;  %v9535_v44 = vor.u32 %v12850_v32, %v9534_v31  ;;  %3403 = vmatpush.bf16.msra.mxu2 %v9807_v30 }
  0x81   :  { %v9790_v39 = vld [vmem:[#allocation2 + $0xa20] sm:$0xf]  ;;  %v12914_v41 = vld [vmem:[#allocation2 + $0xa2c] sm:$0xf0]  ;;  %v9663_v48 = vor.u32 %v12882_v36, %v9662_v33  ;;  %3416 = vmatpush.bf16.msra.mxu3 %v9935_v35 }
  0x82   :  { %v9918_v42 = vld [vmem:[#allocation2 + $0xb20] sm:$0xf]  ;;  %v12946_v43 = vld [vmem:[#allocation2 + $0xb2c] sm:$0xf0]  ;;  %v9791_v49 = vor.u32 %v12914_v41, %v9790_v39 }
  0x83   :  { %v9518_v45 = vld [vmem:[#allocation2 + $0x800] sm:$0xf]  ;;  %v12846_v46 = vld [vmem:[#allocation2 + $0x80c] sm:$0xf0]  ;;  %v9919_v53 = vor.u32 %v12946_v43, %v9918_v42  ;;  %3378 = vmatpush.bf16.msra.mxu0 %v9535_v44  ;;  %3391 = vmatpush.bf16.msra.mxu1 %v9663_v48 }
  0x84   :  { %v9646_v47 = vld [vmem:[#allocation2 + $0x900] sm:$0xf]  ;;  %v12878_v50 = vld [vmem:[#allocation2 + $0x90c] sm:$0xf0]  ;;  %v9519_v59 = vor.u32 %v12846_v46, %v9518_v45  ;;  %3404 = vmatpush.bf16.msra.mxu2 %v9791_v49 }
  0x85   :  { %v9774_v51 = vld [vmem:[#allocation2 + $0xa00] sm:$0xf]  ;;  %v12910_v52 = vld [vmem:[#allocation2 + $0xa0c] sm:$0xf0]  ;;  %v9647_v63 = vor.u32 %v12878_v50, %v9646_v47  ;;  %3417 = vmatpush.bf16.msra.mxu3 %v9919_v53 }
  0x86   :  { %v9902_v54 = vld [vmem:[#allocation2 + $0xb00] sm:$0xf]  ;;  %v12942_v55 = vld [vmem:[#allocation2 + $0xb0c] sm:$0xf0]  ;;  %v9775_v0 = vor.u32 %v12910_v52, %v9774_v51 }
  0x87   :  { %v10142_v56 = vld [vmem:[#allocation2 + $0xce0] sm:$0xf]  ;;  %v13002_v57 = vld [vmem:[#allocation2 + $0xcec] sm:$0xf0]  ;;  %v9903_v4 = vor.u32 %v12942_v55, %v9902_v54  ;;  %3379 = vmatpush.bf16.msra.mxu0 %v9519_v59  ;;  %3392 = vmatpush.bf16.msra.mxu1 %v9647_v63 }
  0x88   :  { %v10270_v58 = vld [vmem:[#allocation2 + $0xde0] sm:$0xf]  ;;  %v13034_v60 = vld [vmem:[#allocation2 + $0xdec] sm:$0xf0]  ;;  %v10143_v5 = vor.u32 %v13002_v57, %v10142_v56  ;;  %3405 = vmatpush.bf16.msra.mxu2 %v9775_v0 }
  0x89   :  { %v10398_v61 = vld [vmem:[#allocation2 + $0xee0] sm:$0xf]  ;;  %v13066_v62 = vld [vmem:[#allocation2 + $0xeec] sm:$0xf0]  ;;  %v10271_v11 = vor.u32 %v13034_v60, %v10270_v58  ;;  %3418 = vmatpush.bf16.msra.mxu3 %v9903_v4 }
  0x8a   :  { %v10526_v1 = vld [vmem:[#allocation2 + $0xfe0] sm:$0xf]  ;;  %v13098_v2 = vld [vmem:[#allocation2 + $0xfec] sm:$0xf0]  ;;  %v10399_v12 = vor.u32 %v13066_v62, %v10398_v61  ;;  %3393 = vmatmul.bf16.vlgmr.msra.gmra.mxu1 %v14035_v23 }
  0x8b   :  { %v162_v3 = vld [vmem:[%s14449_s0 + $0x40] sm:$0xff]  ;;  %v164_v6 = vld [vmem:[%s14449_s0 + $0x50] sm:$0xff]  ;;  %v10527_v17 = vor.u32 %v13098_v2, %v10526_v1  ;;  %3424 = vmatpush.bf16.msrb.mxu0 %v10143_v5  ;;  %3437 = vmatpush.bf16.msrb.mxu1 %v10271_v11 }
  0x8c   :  { %v10126_v13 = vld [vmem:[#allocation2 + $0xcc0] sm:$0xf]  ;;  %v12998_v14 = vld [vmem:[#allocation2 + $0xccc] sm:$0xf0]  ;;  %v14031_v18 = vpack.c.bf16 %v162_v3, %v162_v3  ;;  %v14033_v22 = vpack.c.bf16 %v164_v6, %v164_v6  ;;  %3450 = vmatpush.bf16.msrb.mxu2 %v10399_v12  ;;  %3419 = vmatmul.bf16.vlgmr.msra.gmra.mxu3 %v14037_v27 }
  0x8d   :  { %v10254_v16 = vld [vmem:[#allocation2 + $0xdc0] sm:$0xf]  ;;  %v13030_v19 = vld [vmem:[#allocation2 + $0xdcc] sm:$0xf0]  ;;  %v10127_v28 = vor.u32 %v12998_v14, %v10126_v13  ;;  %3463 = vmatpush.bf16.msrb.mxu3 %v10527_v17 }
  0x8e   :  { %v10382_v20 = vld [vmem:[#allocation2 + $0xec0] sm:$0xf]  ;;  %v13062_v21 = vld [vmem:[#allocation2 + $0xecc] sm:$0xf0]  ;;  %v10255_v29 = vor.u32 %v13030_v19, %v10254_v16  ;;  %3380 = vmatmul.bf16.vlgmr.msra.gmra.mxu0 %v14031_v18  ;;  %3406 = vmatmul.bf16.vlgmr.msra.gmra.mxu2 %v14033_v22 }
  0x8f   :  { %v10510_v24 = vld [vmem:[#allocation2 + $0xfc0] sm:$0xf]  ;;  %v13094_v26 = vld [vmem:[#allocation2 + $0xfcc] sm:$0xf0]  ;;  %v10383_v30 = vor.u32 %v13062_v21, %v10382_v20  ;;  %3425 = vmatpush.bf16.msrb.mxu0 %v10127_v28 }
  0x90   :  { %v10110_v31 = vld [vmem:[#allocation2 + $0xca0] sm:$0xf]  ;;  %v12994_v32 = vld [vmem:[#allocation2 + $0xcac] sm:$0xf0]  ;;  %v10511_v35 = vor.u32 %v13094_v26, %v10510_v24  ;;  %3438 = vmatpush.bf16.msrb.mxu1 %v10255_v29 }
  0x91   :  { %v10238_v33 = vld [vmem:[#allocation2 + $0xda0] sm:$0xf]  ;;  %v13026_v36 = vld [vmem:[#allocation2 + $0xdac] sm:$0xf0]  ;;  %v10111_v44 = vor.u32 %v12994_v32, %v10110_v31  ;;  %3451 = vmatpush.bf16.msrb.mxu2 %v10383_v30 }
  0x92   :  { %v10366_v39 = vld [vmem:[#allocation2 + $0xea0] sm:$0xf]  ;;  %v13058_v41 = vld [vmem:[#allocation2 + $0xeac] sm:$0xf0]  ;;  %v10239_v45 = vor.u32 %v13026_v36, %v10238_v33  ;;  %3464 = vmatpush.bf16.msrb.mxu3 %v10511_v35 }
  0x93   :  { %v10494_v42 = vld [vmem:[#allocation2 + $0xfa0] sm:$0xf]  ;;  %v13090_v43 = vld [vmem:[#allocation2 + $0xfac] sm:$0xf0]  ;;  %v10367_v46 = vor.u32 %v13058_v41, %v10366_v39  ;;  %3426 = vmatpush.bf16.msrb.mxu0 %v10111_v44 }
  0x94   :  { %v10094_v47 = vld [vmem:[#allocation2 + $0xc80] sm:$0xf]  ;;  %v12990_v48 = vld [vmem:[#allocation2 + $0xc8c] sm:$0xf0]  ;;  %v10495_v50 = vor.u32 %v13090_v43, %v10494_v42  ;;  %3439 = vmatpush.bf16.msrb.mxu1 %v10239_v45 }
  0x95   :  { %v10222_v49 = vld [vmem:[#allocation2 + $0xd80] sm:$0xf]  ;;  %v13022_v51 = vld [vmem:[#allocation2 + $0xd8c] sm:$0xf0]  ;;  %v10095_v56 = vor.u32 %v12990_v48, %v10094_v47  ;;  %3452 = vmatpush.bf16.msrb.mxu2 %v10367_v46 }
  0x96   :  { %v10350_v52 = vld [vmem:[#allocation2 + $0xe80] sm:$0xf]  ;;  %v13054_v53 = vld [vmem:[#allocation2 + $0xe8c] sm:$0xf0]  ;;  %v10223_v57 = vor.u32 %v13022_v51, %v10222_v49  ;;  %3465 = vmatpush.bf16.msrb.mxu3 %v10495_v50 }
  0x97   :  { %v10478_v54 = vld [vmem:[#allocation2 + $0xf80] sm:$0xf]  ;;  %v13086_v55 = vld [vmem:[#allocation2 + $0xf8c] sm:$0xf0]  ;;  %v10351_v58 = vor.u32 %v13054_v53, %v10350_v52  ;;  %3427 = vmatpush.bf16.msrb.mxu0 %v10095_v56  ;;  %v12616_v52 = vld [vmem:[#allocation2 + $0xe4] sm:$0xf] }
  0x98   :  { %v10078_v59 = vld [vmem:[#allocation2 + $0xc60] sm:$0xf]  ;;  %v12986_v60 = vld [vmem:[#allocation2 + $0xc6c] sm:$0xf0]  ;;  %v10479_v62 = vor.u32 %v13086_v55, %v10478_v54  ;;  %3440 = vmatpush.bf16.msrb.mxu1 %v10223_v57  ;;  %v8608_v53 = vld [vmem:[#allocation2 + $0xf0] sm:$0xf0] }
  0x99   :  { %v10206_v61 = vld [vmem:[#allocation2 + $0xd60] sm:$0xf]  ;;  %v13018_v63 = vld [vmem:[#allocation2 + $0xd6c] sm:$0xf0]  ;;  %v10079_v4 = vor.u32 %v12986_v60, %v10078_v59  ;;  %3453 = vmatpush.bf16.msrb.mxu2 %v10351_v58  ;;  %v12648_v54 = vld [vmem:[#allocation2 + $0x1e4] sm:$0xf] }
  0x9a   :  { %v10334_v0 = vld [vmem:[#allocation2 + $0xe60] sm:$0xf]  ;;  %v13050_v1 = vld [vmem:[#allocation2 + $0xe6c] sm:$0xf0]  ;;  %v10207_v5 = vor.u32 %v13018_v63, %v10206_v61  ;;  %3466 = vmatpush.bf16.msrb.mxu3 %v10479_v62  ;;  %v8736_v56 = vld [vmem:[#allocation2 + $0x1f0] sm:$0xf0] }
  0x9b   :  { %v10462_v2 = vld [vmem:[#allocation2 + $0xf60] sm:$0xf]  ;;  %v13082_v3 = vld [vmem:[#allocation2 + $0xf6c] sm:$0xf0]  ;;  %v10335_v6 = vor.u32 %v13050_v1, %v10334_v0  ;;  %3428 = vmatpush.bf16.msrb.mxu0 %v10079_v4  ;;  %v12680_v57 = vld [vmem:[#allocation2 + $0x2e4] sm:$0xf]  ;;  %v8611_v1 = vor.u32 %v12616_v52, %v8608_v53 }
  0x9c   :  { %v10062_v7 = vld [vmem:[#allocation2 + $0xc40] sm:$0xf]  ;;  %v12982_v10 = vld [vmem:[#allocation2 + $0xc4c] sm:$0xf0]  ;;  %v10463_v12 = vor.u32 %v13082_v3, %v10462_v2  ;;  %3441 = vmatpush.bf16.msrb.mxu1 %v10207_v5  ;;  %v8864_v58 = vld [vmem:[#allocation2 + $0x2f0] sm:$0xf0]  ;;  %v8739_v5 = vor.u32 %v12648_v54, %v8736_v56 }
  0x9d   :  { %v10190_v11 = vld [vmem:[#allocation2 + $0xd40] sm:$0xf]  ;;  %v13014_v13 = vld [vmem:[#allocation2 + $0xd4c] sm:$0xf0]  ;;  %v10063_v20 = vor.u32 %v12982_v10, %v10062_v7  ;;  %3454 = vmatpush.bf16.msrb.mxu2 %v10335_v6  ;;  %v12712_v61 = vld [vmem:[#allocation2 + $0x3e4] sm:$0xf]  ;;  %v8867_v6 = vor.u32 %v12680_v57, %v8864_v58 }
  0x9e   :  { %v10318_v14 = vld [vmem:[#allocation2 + $0xe40] sm:$0xf]  ;;  %v13046_v16 = vld [vmem:[#allocation2 + $0xe4c] sm:$0xf0]  ;;  %v10191_v21 = vor.u32 %v13014_v13, %v10190_v11  ;;  %3467 = vmatpush.bf16.msrb.mxu3 %v10463_v12  ;;  %v8992_v62 = vld [vmem:[#allocation2 + $0x3f0] sm:$0xf0] }
  0x9f   :  { %v10446_v17 = vld [vmem:[#allocation2 + $0xf40] sm:$0xf]  ;;  %v13078_v19 = vld [vmem:[#allocation2 + $0xf4c] sm:$0xf0]  ;;  %v10319_v24 = vor.u32 %v13046_v16, %v10318_v14  ;;  %3429 = vmatpush.bf16.msrb.mxu0 %v10063_v20  ;;  %v167_v3 = vld [vmem:[%s14449_s0 + $0x68] sm:$0xff]  ;;  %v8995_v12 = vor.u32 %v12712_v61, %v8992_v62 }
  0xa0   :  { %v10046_v26 = vld [vmem:[#allocation2 + $0xc20] sm:$0xf]  ;;  %v12978_v28 = vld [vmem:[#allocation2 + $0xc2c] sm:$0xf0]  ;;  %v10447_v30 = vor.u32 %v13078_v19, %v10446_v17  ;;  %3442 = vmatpush.bf16.msrb.mxu1 %v10191_v21  ;;  %v169_v4 = vld [vmem:[%s14449_s0 + $0x78] sm:$0xff]  ;;  %v14059_v20 = vpack.c.bf16 %v167_v3, %v167_v3 }
  0xa1   :  { %v10174_v29 = vld [vmem:[#allocation2 + $0xd20] sm:$0xf]  ;;  %v13010_v31 = vld [vmem:[#allocation2 + $0xd2c] sm:$0xf0]  ;;  %v10047_v39 = vor.u32 %v12978_v28, %v10046_v26  ;;  %3455 = vmatpush.bf16.msrb.mxu2 %v10319_v24  ;;  %v12612_v7 = vld [vmem:[#allocation2 + $0xc4] sm:$0xf]  ;;  %v14061_v26 = vpack.c.bf16 %v169_v4, %v169_v4 }
  0xa2   :  { %v10302_v32 = vld [vmem:[#allocation2 + $0xe20] sm:$0xf]  ;;  %v13042_v33 = vld [vmem:[#allocation2 + $0xe2c] sm:$0xf0]  ;;  %v10175_v43 = vor.u32 %v13010_v31, %v10174_v29  ;;  %3468 = vmatpush.bf16.msrb.mxu3 %v10447_v30  ;;  %v8592_v10 = vld [vmem:[#allocation2 + $0xd0] sm:$0xf0] }
  0xa3   :  { %v10430_v35 = vld [vmem:[#allocation2 + $0xf20] sm:$0xf]  ;;  %v13074_v36 = vld [vmem:[#allocation2 + $0xf2c] sm:$0xf0]  ;;  %v10303_v44 = vor.u32 %v13042_v33, %v10302_v32  ;;  %3430 = vmatpush.bf16.msrb.mxu0 %v10047_v39  ;;  %v12644_v11 = vld [vmem:[#allocation2 + $0x1c4] sm:$0xf]  ;;  %v8595_v28 = vor.u32 %v12612_v7, %v8592_v10 }
  0xa4   :  { %v10030_v41 = vld [vmem:[#allocation2 + $0xc00] sm:$0xf]  ;;  %v12974_v42 = vld [vmem:[#allocation2 + $0xc0c] sm:$0xf0]  ;;  %v10431_v48 = vor.u32 %v13074_v36, %v10430_v35  ;;  %3443 = vmatpush.bf16.msrb.mxu1 %v10175_v43  ;;  %v8720_v14 = vld [vmem:[#allocation2 + $0x1d0] sm:$0xf0] }
  0xa5   :  { %v10158_v45 = vld [vmem:[#allocation2 + $0xd00] sm:$0xf]  ;;  %v13006_v46 = vld [vmem:[#allocation2 + $0xd0c] sm:$0xf0]  ;;  %v10031_v55 = vor.u32 %v12974_v42, %v10030_v41  ;;  %3456 = vmatpush.bf16.msrb.mxu2 %v10303_v44  ;;  %v12676_v16 = vld [vmem:[#allocation2 + $0x2c4] sm:$0xf]  ;;  %v8723_v29 = vor.u32 %v12644_v11, %v8720_v14 }
  0xa6   :  { %v10286_v47 = vld [vmem:[#allocation2 + $0xe00] sm:$0xf]  ;;  %v13038_v49 = vld [vmem:[#allocation2 + $0xe0c] sm:$0xf0]  ;;  %v10159_v59 = vor.u32 %v13006_v46, %v10158_v45  ;;  %3469 = vmatpush.bf16.msrb.mxu3 %v10431_v48  ;;  %v8848_v17 = vld [vmem:[#allocation2 + $0x2d0] sm:$0xf0] }
  0xa7   :  { %v10414_v50 = vld [vmem:[#allocation2 + $0xf00] sm:$0xf]  ;;  %v13070_v51 = vld [vmem:[#allocation2 + $0xf0c] sm:$0xf0]  ;;  %v10287_v60 = vor.u32 %v13038_v49, %v10286_v47  ;;  %3431 = vmatpush.bf16.msrb.mxu0 %v10031_v55  ;;  %v12708_v21 = vld [vmem:[#allocation2 + $0x3c4] sm:$0xf]  ;;  %v8851_v30 = vor.u32 %v12676_v16, %v8848_v17 }
  0xa8   :  { %v166_v63 = vld [vmem:[%s14449_s0 + $0x60] sm:$0xff]  ;;  %v10415_v0 = vor.u32 %v13070_v51, %v10414_v50  ;;  %v168_v2 = vld [vmem:[%s14449_s0 + $0x70] sm:$0xff]  ;;  %3444 = vmatpush.bf16.msrb.mxu1 %v10159_v59 }
  0xa9   :  { %v14055_v13 = vpack.c.bf16 %v166_v63, %v166_v63  ;;  %3457 = vmatpush.bf16.msrb.mxu2 %v10287_v60  ;;  %v14057_v19 = vpack.c.bf16 %v168_v2, %v168_v2  ;;  %v8976_v24 = vld [vmem:[#allocation2 + $0x3d0] sm:$0xf0]  ;;  %v12608_v31 = vld [vmem:[#allocation2 + $0xa4] sm:$0xf] }
  0xaa   :  { %3470 = vmatpush.bf16.msrb.mxu3 %v10415_v0  ;;  %v8576_v32 = vld [vmem:[#allocation2 + $0xb0] sm:$0xf0]  ;;  %v12640_v33 = vld [vmem:[#allocation2 + $0x1a4] sm:$0xf]  ;;  %v8979_v35 = vor.u32 %v12708_v21, %v8976_v24 }
  0xab   :  { %3476 = vmatpush.bf16.msra.mxu0 %v8611_v1  ;;  %v8704_v36 = vld [vmem:[#allocation2 + $0x1b0] sm:$0xf0]  ;;  %v12672_v39 = vld [vmem:[#allocation2 + $0x2a4] sm:$0xf]  ;;  %3445 = vmatmul.bf16.vlgmr.msrb.gmra.mxu1 %v14059_v20  ;;  %v8579_v44 = vor.u32 %v12608_v31, %v8576_v32 }
  0xac   :  { %3489 = vmatpush.bf16.msra.mxu1 %v8739_v5  ;;  %3432 = vmatmul.bf16.vlgmr.msrb.gmra.mxu0 %v14055_v13  ;;  %v8832_v41 = vld [vmem:[#allocation2 + $0x2b0] sm:$0xf0]  ;;  %v12704_v42 = vld [vmem:[#allocation2 + $0x3a4] sm:$0xf]  ;;  %v8707_v45 = vor.u32 %v12640_v33, %v8704_v36 }
  0xad   :  { %3502 = vmatpush.bf16.msra.mxu2 %v8867_v6  ;;  %v8960_v43 = vld [vmem:[#allocation2 + $0x3b0] sm:$0xf0]  ;;  %3471 = vmatmul.bf16.vlgmr.msrb.gmra.mxu3 %v14061_v26  ;;  %v8835_v46 = vor.u32 %v12672_v39, %v8832_v41  ;;  %v12604_v47 = vld [vmem:[#allocation2 + $0x84] sm:$0xf] }
  0xae   :  { %3515 = vmatpush.bf16.msra.mxu3 %v8995_v12  ;;  %3458 = vmatmul.bf16.vlgmr.msrb.gmra.mxu2 %v14057_v19  ;;  %v8560_v48 = vld [vmem:[#allocation2 + $0x90] sm:$0xf0]  ;;  %v12636_v49 = vld [vmem:[#allocation2 + $0x184] sm:$0xf]  ;;  %v8963_v50 = vor.u32 %v12704_v42, %v8960_v43 }
  0xaf   :  { %3477 = vmatpush.bf16.msra.mxu0 %v8595_v28  ;;  %v8688_v51 = vld [vmem:[#allocation2 + $0x190] sm:$0xf0]  ;;  %v12668_v52 = vld [vmem:[#allocation2 + $0x284] sm:$0xf]  ;;  %v8563_v56 = vor.u32 %v12604_v47, %v8560_v48 }
  0xb0   :  { %3490 = vmatpush.bf16.msra.mxu1 %v8723_v29  ;;  %v8816_v53 = vld [vmem:[#allocation2 + $0x290] sm:$0xf0]  ;;  %v12700_v54 = vld [vmem:[#allocation2 + $0x384] sm:$0xf]  ;;  %v8691_v57 = vor.u32 %v12636_v49, %v8688_v51 }
  0xb1   :  { %3503 = vmatpush.bf16.msra.mxu2 %v8851_v30  ;;  %v8944_v55 = vld [vmem:[#allocation2 + $0x390] sm:$0xf0]  ;;  %v8819_v58 = vor.u32 %v12668_v52, %v8816_v53  ;;  %v12600_v59 = vld [vmem:[#allocation2 + $0x64] sm:$0xf] }
  0xb2   :  { %3516 = vmatpush.bf16.msra.mxu3 %v8979_v35  ;;  %v8544_v60 = vld [vmem:[#allocation2 + $0x70] sm:$0xf0]  ;;  %v12632_v61 = vld [vmem:[#allocation2 + $0x164] sm:$0xf]  ;;  %v8947_v62 = vor.u32 %v12700_v54, %v8944_v55 }
  0xb3   :  { %3478 = vmatpush.bf16.msra.mxu0 %v8579_v44  ;;  %v8672_v63 = vld [vmem:[#allocation2 + $0x170] sm:$0xf0]  ;;  %v12664_v0 = vld [vmem:[#allocation2 + $0x264] sm:$0xf]  ;;  %v8547_v4 = vor.u32 %v12600_v59, %v8544_v60 }
  0xb4   :  { %3491 = vmatpush.bf16.msra.mxu1 %v8707_v45  ;;  %v8800_v1 = vld [vmem:[#allocation2 + $0x270] sm:$0xf0]  ;;  %v12696_v2 = vld [vmem:[#allocation2 + $0x364] sm:$0xf]  ;;  %v8675_v5 = vor.u32 %v12632_v61, %v8672_v63 }
  0xb5   :  { %3504 = vmatpush.bf16.msra.mxu2 %v8835_v46  ;;  %v8928_v3 = vld [vmem:[#allocation2 + $0x370] sm:$0xf0]  ;;  %v8803_v6 = vor.u32 %v12664_v0, %v8800_v1  ;;  %v12596_v7 = vld [vmem:[#allocation2 + $0x44] sm:$0xf] }
  0xb6   :  { %3517 = vmatpush.bf16.msra.mxu3 %v8963_v50  ;;  %v8528_v10 = vld [vmem:[#allocation2 + $0x50] sm:$0xf0]  ;;  %v12628_v11 = vld [vmem:[#allocation2 + $0x144] sm:$0xf]  ;;  %v8931_v12 = vor.u32 %v12696_v2, %v8928_v3 }
  0xb7   :  { %3479 = vmatpush.bf16.msra.mxu0 %v8563_v56  ;;  %v8656_v14 = vld [vmem:[#allocation2 + $0x150] sm:$0xf0]  ;;  %v12660_v16 = vld [vmem:[#allocation2 + $0x244] sm:$0xf]  ;;  %v8531_v28 = vor.u32 %v12596_v7, %v8528_v10 }
  0xb8   :  { %3492 = vmatpush.bf16.msra.mxu1 %v8691_v57  ;;  %v8784_v17 = vld [vmem:[#allocation2 + $0x250] sm:$0xf0]  ;;  %v12692_v21 = vld [vmem:[#allocation2 + $0x344] sm:$0xf]  ;;  %v8659_v29 = vor.u32 %v12628_v11, %v8656_v14 }
  0xb9   :  { %3505 = vmatpush.bf16.msra.mxu2 %v8819_v58  ;;  %v8912_v24 = vld [vmem:[#allocation2 + $0x350] sm:$0xf0]  ;;  %v8787_v30 = vor.u32 %v12660_v16, %v8784_v17  ;;  %v12592_v31 = vld [vmem:[#allocation2 + $0x24] sm:$0xf] }
  0xba   :  { %3518 = vmatpush.bf16.msra.mxu3 %v8947_v62  ;;  %v8512_v32 = vld [vmem:[#allocation2 + $0x30] sm:$0xf0]  ;;  %v12624_v33 = vld [vmem:[#allocation2 + $0x124] sm:$0xf]  ;;  %v8915_v35 = vor.u32 %v12692_v21, %v8912_v24 }
  0xbb   :  { %3480 = vmatpush.bf16.msra.mxu0 %v8547_v4  ;;  %v8640_v36 = vld [vmem:[#allocation2 + $0x130] sm:$0xf0]  ;;  %v12656_v39 = vld [vmem:[#allocation2 + $0x224] sm:$0xf]  ;;  %v8515_v44 = vor.u32 %v12592_v31, %v8512_v32 }
  0xbc   :  { %3493 = vmatpush.bf16.msra.mxu1 %v8675_v5  ;;  %v8768_v41 = vld [vmem:[#allocation2 + $0x230] sm:$0xf0]  ;;  %v12688_v42 = vld [vmem:[#allocation2 + $0x324] sm:$0xf]  ;;  %v8643_v47 = vor.u32 %v12624_v33, %v8640_v36 }
  0xbd   :  { %3506 = vmatpush.bf16.msra.mxu2 %v8803_v6  ;;  %v8896_v43 = vld [vmem:[#allocation2 + $0x330] sm:$0xf0]  ;;  %v12588_v45 = vld [vmem:[#allocation2 + $0x4] sm:$0xf]  ;;  %v8771_v48 = vor.u32 %v12656_v39, %v8768_v41 }
  0xbe   :  { %3519 = vmatpush.bf16.msra.mxu3 %v8931_v12  ;;  %v8496_v46 = vld [vmem:[#allocation2 + $0x10] sm:$0xf0]  ;;  %v12620_v49 = vld [vmem:[#allocation2 + $0x104] sm:$0xf]  ;;  %v8899_v52 = vor.u32 %v12688_v42, %v8896_v43 }
  0xbf   :  { %3481 = vmatpush.bf16.msra.mxu0 %v8531_v28  ;;  %v8624_v50 = vld [vmem:[#allocation2 + $0x110] sm:$0xf0]  ;;  %v12652_v51 = vld [vmem:[#allocation2 + $0x204] sm:$0xf]  ;;  %v8499_v59 = vor.u32 %v12588_v45, %v8496_v46 }
  0xc0   :  { %3494 = vmatpush.bf16.msra.mxu1 %v8659_v29  ;;  %v8752_v53 = vld [vmem:[#allocation2 + $0x210] sm:$0xf0]  ;;  %v12684_v54 = vld [vmem:[#allocation2 + $0x304] sm:$0xf]  ;;  %v8627_v63 = vor.u32 %v12620_v49, %v8624_v50 }
  0xc1   :  { %3507 = vmatpush.bf16.msra.mxu2 %v8787_v30  ;;  %v8880_v55 = vld [vmem:[#allocation2 + $0x310] sm:$0xf0]  ;;  %v12744_v56 = vld [vmem:[#allocation2 + $0x4e4] sm:$0xf]  ;;  %v8755_v0 = vor.u32 %v12652_v51, %v8752_v53 }
  0xc2   :  { %3520 = vmatpush.bf16.msra.mxu3 %v8915_v35  ;;  %v9120_v57 = vld [vmem:[#allocation2 + $0x4f0] sm:$0xf0]  ;;  %v12776_v58 = vld [vmem:[#allocation2 + $0x5e4] sm:$0xf]  ;;  %v8883_v3 = vor.u32 %v12684_v54, %v8880_v55  ;;  %v698_v54 = vld [vmem:[#allocation4] sm:$0xf] }
  0xc3   :  { %3482 = vmatpush.bf16.msra.mxu0 %v8515_v44  ;;  %v9248_v60 = vld [vmem:[#allocation2 + $0x5f0] sm:$0xf0]  ;;  %v12808_v61 = vld [vmem:[#allocation2 + $0x6e4] sm:$0xf]  ;;  %v9123_v4 = vor.u32 %v12744_v56, %v9120_v57 }
  0xc4   :  { %v9376_v62 = vld [vmem:[#allocation2 + $0x6f0] sm:$0xf0]  ;;  %3495 = vmatpush.bf16.msra.mxu1 %v8643_v47  ;;  %v12840_v1 = vld [vmem:[#allocation2 + $0x7e4] sm:$0xf]  ;;  %v9251_v5 = vor.u32 %v12776_v58, %v9248_v60 }
  0xc5   :  { %3508 = vmatpush.bf16.msra.mxu2 %v8771_v48  ;;  %v9504_v2 = vld [vmem:[#allocation2 + $0x7f0] sm:$0xf0]  ;;  %v9379_v6 = vor.u32 %v12808_v61, %v9376_v62  ;;  %v12740_v7 = vld [vmem:[#allocation2 + $0x4c4] sm:$0xf] }
  0xc6   :  { %3521 = vmatpush.bf16.msra.mxu3 %v8899_v52  ;;  %v9104_v10 = vld [vmem:[#allocation2 + $0x4d0] sm:$0xf0]  ;;  %v12772_v11 = vld [vmem:[#allocation2 + $0x5c4] sm:$0xf]  ;;  %v9507_v12 = vor.u32 %v12840_v1, %v9504_v2 }
  0xc7   :  { %3483 = vmatpush.bf16.msra.mxu0 %v8499_v59  ;;  %v9232_v14 = vld [vmem:[#allocation2 + $0x5d0] sm:$0xf0]  ;;  %v12804_v16 = vld [vmem:[#allocation2 + $0x6c4] sm:$0xf]  ;;  %v9107_v28 = vor.u32 %v12740_v7, %v9104_v10 }
  0xc8   :  { %v9360_v17 = vld [vmem:[#allocation2 + $0x6d0] sm:$0xf0]  ;;  %3496 = vmatpush.bf16.msra.mxu1 %v8627_v63  ;;  %v12836_v21 = vld [vmem:[#allocation2 + $0x7c4] sm:$0xf]  ;;  %v9235_v29 = vor.u32 %v12772_v11, %v9232_v14  ;;  %v700_v63 = vperm.slane %v698_v54, 0 }
  0xc9   :  { %3509 = vmatpush.bf16.msra.mxu2 %v8755_v0  ;;  %v9488_v24 = vld [vmem:[#allocation2 + $0x7d0] sm:$0xf0]  ;;  %v9363_v30 = vor.u32 %v12804_v16, %v9360_v17  ;;  %v12736_v31 = vld [vmem:[#allocation2 + $0x4a4] sm:$0xf] }
  0xca   :  { %3522 = vmatpush.bf16.msra.mxu3 %v8883_v3  ;;  %v9088_v32 = vld [vmem:[#allocation2 + $0x4b0] sm:$0xf0]  ;;  %v12768_v33 = vld [vmem:[#allocation2 + $0x5a4] sm:$0xf]  ;;  %v9491_v35 = vor.u32 %v12836_v21, %v9488_v24  ;;  %3484 = vmatmul.bf16.vlgmr.msra.gmra.mxu0 %v13979_v9 }
  0xcb   :  { %3528 = vmatpush.bf16.msrb.mxu0 %v9123_v4  ;;  %v9216_v36 = vld [vmem:[#allocation2 + $0x5b0] sm:$0xf0]  ;;  %v12800_v39 = vld [vmem:[#allocation2 + $0x6a4] sm:$0xf]  ;;  %v9091_v44 = vor.u32 %v12736_v31, %v9088_v32  ;;  %3497 = vmatmul.bf16.vlgmr.msra.gmra.mxu1 %v13992_v25 }
  0xcc   :  { %3541 = vmatpush.bf16.msrb.mxu1 %v9251_v5  ;;  %v9344_v41 = vld [vmem:[#allocation2 + $0x6b0] sm:$0xf0]  ;;  %3510 = vmatmul.bf16.vlgmr.msra.gmra.mxu2 %v13977_v8  ;;  %v12832_v42 = vld [vmem:[#allocation2 + $0x7a4] sm:$0xf]  ;;  %v9219_v46 = vor.u32 %v12768_v33, %v9216_v36  ;;  %v3290_v33 = vpop.f32.mrf.mxu1 }
  0xcd   :  { %3554 = vmatpush.bf16.msrb.mxu2 %v9379_v6  ;;  %v9472_v43 = vld [vmem:[#allocation2 + $0x7b0] sm:$0xf0]  ;;  %3523 = vmatmul.bf16.vlgmr.msra.gmra.mxu3 %v13984_v15  ;;  %v12732_v45 = vld [vmem:[#allocation2 + $0x484] sm:$0xf]  ;;  %v9347_v47 = vor.u32 %v12800_v39, %v9344_v41 }
  0xce   :  { %3567 = vmatpush.bf16.msrb.mxu3 %v9507_v12  ;;  %v9072_v48 = vld [vmem:[#allocation2 + $0x490] sm:$0xf0]  ;;  %v12764_v49 = vld [vmem:[#allocation2 + $0x584] sm:$0xf]  ;;  %v9475_v51 = vor.u32 %v12832_v42, %v9472_v43 }
  0xcf   :  { %3529 = vmatpush.bf16.msrb.mxu0 %v9107_v28  ;;  %v9200_v50 = vld [vmem:[#allocation2 + $0x590] sm:$0xf0]  ;;  %v12796_v52 = vld [vmem:[#allocation2 + $0x684] sm:$0xf]  ;;  %v9075_v57 = vor.u32 %v12732_v45, %v9072_v48 }
  0xd0   :  { %3542 = vmatpush.bf16.msrb.mxu1 %v9235_v29  ;;  %v9328_v53 = vld [vmem:[#allocation2 + $0x690] sm:$0xf0]  ;;  %v12828_v55 = vld [vmem:[#allocation2 + $0x784] sm:$0xf]  ;;  %v9203_v59 = vor.u32 %v12764_v49, %v9200_v50 }
  0xd1   :  { %3555 = vmatpush.bf16.msrb.mxu2 %v9363_v30  ;;  %v9456_v56 = vld [vmem:[#allocation2 + $0x790] sm:$0xf0]  ;;  %v12728_v58 = vld [vmem:[#allocation2 + $0x464] sm:$0xf]  ;;  %v9331_v60 = vor.u32 %v12796_v52, %v9328_v53  ;;  %v3316_v52 = vpop.f32.mrf.mxu3 }
  0xd2   :  { %3568 = vmatpush.bf16.msrb.mxu3 %v9491_v35  ;;  %v9056_v61 = vld [vmem:[#allocation2 + $0x470] sm:$0xf0]  ;;  %v12760_v62 = vld [vmem:[#allocation2 + $0x564] sm:$0xf]  ;;  %v9459_v0 = vor.u32 %v12828_v55, %v9456_v56  ;;  %v3277_v7 = vpop.f32.mrf.mxu0 }
  0xd3   :  { %3530 = vmatpush.bf16.msrb.mxu0 %v9091_v44  ;;  %v9184_v1 = vld [vmem:[#allocation2 + $0x570] sm:$0xf0]  ;;  %v12792_v2 = vld [vmem:[#allocation2 + $0x664] sm:$0xf]  ;;  %v9059_v6 = vor.u32 %v12728_v58, %v9056_v61  ;;  %v3278_v17 = vadd.f32 %v3277_v7, %v700_v63 }
  0xd4   :  { %3543 = vmatpush.bf16.msrb.mxu1 %v9219_v46  ;;  %v9312_v3 = vld [vmem:[#allocation2 + $0x670] sm:$0xf0]  ;;  %v12824_v4 = vld [vmem:[#allocation2 + $0x764] sm:$0xf]  ;;  %v9187_v10 = vor.u32 %v12760_v62, %v9184_v1 }
  0xd5   :  { %3556 = vmatpush.bf16.msrb.mxu2 %v9347_v47  ;;  %v9440_v5 = vld [vmem:[#allocation2 + $0x770] sm:$0xf0]  ;;  %v9315_v11 = vor.u32 %v12792_v2, %v9312_v3  ;;  %v12724_v12 = vld [vmem:[#allocation2 + $0x444] sm:$0xf]  ;;  %v3291_v43 = vadd.f32 %v3290_v33, %v3278_v17 }
  0xd6   :  { %3569 = vmatpush.bf16.msrb.mxu3 %v9475_v51  ;;  %v9040_v14 = vld [vmem:[#allocation2 + $0x450] sm:$0xf0]  ;;  %v12756_v16 = vld [vmem:[#allocation2 + $0x544] sm:$0xf]  ;;  %v9443_v21 = vor.u32 %v12824_v4, %v9440_v5 }
  0xd7   :  { %3531 = vmatpush.bf16.msrb.mxu0 %v9075_v57  ;;  %v9168_v24 = vld [vmem:[#allocation2 + $0x550] sm:$0xf0]  ;;  %v12788_v28 = vld [vmem:[#allocation2 + $0x644] sm:$0xf]  ;;  %v9043_v32 = vor.u32 %v12724_v12, %v9040_v14  ;;  %v3303_v48 = vpop.f32.mrf.mxu2  ;;  %v3292_v12 = vpop.f32.mrf.mxu1 }
  0xd8   :  { %3544 = vmatpush.bf16.msrb.mxu1 %v9203_v59  ;;  %v9296_v29 = vld [vmem:[#allocation2 + $0x650] sm:$0xf0]  ;;  %v12820_v30 = vld [vmem:[#allocation2 + $0x744] sm:$0xf]  ;;  %v9171_v35 = vor.u32 %v12756_v16, %v9168_v24  ;;  %v3304_v51 = vadd.f32 %v3303_v48, %v3291_v43 }
  0xd9   :  { %3557 = vmatpush.bf16.msrb.mxu2 %v9331_v60  ;;  %v9424_v31 = vld [vmem:[#allocation2 + $0x750] sm:$0xf0]  ;;  %v9299_v36 = vor.u32 %v12788_v28, %v9296_v29  ;;  %v12720_v39 = vld [vmem:[#allocation2 + $0x424] sm:$0xf] }
  0xda   :  { %3570 = vmatpush.bf16.msrb.mxu3 %v9459_v0  ;;  %v9024_v41 = vld [vmem:[#allocation2 + $0x430] sm:$0xf0]  ;;  %v12752_v42 = vld [vmem:[#allocation2 + $0x524] sm:$0xf]  ;;  %v9427_v44 = vor.u32 %v12820_v30, %v9424_v31  ;;  %v3279_v56 = vpop.f32.mrf.mxu0  ;;  %v14071_v62 = vadd.f32 %v3316_v52, %v3304_v51 }
  0xdb   :  { %3532 = vmatpush.bf16.msrb.mxu0 %v9059_v6  ;;  %v9152_v45 = vld [vmem:[#allocation2 + $0x530] sm:$0xf0]  ;;  %v12784_v46 = vld [vmem:[#allocation2 + $0x624] sm:$0xf]  ;;  %v9027_v53 = vor.u32 %v12720_v39, %v9024_v41 }
  0xdc   :  { %3545 = vmatpush.bf16.msrb.mxu1 %v9187_v10  ;;  %v9280_v47 = vld [vmem:[#allocation2 + $0x630] sm:$0xf0]  ;;  %v12816_v49 = vld [vmem:[#allocation2 + $0x724] sm:$0xf]  ;;  %v9155_v57 = vor.u32 %v12752_v42, %v9152_v45 }
  0xdd   :  { %3558 = vmatpush.bf16.msrb.mxu2 %v9315_v11  ;;  %v9408_v50 = vld [vmem:[#allocation2 + $0x730] sm:$0xf0]  ;;  %v12716_v54 = vld [vmem:[#allocation2 + $0x404] sm:$0xf]  ;;  %v9283_v58 = vor.u32 %v12784_v46, %v9280_v47 }
  0xde   :  { %3571 = vmatpush.bf16.msrb.mxu3 %v9443_v21  ;;  %v9008_v55 = vld [vmem:[#allocation2 + $0x410] sm:$0xf0]  ;;  %v12748_v59 = vld [vmem:[#allocation2 + $0x504] sm:$0xf]  ;;  %v9411_v63 = vor.u32 %v12816_v49, %v9408_v50 }
  0xdf   :  { %3533 = vmatpush.bf16.msrb.mxu0 %v9043_v32  ;;  %v9136_v60 = vld [vmem:[#allocation2 + $0x510] sm:$0xf0]  ;;  %v12780_v61 = vld [vmem:[#allocation2 + $0x604] sm:$0xf]  ;;  %v9011_v6 = vor.u32 %v12716_v54, %v9008_v55  ;;  %v3305_v29 = vpop.f32.mrf.mxu2 }
  0xe0   :  { %3546 = vmatpush.bf16.msrb.mxu1 %v9171_v35  ;;  %v9264_v0 = vld [vmem:[#allocation2 + $0x610] sm:$0xf0]  ;;  %v12812_v1 = vld [vmem:[#allocation2 + $0x704] sm:$0xf]  ;;  %v9139_v14 = vor.u32 %v12748_v59, %v9136_v60 }
  0xe1   :  { %3559 = vmatpush.bf16.msrb.mxu2 %v9299_v36  ;;  %v9392_v2 = vld [vmem:[#allocation2 + $0x710] sm:$0xf0]  ;;  %v12872_v3 = vld [vmem:[#allocation2 + $0x8e4] sm:$0xf]  ;;  %v9267_v16 = vor.u32 %v12780_v61, %v9264_v0  ;;  %v3318_v36 = vpop.f32.mrf.mxu3 }
  0xe2   :  { %3572 = vmatpush.bf16.msrb.mxu3 %v9427_v44  ;;  %v9632_v4 = vld [vmem:[#allocation2 + $0x8f0] sm:$0xf0]  ;;  %v12904_v5 = vld [vmem:[#allocation2 + $0x9e4] sm:$0xf]  ;;  %v9395_v24 = vor.u32 %v12812_v1, %v9392_v2 }
  0xe3   :  { %3534 = vmatpush.bf16.msrb.mxu0 %v9027_v53  ;;  %v9760_v7 = vld [vmem:[#allocation2 + $0x9f0] sm:$0xf0]  ;;  %v12936_v10 = vld [vmem:[#allocation2 + $0xae4] sm:$0xf]  ;;  %v9635_v28 = vor.u32 %v12872_v3, %v9632_v4 }
  0xe4   :  { %v9888_v11 = vld [vmem:[#allocation2 + $0xaf0] sm:$0xf0]  ;;  %3547 = vmatpush.bf16.msrb.mxu1 %v9155_v57  ;;  %v12968_v17 = vld [vmem:[#allocation2 + $0xbe4] sm:$0xf]  ;;  %v9763_v30 = vor.u32 %v12904_v5, %v9760_v7 }
  0xe5   :  { %3560 = vmatpush.bf16.msrb.mxu2 %v9283_v58  ;;  %v10016_v21 = vld [vmem:[#allocation2 + $0xbf0] sm:$0xf0]  ;;  %v9891_v31 = vor.u32 %v12936_v10, %v9888_v11  ;;  %v12868_v32 = vld [vmem:[#allocation2 + $0x8c4] sm:$0xf] }
  0xe6   :  { %3573 = vmatpush.bf16.msrb.mxu3 %v9411_v63  ;;  %v9616_v33 = vld [vmem:[#allocation2 + $0x8d0] sm:$0xf0]  ;;  %v12900_v35 = vld [vmem:[#allocation2 + $0x9c4] sm:$0xf]  ;;  %v10019_v39 = vor.u32 %v12968_v17, %v10016_v21 }
  0xe7   :  { %3535 = vmatpush.bf16.msrb.mxu0 %v9011_v6  ;;  %v9744_v41 = vld [vmem:[#allocation2 + $0x9d0] sm:$0xf0]  ;;  %v12932_v42 = vld [vmem:[#allocation2 + $0xac4] sm:$0xf]  ;;  %v9619_v46 = vor.u32 %v12868_v32, %v9616_v33 }
  0xe8   :  { %v9872_v43 = vld [vmem:[#allocation2 + $0xad0] sm:$0xf0]  ;;  %3548 = vmatpush.bf16.msrb.mxu1 %v9139_v14  ;;  %v12964_v44 = vld [vmem:[#allocation2 + $0xbc4] sm:$0xf]  ;;  %v9747_v47 = vor.u32 %v12900_v35, %v9744_v41 }
  0xe9   :  { %3561 = vmatpush.bf16.msrb.mxu2 %v9267_v16  ;;  %v10000_v45 = vld [vmem:[#allocation2 + $0xbd0] sm:$0xf0]  ;;  %v9875_v48 = vor.u32 %v12932_v42, %v9872_v43  ;;  %v12864_v49 = vld [vmem:[#allocation2 + $0x8a4] sm:$0xf] }
  0xea   :  { %3574 = vmatpush.bf16.msrb.mxu3 %v9395_v24  ;;  %v9600_v50 = vld [vmem:[#allocation2 + $0x8b0] sm:$0xf0]  ;;  %v12896_v51 = vld [vmem:[#allocation2 + $0x9a4] sm:$0xf]  ;;  %v10003_v52 = vor.u32 %v12964_v44, %v10000_v45  ;;  %3536 = vmatmul.bf16.vlgmr.msrb.gmra.mxu0 %v14009_v37  ;;  %v3342_v24 = vpop.f32.mrf.mxu1 }
  0xeb   :  { %3580 = vmatpush.bf16.msra.mxu0 %v9635_v28  ;;  %v9728_v53 = vld [vmem:[#allocation2 + $0x9b0] sm:$0xf0]  ;;  %v12928_v54 = vld [vmem:[#allocation2 + $0xaa4] sm:$0xf]  ;;  %v9603_v58 = vor.u32 %v12864_v49, %v9600_v50  ;;  %3549 = vmatmul.bf16.vlgmr.msrb.gmra.mxu1 %v14013_v40  ;;  %v3329_v10 = vpop.f32.mrf.mxu0 }
  0xec   :  { %3593 = vmatpush.bf16.msra.mxu1 %v9763_v30  ;;  %3562 = vmatmul.bf16.vlgmr.msrb.gmra.mxu2 %v14007_v34  ;;  %v9856_v55 = vld [vmem:[#allocation2 + $0xab0] sm:$0xf0]  ;;  %v12960_v56 = vld [vmem:[#allocation2 + $0xba4] sm:$0xf]  ;;  %v9731_v59 = vor.u32 %v12896_v51, %v9728_v53  ;;  %v3330_v21 = vadd.f32 %v3329_v10, %v14071_v62 }
  0xed   :  { %3606 = vmatpush.bf16.msra.mxu2 %v9891_v31  ;;  %v9984_v57 = vld [vmem:[#allocation2 + $0xbb0] sm:$0xf0]  ;;  %3575 = vmatmul.bf16.vlgmr.msrb.gmra.mxu3 %v14011_v38  ;;  %v9859_v60 = vor.u32 %v12928_v54, %v9856_v55  ;;  %v12860_v61 = vld [vmem:[#allocation2 + $0x884] sm:$0xf] }
  0xee   :  { %3619 = vmatpush.bf16.msra.mxu3 %v10019_v39  ;;  %v9584_v63 = vld [vmem:[#allocation2 + $0x890] sm:$0xf0]  ;;  %v12892_v0 = vld [vmem:[#allocation2 + $0x984] sm:$0xf]  ;;  %v9987_v1 = vor.u32 %v12960_v56, %v9984_v57  ;;  %v3343_v35 = vadd.f32 %v3342_v24, %v3330_v21  ;;  %v3368_v50 = vpop.f32.mrf.mxu3 }
  0xef   :  { %3581 = vmatpush.bf16.msra.mxu0 %v9619_v46  ;;  %v9712_v2 = vld [vmem:[#allocation2 + $0x990] sm:$0xf0]  ;;  %v12924_v3 = vld [vmem:[#allocation2 + $0xa84] sm:$0xf]  ;;  %v9587_v7 = vor.u32 %v12860_v61, %v9584_v63 }
  0xf0   :  { %3594 = vmatpush.bf16.msra.mxu1 %v9747_v47  ;;  %v9840_v4 = vld [vmem:[#allocation2 + $0xa90] sm:$0xf0]  ;;  %v12956_v5 = vld [vmem:[#allocation2 + $0xb84] sm:$0xf]  ;;  %v9715_v11 = vor.u32 %v12892_v0, %v9712_v2  ;;  %v3355_v45 = vpop.f32.mrf.mxu2 }
  0xf1   :  { %3607 = vmatpush.bf16.msra.mxu2 %v9875_v48  ;;  %v9968_v6 = vld [vmem:[#allocation2 + $0xb90] sm:$0xf0]  ;;  %v9843_v12 = vor.u32 %v12924_v3, %v9840_v4  ;;  %v12856_v14 = vld [vmem:[#allocation2 + $0x864] sm:$0xf]  ;;  %v3356_v49 = vadd.f32 %v3355_v45, %v3343_v35 }
  0xf2   :  { %3620 = vmatpush.bf16.msra.mxu3 %v10003_v52  ;;  %v9568_v16 = vld [vmem:[#allocation2 + $0x870] sm:$0xf0]  ;;  %v12888_v17 = vld [vmem:[#allocation2 + $0x964] sm:$0xf]  ;;  %v9971_v28 = vor.u32 %v12956_v5, %v9968_v6  ;;  %v3344_v61 = vpop.f32.mrf.mxu1 }
  0xf3   :  { %3582 = vmatpush.bf16.msra.mxu0 %v9603_v58  ;;  %v9696_v29 = vld [vmem:[#allocation2 + $0x970] sm:$0xf0]  ;;  %v12920_v30 = vld [vmem:[#allocation2 + $0xa64] sm:$0xf]  ;;  %v9571_v36 = vor.u32 %v12856_v14, %v9568_v16  ;;  %v14078_v54 = vadd.f32 %v3368_v50, %v3356_v49  ;;  %v3331_v55 = vpop.f32.mrf.mxu0 }
  0xf4   :  { %3595 = vmatpush.bf16.msra.mxu1 %v9731_v59  ;;  %v9824_v31 = vld [vmem:[#allocation2 + $0xa70] sm:$0xf0]  ;;  %v12952_v32 = vld [vmem:[#allocation2 + $0xb64] sm:$0xf]  ;;  %v9699_v39 = vor.u32 %v12888_v17, %v9696_v29 }
  0xf5   :  { %3608 = vmatpush.bf16.msra.mxu2 %v9859_v60  ;;  %v9952_v33 = vld [vmem:[#allocation2 + $0xb70] sm:$0xf0]  ;;  %v9827_v41 = vor.u32 %v12920_v30, %v9824_v31  ;;  %v12852_v42 = vld [vmem:[#allocation2 + $0x844] sm:$0xf] }
  0xf6   :  { %3621 = vmatpush.bf16.msra.mxu3 %v9987_v1  ;;  %v9552_v43 = vld [vmem:[#allocation2 + $0x850] sm:$0xf0]  ;;  %v12884_v44 = vld [vmem:[#allocation2 + $0x944] sm:$0xf]  ;;  %v9955_v62 = vor.u32 %v12952_v32, %v9952_v33  ;;  %v3370_v30 = vpop.f32.mrf.mxu3 }
  0xf7   :  { %3583 = vmatpush.bf16.msra.mxu0 %v9587_v7  ;;  %v9680_v46 = vld [vmem:[#allocation2 + $0x950] sm:$0xf0]  ;;  %v12916_v47 = vld [vmem:[#allocation2 + $0xa44] sm:$0xf]  ;;  %v9555_v53 = vor.u32 %v12852_v42, %v9552_v43 }
  0xf8   :  { %3596 = vmatpush.bf16.msra.mxu1 %v9715_v11  ;;  %v9808_v48 = vld [vmem:[#allocation2 + $0xa50] sm:$0xf0]  ;;  %v12948_v51 = vld [vmem:[#allocation2 + $0xb44] sm:$0xf]  ;;  %v9683_v56 = vor.u32 %v12884_v44, %v9680_v46  ;;  %v3357_v17 = vpop.f32.mrf.mxu2 }
  0xf9   :  { %3609 = vmatpush.bf16.msra.mxu2 %v9843_v12  ;;  %v9936_v52 = vld [vmem:[#allocation2 + $0xb50] sm:$0xf0]  ;;  %v9811_v57 = vor.u32 %v12916_v47, %v9808_v48  ;;  %v12848_v58 = vld [vmem:[#allocation2 + $0x824] sm:$0xf] }
  0xfa   :  { %3622 = vmatpush.bf16.msra.mxu3 %v9971_v28  ;;  %v9536_v59 = vld [vmem:[#allocation2 + $0x830] sm:$0xf0]  ;;  %v12880_v60 = vld [vmem:[#allocation2 + $0x924] sm:$0xf]  ;;  %v9939_v63 = vor.u32 %v12948_v51, %v9936_v52 }
  0xfb   :  { %3584 = vmatpush.bf16.msra.mxu0 %v9571_v36  ;;  %v9664_v0 = vld [vmem:[#allocation2 + $0x930] sm:$0xf0]  ;;  %v12912_v1 = vld [vmem:[#allocation2 + $0xa24] sm:$0xf]  ;;  %v9539_v5 = vor.u32 %v12848_v58, %v9536_v59 }
  0xfc   :  { %3597 = vmatpush.bf16.msra.mxu1 %v9699_v39  ;;  %v9792_v2 = vld [vmem:[#allocation2 + $0xa30] sm:$0xf0]  ;;  %v12944_v3 = vld [vmem:[#allocation2 + $0xb24] sm:$0xf]  ;;  %v9667_v10 = vor.u32 %v12880_v60, %v9664_v0 }
  0xfd   :  { %3610 = vmatpush.bf16.msra.mxu2 %v9827_v41  ;;  %v9920_v4 = vld [vmem:[#allocation2 + $0xb30] sm:$0xf0]  ;;  %v12844_v6 = vld [vmem:[#allocation2 + $0x804] sm:$0xf]  ;;  %v9795_v11 = vor.u32 %v12912_v1, %v9792_v2 }
  0xfe   :  { %3623 = vmatpush.bf16.msra.mxu3 %v9955_v62  ;;  %v9520_v7 = vld [vmem:[#allocation2 + $0x810] sm:$0xf0]  ;;  %v12876_v12 = vld [vmem:[#allocation2 + $0x904] sm:$0xf]  ;;  %v9923_v21 = vor.u32 %v12944_v3, %v9920_v4 }
  0xff   :  { %3585 = vmatpush.bf16.msra.mxu0 %v9555_v53  ;;  %v9648_v14 = vld [vmem:[#allocation2 + $0x910] sm:$0xf0]  ;;  %v12908_v16 = vld [vmem:[#allocation2 + $0xa04] sm:$0xf]  ;;  %v9523_v35 = vor.u32 %v12844_v6, %v9520_v7 }
 0x100   :  { %3598 = vmatpush.bf16.msra.mxu1 %v9683_v56  ;;  %v9776_v24 = vld [vmem:[#allocation2 + $0xa10] sm:$0xf0]  ;;  %v12940_v28 = vld [vmem:[#allocation2 + $0xb04] sm:$0xf]  ;;  %v9651_v42 = vor.u32 %v12876_v12, %v9648_v14 }
 0x101   :  { %3611 = vmatpush.bf16.msra.mxu2 %v9811_v57  ;;  %v9904_v29 = vld [vmem:[#allocation2 + $0xb10] sm:$0xf0]  ;;  %v13000_v31 = vld [vmem:[#allocation2 + $0xce4] sm:$0xf]  ;;  %v9779_v43 = vor.u32 %v12908_v16, %v9776_v24 }
 0x102   :  { %3624 = vmatpush.bf16.msra.mxu3 %v9939_v63  ;;  %v10144_v32 = vld [vmem:[#allocation2 + $0xcf0] sm:$0xf0]  ;;  %v13032_v33 = vld [vmem:[#allocation2 + $0xde4] sm:$0xf]  ;;  %v9907_v62 = vor.u32 %v12940_v28, %v9904_v29 }
 0x103   :  { %3586 = vmatpush.bf16.msra.mxu0 %v9539_v5  ;;  %v10272_v36 = vld [vmem:[#allocation2 + $0xdf0] sm:$0xf0]  ;;  %v13064_v39 = vld [vmem:[#allocation2 + $0xee4] sm:$0xf]  ;;  %v10147_v46 = vor.u32 %v13000_v31, %v10144_v32 }
 0x104   :  { %v10400_v41 = vld [vmem:[#allocation2 + $0xef0] sm:$0xf0]  ;;  %3599 = vmatpush.bf16.msra.mxu1 %v9667_v10  ;;  %v13096_v44 = vld [vmem:[#allocation2 + $0xfe4] sm:$0xf]  ;;  %v10275_v47 = vor.u32 %v13032_v33, %v10272_v36 }
 0x105   :  { %3612 = vmatpush.bf16.msra.mxu2 %v9795_v11  ;;  %v10528_v45 = vld [vmem:[#allocation2 + $0xff0] sm:$0xf0]  ;;  %v10403_v48 = vor.u32 %v13064_v39, %v10400_v41  ;;  %v12996_v49 = vld [vmem:[#allocation2 + $0xcc4] sm:$0xf] }
 0x106   :  { %3625 = vmatpush.bf16.msra.mxu3 %v9923_v21  ;;  %v10128_v50 = vld [vmem:[#allocation2 + $0xcd0] sm:$0xf0]  ;;  %v13028_v51 = vld [vmem:[#allocation2 + $0xdc4] sm:$0xf]  ;;  %v10531_v52 = vor.u32 %v13096_v44, %v10528_v45 }
 0x107   :  { %3587 = vmatpush.bf16.msra.mxu0 %v9523_v35  ;;  %v10256_v53 = vld [vmem:[#allocation2 + $0xdd0] sm:$0xf0]  ;;  %v13060_v55 = vld [vmem:[#allocation2 + $0xec4] sm:$0xf]  ;;  %v10131_v59 = vor.u32 %v12996_v49, %v10128_v50  ;;  %v3394_v36 = vpop.f32.mrf.mxu1 }
 0x108   :  { %v10384_v56 = vld [vmem:[#allocation2 + $0xed0] sm:$0xf0]  ;;  %3600 = vmatpush.bf16.msra.mxu1 %v9651_v42  ;;  %v13092_v57 = vld [vmem:[#allocation2 + $0xfc4] sm:$0xf]  ;;  %v10259_v60 = vor.u32 %v13028_v51, %v10256_v53 }
 0x109   :  { %3613 = vmatpush.bf16.msra.mxu2 %v9779_v43  ;;  %v10512_v58 = vld [vmem:[#allocation2 + $0xfd0] sm:$0xf0]  ;;  %v10387_v61 = vor.u32 %v13060_v55, %v10384_v56  ;;  %v12992_v63 = vld [vmem:[#allocation2 + $0xca4] sm:$0xf] }
 0x10a   :  { %3626 = vmatpush.bf16.msra.mxu3 %v9907_v62  ;;  %v10112_v0 = vld [vmem:[#allocation2 + $0xcb0] sm:$0xf0]  ;;  %v13024_v1 = vld [vmem:[#allocation2 + $0xda4] sm:$0xf]  ;;  %3588 = vmatmul.bf16.vlgmr.msra.gmra.mxu0 %v14031_v18  ;;  %v10515_v2 = vor.u32 %v13092_v57, %v10512_v58 }
 0x10b   :  { %3632 = vmatpush.bf16.msrb.mxu0 %v10147_v46  ;;  %v10240_v3 = vld [vmem:[#allocation2 + $0xdb0] sm:$0xf0]  ;;  %v13056_v4 = vld [vmem:[#allocation2 + $0xea4] sm:$0xf]  ;;  %3601 = vmatmul.bf16.vlgmr.msra.gmra.mxu1 %v14035_v23  ;;  %v10115_v10 = vor.u32 %v12992_v63, %v10112_v0  ;;  %v3381_v30 = vpop.f32.mrf.mxu0 }
 0x10c   :  { %3645 = vmatpush.bf16.msrb.mxu1 %v10275_v47  ;;  %v10368_v5 = vld [vmem:[#allocation2 + $0xeb0] sm:$0xf0]  ;;  %3614 = vmatmul.bf16.vlgmr.msra.gmra.mxu2 %v14033_v22  ;;  %v13088_v6 = vld [vmem:[#allocation2 + $0xfa4] sm:$0xf]  ;;  %v10243_v11 = vor.u32 %v13024_v1, %v10240_v3  ;;  %v3382_v33 = vadd.f32 %v3381_v30, %v14078_v54 }
 0x10d   :  { %3658 = vmatpush.bf16.msrb.mxu2 %v10403_v48  ;;  %v10496_v7 = vld [vmem:[#allocation2 + $0xfb0] sm:$0xf0]  ;;  %3627 = vmatmul.bf16.vlgmr.msra.gmra.mxu3 %v14037_v27  ;;  %v10371_v12 = vor.u32 %v13056_v4, %v10368_v5  ;;  %v12988_v14 = vld [vmem:[#allocation2 + $0xc84] sm:$0xf] }
 0x10e   :  { %3671 = vmatpush.bf16.msrb.mxu3 %v10531_v52  ;;  %v10096_v16 = vld [vmem:[#allocation2 + $0xc90] sm:$0xf0]  ;;  %v13020_v17 = vld [vmem:[#allocation2 + $0xd84] sm:$0xf]  ;;  %v10499_v21 = vor.u32 %v13088_v6, %v10496_v7  ;;  %v3395_v62 = vadd.f32 %v3394_v36, %v3382_v33 }
 0x10f   :  { %3633 = vmatpush.bf16.msrb.mxu0 %v10131_v59  ;;  %v10224_v24 = vld [vmem:[#allocation2 + $0xd90] sm:$0xf0]  ;;  %v13052_v28 = vld [vmem:[#allocation2 + $0xe84] sm:$0xf]  ;;  %v10099_v35 = vor.u32 %v12988_v14, %v10096_v16  ;;  %v3420_v0 = vpop.f32.mrf.mxu3  ;;  %v3396_v5 = vpop.f32.mrf.mxu1 }
 0x110   :  { %3646 = vmatpush.bf16.msrb.mxu1 %v10259_v60  ;;  %v10352_v29 = vld [vmem:[#allocation2 + $0xe90] sm:$0xf0]  ;;  %v13084_v31 = vld [vmem:[#allocation2 + $0xf84] sm:$0xf]  ;;  %v10227_v39 = vor.u32 %v13020_v17, %v10224_v24  ;;  %v12679_v5 = vld [vmem:[#allocation2 + $0x2d4] sm:$0xf0] }
 0x111   :  { %3659 = vmatpush.bf16.msrb.mxu2 %v10387_v61  ;;  %v10480_v32 = vld [vmem:[#allocation2 + $0xf90] sm:$0xf0]  ;;  %v10355_v41 = vor.u32 %v13052_v28, %v10352_v29  ;;  %v12984_v42 = vld [vmem:[#allocation2 + $0xc64] sm:$0xf]  ;;  %v3407_v58 = vpop.f32.mrf.mxu2 }
 0x112   :  { %3672 = vmatpush.bf16.msrb.mxu3 %v10515_v2  ;;  %v10080_v43 = vld [vmem:[#allocation2 + $0xc70] sm:$0xf0]  ;;  %v13016_v44 = vld [vmem:[#allocation2 + $0xd64] sm:$0xf]  ;;  %v10483_v45 = vor.u32 %v13084_v31, %v10480_v32  ;;  %v3408_v63 = vadd.f32 %v3407_v58, %v3395_v62 }
 0x113   :  { %3634 = vmatpush.bf16.msrb.mxu0 %v10115_v10  ;;  %v10208_v46 = vld [vmem:[#allocation2 + $0xd70] sm:$0xf0]  ;;  %v13048_v47 = vld [vmem:[#allocation2 + $0xe64] sm:$0xf]  ;;  %v10083_v51 = vor.u32 %v12984_v42, %v10080_v43  ;;  %v3383_v3 = vpop.f32.mrf.mxu0 }
 0x114   :  { %3647 = vmatpush.bf16.msrb.mxu1 %v10243_v11  ;;  %v10336_v48 = vld [vmem:[#allocation2 + $0xe70] sm:$0xf0]  ;;  %v13080_v49 = vld [vmem:[#allocation2 + $0xf64] sm:$0xf]  ;;  %v10211_v54 = vor.u32 %v13016_v44, %v10208_v46  ;;  %v14085_v6 = vadd.f32 %v3420_v0, %v3408_v63  ;;  %v8614_v46 = vld [vmem:[#allocation2 + $0xe8] sm:$0xf] }
 0x115   :  { %3660 = vmatpush.bf16.msrb.mxu2 %v10371_v12  ;;  %v10464_v50 = vld [vmem:[#allocation2 + $0xf70] sm:$0xf0]  ;;  %v10339_v52 = vor.u32 %v13048_v47, %v10336_v48  ;;  %v12980_v53 = vld [vmem:[#allocation2 + $0xc44] sm:$0xf]  ;;  %v12619_v47 = vld [vmem:[#allocation2 + $0xf4] sm:$0xf0] }
 0x116   :  { %3673 = vmatpush.bf16.msrb.mxu3 %v10499_v21  ;;  %v10064_v55 = vld [vmem:[#allocation2 + $0xc50] sm:$0xf0]  ;;  %v13012_v56 = vld [vmem:[#allocation2 + $0xd44] sm:$0xf]  ;;  %v10467_v57 = vor.u32 %v13080_v49, %v10464_v50  ;;  %v8742_v48 = vld [vmem:[#allocation2 + $0x1e8] sm:$0xf] }
 0x117   :  { %3635 = vmatpush.bf16.msrb.mxu0 %v10099_v35  ;;  %v10192_v59 = vld [vmem:[#allocation2 + $0xd50] sm:$0xf0]  ;;  %v13044_v60 = vld [vmem:[#allocation2 + $0xe44] sm:$0xf]  ;;  %v10067_v4 = vor.u32 %v12980_v53, %v10064_v55  ;;  %v3422_v49 = vpop.f32.mrf.mxu3  ;;  %v8598_v63 = vld [vmem:[#allocation2 + $0xc8] sm:$0xf] }
 0x118   :  { %3648 = vmatpush.bf16.msrb.mxu1 %v10227_v39  ;;  %v10320_v61 = vld [vmem:[#allocation2 + $0xe50] sm:$0xf0]  ;;  %v13076_v1 = vld [vmem:[#allocation2 + $0xf44] sm:$0xf]  ;;  %v10195_v7 = vor.u32 %v13012_v56, %v10192_v59  ;;  %v8998_v56 = vld [vmem:[#allocation2 + $0x3e8] sm:$0xf]  ;;  %v8615_v59 = vor.u32 %v12619_v47, %v8614_v46 }
 0x119   :  { %3661 = vmatpush.bf16.msrb.mxu2 %v10355_v41  ;;  %v10448_v2 = vld [vmem:[#allocation2 + $0xf50] sm:$0xf0]  ;;  %v10323_v10 = vor.u32 %v13044_v60, %v10320_v61  ;;  %v12976_v11 = vld [vmem:[#allocation2 + $0xc24] sm:$0xf]  ;;  %v3409_v62 = vpop.f32.mrf.mxu2  ;;  %v12615_v0 = vld [vmem:[#allocation2 + $0xd4] sm:$0xf0] }
 0x11a   :  { %3674 = vmatpush.bf16.msrb.mxu3 %v10483_v45  ;;  %v10048_v12 = vld [vmem:[#allocation2 + $0xc30] sm:$0xf0]  ;;  %v13008_v14 = vld [vmem:[#allocation2 + $0xd24] sm:$0xf]  ;;  %v10451_v16 = vor.u32 %v13076_v1, %v10448_v2  ;;  %v8726_v1 = vld [vmem:[#allocation2 + $0x1c8] sm:$0xf] }
 0x11b   :  { %3636 = vmatpush.bf16.msrb.mxu0 %v10083_v51  ;;  %v10176_v17 = vld [vmem:[#allocation2 + $0xd30] sm:$0xf0]  ;;  %v13040_v21 = vld [vmem:[#allocation2 + $0xe24] sm:$0xf]  ;;  %v10051_v30 = vor.u32 %v12976_v11, %v10048_v12  ;;  %v12651_v51 = vld [vmem:[#allocation2 + $0x1f4] sm:$0xf0]  ;;  %v8599_v11 = vor.u32 %v12615_v0, %v8598_v63 }
 0x11c   :  { %3649 = vmatpush.bf16.msrb.mxu1 %v10211_v54  ;;  %v10304_v24 = vld [vmem:[#allocation2 + $0xe30] sm:$0xf0]  ;;  %v13072_v28 = vld [vmem:[#allocation2 + $0xf24] sm:$0xf]  ;;  %v10179_v33 = vor.u32 %v13008_v14, %v10176_v17  ;;  %v8870_v54 = vld [vmem:[#allocation2 + $0x2e8] sm:$0xf]  ;;  %v8743_v60 = vor.u32 %v12651_v51, %v8742_v48 }
 0x11d   :  { %3662 = vmatpush.bf16.msrb.mxu2 %v10339_v52  ;;  %v10432_v29 = vld [vmem:[#allocation2 + $0xf30] sm:$0xf0]  ;;  %v12972_v31 = vld [vmem:[#allocation2 + $0xc04] sm:$0xf]  ;;  %v10307_v35 = vor.u32 %v13040_v21, %v10304_v24  ;;  %v12683_v52 = vld [vmem:[#allocation2 + $0x2f4] sm:$0xf0] }
 0x11e   :  { %3675 = vmatpush.bf16.msrb.mxu3 %v10467_v57  ;;  %v10032_v32 = vld [vmem:[#allocation2 + $0xc10] sm:$0xf0]  ;;  %v13004_v36 = vld [vmem:[#allocation2 + $0xd04] sm:$0xf]  ;;  %v10435_v42 = vor.u32 %v13072_v28, %v10432_v29  ;;  %v12715_v57 = vld [vmem:[#allocation2 + $0x3f4] sm:$0xf0]  ;;  %v8871_v61 = vor.u32 %v12683_v52, %v8870_v54 }
 0x11f   :  { %3637 = vmatpush.bf16.msrb.mxu0 %v10067_v4  ;;  %v10160_v39 = vld [vmem:[#allocation2 + $0xd10] sm:$0xf0]  ;;  %v13036_v41 = vld [vmem:[#allocation2 + $0xe04] sm:$0xf]  ;;  %v10035_v50 = vor.u32 %v12972_v31, %v10032_v32  ;;  %v8999_v2 = vor.u32 %v12715_v57, %v8998_v56  ;;  %v12647_v3 = vld [vmem:[#allocation2 + $0x1d4] sm:$0xf0] }
 0x120   :  { %3650 = vmatpush.bf16.msrb.mxu1 %v10195_v7  ;;  %v10288_v43 = vld [vmem:[#allocation2 + $0xe10] sm:$0xf0]  ;;  %v13068_v44 = vld [vmem:[#allocation2 + $0xf04] sm:$0xf]  ;;  %v10163_v53 = vor.u32 %v13004_v36, %v10160_v39  ;;  %v8854_v4 = vld [vmem:[#allocation2 + $0x2c8] sm:$0xf]  ;;  %v8727_v12 = vor.u32 %v12647_v3, %v8726_v1 }
 0x121   :  { %3663 = vmatpush.bf16.msrb.mxu2 %v10323_v10  ;;  %v10416_v45 = vld [vmem:[#allocation2 + $0xf10] sm:$0xf0]  ;;  %v10291_v55 = vor.u32 %v13036_v41, %v10288_v43  ;;  %v8982_v7 = vld [vmem:[#allocation2 + $0x3c8] sm:$0xf]  ;;  %v12711_v10 = vld [vmem:[#allocation2 + $0x3d4] sm:$0xf0]  ;;  %v8855_v14 = vor.u32 %v12679_v5, %v8854_v4 }
 0x122   :  { %3676 = vmatpush.bf16.msrb.mxu3 %v10451_v16  ;;  %v10419_v58 = vor.u32 %v13068_v44, %v10416_v45  ;;  %v8582_v16 = vld [vmem:[#allocation2 + $0xa8] sm:$0xf]  ;;  %v12611_v17 = vld [vmem:[#allocation2 + $0xb4] sm:$0xf0]  ;;  %v8983_v24 = vor.u32 %v12711_v10, %v8982_v7 }
 0x123   :  { %3638 = vmatpush.bf16.msrb.mxu0 %v10051_v30  ;;  %v8710_v21 = vld [vmem:[#allocation2 + $0x1a8] sm:$0xf]  ;;  %v12643_v28 = vld [vmem:[#allocation2 + $0x1b4] sm:$0xf0] }
 0x124   :  { %3651 = vmatpush.bf16.msrb.mxu1 %v10179_v33  ;;  %v8838_v29 = vld [vmem:[#allocation2 + $0x2a8] sm:$0xf]  ;;  %v12675_v30 = vld [vmem:[#allocation2 + $0x2b4] sm:$0xf0]  ;;  %v8583_v33 = vor.u32 %v12611_v17, %v8582_v16 }
 0x125   :  { %3664 = vmatpush.bf16.msrb.mxu2 %v10307_v35  ;;  %v8966_v31 = vld [vmem:[#allocation2 + $0x3a8] sm:$0xf]  ;;  %v12707_v32 = vld [vmem:[#allocation2 + $0x3b4] sm:$0xf0]  ;;  %v8711_v35 = vor.u32 %v12643_v28, %v8710_v21  ;;  %v8839_v36 = vor.u32 %v12675_v30, %v8838_v29 }
 0x126   :  { %3677 = vmatpush.bf16.msrb.mxu3 %v10435_v42  ;;  %v8566_v39 = vld [vmem:[#allocation2 + $0x88] sm:$0xf]  ;;  %v12607_v41 = vld [vmem:[#allocation2 + $0x94] sm:$0xf0]  ;;  %v8967_v43 = vor.u32 %v12707_v32, %v8966_v31 }
 0x127   :  { %3639 = vmatpush.bf16.msrb.mxu0 %v10035_v50  ;;  %v8694_v42 = vld [vmem:[#allocation2 + $0x188] sm:$0xf]  ;;  %v12639_v44 = vld [vmem:[#allocation2 + $0x194] sm:$0xf0]  ;;  %v8567_v50 = vor.u32 %v12607_v41, %v8566_v39 }
 0x128   :  { %3652 = vmatpush.bf16.msrb.mxu1 %v10163_v53  ;;  %v8822_v45 = vld [vmem:[#allocation2 + $0x288] sm:$0xf]  ;;  %v12671_v62 = vld [vmem:[#allocation2 + $0x294] sm:$0xf0]  ;;  %v3446_v51 = vpop.f32.mrf.mxu1  ;;  %v8695_v54 = vor.u32 %v12639_v44, %v8694_v42 }
 0x129   :  { %3665 = vmatpush.bf16.msrb.mxu2 %v10291_v55  ;;  %v3433_v46 = vpop.f32.mrf.mxu0  ;;  %v8950_v47 = vld [vmem:[#allocation2 + $0x388] sm:$0xf]  ;;  %v12703_v48 = vld [vmem:[#allocation2 + $0x394] sm:$0xf0]  ;;  %v8823_v52 = vor.u32 %v12671_v62, %v8822_v45 }
 0x12a   :  { %3678 = vmatpush.bf16.msrb.mxu3 %v10419_v58  ;;  %3640 = vmatmul.bf16.vlgmr.msrb.gmra.mxu0 %v14055_v13  ;;  %v3434_v49 = vadd.f32 %v3433_v46, %v14085_v6  ;;  %v8550_v53 = vld [vmem:[#allocation2 + $0x68] sm:$0xf]  ;;  %v12603_v55 = vld [vmem:[#allocation2 + $0x74] sm:$0xf0]  ;;  %v8951_v57 = vor.u32 %v12703_v48, %v8950_v47 }
 0x12b   :  { %3684 = vmatpush.bf16.msra.mxu0 %v8615_v59  ;;  %3653 = vmatmul.bf16.vlgmr.msrb.gmra.mxu1 %v14059_v20  ;;  %v8678_v56 = vld [vmem:[#allocation2 + $0x168] sm:$0xf]  ;;  %v12635_v59 = vld [vmem:[#allocation2 + $0x174] sm:$0xf0]  ;;  %v8551_v1 = vor.u32 %v12603_v55, %v8550_v53 }
 0x12c   :  { %3697 = vmatpush.bf16.msra.mxu1 %v8743_v60  ;;  %3666 = vmatmul.bf16.vlgmr.msrb.gmra.mxu2 %v14057_v19  ;;  %v3447_v58 = vadd.f32 %v3446_v51, %v3434_v49  ;;  %v8806_v60 = vld [vmem:[#allocation2 + $0x268] sm:$0xf]  ;;  %v12699_v0 = vld [vmem:[#allocation2 + $0x374] sm:$0xf0]  ;;  %v8679_v6 = vor.u32 %v12635_v59, %v8678_v56 }
 0x12d   :  { %3710 = vmatpush.bf16.msra.mxu2 %v8871_v61  ;;  %3679 = vmatmul.bf16.vlgmr.msrb.gmra.mxu3 %v14061_v26  ;;  %v12667_v61 = vld [vmem:[#allocation2 + $0x274] sm:$0xf0]  ;;  %v8934_v63 = vld [vmem:[#allocation2 + $0x368] sm:$0xf] }
 0x12e   :  { %3723 = vmatpush.bf16.msra.mxu3 %v8999_v2  ;;  %v8807_v2 = vor.u32 %v12667_v61, %v8806_v60  ;;  %v8534_v3 = vld [vmem:[#allocation2 + $0x48] sm:$0xf]  ;;  %v12599_v4 = vld [vmem:[#allocation2 + $0x54] sm:$0xf0]  ;;  %v8935_v7 = vor.u32 %v12699_v0, %v8934_v63 }
 0x12f   :  { %3685 = vmatpush.bf16.msra.mxu0 %v8599_v11  ;;  %v8662_v5 = vld [vmem:[#allocation2 + $0x148] sm:$0xf]  ;;  %v12631_v11 = vld [vmem:[#allocation2 + $0x154] sm:$0xf0]  ;;  %v8535_v29 = vor.u32 %v12599_v4, %v8534_v3 }
 0x130   :  { %3698 = vmatpush.bf16.msra.mxu1 %v8727_v12  ;;  %v8790_v12 = vld [vmem:[#allocation2 + $0x248] sm:$0xf]  ;;  %v3472_v17 = vpop.f32.mrf.mxu3  ;;  %v3448_v30 = vpop.f32.mrf.mxu1  ;;  %v8663_v32 = vor.u32 %v12631_v11, %v8662_v5  ;;  %v12627_v42 = vld [vmem:[#allocation2 + $0x134] sm:$0xf0] }
 0x131   :  { %3711 = vmatpush.bf16.msra.mxu2 %v8855_v14  ;;  %v3459_v10 = vpop.f32.mrf.mxu2  ;;  %v12663_v14 = vld [vmem:[#allocation2 + $0x254] sm:$0xf0]  ;;  %v8918_v21 = vld [vmem:[#allocation2 + $0x348] sm:$0xf]  ;;  %v3435_v28 = vpop.f32.mrf.mxu0 }
 0x132   :  { %3724 = vmatpush.bf16.msra.mxu3 %v8983_v24  ;;  %v3460_v16 = vadd.f32 %v3459_v10, %v3447_v58  ;;  %v12695_v24 = vld [vmem:[#allocation2 + $0x354] sm:$0xf0]  ;;  %v8646_v39 = vld [vmem:[#allocation2 + $0x128] sm:$0xf] }
 0x133   :  { %3686 = vmatpush.bf16.msra.mxu0 %v8583_v33  ;;  %v8791_v33 = vor.u32 %v12663_v14, %v8790_v12  ;;  %v8919_v41 = vor.u32 %v12695_v24, %v8918_v21  ;;  %v12659_v44 = vld [vmem:[#allocation2 + $0x234] sm:$0xf0]  ;;  %v8902_v45 = vld [vmem:[#allocation2 + $0x328] sm:$0xf]  ;;  %v8647_v49 = vor.u32 %v12627_v42, %v8646_v39 }
 0x134   :  { %3699 = vmatpush.bf16.msra.mxu1 %v8711_v35  ;;  %v14092_v31 = vadd.f32 %v3472_v17, %v3460_v16  ;;  %v8518_v35 = vld [vmem:[#allocation2 + $0x28] sm:$0xf]  ;;  %v12691_v62 = vld [vmem:[#allocation2 + $0x334] sm:$0xf0] }
 0x135   :  { %3712 = vmatpush.bf16.msra.mxu2 %v8839_v36  ;;  %v12595_v36 = vld [vmem:[#allocation2 + $0x34] sm:$0xf0]  ;;  %v8502_v47 = vld [vmem:[#allocation2 + $0x8] sm:$0xf]  ;;  %v8903_v53 = vor.u32 %v12691_v62, %v8902_v45 }
 0x136   :  { %3725 = vmatpush.bf16.msra.mxu3 %v8967_v43  ;;  %v8774_v43 = vld [vmem:[#allocation2 + $0x228] sm:$0xf]  ;;  %v8519_v46 = vor.u32 %v12595_v36, %v8518_v35  ;;  %v12591_v48 = vld [vmem:[#allocation2 + $0x14] sm:$0xf0] }
 0x137   :  { %3687 = vmatpush.bf16.msra.mxu0 %v8567_v50  ;;  %v8775_v50 = vor.u32 %v12659_v44, %v8774_v43  ;;  %v8630_v51 = vld [vmem:[#allocation2 + $0x108] sm:$0xf]  ;;  %v12655_v55 = vld [vmem:[#allocation2 + $0x214] sm:$0xf0]  ;;  %v8503_v0 = vor.u32 %v12591_v48, %v8502_v47 }
 0x138   :  { %3700 = vmatpush.bf16.msra.mxu1 %v8695_v54  ;;  %v12623_v54 = vld [vmem:[#allocation2 + $0x114] sm:$0xf0]  ;;  %v8886_v56 = vld [vmem:[#allocation2 + $0x308] sm:$0xf]  ;;  %v3474_v63 = vpop.f32.mrf.mxu3 }
 0x139   :  { %3713 = vmatpush.bf16.msra.mxu2 %v8823_v52  ;;  %v8758_v52 = vld [vmem:[#allocation2 + $0x208] sm:$0xf]  ;;  %v3461_v58 = vpop.f32.mrf.mxu2  ;;  %v12747_v60 = vld [vmem:[#allocation2 + $0x4f4] sm:$0xf0]  ;;  %v8631_v3 = vor.u32 %v12623_v54, %v8630_v51 }
 0x13a   :  { %3726 = vmatpush.bf16.msra.mxu3 %v8951_v57  ;;  %v12687_v57 = vld [vmem:[#allocation2 + $0x314] sm:$0xf0]  ;;  %v9126_v59 = vld [vmem:[#allocation2 + $0x4e8] sm:$0xf]  ;;  %v8759_v4 = vor.u32 %v12655_v55, %v8758_v52 }
 0x13b   :  { %3688 = vmatpush.bf16.msra.mxu0 %v8551_v1  ;;  %v9254_v61 = vld [vmem:[#allocation2 + $0x5e8] sm:$0xf]  ;;  %v12779_v1 = vld [vmem:[#allocation2 + $0x5f4] sm:$0xf0]  ;;  %v8887_v10 = vor.u32 %v12687_v57, %v8886_v56  ;;  %v9127_v11 = vor.u32 %v12747_v60, %v9126_v59 }
 0x13c   :  { %3701 = vmatpush.bf16.msra.mxu1 %v8679_v6  ;;  %v9382_v6 = vld [vmem:[#allocation2 + $0x6e8] sm:$0xf]  ;;  %v9255_v12 = vor.u32 %v12779_v1, %v9254_v61  ;;  %v12743_v17 = vld [vmem:[#allocation2 + $0x4d4] sm:$0xf0] }
 0x13d   :  { %3714 = vmatpush.bf16.msra.mxu2 %v8807_v2  ;;  %v12811_v2 = vld [vmem:[#allocation2 + $0x6f4] sm:$0xf0]  ;;  %v9510_v5 = vld [vmem:[#allocation2 + $0x7e8] sm:$0xf] }
 0x13e   :  { %3727 = vmatpush.bf16.msra.mxu3 %v8935_v7  ;;  %v12843_v7 = vld [vmem:[#allocation2 + $0x7f4] sm:$0xf0]  ;;  %v9383_v14 = vor.u32 %v12811_v2, %v9382_v6  ;;  %v9110_v16 = vld [vmem:[#allocation2 + $0x4c8] sm:$0xf] }
 0x13f   :  { %3689 = vmatpush.bf16.msra.mxu0 %v8535_v29  ;;  %v9238_v21 = vld [vmem:[#allocation2 + $0x5c8] sm:$0xf]  ;;  %v9511_v24 = vor.u32 %v12843_v7, %v9510_v5  ;;  %v12775_v28 = vld [vmem:[#allocation2 + $0x5d4] sm:$0xf0]  ;;  %v9111_v35 = vor.u32 %v12743_v17, %v9110_v16 }
 0x140   :  { %3702 = vmatpush.bf16.msra.mxu1 %v8663_v32  ;;  %v9366_v29 = vld [vmem:[#allocation2 + $0x6c8] sm:$0xf]  ;;  %v12807_v30 = vld [vmem:[#allocation2 + $0x6d4] sm:$0xf0]  ;;  %v9239_v36 = vor.u32 %v12775_v28, %v9238_v21 }
 0x141   :  { %3715 = vmatpush.bf16.msra.mxu2 %v8791_v33  ;;  %v9494_v32 = vld [vmem:[#allocation2 + $0x7c8] sm:$0xf]  ;;  %v12839_v33 = vld [vmem:[#allocation2 + $0x7d4] sm:$0xf0]  ;;  %v9367_v39 = vor.u32 %v12807_v30, %v9366_v29 }
 0x142   :  { %3728 = vmatpush.bf16.msra.mxu3 %v8919_v41  ;;  %v9094_v41 = vld [vmem:[#allocation2 + $0x4a8] sm:$0xf]  ;;  %v12739_v42 = vld [vmem:[#allocation2 + $0x4b4] sm:$0xf0]  ;;  %v9495_v44 = vor.u32 %v12839_v33, %v9494_v32 }
 0x143   :  { %3690 = vmatpush.bf16.msra.mxu0 %v8519_v46  ;;  %v9222_v43 = vld [vmem:[#allocation2 + $0x5a8] sm:$0xf]  ;;  %v12771_v45 = vld [vmem:[#allocation2 + $0x5b4] sm:$0xf0] }
 0x144   :  { %3703 = vmatpush.bf16.msra.mxu1 %v8647_v49  ;;  %v9350_v62 = vld [vmem:[#allocation2 + $0x6a8] sm:$0xf]  ;;  %v12803_v46 = vld [vmem:[#allocation2 + $0x6b4] sm:$0xf0]  ;;  %v9095_v49 = vor.u32 %v12739_v42, %v9094_v41 }
 0x145   :  { %3716 = vmatpush.bf16.msra.mxu2 %v8775_v50  ;;  %v9478_v47 = vld [vmem:[#allocation2 + $0x7a8] sm:$0xf]  ;;  %v12835_v48 = vld [vmem:[#allocation2 + $0x7b4] sm:$0xf0]  ;;  %v9223_v50 = vor.u32 %v12771_v45, %v9222_v43  ;;  %v9351_v51 = vor.u32 %v12803_v46, %v9350_v62 }
 0x146   :  { %3729 = vmatpush.bf16.msra.mxu3 %v8903_v53  ;;  %v9078_v54 = vld [vmem:[#allocation2 + $0x488] sm:$0xf]  ;;  %v12735_v52 = vld [vmem:[#allocation2 + $0x494] sm:$0xf0]  ;;  %v9479_v55 = vor.u32 %v12835_v48, %v9478_v47 }
 0x147   :  { %3691 = vmatpush.bf16.msra.mxu0 %v8503_v0  ;;  %v9206_v53 = vld [vmem:[#allocation2 + $0x588] sm:$0xf]  ;;  %v12767_v56 = vld [vmem:[#allocation2 + $0x594] sm:$0xf0]  ;;  %v9079_v61 = vor.u32 %v12735_v52, %v9078_v54  ;;  %v14098_v63 = vpop.f32.mrf.mxu0 }
 0x148   :  { %3704 = vmatpush.bf16.msra.mxu1 %v8631_v3  ;;  %v9334_v57 = vld [vmem:[#allocation2 + $0x688] sm:$0xf]  ;;  %v12799_v58 = vld [vmem:[#allocation2 + $0x694] sm:$0xf0]  ;;  %v9207_v0 = vor.u32 %v12767_v56, %v9206_v53  ;;  %v13665_v56 = vld [vmem:[#allocation4] sm:$0xf] }
 0x149   :  { %3717 = vmatpush.bf16.msra.mxu2 %v8759_v4  ;;  %v9462_v59 = vld [vmem:[#allocation2 + $0x788] sm:$0xf]  ;;  %v12831_v60 = vld [vmem:[#allocation2 + $0x794] sm:$0xf0]  ;;  %v9335_v1 = vor.u32 %v12799_v58, %v9334_v57  ;;  %v14100_v4 = vpop.f32.mrf.mxu1  ;;  %v701_v57 = vperm.slane %v13665_v56, 1 }
 0x14a   :  { %3730 = vmatpush.bf16.msra.mxu3 %v8887_v10  ;;  %3692 = vmatmul.bf16.vlgmr.msra.gmra.mxu0 %v13979_v9  ;;  %v9062_v6 = vld [vmem:[#allocation2 + $0x468] sm:$0xf]  ;;  %v12731_v2 = vld [vmem:[#allocation2 + $0x474] sm:$0xf0]  ;;  %v9463_v5 = vor.u32 %v12831_v60, %v9462_v59 }
 0x14b   :  { %3736 = vmatpush.bf16.msrb.mxu0 %v9127_v11  ;;  %3705 = vmatmul.bf16.vlgmr.msra.gmra.mxu1 %v13992_v25  ;;  %v9190_v3 = vld [vmem:[#allocation2 + $0x568] sm:$0xf]  ;;  %v12763_v7 = vld [vmem:[#allocation2 + $0x574] sm:$0xf0]  ;;  %v9063_v16 = vor.u32 %v12731_v2, %v9062_v6 }
 0x14c   :  { %3749 = vmatpush.bf16.msrb.mxu1 %v9255_v12  ;;  %3718 = vmatmul.bf16.vlgmr.msra.gmra.mxu2 %v13977_v8  ;;  %v9318_v10 = vld [vmem:[#allocation2 + $0x668] sm:$0xf]  ;;  %v12795_v11 = vld [vmem:[#allocation2 + $0x674] sm:$0xf0]  ;;  %v9191_v17 = vor.u32 %v12763_v7, %v9190_v3 }
 0x14d   :  { %3762 = vmatpush.bf16.msrb.mxu2 %v9383_v14  ;;  %3731 = vmatmul.bf16.vlgmr.msra.gmra.mxu3 %v13984_v15  ;;  %v9446_v12 = vld [vmem:[#allocation2 + $0x768] sm:$0xf]  ;;  %v12827_v14 = vld [vmem:[#allocation2 + $0x774] sm:$0xf0]  ;;  %v9319_v21 = vor.u32 %v12795_v11, %v9318_v10 }
 0x14e   :  { %3775 = vmatpush.bf16.msrb.mxu3 %v9511_v24  ;;  %v9046_v24 = vld [vmem:[#allocation2 + $0x448] sm:$0xf]  ;;  %v12727_v28 = vld [vmem:[#allocation2 + $0x454] sm:$0xf0]  ;;  %v9447_v32 = vor.u32 %v12827_v14, %v9446_v12 }
 0x14f   :  { %3737 = vmatpush.bf16.msrb.mxu0 %v9111_v35  ;;  %v9174_v29 = vld [vmem:[#allocation2 + $0x548] sm:$0xf]  ;;  %v14102_v30 = vpop.f32.mrf.mxu2  ;;  %v12759_v33 = vld [vmem:[#allocation2 + $0x554] sm:$0xf0]  ;;  %v9047_v43 = vor.u32 %v12727_v28, %v9046_v24 }
 0x150   :  { %3750 = vmatpush.bf16.msrb.mxu1 %v9239_v36  ;;  %v9302_v35 = vld [vmem:[#allocation2 + $0x648] sm:$0xf]  ;;  %v12791_v36 = vld [vmem:[#allocation2 + $0x654] sm:$0xf0]  ;;  %v9175_v45 = vor.u32 %v12759_v33, %v9174_v29 }
 0x151   :  { %3763 = vmatpush.bf16.msrb.mxu2 %v9367_v39  ;;  %v14104_v39 = vpop.f32.mrf.mxu3  ;;  %v9430_v41 = vld [vmem:[#allocation2 + $0x748] sm:$0xf]  ;;  %v12823_v42 = vld [vmem:[#allocation2 + $0x754] sm:$0xf0]  ;;  %v9303_v62 = vor.u32 %v12791_v36, %v9302_v35 }
 0x152   :  { %3776 = vmatpush.bf16.msrb.mxu3 %v9495_v44  ;;  %v3487_v44 = vpop.f32.mrf.mxu0  ;;  %v9030_v46 = vld [vmem:[#allocation2 + $0x428] sm:$0xf]  ;;  %v12723_v47 = vld [vmem:[#allocation2 + $0x434] sm:$0xf0] }
 0x153   :  { %3738 = vmatpush.bf16.msrb.mxu0 %v9095_v49  ;;  %v9158_v48 = vld [vmem:[#allocation2 + $0x528] sm:$0xf]  ;;  %v3500_v49 = vpop.f32.mrf.mxu1  ;;  %v12787_v52 = vld [vmem:[#allocation2 + $0x634] sm:$0xf0]  ;;  %v9031_v58 = vor.u32 %v12723_v47, %v9030_v46 }
 0x154   :  { %3751 = vmatpush.bf16.msrb.mxu1 %v9223_v50  ;;  %v9431_v50 = vor.u32 %v12823_v42, %v9430_v41  ;;  %v9286_v54 = vld [vmem:[#allocation2 + $0x628] sm:$0xf]  ;;  %v12719_v60 = vld [vmem:[#allocation2 + $0x414] sm:$0xf0] }
 0x155   :  { %3764 = vmatpush.bf16.msrb.mxu2 %v9351_v51  ;;  %v12755_v51 = vld [vmem:[#allocation2 + $0x534] sm:$0xf0]  ;;  %v9414_v53 = vld [vmem:[#allocation2 + $0x728] sm:$0xf] }
 0x156   :  { %3777 = vmatpush.bf16.msrb.mxu3 %v9479_v55  ;;  %v12819_v55 = vld [vmem:[#allocation2 + $0x734] sm:$0xf0]  ;;  %v9014_v59 = vld [vmem:[#allocation2 + $0x408] sm:$0xf] }
 0x157   :  { %3739 = vmatpush.bf16.msrb.mxu0 %v9079_v61  ;;  %v9159_v61 = vor.u32 %v12755_v51, %v9158_v48  ;;  %v12751_v6 = vld [vmem:[#allocation2 + $0x514] sm:$0xf0]  ;;  %v9270_v2 = vld [vmem:[#allocation2 + $0x608] sm:$0xf]  ;;  %v3513_v3 = vpop.f32.mrf.mxu2  ;;  %v9015_v24 = vor.u32 %v12719_v60, %v9014_v59 }
 0x158   :  { %3752 = vmatpush.bf16.msrb.mxu1 %v9207_v0  ;;  %v9287_v0 = vor.u32 %v12787_v52, %v9286_v54  ;;  %v12783_v7 = vld [vmem:[#allocation2 + $0x614] sm:$0xf0]  ;;  %v9398_v10 = vld [vmem:[#allocation2 + $0x708] sm:$0xf] }
 0x159   :  { %3765 = vmatpush.bf16.msrb.mxu2 %v9335_v1  ;;  %v9142_v1 = vld [vmem:[#allocation2 + $0x508] sm:$0xf]  ;;  %v12815_v11 = vld [vmem:[#allocation2 + $0x714] sm:$0xf0]  ;;  %v3526_v12 = vpop.f32.mrf.mxu3  ;;  %v9271_v35 = vor.u32 %v12783_v7, %v9270_v2 }
 0x15a   :  { %3778 = vmatpush.bf16.msrb.mxu3 %v9463_v5  ;;  %v9415_v5 = vor.u32 %v12819_v55, %v9414_v53  ;;  %v9638_v14 = vld [vmem:[#allocation2 + $0x8e8] sm:$0xf]  ;;  %v12907_v28 = vld [vmem:[#allocation2 + $0x9f4] sm:$0xf0]  ;;  %v9143_v33 = vor.u32 %v12751_v6, %v9142_v1  ;;  %v9399_v42 = vor.u32 %v12815_v11, %v9398_v10 }
 0x15b   :  { %3740 = vmatpush.bf16.msrb.mxu0 %v9063_v16  ;;  %v12875_v16 = vld [vmem:[#allocation2 + $0x8f4] sm:$0xf0]  ;;  %v9894_v29 = vld [vmem:[#allocation2 + $0xae8] sm:$0xf] }
 0x15c   :  { %3753 = vmatpush.bf16.msrb.mxu1 %v9191_v17  ;;  %v9766_v17 = vld [vmem:[#allocation2 + $0x9e8] sm:$0xf]  ;;  %v12971_v41 = vld [vmem:[#allocation2 + $0xbf4] sm:$0xf0] }
 0x15d   :  { %3766 = vmatpush.bf16.msrb.mxu2 %v9319_v21  ;;  %v3486_v21 = vadd.f32 %v14098_v63, %v701_v57  ;;  %v10022_v36 = vld [vmem:[#allocation2 + $0xbe8] sm:$0xf]  ;;  %v9767_v44 = vor.u32 %v12907_v28, %v9766_v17  ;;  %v12871_v46 = vld [vmem:[#allocation2 + $0x8d4] sm:$0xf0] }
 0x15e   :  { %3779 = vmatpush.bf16.msrb.mxu3 %v9447_v32  ;;  %v12939_v32 = vld [vmem:[#allocation2 + $0xaf4] sm:$0xf0]  ;;  %v9750_v47 = vld [vmem:[#allocation2 + $0x9c8] sm:$0xf]  ;;  %v10023_v48 = vor.u32 %v12971_v41, %v10022_v36 }
 0x15f   :  { %3741 = vmatpush.bf16.msrb.mxu0 %v9047_v43  ;;  %v9639_v43 = vor.u32 %v12875_v16, %v9638_v14  ;;  %v3499_v63 = vadd.f32 %v14100_v4, %v3486_v21  ;;  %v12903_v49 = vld [vmem:[#allocation2 + $0x9d4] sm:$0xf0]  ;;  %v10006_v54 = vld [vmem:[#allocation2 + $0xbc8] sm:$0xf] }
 0x160   :  { %3754 = vmatpush.bf16.msrb.mxu1 %v9175_v45  ;;  %v9895_v45 = vor.u32 %v12939_v32, %v9894_v29  ;;  %v12935_v51 = vld [vmem:[#allocation2 + $0xad4] sm:$0xf0]  ;;  %v9751_v55 = vor.u32 %v12903_v49, %v9750_v47  ;;  %v9734_v59 = vld [vmem:[#allocation2 + $0x9a8] sm:$0xf] }
 0x161   :  { %3767 = vmatpush.bf16.msrb.mxu2 %v9303_v62  ;;  %v9622_v62 = vld [vmem:[#allocation2 + $0x8c8] sm:$0xf]  ;;  %v12967_v52 = vld [vmem:[#allocation2 + $0xbd4] sm:$0xf0]  ;;  %v3512_v57 = vadd.f32 %v14102_v30, %v3499_v63 }
 0x162   :  { %3780 = vmatpush.bf16.msrb.mxu3 %v9431_v50  ;;  %v9878_v50 = vld [vmem:[#allocation2 + $0xac8] sm:$0xf]  ;;  %v9623_v53 = vor.u32 %v12871_v46, %v9622_v62  ;;  %v12867_v4 = vld [vmem:[#allocation2 + $0x8b4] sm:$0xf0]  ;;  %v10007_v60 = vor.u32 %v12967_v52, %v10006_v54 }
 0x163   :  { %3742 = vmatpush.bf16.msrb.mxu0 %v9031_v58  ;;  %v9879_v56 = vor.u32 %v12935_v51, %v9878_v50  ;;  %v9606_v58 = vld [vmem:[#allocation2 + $0x8a8] sm:$0xf]  ;;  %v12931_v1 = vld [vmem:[#allocation2 + $0xab4] sm:$0xf0]  ;;  %v3525_v7 = vadd.f32 %v14104_v39, %v3512_v57 }
 0x164   :  { %3755 = vmatpush.bf16.msrb.mxu1 %v9159_v61  ;;  %v12899_v61 = vld [vmem:[#allocation2 + $0x9b4] sm:$0xf0]  ;;  %v9990_v6 = vld [vmem:[#allocation2 + $0xba8] sm:$0xf]  ;;  %v9607_v3 = vor.u32 %v12867_v4, %v9606_v58 }
 0x165   :  { %3768 = vmatpush.bf16.msrb.mxu2 %v9287_v0  ;;  %v9862_v0 = vld [vmem:[#allocation2 + $0xaa8] sm:$0xf]  ;;  %v12963_v2 = vld [vmem:[#allocation2 + $0xbb4] sm:$0xf0]  ;;  %v9735_v30 = vor.u32 %v12899_v61, %v9734_v59 }
 0x166   :  { %3781 = vmatpush.bf16.msrb.mxu3 %v9415_v5  ;;  %v9863_v5 = vor.u32 %v12931_v1, %v9862_v0  ;;  %v9590_v10 = vld [vmem:[#allocation2 + $0x888] sm:$0xf]  ;;  %v12863_v11 = vld [vmem:[#allocation2 + $0x894] sm:$0xf0]  ;;  %v9991_v14 = vor.u32 %v12963_v2, %v9990_v6 }
 0x167   :  { %3743 = vmatpush.bf16.msrb.mxu0 %v9015_v24  ;;  %v9718_v12 = vld [vmem:[#allocation2 + $0x988] sm:$0xf]  ;;  %v12895_v16 = vld [vmem:[#allocation2 + $0x994] sm:$0xf0]  ;;  %v9591_v29 = vor.u32 %v12863_v11, %v9590_v10  ;;  %v3537_v32 = vpop.f32.mrf.mxu0 }
 0x168   :  { %3756 = vmatpush.bf16.msrb.mxu1 %v9143_v33  ;;  %v9846_v17 = vld [vmem:[#allocation2 + $0xa88] sm:$0xf]  ;;  %v12927_v21 = vld [vmem:[#allocation2 + $0xa94] sm:$0xf0]  ;;  %v9719_v33 = vor.u32 %v12895_v16, %v9718_v12 }
 0x169   :  { %3769 = vmatpush.bf16.msrb.mxu2 %v9271_v35  ;;  %v9974_v24 = vld [vmem:[#allocation2 + $0xb88] sm:$0xf]  ;;  %v12959_v28 = vld [vmem:[#allocation2 + $0xb94] sm:$0xf0]  ;;  %v9847_v35 = vor.u32 %v12927_v21, %v9846_v17 }
 0x16a   :  { %3782 = vmatpush.bf16.msrb.mxu3 %v9399_v42  ;;  %3744 = vmatmul.bf16.vlgmr.msrb.gmra.mxu0 %v14009_v37  ;;  %v9574_v36 = vld [vmem:[#allocation2 + $0x868] sm:$0xf]  ;;  %v12859_v41 = vld [vmem:[#allocation2 + $0x874] sm:$0xf0]  ;;  %v3538_v42 = vadd.f32 %v3537_v32, %v3525_v7 }
 0x16b   :  { %3788 = vmatpush.bf16.msra.mxu0 %v9639_v43  ;;  %3757 = vmatmul.bf16.vlgmr.msrb.gmra.mxu1 %v14013_v40  ;;  %v9702_v39 = vld [vmem:[#allocation2 + $0x968] sm:$0xf]  ;;  %v3550_v43 = vpop.f32.mrf.mxu1  ;;  %v12923_v46 = vld [vmem:[#allocation2 + $0xa74] sm:$0xf0]  ;;  %v9575_v49 = vor.u32 %v12859_v41, %v9574_v36 }
 0x16c   :  { %3801 = vmatpush.bf16.msra.mxu1 %v9767_v44  ;;  %3770 = vmatmul.bf16.vlgmr.msrb.gmra.mxu2 %v14007_v34  ;;  %v9975_v44 = vor.u32 %v12959_v28, %v9974_v24  ;;  %v9830_v62 = vld [vmem:[#allocation2 + $0xa68] sm:$0xf]  ;;  %v12955_v63 = vld [vmem:[#allocation2 + $0xb74] sm:$0xf0] }
 0x16d   :  { %3814 = vmatpush.bf16.msra.mxu2 %v9895_v45  ;;  %3783 = vmatmul.bf16.vlgmr.msrb.gmra.mxu3 %v14011_v38  ;;  %v12891_v45 = vld [vmem:[#allocation2 + $0x974] sm:$0xf0]  ;;  %v9958_v47 = vld [vmem:[#allocation2 + $0xb68] sm:$0xf]  ;;  %v9831_v51 = vor.u32 %v12923_v46, %v9830_v62 }
 0x16e   :  { %3827 = vmatpush.bf16.msra.mxu3 %v10023_v48  ;;  %v3551_v48 = vadd.f32 %v3550_v43, %v3538_v42  ;;  %v9703_v50 = vor.u32 %v12891_v45, %v9702_v39  ;;  %v9558_v54 = vld [vmem:[#allocation2 + $0x848] sm:$0xf]  ;;  %v12855_v52 = vld [vmem:[#allocation2 + $0x854] sm:$0xf0] }
 0x16f   :  { %3789 = vmatpush.bf16.msra.mxu0 %v9623_v53  ;;  %v9686_v53 = vld [vmem:[#allocation2 + $0x948] sm:$0xf]  ;;  %v12887_v57 = vld [vmem:[#allocation2 + $0x954] sm:$0xf0]  ;;  %v9559_v1 = vor.u32 %v12855_v52, %v9558_v54  ;;  %v3539_v2 = vpop.f32.mrf.mxu0 }
 0x170   :  { %3802 = vmatpush.bf16.msra.mxu1 %v9751_v55  ;;  %v3563_v55 = vpop.f32.mrf.mxu2  ;;  %v9814_v58 = vld [vmem:[#allocation2 + $0xa48] sm:$0xf]  ;;  %v12919_v4 = vld [vmem:[#allocation2 + $0xa54] sm:$0xf0] }
 0x171   :  { %3815 = vmatpush.bf16.msra.mxu2 %v9879_v56  ;;  %v9959_v56 = vor.u32 %v12955_v63, %v9958_v47  ;;  %v3564_v59 = vadd.f32 %v3563_v55, %v3551_v48  ;;  %v9942_v61 = vld [vmem:[#allocation2 + $0xb48] sm:$0xf]  ;;  %v12951_v0 = vld [vmem:[#allocation2 + $0xb54] sm:$0xf0] }
 0x172   :  { %3828 = vmatpush.bf16.msra.mxu3 %v10007_v60  ;;  %v3576_v60 = vpop.f32.mrf.mxu3  ;;  %v12851_v7 = vld [vmem:[#allocation2 + $0x834] sm:$0xf0]  ;;  %v9670_v10 = vld [vmem:[#allocation2 + $0x928] sm:$0xf]  ;;  %v9943_v12 = vor.u32 %v12951_v0, %v9942_v61 }
 0x173   :  { %3790 = vmatpush.bf16.msra.mxu0 %v9607_v3  ;;  %v14114_v6 = vadd.f32 %v3576_v60, %v3564_v59  ;;  %v9687_v3 = vor.u32 %v12887_v57, %v9686_v53  ;;  %v3552_v11 = vpop.f32.mrf.mxu1  ;;  %v9798_v16 = vld [vmem:[#allocation2 + $0xa28] sm:$0xf]  ;;  %v12915_v17 = vld [vmem:[#allocation2 + $0xa34] sm:$0xf0] }
 0x174   :  { %3803 = vmatpush.bf16.msra.mxu1 %v9735_v30  ;;  %v9815_v30 = vor.u32 %v12919_v4, %v9814_v58  ;;  %v9926_v21 = vld [vmem:[#allocation2 + $0xb28] sm:$0xf]  ;;  %v12947_v24 = vld [vmem:[#allocation2 + $0xb34] sm:$0xf0] }
 0x175   :  { %3816 = vmatpush.bf16.msra.mxu2 %v9863_v5  ;;  %v9542_v5 = vld [vmem:[#allocation2 + $0x828] sm:$0xf]  ;;  %v12847_v32 = vld [vmem:[#allocation2 + $0x814] sm:$0xf0]  ;;  %v9927_v43 = vor.u32 %v12947_v24, %v9926_v21 }
 0x176   :  { %3829 = vmatpush.bf16.msra.mxu3 %v9991_v14  ;;  %v12883_v14 = vld [vmem:[#allocation2 + $0x934] sm:$0xf0]  ;;  %v9543_v28 = vor.u32 %v12851_v7, %v9542_v5  ;;  %v9654_v36 = vld [vmem:[#allocation2 + $0x908] sm:$0xf] }
 0x177   :  { %3791 = vmatpush.bf16.msra.mxu0 %v9591_v29  ;;  %v9526_v29 = vld [vmem:[#allocation2 + $0x808] sm:$0xf]  ;;  %v12879_v41 = vld [vmem:[#allocation2 + $0x914] sm:$0xf0] }
 0x178   :  { %3804 = vmatpush.bf16.msra.mxu1 %v9719_v33  ;;  %v9671_v33 = vor.u32 %v12883_v14, %v9670_v10  ;;  %v9782_v39 = vld [vmem:[#allocation2 + $0xa08] sm:$0xf]  ;;  %v3565_v42 = vpop.f32.mrf.mxu2  ;;  %v12943_v62 = vld [vmem:[#allocation2 + $0xb14] sm:$0xf0]  ;;  %v9655_v52 = vor.u32 %v12879_v41, %v9654_v36 }
 0x179   :  { %3817 = vmatpush.bf16.msra.mxu2 %v9847_v35  ;;  %v9799_v35 = vor.u32 %v12915_v17, %v9798_v16  ;;  %v9910_v45 = vld [vmem:[#allocation2 + $0xb08] sm:$0xf]  ;;  %v13003_v63 = vld [vmem:[#allocation2 + $0xcf4] sm:$0xf0] }
 0x17a   :  { %3830 = vmatpush.bf16.msra.mxu3 %v9975_v44  ;;  %v12911_v44 = vld [vmem:[#allocation2 + $0xa14] sm:$0xf0]  ;;  %v3578_v46 = vpop.f32.mrf.mxu3  ;;  %v10150_v47 = vld [vmem:[#allocation2 + $0xce8] sm:$0xf]  ;;  %v9911_v57 = vor.u32 %v12943_v62, %v9910_v45 }
 0x17b   :  { %3792 = vmatpush.bf16.msra.mxu0 %v9575_v49  ;;  %v10278_v48 = vld [vmem:[#allocation2 + $0xde8] sm:$0xf]  ;;  %v9527_v49 = vor.u32 %v12847_v32, %v9526_v29  ;;  %v13067_v54 = vld [vmem:[#allocation2 + $0xef4] sm:$0xf0]  ;;  %v9783_v53 = vor.u32 %v12911_v44, %v9782_v39  ;;  %v10151_v58 = vor.u32 %v13003_v63, %v10150_v47 }
 0x17c   :  { %3805 = vmatpush.bf16.msra.mxu1 %v9703_v50  ;;  %v13035_v50 = vld [vmem:[#allocation2 + $0xdf4] sm:$0xf0]  ;;  %v10534_v55 = vld [vmem:[#allocation2 + $0xfe8] sm:$0xf] }
 0x17d   :  { %3818 = vmatpush.bf16.msra.mxu2 %v9831_v51  ;;  %v10406_v51 = vld [vmem:[#allocation2 + $0xee8] sm:$0xf]  ;;  %v10279_v4 = vor.u32 %v13035_v50, %v10278_v48  ;;  %v12999_v61 = vld [vmem:[#allocation2 + $0xcd4] sm:$0xf0] }
 0x17e   :  { %3831 = vmatpush.bf16.msra.mxu3 %v9959_v56  ;;  %v13099_v56 = vld [vmem:[#allocation2 + $0xff4] sm:$0xf0]  ;;  %v10407_v59 = vor.u32 %v13067_v54, %v10406_v51  ;;  %v10134_v60 = vld [vmem:[#allocation2 + $0xcc8] sm:$0xf] }
 0x17f   :  { %3793 = vmatpush.bf16.msra.mxu0 %v9559_v1  ;;  %v10262_v0 = vld [vmem:[#allocation2 + $0xdc8] sm:$0xf]  ;;  %v10535_v1 = vor.u32 %v13099_v56, %v10534_v55  ;;  %v13031_v2 = vld [vmem:[#allocation2 + $0xdd4] sm:$0xf0]  ;;  %v10135_v10 = vor.u32 %v12999_v61, %v10134_v60 }
 0x180   :  { %3806 = vmatpush.bf16.msra.mxu1 %v9687_v3  ;;  %v10390_v3 = vld [vmem:[#allocation2 + $0xec8] sm:$0xf]  ;;  %v13095_v7 = vld [vmem:[#allocation2 + $0xfd4] sm:$0xf0]  ;;  %v10263_v11 = vor.u32 %v13031_v2, %v10262_v0 }
 0x181   :  { %3819 = vmatpush.bf16.msra.mxu2 %v9815_v30  ;;  %v13063_v30 = vld [vmem:[#allocation2 + $0xed4] sm:$0xf0]  ;;  %v10518_v5 = vld [vmem:[#allocation2 + $0xfc8] sm:$0xf] }
 0x182   :  { %3832 = vmatpush.bf16.msra.mxu3 %v9943_v12  ;;  %v10391_v12 = vor.u32 %v13063_v30, %v10390_v3  ;;  %v10118_v14 = vld [vmem:[#allocation2 + $0xca8] sm:$0xf]  ;;  %v12995_v16 = vld [vmem:[#allocation2 + $0xcb4] sm:$0xf0]  ;;  %v10519_v21 = vor.u32 %v13095_v7, %v10518_v5 }
 0x183   :  { %3794 = vmatpush.bf16.msra.mxu0 %v9543_v28  ;;  %v10246_v17 = vld [vmem:[#allocation2 + $0xda8] sm:$0xf]  ;;  %v13027_v24 = vld [vmem:[#allocation2 + $0xdb4] sm:$0xf0] }
 0x184   :  { %3807 = vmatpush.bf16.msra.mxu1 %v9671_v33  ;;  %v10374_v28 = vld [vmem:[#allocation2 + $0xea8] sm:$0xf]  ;;  %v13059_v29 = vld [vmem:[#allocation2 + $0xeb4] sm:$0xf0]  ;;  %v10247_v36 = vor.u32 %v13027_v24, %v10246_v17 }
 0x185   :  { %3820 = vmatpush.bf16.msra.mxu2 %v9799_v35  ;;  %v10502_v32 = vld [vmem:[#allocation2 + $0xfa8] sm:$0xf]  ;;  %v13091_v33 = vld [vmem:[#allocation2 + $0xfb4] sm:$0xf0]  ;;  %v10119_v35 = vor.u32 %v12995_v16, %v10118_v14  ;;  %v10375_v41 = vor.u32 %v13059_v29, %v10374_v28 }
 0x186   :  { %3833 = vmatpush.bf16.msra.mxu3 %v9927_v43  ;;  %v10102_v39 = vld [vmem:[#allocation2 + $0xc88] sm:$0xf]  ;;  %v12991_v42 = vld [vmem:[#allocation2 + $0xc94] sm:$0xf0]  ;;  %v10503_v44 = vor.u32 %v13091_v33, %v10502_v32 }
 0x187   :  { %3795 = vmatpush.bf16.msra.mxu0 %v9527_v49  ;;  %v10230_v43 = vld [vmem:[#allocation2 + $0xd88] sm:$0xf]  ;;  %v13023_v45 = vld [vmem:[#allocation2 + $0xd94] sm:$0xf0]  ;;  %v3589_v47 = vpop.f32.mrf.mxu0  ;;  %v10103_v50 = vor.u32 %v12991_v42, %v10102_v39 }
 0x188   :  { %3808 = vmatpush.bf16.msra.mxu1 %v9655_v52  ;;  %v10358_v62 = vld [vmem:[#allocation2 + $0xe88] sm:$0xf]  ;;  %v13055_v46 = vld [vmem:[#allocation2 + $0xe94] sm:$0xf0]  ;;  %v3590_v49 = vadd.f32 %v3589_v47, %v14114_v6  ;;  %v3602_v51 = vpop.f32.mrf.mxu1  ;;  %v10231_v54 = vor.u32 %v13023_v45, %v10230_v43 }
 0x189   :  { %3821 = vmatpush.bf16.msra.mxu2 %v9783_v53  ;;  %v10486_v63 = vld [vmem:[#allocation2 + $0xf88] sm:$0xf]  ;;  %v13087_v48 = vld [vmem:[#allocation2 + $0xf94] sm:$0xf0]  ;;  %v10359_v52 = vor.u32 %v13055_v46, %v10358_v62 }
 0x18a   :  { %3834 = vmatpush.bf16.msra.mxu3 %v9911_v57  ;;  %3796 = vmatmul.bf16.vlgmr.msra.gmra.mxu0 %v14031_v18  ;;  %v10086_v53 = vld [vmem:[#allocation2 + $0xc68] sm:$0xf]  ;;  %v12987_v55 = vld [vmem:[#allocation2 + $0xc74] sm:$0xf0]  ;;  %v10487_v57 = vor.u32 %v13087_v48, %v10486_v63 }
 0x18b   :  { %3840 = vmatpush.bf16.msrb.mxu0 %v10151_v58  ;;  %3809 = vmatmul.bf16.vlgmr.msra.gmra.mxu1 %v14035_v23  ;;  %v10214_v56 = vld [vmem:[#allocation2 + $0xd68] sm:$0xf]  ;;  %v3603_v58 = vadd.f32 %v3602_v51, %v3590_v49  ;;  %v13051_v60 = vld [vmem:[#allocation2 + $0xe74] sm:$0xf0] }
 0x18c   :  { %3853 = vmatpush.bf16.msrb.mxu1 %v10279_v4  ;;  %3822 = vmatmul.bf16.vlgmr.msra.gmra.mxu2 %v14033_v22  ;;  %v13019_v4 = vld [vmem:[#allocation2 + $0xd74] sm:$0xf0]  ;;  %v10470_v61 = vld [vmem:[#allocation2 + $0xf68] sm:$0xf] }
 0x18d   :  { %3866 = vmatpush.bf16.msrb.mxu2 %v10407_v59  ;;  %3835 = vmatmul.bf16.vlgmr.msra.gmra.mxu3 %v14037_v27  ;;  %v10342_v59 = vld [vmem:[#allocation2 + $0xe68] sm:$0xf]  ;;  %v13083_v0 = vld [vmem:[#allocation2 + $0xf74] sm:$0xf0]  ;;  %v10215_v6 = vor.u32 %v13019_v4, %v10214_v56 }
 0x18e   :  { %3879 = vmatpush.bf16.msrb.mxu3 %v10535_v1  ;;  %v10087_v1 = vor.u32 %v12987_v55, %v10086_v53  ;;  %v10343_v2 = vor.u32 %v13051_v60, %v10342_v59  ;;  %v10070_v3 = vld [vmem:[#allocation2 + $0xc48] sm:$0xf]  ;;  %v12983_v30 = vld [vmem:[#allocation2 + $0xc54] sm:$0xf0]  ;;  %v10471_v7 = vor.u32 %v13083_v0, %v10470_v61  ;;  %v12617_v59 = vld [vmem:[#allocation2 + $0xec] sm:$0xf] }
 0x18f   :  { %3841 = vmatpush.bf16.msrb.mxu0 %v10135_v10  ;;  %v10198_v5 = vld [vmem:[#allocation2 + $0xd48] sm:$0xf]  ;;  %v3615_v10 = vpop.f32.mrf.mxu2  ;;  %v13047_v14 = vld [vmem:[#allocation2 + $0xe54] sm:$0xf0]  ;;  %v3591_v28 = vpop.f32.mrf.mxu0  ;;  %v10071_v29 = vor.u32 %v12983_v30, %v10070_v3  ;;  %v8616_v60 = vld [vmem:[#allocation2 + $0xf8] sm:$0xf0] }
 0x190   :  { %3854 = vmatpush.bf16.msrb.mxu1 %v10263_v11  ;;  %v13015_v11 = vld [vmem:[#allocation2 + $0xd54] sm:$0xf0]  ;;  %v3616_v16 = vadd.f32 %v3615_v10, %v3603_v58  ;;  %v3628_v17 = vpop.f32.mrf.mxu3  ;;  %v3604_v32 = vpop.f32.mrf.mxu1  ;;  %v10182_v42 = vld [vmem:[#allocation2 + $0xd28] sm:$0xf]  ;;  %v12649_v61 = vld [vmem:[#allocation2 + $0x1ec] sm:$0xf] }
 0x191   :  { %3867 = vmatpush.bf16.msrb.mxu2 %v10391_v12  ;;  %v10326_v12 = vld [vmem:[#allocation2 + $0xe48] sm:$0xf]  ;;  %v13079_v24 = vld [vmem:[#allocation2 + $0xf54] sm:$0xf0]  ;;  %v8872_v3 = vld [vmem:[#allocation2 + $0x2f8] sm:$0xf0] }
 0x192   :  { %3880 = vmatpush.bf16.msrb.mxu3 %v10519_v21  ;;  %v10454_v21 = vld [vmem:[#allocation2 + $0xf48] sm:$0xf]  ;;  %v14121_v33 = vadd.f32 %v3628_v17, %v3616_v16  ;;  %v12979_v39 = vld [vmem:[#allocation2 + $0xc34] sm:$0xf0]  ;;  %v9000_v10 = vld [vmem:[#allocation2 + $0x3f8] sm:$0xf0] }
 0x193   :  { %3842 = vmatpush.bf16.msrb.mxu0 %v10119_v35  ;;  %v10199_v35 = vor.u32 %v13015_v11, %v10198_v5  ;;  %v10455_v43 = vor.u32 %v13079_v24, %v10454_v21  ;;  %v10310_v45 = vld [vmem:[#allocation2 + $0xe28] sm:$0xf]  ;;  %v13043_v62 = vld [vmem:[#allocation2 + $0xe34] sm:$0xf0]  ;;  %v12613_v17 = vld [vmem:[#allocation2 + $0xcc] sm:$0xf] }
 0x194   :  { %3855 = vmatpush.bf16.msrb.mxu1 %v10247_v36  ;;  %v10327_v36 = vor.u32 %v13047_v14, %v10326_v12  ;;  %v10438_v46 = vld [vmem:[#allocation2 + $0xf28] sm:$0xf]  ;;  %v13075_v47 = vld [vmem:[#allocation2 + $0xf34] sm:$0xf0]  ;;  %v10311_v51 = vor.u32 %v13043_v62, %v10310_v45  ;;  %v8619_v12 = vor.u32 %v12617_v59, %v8616_v60  ;;  %v8600_v21 = vld [vmem:[#allocation2 + $0xd8] sm:$0xf0] }
 0x195   :  { %3868 = vmatpush.bf16.msrb.mxu2 %v10375_v41  ;;  %v10054_v41 = vld [vmem:[#allocation2 + $0xc28] sm:$0xf]  ;;  %v12975_v49 = vld [vmem:[#allocation2 + $0xc14] sm:$0xf0]  ;;  %v10439_v55 = vor.u32 %v13075_v47, %v10438_v46  ;;  %v12645_v24 = vld [vmem:[#allocation2 + $0x1cc] sm:$0xf] }
 0x196   :  { %3881 = vmatpush.bf16.msrb.mxu3 %v10503_v44  ;;  %v13011_v44 = vld [vmem:[#allocation2 + $0xd34] sm:$0xf0]  ;;  %v10055_v63 = vor.u32 %v12979_v39, %v10054_v41  ;;  %v10038_v48 = vld [vmem:[#allocation2 + $0xc08] sm:$0xf]  ;;  %v12677_v32 = vld [vmem:[#allocation2 + $0x2cc] sm:$0xf]  ;;  %v8603_v39 = vor.u32 %v12613_v17, %v8600_v21 }
 0x197   :  { %3843 = vmatpush.bf16.msrb.mxu0 %v10103_v50  ;;  %v10183_v50 = vor.u32 %v13011_v44, %v10182_v42  ;;  %v10294_v53 = vld [vmem:[#allocation2 + $0xe08] sm:$0xf]  ;;  %v13039_v56 = vld [vmem:[#allocation2 + $0xe14] sm:$0xf0]  ;;  %v3617_v4 = vpop.f32.mrf.mxu2  ;;  %v8984_v41 = vld [vmem:[#allocation2 + $0x3d8] sm:$0xf0] }
 0x198   :  { %3856 = vmatpush.bf16.msrb.mxu1 %v10231_v54  ;;  %v10166_v54 = vld [vmem:[#allocation2 + $0xd08] sm:$0xf]  ;;  %v13071_v58 = vld [vmem:[#allocation2 + $0xf14] sm:$0xf0]  ;;  %v3630_v0 = vpop.f32.mrf.mxu3  ;;  %v10295_v5 = vor.u32 %v13039_v56, %v10294_v53  ;;  %v12609_v44 = vld [vmem:[#allocation2 + $0xac] sm:$0xf] }
 0x199   :  { %3869 = vmatpush.bf16.msrb.mxu2 %v10359_v52  ;;  %v13007_v52 = vld [vmem:[#allocation2 + $0xd14] sm:$0xf0]  ;;  %v8584_v45 = vld [vmem:[#allocation2 + $0xb8] sm:$0xf0]  ;;  %v12641_v62 = vld [vmem:[#allocation2 + $0x1ac] sm:$0xf] }
 0x19a   :  { %3882 = vmatpush.bf16.msrb.mxu3 %v10487_v57  ;;  %v10422_v57 = vld [vmem:[#allocation2 + $0xf08] sm:$0xf]  ;;  %v10167_v30 = vor.u32 %v13007_v52, %v10166_v54  ;;  %v8712_v47 = vld [vmem:[#allocation2 + $0x1b8] sm:$0xf0]  ;;  %v12605_v53 = vld [vmem:[#allocation2 + $0x8c] sm:$0xf] }
 0x19b   :  { %3844 = vmatpush.bf16.msrb.mxu0 %v10087_v1  ;;  %v10039_v1 = vor.u32 %v12975_v49, %v10038_v48  ;;  %v10423_v11 = vor.u32 %v13071_v58, %v10422_v57  ;;  %v8840_v48 = vld [vmem:[#allocation2 + $0x2b8] sm:$0xf0]  ;;  %v12705_v49 = vld [vmem:[#allocation2 + $0x3ac] sm:$0xf]  ;;  %v8715_v54 = vor.u32 %v12641_v62, %v8712_v47 }
 0x19c   :  { %3857 = vmatpush.bf16.msrb.mxu1 %v10215_v6  ;;  %v8744_v6 = vld [vmem:[#allocation2 + $0x1f8] sm:$0xf0]  ;;  %v12637_v56 = vld [vmem:[#allocation2 + $0x18c] sm:$0xf] }
 0x19d   :  { %3870 = vmatpush.bf16.msrb.mxu2 %v10343_v2  ;;  %v12681_v2 = vld [vmem:[#allocation2 + $0x2ec] sm:$0xf]  ;;  %v8747_v14 = vor.u32 %v12649_v61, %v8744_v6  ;;  %v8696_v58 = vld [vmem:[#allocation2 + $0x198] sm:$0xf0] }
 0x19e   :  { %3883 = vmatpush.bf16.msrb.mxu3 %v10471_v7  ;;  %v12713_v7 = vld [vmem:[#allocation2 + $0x3ec] sm:$0xf]  ;;  %v8875_v16 = vor.u32 %v12681_v2, %v8872_v3  ;;  %v8824_v59 = vld [vmem:[#allocation2 + $0x298] sm:$0xf0]  ;;  %v8699_v3 = vor.u32 %v12637_v56, %v8696_v58 }
 0x19f   :  { %3845 = vmatpush.bf16.msrb.mxu0 %v10071_v29  ;;  %v9003_v28 = vor.u32 %v12713_v7, %v9000_v10  ;;  %v8728_v29 = vld [vmem:[#allocation2 + $0x1d8] sm:$0xf0]  ;;  %v12669_v4 = vld [vmem:[#allocation2 + $0x28c] sm:$0xf] }
 0x1a0   :  { %3858 = vmatpush.bf16.msrb.mxu1 %v10199_v35  ;;  %v8856_v35 = vld [vmem:[#allocation2 + $0x2d8] sm:$0xf0]  ;;  %v8731_v42 = vor.u32 %v12645_v24, %v8728_v29  ;;  %v12701_v61 = vld [vmem:[#allocation2 + $0x38c] sm:$0xf] }
 0x1a1   :  { %3871 = vmatpush.bf16.msrb.mxu2 %v10327_v36  ;;  %v12709_v36 = vld [vmem:[#allocation2 + $0x3cc] sm:$0xf]  ;;  %v8952_v0 = vld [vmem:[#allocation2 + $0x398] sm:$0xf0] }
 0x1a2   :  { %3884 = vmatpush.bf16.msrb.mxu3 %v10455_v43  ;;  %v8859_v43 = vor.u32 %v12677_v32, %v8856_v35  ;;  %v8987_v46 = vor.u32 %v12709_v36, %v8984_v41  ;;  %v8552_v7 = vld [vmem:[#allocation2 + $0x78] sm:$0xf0]  ;;  %v12633_v10 = vld [vmem:[#allocation2 + $0x16c] sm:$0xf] }
 0x1a3   :  { %3846 = vmatpush.bf16.msrb.mxu0 %v10055_v63  ;;  %v12673_v63 = vld [vmem:[#allocation2 + $0x2ac] sm:$0xf]  ;;  %v8808_v17 = vld [vmem:[#allocation2 + $0x278] sm:$0xf0] }
 0x1a4   :  { %3859 = vmatpush.bf16.msrb.mxu1 %v10183_v50  ;;  %v8968_v50 = vld [vmem:[#allocation2 + $0x3b8] sm:$0xf0]  ;;  %v8843_v52 = vor.u32 %v12673_v63, %v8840_v48  ;;  %v12697_v21 = vld [vmem:[#allocation2 + $0x36c] sm:$0xf] }
 0x1a5   :  { %3872 = vmatpush.bf16.msrb.mxu2 %v10311_v51  ;;  %v8587_v51 = vor.u32 %v12609_v44, %v8584_v45  ;;  %v8971_v57 = vor.u32 %v12705_v49, %v8968_v50  ;;  %v8936_v24 = vld [vmem:[#allocation2 + $0x378] sm:$0xf0]  ;;  %v12597_v32 = vld [vmem:[#allocation2 + $0x4c] sm:$0xf] }
 0x1a6   :  { %3885 = vmatpush.bf16.msrb.mxu3 %v10439_v55  ;;  %v8568_v55 = vld [vmem:[#allocation2 + $0x98] sm:$0xf0]  ;;  %v12629_v36 = vld [vmem:[#allocation2 + $0x14c] sm:$0xf]  ;;  %v8939_v41 = vor.u32 %v12697_v21, %v8936_v24 }
 0x1a7   :  { %3847 = vmatpush.bf16.msrb.mxu0 %v10039_v1  ;;  %v3641_v60 = vpop.f32.mrf.mxu0  ;;  %v8571_v6 = vor.u32 %v12605_v53, %v8568_v55  ;;  %v8536_v35 = vld [vmem:[#allocation2 + $0x58] sm:$0xf0]  ;;  %v12625_v55 = vld [vmem:[#allocation2 + $0x12c] sm:$0xf] }
 0x1a8   :  { %3860 = vmatpush.bf16.msrb.mxu1 %v10167_v30  ;;  %v3642_v1 = vadd.f32 %v3641_v60, %v14121_v33  ;;  %v3654_v2 = vpop.f32.mrf.mxu1  ;;  %v8827_v30 = vor.u32 %v12669_v4, %v8824_v59  ;;  %v8792_v44 = vld [vmem:[#allocation2 + $0x258] sm:$0xf0]  ;;  %v8539_v48 = vor.u32 %v12597_v32, %v8536_v35  ;;  %v12657_v58 = vld [vmem:[#allocation2 + $0x22c] sm:$0xf] }
 0x1a9   :  { %3873 = vmatpush.bf16.msrb.mxu2 %v10295_v5  ;;  %v12601_v5 = vld [vmem:[#allocation2 + $0x6c] sm:$0xf]  ;;  %v8920_v47 = vld [vmem:[#allocation2 + $0x358] sm:$0xf0] }
 0x1aa   :  { %3886 = vmatpush.bf16.msrb.mxu3 %v10423_v11  ;;  %3848 = vmatmul.bf16.vlgmr.msrb.gmra.mxu0 %v14055_v13  ;;  %v8955_v11 = vor.u32 %v12701_v61, %v8952_v0  ;;  %v8520_v53 = vld [vmem:[#allocation2 + $0x38] sm:$0xf0]  ;;  %v12689_v59 = vld [vmem:[#allocation2 + $0x32c] sm:$0xf] }
 0x1ab   :  { %3892 = vmatpush.bf16.msra.mxu0 %v8619_v12  ;;  %3861 = vmatmul.bf16.vlgmr.msrb.gmra.mxu1 %v14059_v20  ;;  %v3655_v12 = vadd.f32 %v3654_v2, %v3642_v1  ;;  %v8776_v4 = vld [vmem:[#allocation2 + $0x238] sm:$0xf0]  ;;  %v12589_v0 = vld [vmem:[#allocation2 + $0xc] sm:$0xf] }
 0x1ac   :  { %3905 = vmatpush.bf16.msra.mxu1 %v8747_v14  ;;  %3874 = vmatmul.bf16.vlgmr.msrb.gmra.mxu2 %v14057_v19  ;;  %v8680_v14 = vld [vmem:[#allocation2 + $0x178] sm:$0xf0]  ;;  %v8779_v2 = vor.u32 %v12657_v58, %v8776_v4  ;;  %v12777_v21 = vld [vmem:[#allocation2 + $0x5ec] sm:$0xf] }
 0x1ad   :  { %3918 = vmatpush.bf16.msra.mxu2 %v8875_v16  ;;  %3887 = vmatmul.bf16.vlgmr.msrb.gmra.mxu3 %v14061_v26  ;;  %v12665_v16 = vld [vmem:[#allocation2 + $0x26c] sm:$0xf]  ;;  %v8683_v33 = vor.u32 %v12633_v10, %v8680_v14  ;;  %v8904_v60 = vld [vmem:[#allocation2 + $0x338] sm:$0xf0] }
 0x1ae   :  { %3931 = vmatpush.bf16.msra.mxu3 %v9003_v28  ;;  %v8555_v28 = vor.u32 %v12601_v5, %v8552_v7  ;;  %v8811_v29 = vor.u32 %v12665_v16, %v8808_v17  ;;  %v8504_v1 = vld [vmem:[#allocation2 + $0x18] sm:$0xf0]  ;;  %v12653_v5 = vld [vmem:[#allocation2 + $0x20c] sm:$0xf]  ;;  %v8907_v7 = vor.u32 %v12689_v59, %v8904_v60 }
 0x1af   :  { %3893 = vmatpush.bf16.msra.mxu0 %v8603_v39  ;;  %v3667_v39 = vpop.f32.mrf.mxu2  ;;  %v3643_v63 = vpop.f32.mrf.mxu0  ;;  %v8760_v10 = vld [vmem:[#allocation2 + $0x218] sm:$0xf0]  ;;  %v12745_v16 = vld [vmem:[#allocation2 + $0x4ec] sm:$0xf] }
 0x1b0   :  { %3906 = vmatpush.bf16.msra.mxu1 %v8731_v42  ;;  %v8664_v42 = vld [vmem:[#allocation2 + $0x158] sm:$0xf0]  ;;  %v3668_v45 = vadd.f32 %v3667_v39, %v3655_v12  ;;  %v3680_v62 = vpop.f32.mrf.mxu3  ;;  %v3656_v49 = vpop.f32.mrf.mxu1  ;;  %v12769_v4 = vld [vmem:[#allocation2 + $0x5ac] sm:$0xf] }
 0x1b1   :  { %3919 = vmatpush.bf16.msra.mxu2 %v8859_v43  ;;  %v12661_v43 = vld [vmem:[#allocation2 + $0x24c] sm:$0xf]  ;;  %v8888_v12 = vld [vmem:[#allocation2 + $0x318] sm:$0xf0] }
 0x1b2   :  { %3932 = vmatpush.bf16.msra.mxu3 %v8987_v46  ;;  %v12693_v46 = vld [vmem:[#allocation2 + $0x34c] sm:$0xf]  ;;  %v14128_v50 = vadd.f32 %v3680_v62, %v3668_v45  ;;  %v9128_v17 = vld [vmem:[#allocation2 + $0x4f8] sm:$0xf0] }
 0x1b3   :  { %3894 = vmatpush.bf16.msra.mxu0 %v8587_v51  ;;  %v8667_v51 = vor.u32 %v12629_v36, %v8664_v42  ;;  %v8923_v56 = vor.u32 %v12693_v46, %v8920_v47  ;;  %v9384_v32 = vld [vmem:[#allocation2 + $0x6f8] sm:$0xf0]  ;;  %v8763_v36 = vor.u32 %v12653_v5, %v8760_v10  ;;  %v12741_v62 = vld [vmem:[#allocation2 + $0x4cc] sm:$0xf] }
 0x1b4   :  { %3907 = vmatpush.bf16.msra.mxu1 %v8715_v54  ;;  %v8795_v54 = vor.u32 %v12661_v43, %v8792_v44  ;;  %v9512_v39 = vld [vmem:[#allocation2 + $0x7f8] sm:$0xf0]  ;;  %v9131_v43 = vor.u32 %v12745_v16, %v9128_v17  ;;  %v12773_v47 = vld [vmem:[#allocation2 + $0x5cc] sm:$0xf] }
 0x1b5   :  { %3920 = vmatpush.bf16.msra.mxu2 %v8843_v52  ;;  %v12593_v52 = vld [vmem:[#allocation2 + $0x2c] sm:$0xf]  ;;  %v9112_v46 = vld [vmem:[#allocation2 + $0x4d8] sm:$0xf0] }
 0x1b6   :  { %3933 = vmatpush.bf16.msra.mxu3 %v8971_v57  ;;  %v8648_v57 = vld [vmem:[#allocation2 + $0x138] sm:$0xf0]  ;;  %v8523_v61 = vor.u32 %v12593_v52, %v8520_v53  ;;  %v12805_v49 = vld [vmem:[#allocation2 + $0x6cc] sm:$0xf]  ;;  %v9115_v53 = vor.u32 %v12741_v62, %v9112_v46 }
 0x1b7   :  { %3895 = vmatpush.bf16.msra.mxu0 %v8571_v6  ;;  %v8651_v6 = vor.u32 %v12625_v55, %v8648_v57  ;;  %v3669_v14 = vpop.f32.mrf.mxu2  ;;  %v9496_v52 = vld [vmem:[#allocation2 + $0x7d8] sm:$0xf0]  ;;  %v12737_v57 = vld [vmem:[#allocation2 + $0x4ac] sm:$0xf] }
 0x1b8   :  { %3908 = vmatpush.bf16.msra.mxu1 %v8699_v3  ;;  %v12621_v3 = vld [vmem:[#allocation2 + $0x10c] sm:$0xf]  ;;  %v3682_v24 = vpop.f32.mrf.mxu3  ;;  %v9096_v58 = vld [vmem:[#allocation2 + $0x4b8] sm:$0xf0] }
 0x1b9   :  { %3921 = vmatpush.bf16.msra.mxu2 %v8827_v30  ;;  %v8632_v30 = vld [vmem:[#allocation2 + $0x118] sm:$0xf0]  ;;  %v12765_v10 = vld [vmem:[#allocation2 + $0x58c] sm:$0xf] }
 0x1ba   :  { %3934 = vmatpush.bf16.msra.mxu3 %v8955_v11  ;;  %v12685_v11 = vld [vmem:[#allocation2 + $0x30c] sm:$0xf]  ;;  %v8635_v35 = vor.u32 %v12621_v3, %v8632_v30  ;;  %v9224_v60 = vld [vmem:[#allocation2 + $0x5b8] sm:$0xf0] }
 0x1bb   :  { %3896 = vmatpush.bf16.msra.mxu0 %v8555_v28  ;;  %v8507_v28 = vor.u32 %v12589_v0, %v8504_v1  ;;  %v8891_v42 = vor.u32 %v12685_v11, %v8888_v12  ;;  %v9352_v0 = vld [vmem:[#allocation2 + $0x6b8] sm:$0xf0]  ;;  %v12833_v1 = vld [vmem:[#allocation2 + $0x7ac] sm:$0xf]  ;;  %v9227_v30 = vor.u32 %v12769_v4, %v9224_v60  ;;  %v14134_v11 = vld [vmem:[#allocation4] sm:$0xf] }
 0x1bc   :  { %3909 = vmatpush.bf16.msra.mxu1 %v8683_v33  ;;  %v9256_v33 = vld [vmem:[#allocation2 + $0x5f8] sm:$0xf0]  ;;  %v12733_v3 = vld [vmem:[#allocation2 + $0x48c] sm:$0xf] }
 0x1bd   :  { %3922 = vmatpush.bf16.msra.mxu2 %v8811_v29  ;;  %v12809_v29 = vld [vmem:[#allocation2 + $0x6ec] sm:$0xf]  ;;  %v9259_v44 = vor.u32 %v12777_v21, %v9256_v33  ;;  %v9464_v17 = vld [vmem:[#allocation2 + $0x798] sm:$0xf0] }
 0x1be   :  { %3935 = vmatpush.bf16.msra.mxu3 %v8939_v41  ;;  %v12841_v41 = vld [vmem:[#allocation2 + $0x7ec] sm:$0xf]  ;;  %v9387_v45 = vor.u32 %v12809_v29, %v9384_v32  ;;  %v9064_v29 = vld [vmem:[#allocation2 + $0x478] sm:$0xf0] }
 0x1bf   :  { %3897 = vmatpush.bf16.msra.mxu0 %v8539_v48  ;;  %v9515_v63 = vor.u32 %v12841_v41, %v9512_v39  ;;  %v9240_v48 = vld [vmem:[#allocation2 + $0x5d8] sm:$0xf0]  ;;  %v12797_v14 = vld [vmem:[#allocation2 + $0x68c] sm:$0xf] }
 0x1c0   :  { %3910 = vmatpush.bf16.msra.mxu1 %v8667_v51  ;;  %v9368_v51 = vld [vmem:[#allocation2 + $0x6d8] sm:$0xf0]  ;;  %v9243_v55 = vor.u32 %v12773_v47, %v9240_v48  ;;  %v12829_v16 = vld [vmem:[#allocation2 + $0x78c] sm:$0xf] }
 0x1c1   :  { %3923 = vmatpush.bf16.msra.mxu2 %v8795_v54  ;;  %v12837_v54 = vld [vmem:[#allocation2 + $0x7cc] sm:$0xf]  ;;  %v9467_v41 = vor.u32 %v12829_v16, %v9464_v17  ;;  %v9192_v39 = vld [vmem:[#allocation2 + $0x578] sm:$0xf0] }
 0x1c2   :  { %3936 = vmatpush.bf16.msra.mxu3 %v8923_v56  ;;  %v9371_v56 = vor.u32 %v12805_v49, %v9368_v51  ;;  %v9499_v59 = vor.u32 %v12837_v54, %v9496_v52  ;;  %v12729_v33 = vld [vmem:[#allocation2 + $0x46c] sm:$0xf]  ;;  %v9048_v49 = vld [vmem:[#allocation2 + $0x458] sm:$0xf0] }
 0x1c3   :  { %3898 = vmatpush.bf16.msra.mxu0 %v8523_v61  ;;  %v12801_v61 = vld [vmem:[#allocation2 + $0x6ac] sm:$0xf]  ;;  %v9067_v46 = vor.u32 %v12729_v33, %v9064_v29  ;;  %v9016_v17 = vld [vmem:[#allocation2 + $0x418] sm:$0xf0] }
 0x1c4   :  { %3911 = vmatpush.bf16.msra.mxu1 %v8651_v6  ;;  %v9480_v6 = vld [vmem:[#allocation2 + $0x7b8] sm:$0xf0]  ;;  %v9355_v5 = vor.u32 %v12801_v61, %v9352_v0  ;;  %v12761_v32 = vld [vmem:[#allocation2 + $0x56c] sm:$0xf] }
 0x1c5   :  { %3924 = vmatpush.bf16.msra.mxu2 %v8779_v2  ;;  %v9099_v2 = vor.u32 %v12737_v57, %v9096_v58  ;;  %v9483_v12 = vor.u32 %v12833_v1, %v9480_v6  ;;  %v9195_v47 = vor.u32 %v12761_v32, %v9192_v39  ;;  %v12725_v48 = vld [vmem:[#allocation2 + $0x44c] sm:$0xf] }
 0x1c6   :  { %3937 = vmatpush.bf16.msra.mxu3 %v8907_v7  ;;  %v9080_v7 = vld [vmem:[#allocation2 + $0x498] sm:$0xf0]  ;;  %v12757_v51 = vld [vmem:[#allocation2 + $0x54c] sm:$0xf]  ;;  %v9051_v60 = vor.u32 %v12725_v48, %v9048_v49 }
 0x1c7   :  { %3899 = vmatpush.bf16.msra.mxu0 %v8507_v28  ;;  %v9083_v21 = vor.u32 %v12733_v3, %v9080_v7  ;;  %v12821_v4 = vld [vmem:[#allocation2 + $0x74c] sm:$0xf]  ;;  %v9032_v3 = vld [vmem:[#allocation2 + $0x438] sm:$0xf0] }
 0x1c8   :  { %3912 = vmatpush.bf16.msra.mxu1 %v8635_v35  ;;  %v12717_v16 = vld [vmem:[#allocation2 + $0x40c] sm:$0xf] }
 0x1c9   :  { %3925 = vmatpush.bf16.msra.mxu2 %v8763_v36  ;;  %v3706_v36 = vpop.f32.mrf.mxu1  ;;  %v12781_v33 = vld [vmem:[#allocation2 + $0x60c] sm:$0xf] }
 0x1ca   :  { %3938 = vmatpush.bf16.msra.mxu3 %v8891_v42  ;;  %3900 = vmatmul.bf16.vlgmr.msra.gmra.mxu0 %v13979_v9  ;;  %v9208_v9 = vld [vmem:[#allocation2 + $0x598] sm:$0xf0]  ;;  %v12793_v42 = vld [vmem:[#allocation2 + $0x66c] sm:$0xf] }
 0x1cb   :  { %3944 = vmatpush.bf16.msrb.mxu0 %v9131_v43  ;;  %3913 = vmatmul.bf16.vlgmr.msra.gmra.mxu1 %v13992_v25  ;;  %v3693_v25 = vpop.f32.mrf.mxu0  ;;  %v9211_v24 = vor.u32 %v12765_v10, %v9208_v9  ;;  %v9320_v43 = vld [vmem:[#allocation2 + $0x678] sm:$0xf0]  ;;  %v12817_v9 = vld [vmem:[#allocation2 + $0x72c] sm:$0xf] }
 0x1cc   :  { %3957 = vmatpush.bf16.msrb.mxu1 %v9259_v44  ;;  %3926 = vmatmul.bf16.vlgmr.msra.gmra.mxu2 %v13977_v8  ;;  %v702_v8 = vperm.slane %v14134_v11, 2  ;;  %v12825_v44 = vld [vmem:[#allocation2 + $0x76c] sm:$0xf]  ;;  %v9160_v10 = vld [vmem:[#allocation2 + $0x538] sm:$0xf0] }
 0x1cd   :  { %3970 = vmatpush.bf16.msrb.mxu2 %v9387_v45  ;;  %3939 = vmatmul.bf16.vlgmr.msra.gmra.mxu3 %v13984_v15  ;;  %v9336_v15 = vld [vmem:[#allocation2 + $0x698] sm:$0xf0]  ;;  %v12969_v49 = vld [vmem:[#allocation2 + $0xbec] sm:$0xf] }
 0x1ce   :  { %3983 = vmatpush.bf16.msrb.mxu3 %v9515_v63  ;;  %v9339_v28 = vor.u32 %v12797_v14, %v9336_v15  ;;  %v3694_v35 = vadd.f32 %v3693_v25, %v702_v8  ;;  %v9448_v45 = vld [vmem:[#allocation2 + $0x778] sm:$0xf0]  ;;  %v9323_v63 = vor.u32 %v12793_v42, %v9320_v43  ;;  %v12785_v8 = vld [vmem:[#allocation2 + $0x62c] sm:$0xf] }
 0x1cf   :  { %3945 = vmatpush.bf16.msrb.mxu0 %v9115_v53  ;;  %v3719_v54 = vpop.f32.mrf.mxu2  ;;  %v9451_v52 = vor.u32 %v12825_v44, %v9448_v45  ;;  %v9176_v53 = vld [vmem:[#allocation2 + $0x558] sm:$0xf0]  ;;  %v12873_v42 = vld [vmem:[#allocation2 + $0x8ec] sm:$0xf]  ;;  %v9019_v45 = vor.u32 %v12717_v16, %v9016_v17 }
 0x1d0   :  { %3958 = vmatpush.bf16.msrb.mxu1 %v9243_v55  ;;  %v3707_v62 = vadd.f32 %v3706_v36, %v3694_v35  ;;  %v12789_v55 = vld [vmem:[#allocation2 + $0x64c] sm:$0xf]  ;;  %v3732_v58 = vpop.f32.mrf.mxu3  ;;  %v9179_v1 = vor.u32 %v12757_v51, %v9176_v53  ;;  %v9416_v14 = vld [vmem:[#allocation2 + $0x738] sm:$0xf0] }
 0x1d1   :  { %3971 = vmatpush.bf16.msrb.mxu2 %v9371_v56  ;;  %v9304_v56 = vld [vmem:[#allocation2 + $0x658] sm:$0xf0]  ;;  %v9419_v32 = vor.u32 %v12817_v9, %v9416_v14  ;;  %v12813_v36 = vld [vmem:[#allocation2 + $0x70c] sm:$0xf] }
 0x1d2   :  { %3984 = vmatpush.bf16.msrb.mxu3 %v9499_v59  ;;  %v3720_v57 = vadd.f32 %v3719_v54, %v3707_v62  ;;  %v9432_v59 = vld [vmem:[#allocation2 + $0x758] sm:$0xf0]  ;;  %v9307_v6 = vor.u32 %v12789_v55, %v9304_v56  ;;  %v12905_v44 = vld [vmem:[#allocation2 + $0x9ec] sm:$0xf] }
 0x1d3   :  { %3946 = vmatpush.bf16.msrb.mxu0 %v9099_v2  ;;  %v3695_v0 = vpop.f32.mrf.mxu0  ;;  %v12721_v2 = vld [vmem:[#allocation2 + $0x42c] sm:$0xf]  ;;  %v9435_v7 = vor.u32 %v12821_v4, %v9432_v59  ;;  %v9272_v35 = vld [vmem:[#allocation2 + $0x618] sm:$0xf0] }
 0x1d4   :  { %3959 = vmatpush.bf16.msrb.mxu1 %v9227_v30  ;;  %v14137_v61 = vadd.f32 %v3732_v58, %v3720_v57  ;;  %v12753_v30 = vld [vmem:[#allocation2 + $0x52c] sm:$0xf]  ;;  %v9035_v15 = vor.u32 %v12721_v2, %v9032_v3  ;;  %v9640_v43 = vld [vmem:[#allocation2 + $0x8f8] sm:$0xf0]  ;;  %v9275_v48 = vor.u32 %v12781_v33, %v9272_v35 }
 0x1d5   :  { %3972 = vmatpush.bf16.msrb.mxu2 %v9355_v5  ;;  %v3708_v5 = vpop.f32.mrf.mxu1  ;;  %v9768_v62 = vld [vmem:[#allocation2 + $0x9f8] sm:$0xf0]  ;;  %v12869_v56 = vld [vmem:[#allocation2 + $0x8cc] sm:$0xf] }
 0x1d6   :  { %3985 = vmatpush.bf16.msrb.mxu3 %v9483_v12  ;;  %v9288_v12 = vld [vmem:[#allocation2 + $0x638] sm:$0xf0]  ;;  %v9771_v53 = vor.u32 %v12905_v44, %v9768_v62  ;;  %v12901_v58 = vld [vmem:[#allocation2 + $0x9cc] sm:$0xf] }
 0x1d7   :  { %3947 = vmatpush.bf16.msrb.mxu0 %v9083_v21  ;;  %v9163_v21 = vor.u32 %v12753_v30, %v9160_v10  ;;  %v9291_v25 = vor.u32 %v12785_v8, %v9288_v12  ;;  %v3721_v29 = vpop.f32.mrf.mxu2  ;;  %v10024_v51 = vld [vmem:[#allocation2 + $0xbf8] sm:$0xf0]  ;;  %v12865_v5 = vld [vmem:[#allocation2 + $0x8ac] sm:$0xf] }
 0x1d8   :  { %3960 = vmatpush.bf16.msrb.mxu1 %v9211_v24  ;;  %v12749_v24 = vld [vmem:[#allocation2 + $0x50c] sm:$0xf]  ;;  %v3734_v39 = vpop.f32.mrf.mxu3  ;;  %v9624_v57 = vld [vmem:[#allocation2 + $0x8d8] sm:$0xf0]  ;;  %v10027_v4 = vor.u32 %v12969_v49, %v10024_v51 }
 0x1d9   :  { %3973 = vmatpush.bf16.msrb.mxu2 %v9339_v28  ;;  %v9144_v28 = vld [vmem:[#allocation2 + $0x518] sm:$0xf0]  ;;  %v9627_v2 = vor.u32 %v12869_v56, %v9624_v57  ;;  %v12897_v10 = vld [vmem:[#allocation2 + $0x9ac] sm:$0xf] }
 0x1da   :  { %3986 = vmatpush.bf16.msrb.mxu3 %v9467_v41  ;;  %v9400_v41 = vld [vmem:[#allocation2 + $0x718] sm:$0xf0]  ;;  %v12929_v9 = vld [vmem:[#allocation2 + $0xaac] sm:$0xf] }
 0x1db   :  { %3948 = vmatpush.bf16.msrb.mxu0 %v9067_v46  ;;  %v12937_v46 = vld [vmem:[#allocation2 + $0xaec] sm:$0xf]  ;;  %v9403_v54 = vor.u32 %v12813_v36, %v9400_v41  ;;  %v9752_v59 = vld [vmem:[#allocation2 + $0x9d8] sm:$0xf0] }
 0x1dc   :  { %3961 = vmatpush.bf16.msrb.mxu1 %v9195_v47  ;;  %v9896_v47 = vld [vmem:[#allocation2 + $0xaf8] sm:$0xf0]  ;;  %v9755_v3 = vor.u32 %v12901_v58, %v9752_v59  ;;  %v12957_v36 = vld [vmem:[#allocation2 + $0xb8c] sm:$0xf] }
 0x1dd   :  { %3974 = vmatpush.bf16.msrb.mxu2 %v9323_v63  ;;  %v9147_v63 = vor.u32 %v12749_v24, %v9144_v28  ;;  %v9899_v55 = vor.u32 %v12937_v46, %v9896_v47  ;;  %v9880_v0 = vld [vmem:[#allocation2 + $0xad8] sm:$0xf0]  ;;  %v12861_v24 = vld [vmem:[#allocation2 + $0x88c] sm:$0xf] }
 0x1de   :  { %3987 = vmatpush.bf16.msrb.mxu3 %v9451_v52  ;;  %v9643_v52 = vor.u32 %v12873_v42, %v9640_v43  ;;  %v9736_v12 = vld [vmem:[#allocation2 + $0x9b8] sm:$0xf0]  ;;  %v12857_v42 = vld [vmem:[#allocation2 + $0x86c] sm:$0xf] }
 0x1df   :  { %3949 = vmatpush.bf16.msrb.mxu0 %v9051_v60  ;;  %v12933_v60 = vld [vmem:[#allocation2 + $0xacc] sm:$0xf]  ;;  %v9864_v14 = vld [vmem:[#allocation2 + $0xab8] sm:$0xf0] }
 0x1e0   :  { %3962 = vmatpush.bf16.msrb.mxu1 %v9179_v1  ;;  %v12965_v1 = vld [vmem:[#allocation2 + $0xbcc] sm:$0xf]  ;;  %v9883_v30 = vor.u32 %v12933_v60, %v9880_v0  ;;  %v9992_v16 = vld [vmem:[#allocation2 + $0xbb8] sm:$0xf0] }
 0x1e1   :  { %3975 = vmatpush.bf16.msrb.mxu2 %v9307_v6  ;;  %v10008_v6 = vld [vmem:[#allocation2 + $0xbd8] sm:$0xf0]  ;;  %v12889_v44 = vld [vmem:[#allocation2 + $0x96c] sm:$0xf] }
 0x1e2   :  { %3988 = vmatpush.bf16.msrb.mxu3 %v9435_v7  ;;  %v9608_v7 = vld [vmem:[#allocation2 + $0x8b8] sm:$0xf0]  ;;  %v10011_v8 = vor.u32 %v12965_v1, %v10008_v6  ;;  %v12921_v47 = vld [vmem:[#allocation2 + $0xa6c] sm:$0xf] }
 0x1e3   :  { %3950 = vmatpush.bf16.msrb.mxu0 %v9035_v15  ;;  %v12961_v15 = vld [vmem:[#allocation2 + $0xbac] sm:$0xf]  ;;  %v9611_v17 = vor.u32 %v12865_v5, %v9608_v7  ;;  %v9592_v28 = vld [vmem:[#allocation2 + $0x898] sm:$0xf0] }
 0x1e4   :  { %3963 = vmatpush.bf16.msrb.mxu1 %v9163_v21  ;;  %v9739_v21 = vor.u32 %v12897_v10, %v9736_v12  ;;  %v9995_v33 = vor.u32 %v12961_v15, %v9992_v16  ;;  %v9720_v29 = vld [vmem:[#allocation2 + $0x998] sm:$0xf0]  ;;  %v12885_v56 = vld [vmem:[#allocation2 + $0x94c] sm:$0xf] }
 0x1e5   :  { %3976 = vmatpush.bf16.msrb.mxu2 %v9291_v25  ;;  %v9867_v25 = vor.u32 %v12929_v9, %v9864_v14  ;;  %v9848_v35 = vld [vmem:[#allocation2 + $0xa98] sm:$0xf0]  ;;  %v12917_v59 = vld [vmem:[#allocation2 + $0xa4c] sm:$0xf] }
 0x1e6   :  { %3989 = vmatpush.bf16.msrb.mxu3 %v9419_v32  ;;  %v12925_v32 = vld [vmem:[#allocation2 + $0xa8c] sm:$0xf]  ;;  %v9576_v43 = vld [vmem:[#allocation2 + $0x878] sm:$0xf0] }
 0x1e7   :  { %3951 = vmatpush.bf16.msrb.mxu0 %v9019_v45  ;;  %v14143_v41 = vpop.f32.mrf.mxu0  ;;  %v9851_v39 = vor.u32 %v12925_v32, %v9848_v35  ;;  %v9704_v46 = vld [vmem:[#allocation2 + $0x978] sm:$0xf0]  ;;  %v9579_v51 = vor.u32 %v12857_v42, %v9576_v43  ;;  %v12949_v1 = vld [vmem:[#allocation2 + $0xb4c] sm:$0xf] }
 0x1e8   :  { %3964 = vmatpush.bf16.msrb.mxu1 %v9147_v63  ;;  %v14145_v45 = vpop.f32.mrf.mxu1  ;;  %v9832_v63 = vld [vmem:[#allocation2 + $0xa78] sm:$0xf0]  ;;  %v12849_v7 = vld [vmem:[#allocation2 + $0x82c] sm:$0xf] }
 0x1e9   :  { %3977 = vmatpush.bf16.msrb.mxu2 %v9275_v48  ;;  %v12953_v48 = vld [vmem:[#allocation2 + $0xb6c] sm:$0xf]  ;;  %v9960_v49 = vld [vmem:[#allocation2 + $0xb78] sm:$0xf0] }
 0x1ea   :  { %3990 = vmatpush.bf16.msrb.mxu3 %v9403_v54  ;;  %3952 = vmatmul.bf16.vlgmr.msrb.gmra.mxu0 %v14009_v37  ;;  %v9976_v37 = vld [vmem:[#allocation2 + $0xb98] sm:$0xf0]  ;;  %v9707_v54 = vor.u32 %v12889_v44, %v9704_v46  ;;  %v9963_v58 = vor.u32 %v12953_v48, %v9960_v49  ;;  %v12913_v15 = vld [vmem:[#allocation2 + $0xa2c] sm:$0xf] }
 0x1eb   :  { %3996 = vmatpush.bf16.msra.mxu0 %v9643_v52  ;;  %3965 = vmatmul.bf16.vlgmr.msrb.gmra.mxu1 %v14013_v40  ;;  %v9979_v62 = vor.u32 %v12957_v36, %v9976_v37  ;;  %v9835_v52 = vor.u32 %v12921_v47, %v9832_v63  ;;  %v9816_v60 = vld [vmem:[#allocation2 + $0xa58] sm:$0xf0]  ;;  %v12909_v35 = vld [vmem:[#allocation2 + $0xa0c] sm:$0xf] }
 0x1ec   :  { %4009 = vmatpush.bf16.msra.mxu1 %v9771_v53  ;;  %3978 = vmatmul.bf16.vlgmr.msrb.gmra.mxu2 %v14007_v34  ;;  %v12893_v34 = vld [vmem:[#allocation2 + $0x98c] sm:$0xf]  ;;  %v9944_v6 = vld [vmem:[#allocation2 + $0xb58] sm:$0xf0]  ;;  %v9819_v5 = vor.u32 %v12917_v59, %v9816_v60 }
 0x1ed   :  { %4022 = vmatpush.bf16.msra.mxu2 %v9899_v55  ;;  %3991 = vmatmul.bf16.vlgmr.msrb.gmra.mxu3 %v14011_v38  ;;  %v9595_v38 = vor.u32 %v12861_v24, %v9592_v28  ;;  %v9723_v40 = vor.u32 %v12893_v34, %v9720_v29  ;;  %v12853_v53 = vld [vmem:[#allocation2 + $0x84c] sm:$0xf]  ;;  %v9560_v55 = vld [vmem:[#allocation2 + $0x858] sm:$0xf0]  ;;  %v9947_v9 = vor.u32 %v12949_v1, %v9944_v6 }
 0x1ee   :  { %4035 = vmatpush.bf16.msra.mxu3 %v10027_v4  ;;  %v9688_v4 = vld [vmem:[#allocation2 + $0x958] sm:$0xf0]  ;;  %v12845_v24 = vld [vmem:[#allocation2 + $0x80c] sm:$0xf] }
 0x1ef   :  { %3997 = vmatpush.bf16.msra.mxu0 %v9627_v2  ;;  %v14147_v57 = vpop.f32.mrf.mxu2  ;;  %v9563_v2 = vor.u32 %v12853_v53, %v9560_v55  ;;  %v9544_v10 = vld [vmem:[#allocation2 + $0x838] sm:$0xf0]  ;;  %v12877_v29 = vld [vmem:[#allocation2 + $0x90c] sm:$0xf] }
 0x1f0   :  { %4010 = vmatpush.bf16.msra.mxu1 %v9755_v3  ;;  %v14149_v0 = vpop.f32.mrf.mxu3  ;;  %v3747_v3 = vpop.f32.mrf.mxu0  ;;  %v9672_v14 = vld [vmem:[#allocation2 + $0x938] sm:$0xf0]  ;;  %v13001_v43 = vld [vmem:[#allocation2 + $0xcec] sm:$0xf] }
 0x1f1   :  { %4023 = vmatpush.bf16.msra.mxu2 %v9883_v30  ;;  %v9691_v30 = vor.u32 %v12885_v56, %v9688_v4  ;;  %v3760_v12 = vpop.f32.mrf.mxu1  ;;  %v9800_v16 = vld [vmem:[#allocation2 + $0xa38] sm:$0xf0]  ;;  %v13065_v63 = vld [vmem:[#allocation2 + $0xeec] sm:$0xf] }
 0x1f2   :  { %4036 = vmatpush.bf16.msra.mxu3 %v10011_v8  ;;  %v12881_v8 = vld [vmem:[#allocation2 + $0x92c] sm:$0xf]  ;;  %v9528_v28 = vld [vmem:[#allocation2 + $0x818] sm:$0xf0] }
 0x1f3   :  { %3998 = vmatpush.bf16.msra.mxu0 %v9611_v17  ;;  %v12945_v17 = vld [vmem:[#allocation2 + $0xb2c] sm:$0xf]  ;;  %v9675_v34 = vor.u32 %v12881_v8, %v9672_v14  ;;  %v9656_v32 = vld [vmem:[#allocation2 + $0x918] sm:$0xf0]  ;;  %v9531_v46 = vor.u32 %v12845_v24, %v9528_v28 }
 0x1f4   :  { %4011 = vmatpush.bf16.msra.mxu1 %v9739_v21  ;;  %v9928_v21 = vld [vmem:[#allocation2 + $0xb38] sm:$0xf0]  ;;  %v9659_v49 = vor.u32 %v12877_v29, %v9656_v32  ;;  %v12997_v4 = vld [vmem:[#allocation2 + $0xccc] sm:$0xf] }
 0x1f5   :  { %4024 = vmatpush.bf16.msra.mxu2 %v9867_v25  ;;  %v9547_v25 = vor.u32 %v12849_v7, %v9544_v10  ;;  %v9931_v37 = vor.u32 %v12945_v17, %v9928_v21  ;;  %v10152_v44 = vld [vmem:[#allocation2 + $0xcf8] sm:$0xf0]  ;;  %v13029_v60 = vld [vmem:[#allocation2 + $0xdcc] sm:$0xf] }
 0x1f6   :  { %4037 = vmatpush.bf16.msra.mxu3 %v9995_v33  ;;  %v9803_v33 = vor.u32 %v12913_v15, %v9800_v16  ;;  %v10280_v47 = vld [vmem:[#allocation2 + $0xdf8] sm:$0xf0]  ;;  %v10155_v55 = vor.u32 %v13001_v43, %v10152_v44  ;;  %v12993_v12 = vld [vmem:[#allocation2 + $0xcac] sm:$0xf] }
 0x1f7   :  { %3999 = vmatpush.bf16.msra.mxu0 %v9595_v38  ;;  %v3773_v36 = vpop.f32.mrf.mxu2  ;;  %v9784_v38 = vld [vmem:[#allocation2 + $0xa18] sm:$0xf0]  ;;  %v13025_v14 = vld [vmem:[#allocation2 + $0xdac] sm:$0xf] }
 0x1f8   :  { %4012 = vmatpush.bf16.msra.mxu1 %v9723_v40  ;;  %v12941_v40 = vld [vmem:[#allocation2 + $0xb0c] sm:$0xf]  ;;  %v3786_v42 = vpop.f32.mrf.mxu3  ;;  %v10408_v48 = vld [vmem:[#allocation2 + $0xef8] sm:$0xf0] }
 0x1f9   :  { %4025 = vmatpush.bf16.msra.mxu2 %v9851_v39  ;;  %v9912_v39 = vld [vmem:[#allocation2 + $0xb18] sm:$0xf0]  ;;  %v13057_v17 = vld [vmem:[#allocation2 + $0xeac] sm:$0xf] }
 0x1fa   :  { %4038 = vmatpush.bf16.msra.mxu3 %v9979_v62  ;;  %v13033_v62 = vld [vmem:[#allocation2 + $0xdec] sm:$0xf]  ;;  %v9915_v53 = vor.u32 %v12941_v40, %v9912_v39  ;;  %v10136_v59 = vld [vmem:[#allocation2 + $0xcd8] sm:$0xf0] }
 0x1fb   :  { %4000 = vmatpush.bf16.msra.mxu0 %v9579_v51  ;;  %v9787_v51 = vor.u32 %v12909_v35, %v9784_v38  ;;  %v10283_v56 = vor.u32 %v13033_v62, %v10280_v47  ;;  %v10264_v6 = vld [vmem:[#allocation2 + $0xdd8] sm:$0xf0]  ;;  %v10139_v7 = vor.u32 %v12997_v4, %v10136_v59  ;;  %v12989_v29 = vld [vmem:[#allocation2 + $0xc8c] sm:$0xf] }
 0x1fc   :  { %4013 = vmatpush.bf16.msra.mxu1 %v9707_v54  ;;  %v13097_v54 = vld [vmem:[#allocation2 + $0xfec] sm:$0xf]  ;;  %v10392_v3 = vld [vmem:[#allocation2 + $0xed8] sm:$0xf0]  ;;  %v10267_v10 = vor.u32 %v13029_v60, %v10264_v6 }
 0x1fd   :  { %4026 = vmatpush.bf16.msra.mxu2 %v9835_v52  ;;  %v10536_v52 = vld [vmem:[#allocation2 + $0xff8] sm:$0xf0]  ;;  %v13021_v32 = vld [vmem:[#allocation2 + $0xd8c] sm:$0xf] }
 0x1fe   :  { %4039 = vmatpush.bf16.msra.mxu3 %v9963_v58  ;;  %v10411_v58 = vor.u32 %v13065_v63, %v10408_v48  ;;  %v10539_v1 = vor.u32 %v13097_v54, %v10536_v52  ;;  %v10248_v16 = vld [vmem:[#allocation2 + $0xdb8] sm:$0xf0]  ;;  %v12985_v44 = vld [vmem:[#allocation2 + $0xc6c] sm:$0xf] }
 0x1ff   :  { %4001 = vmatpush.bf16.msra.mxu0 %v9563_v2  ;;  %v13061_v2 = vld [vmem:[#allocation2 + $0xecc] sm:$0xf]  ;;  %v10376_v21 = vld [vmem:[#allocation2 + $0xeb8] sm:$0xf0] }
 0x200   :  { %4014 = vmatpush.bf16.msra.mxu1 %v9691_v30  ;;  %v13093_v30 = vld [vmem:[#allocation2 + $0xfcc] sm:$0xf]  ;;  %v10395_v8 = vor.u32 %v13061_v2, %v10392_v3  ;;  %v10504_v24 = vld [vmem:[#allocation2 + $0xfb8] sm:$0xf0] }
 0x201   :  { %4027 = vmatpush.bf16.msra.mxu2 %v9819_v5  ;;  %v10520_v5 = vld [vmem:[#allocation2 + $0xfd8] sm:$0xf0]  ;;  %v13049_v48 = vld [vmem:[#allocation2 + $0xe6c] sm:$0xf] }
 0x202   :  { %4040 = vmatpush.bf16.msra.mxu3 %v9947_v9  ;;  %v10120_v9 = vld [vmem:[#allocation2 + $0xcb8] sm:$0xf0]  ;;  %v10523_v15 = vor.u32 %v13093_v30, %v10520_v5  ;;  %v13013_v4 = vld [vmem:[#allocation2 + $0xd4c] sm:$0xf] }
 0x203   :  { %4002 = vmatpush.bf16.msra.mxu0 %v9547_v25  ;;  %v13089_v25 = vld [vmem:[#allocation2 + $0xfac] sm:$0xf]  ;;  %v10123_v28 = vor.u32 %v12993_v12, %v10120_v9  ;;  %v10232_v36 = vld [vmem:[#allocation2 + $0xd98] sm:$0xf0] }
 0x204   :  { %4015 = vmatpush.bf16.msra.mxu1 %v9675_v34  ;;  %v10251_v34 = vor.u32 %v13025_v14, %v10248_v16  ;;  %v10507_v35 = vor.u32 %v13089_v25, %v10504_v24  ;;  %v10488_v40 = vld [vmem:[#allocation2 + $0xf98] sm:$0xf0]  ;;  %v10235_v42 = vor.u32 %v13021_v32, %v10232_v36  ;;  %v13045_v6 = vld [vmem:[#allocation2 + $0xe4c] sm:$0xf] }
 0x205   :  { %4028 = vmatpush.bf16.msra.mxu2 %v9803_v33  ;;  %v10379_v33 = vor.u32 %v13057_v17, %v10376_v21  ;;  %v10088_v62 = vld [vmem:[#allocation2 + $0xc78] sm:$0xf0]  ;;  %v13077_v30 = vld [vmem:[#allocation2 + $0xf4c] sm:$0xf] }
 0x206   :  { %4041 = vmatpush.bf16.msra.mxu3 %v9931_v37  ;;  %v13053_v37 = vld [vmem:[#allocation2 + $0xe8c] sm:$0xf]  ;;  %v10216_v63 = vld [vmem:[#allocation2 + $0xd78] sm:$0xf0]  ;;  %v10091_v52 = vor.u32 %v12985_v44, %v10088_v62 }
 0x207   :  { %4003 = vmatpush.bf16.msra.mxu0 %v9531_v46  ;;  %v14155_v38 = vpop.f32.mrf.mxu0  ;;  %v13017_v46 = vld [vmem:[#allocation2 + $0xd6c] sm:$0xf]  ;;  %v10472_v54 = vld [vmem:[#allocation2 + $0xf78] sm:$0xf0] }
 0x208   :  { %4016 = vmatpush.bf16.msra.mxu1 %v9659_v49  ;;  %v14157_v39 = vpop.f32.mrf.mxu1  ;;  %v10344_v49 = vld [vmem:[#allocation2 + $0xe78] sm:$0xf0]  ;;  %v12977_v14 = vld [vmem:[#allocation2 + $0xc2c] sm:$0xf] }
 0x209   :  { %4029 = vmatpush.bf16.msra.mxu2 %v9787_v51  ;;  %v13081_v51 = vld [vmem:[#allocation2 + $0xf6c] sm:$0xf]  ;;  %v10328_v2 = vld [vmem:[#allocation2 + $0xe58] sm:$0xf0] }
 0x20a   :  { %4042 = vmatpush.bf16.msra.mxu3 %v9915_v53  ;;  %4004 = vmatmul.bf16.vlgmr.msra.gmra.mxu0 %v14031_v18  ;;  %v10104_v18 = vld [vmem:[#allocation2 + $0xc98] sm:$0xf0]  ;;  %v10219_v53 = vor.u32 %v13017_v46, %v10216_v63  ;;  %v10475_v59 = vor.u32 %v13081_v51, %v10472_v54  ;;  %v10331_v9 = vor.u32 %v13045_v6, %v10328_v2  ;;  %v13009_v16 = vld [vmem:[#allocation2 + $0xd2c] sm:$0xf] }
 0x20b   :  { %4048 = vmatpush.bf16.msrb.mxu0 %v10155_v55  ;;  %4017 = vmatmul.bf16.vlgmr.msra.gmra.mxu1 %v14035_v23  ;;  %v13085_v23 = vld [vmem:[#allocation2 + $0xf8c] sm:$0xf]  ;;  %v10347_v55 = vor.u32 %v13049_v48, %v10344_v49  ;;  %v10456_v5 = vld [vmem:[#allocation2 + $0xf58] sm:$0xf0] }
 0x20c   :  { %4061 = vmatpush.bf16.msrb.mxu1 %v10283_v56  ;;  %4030 = vmatmul.bf16.vlgmr.msra.gmra.mxu2 %v14033_v22  ;;  %v10360_v22 = vld [vmem:[#allocation2 + $0xe98] sm:$0xf0]  ;;  %v10491_v47 = vor.u32 %v13085_v23, %v10488_v40  ;;  %v12981_v56 = vld [vmem:[#allocation2 + $0xc4c] sm:$0xf]  ;;  %v10459_v17 = vor.u32 %v13077_v30, %v10456_v5  ;;  %v4130_v30 = vld [vmem:[#allocation6 + $0xd0] sm:$0xff] }
 0x20d   :  { %4074 = vmatpush.bf16.msrb.mxu2 %v10411_v58  ;;  %4043 = vmatmul.bf16.vlgmr.msra.gmra.mxu3 %v14037_v27  ;;  %v10107_v27 = vor.u32 %v12989_v29, %v10104_v18  ;;  %v10363_v43 = vor.u32 %v13053_v37, %v10360_v22  ;;  %v10072_v58 = vld [vmem:[#allocation2 + $0xc58] sm:$0xf0]  ;;  %v13041_v25 = vld [vmem:[#allocation2 + $0xe2c] sm:$0xf]  ;;  %v3746_v37 = vadd.f32 %v14143_v41, %v14137_v61 }
 0x20e   :  { %4087 = vmatpush.bf16.msrb.mxu3 %v10539_v1  ;;  %v10200_v1 = vld [vmem:[#allocation2 + $0xd58] sm:$0xf0]  ;;  %v12973_v32 = vld [vmem:[#allocation2 + $0xc0c] sm:$0xf] }
 0x20f   :  { %4049 = vmatpush.bf16.msrb.mxu0 %v10139_v7  ;;  %v14159_v60 = vpop.f32.mrf.mxu2  ;;  %v3799_v7 = vpop.f32.mrf.mxu0  ;;  %v10203_v12 = vor.u32 %v13013_v4, %v10200_v1  ;;  %v10184_v21 = vld [vmem:[#allocation2 + $0xd38] sm:$0xf0]  ;;  %v13005_v36 = vld [vmem:[#allocation2 + $0xd0c] sm:$0xf]  ;;  %v3759_v48 = vadd.f32 %v14145_v45, %v3746_v37  ;;  %v4150_v45 = vld [vmem:[#allocation6 + $0x170] sm:$0xff] }
 0x210   :  { %4062 = vmatpush.bf16.msrb.mxu1 %v10267_v10  ;;  %v14161_v3 = vpop.f32.mrf.mxu3  ;;  %v10075_v10 = vor.u32 %v12981_v56, %v10072_v58  ;;  %v10312_v24 = vld [vmem:[#allocation2 + $0xe38] sm:$0xf0]  ;;  %v10187_v29 = vor.u32 %v13009_v16, %v10184_v21  ;;  %v13037_v40 = vld [vmem:[#allocation2 + $0xe0c] sm:$0xf]  ;;  %v4116_v4 = vld [vmem:[#allocation6 + $0x60] sm:$0xff] }
 0x211   :  { %4075 = vmatpush.bf16.msrb.mxu2 %v10395_v8  ;;  %v3812_v8 = vpop.f32.mrf.mxu1  ;;  %v10315_v18 = vor.u32 %v13041_v25, %v10312_v24  ;;  %v10168_v23 = vld [vmem:[#allocation2 + $0xd18] sm:$0xf0]  ;;  %v3772_v54 = vadd.f32 %v14147_v57, %v3759_v48  ;;  %v4133_v56 = vld [vmem:[#allocation6 + $0xe8] sm:$0xff]  ;;  %v4146_v7 = vld [vmem:[#allocation6 + $0x150] sm:$0xff] }
 0x212   :  { %4088 = vmatpush.bf16.msrb.mxu3 %v10523_v15  ;;  %v10056_v15 = vld [vmem:[#allocation2 + $0xc38] sm:$0xf0]  ;;  %v4149_v57 = vld [vmem:[#allocation6 + $0x168] sm:$0xff]  ;;  %v4108_v37 = vld [vmem:[#allocation6 + $0x20] sm:$0xff] }
 0x213   :  { %4050 = vmatpush.bf16.msrb.mxu0 %v10123_v28  ;;  %v13073_v28 = vld [vmem:[#allocation2 + $0xf2c] sm:$0xf]  ;;  %v10424_v44 = vld [vmem:[#allocation2 + $0xf18] sm:$0xf0]  ;;  %v3785_v58 = vadd.f32 %v14149_v0, %v3772_v54  ;;  %v4114_v0 = vld [vmem:[#allocation6 + $0x50] sm:$0xff] }
 0x214   :  { %4063 = vmatpush.bf16.msrb.mxu1 %v10251_v34  ;;  %v10440_v34 = vld [vmem:[#allocation2 + $0xf38] sm:$0xf0]  ;;  %v4105_v48 = vld [vmem:[#allocation6 + $0x8] sm:$0xff]  ;;  %v4120_v54 = vld [vmem:[#allocation6 + $0x80] sm:$0xff] }
 0x215   :  { %4076 = vmatpush.bf16.msrb.mxu2 %v10379_v33  ;;  %v10059_v33 = vor.u32 %v12977_v14, %v10056_v15  ;;  %v10443_v22 = vor.u32 %v13073_v28, %v10440_v34  ;;  %v4119_v61 = vld [vmem:[#allocation6 + $0x78] sm:$0xff]  ;;  %v3798_v1 = vadd.f32 %v14155_v38, %v3785_v58  ;;  %v4113_v38 = vld [vmem:[#allocation6 + $0x48] sm:$0xff]  ;;  %v4128_v14 = vld [vmem:[#allocation6 + $0xc0] sm:$0xff] }
 0x216   :  { %4089 = vmatpush.bf16.msrb.mxu3 %v10507_v35  ;;  %v10040_v35 = vld [vmem:[#allocation2 + $0xc18] sm:$0xf0]  ;;  %v4144_v15 = vld [vmem:[#allocation6 + $0x140] sm:$0xff]  ;;  %v4110_v34 = vld [vmem:[#allocation6 + $0x30] sm:$0xff] }
 0x217   :  { %4051 = vmatpush.bf16.msrb.mxu0 %v10107_v27  ;;  %v10296_v27 = vld [vmem:[#allocation2 + $0xe18] sm:$0xf0]  ;;  %v10043_v46 = vor.u32 %v12973_v32, %v10040_v35  ;;  %v3811_v5 = vadd.f32 %v14157_v39, %v3798_v1  ;;  %v4109_v32 = vld [vmem:[#allocation6 + $0x28] sm:$0xff] }
 0x218   :  { %4064 = vmatpush.bf16.msrb.mxu1 %v10235_v42  ;;  %v3825_v42 = vpop.f32.mrf.mxu2  ;;  %v3838_v62 = vpop.f32.mrf.mxu3  ;;  %v10299_v63 = vor.u32 %v13037_v40, %v10296_v27  ;;  %v4135_v41 = vld [vmem:[#allocation6 + $0xf8] sm:$0xff]  ;;  %v4125_v35 = vld [vmem:[#allocation6 + $0xa8] sm:$0xff] }
 0x219   :  { %4077 = vmatpush.bf16.msrb.mxu2 %v10363_v43  ;;  %v13069_v43 = vld [vmem:[#allocation2 + $0xf0c] sm:$0xf]  ;;  %v4151_v51 = vld [vmem:[#allocation6 + $0x178] sm:$0xff]  ;;  %v3824_v8 = vadd.f32 %v14159_v60, %v3811_v5 }
 0x21a   :  { %4090 = vmatpush.bf16.msrb.mxu3 %v10491_v47  ;;  %v10171_v47 = vor.u32 %v13005_v36, %v10168_v23  ;;  %v10427_v49 = vor.u32 %v13069_v43, %v10424_v44  ;;  %v4111_v39 = vld [vmem:[#allocation6 + $0x38] sm:$0xff]  ;;  %v4141_v36 = vld [vmem:[#allocation6 + $0x128] sm:$0xff]  ;;  %v4140_v23 = vld [vmem:[#allocation6 + $0x120] sm:$0xff] }
 0x21b   :  { %4052 = vmatpush.bf16.msrb.mxu0 %v10091_v52  ;;  %v4118_v52 = vld [vmem:[#allocation6 + $0x70] sm:$0xff]  ;;  %v3837_v24 = vadd.f32 %v14161_v3, %v3824_v8  ;;  %v4143_v60 = vld [vmem:[#allocation6 + $0x138] sm:$0xff]  ;;  %v4124_v3 = vld [vmem:[#allocation6 + $0xa0] sm:$0xff] }
 0x21c   :  { %4065 = vmatpush.bf16.msrb.mxu1 %v10219_v53  ;;  %v4134_v53 = vld [vmem:[#allocation6 + $0xf0] sm:$0xff]  ;;  %v4107_v27 = vld [vmem:[#allocation6 + $0x18] sm:$0xff]  ;;  %v4165_v8 = vld [vmem:[#allocation6 + $0x1e8] sm:$0xff] }
 0x21d   :  { %4078 = vmatpush.bf16.msrb.mxu2 %v10347_v55  ;;  %v4117_v55 = vld [vmem:[#allocation6 + $0x68] sm:$0xff]  ;;  %v4123_v42 = vld [vmem:[#allocation6 + $0x98] sm:$0xff] }
 0x21e   :  { %4091 = vmatpush.bf16.msrb.mxu3 %v10475_v59  ;;  %v4132_v59 = vld [vmem:[#allocation6 + $0xe0] sm:$0xff]  ;;  %v4139_v62 = vld [vmem:[#allocation6 + $0x118] sm:$0xff] }
 0x21f   :  { %4053 = vmatpush.bf16.msrb.mxu0 %v10075_v10  ;;  %v4129_v10 = vld [vmem:[#allocation6 + $0xc8] sm:$0xff] }
 0x220   :  { %4066 = vmatpush.bf16.msrb.mxu1 %v10203_v12  ;;  %v4145_v12 = vld [vmem:[#allocation6 + $0x148] sm:$0xff] }
 0x221   :  { %4079 = vmatpush.bf16.msrb.mxu2 %v10331_v9  ;;  %v4112_v9 = vld [vmem:[#allocation6 + $0x40] sm:$0xff] }
 0x222   :  { %4092 = vmatpush.bf16.msrb.mxu3 %v10459_v17  ;;  %v4127_v17 = vld [vmem:[#allocation6 + $0xb8] sm:$0xff] }
 0x223   :  { %4054 = vmatpush.bf16.msrb.mxu0 %v10059_v33  ;;  %v4126_v33 = vld [vmem:[#allocation6 + $0xb0] sm:$0xff] }
 0x224   :  { %4067 = vmatpush.bf16.msrb.mxu1 %v10187_v29 }
 0x225   :  { %4080 = vmatpush.bf16.msrb.mxu2 %v10315_v18  ;;  %v4142_v18 = vld [vmem:[#allocation6 + $0x130] sm:$0xff] }
 0x226   :  { %4093 = vmatpush.bf16.msrb.mxu3 %v10443_v22 }
 0x227   :  { %4055 = vmatpush.bf16.msrb.mxu0 %v10043_v46  ;;  %v3849_v6 = vpop.f32.mrf.mxu0  ;;  %v4106_v46 = vld [vmem:[#allocation6 + $0x10] sm:$0xff] }
 0x228   :  { %4068 = vmatpush.bf16.msrb.mxu1 %v10171_v47  ;;  %v3862_v2 = vpop.f32.mrf.mxu1  ;;  %v3850_v29 = vadd.f32 %v3849_v6, %v3837_v24  ;;  %v4122_v47 = vld [vmem:[#allocation6 + $0x90] sm:$0xff] }
 0x229   :  { %4081 = vmatpush.bf16.msrb.mxu2 %v10299_v63  ;;  %v4138_v63 = vld [vmem:[#allocation6 + $0x110] sm:$0xff] }
 0x22a   :  { %4094 = vmatpush.bf16.msrb.mxu3 %v10427_v49  ;;  %4056 = vmatmul.bf16.vlgmr.msrb.gmra.mxu0 %v14055_v13  ;;  %v4148_v13 = vld [vmem:[#allocation6 + $0x160] sm:$0xff]  ;;  %v3863_v22 = vadd.f32 %v3862_v2, %v3850_v29  ;;  %v4121_v49 = vld [vmem:[#allocation6 + $0x88] sm:$0xff]  ;;  %v4158_v24 = vld [vmem:[#allocation6 + $0x1b0] sm:$0xff] }
 0x22b   :  { %4172 = vmatpush.msra.mxu0 %v4119_v61  ;;  %4069 = vmatmul.bf16.vlgmr.msrb.gmra.mxu1 %v14059_v20  ;;  %v4115_v20 = vld [vmem:[#allocation6 + $0x58] sm:$0xff] }
 0x22c   :  { %4192 = vmatpush.msra.mxu1 %v4135_v41  ;;  %4082 = vmatmul.bf16.vlgmr.msrb.gmra.mxu2 %v14057_v19  ;;  %v4131_v19 = vld [vmem:[#allocation6 + $0xd8] sm:$0xff]  ;;  %v4137_v41 = vld [vmem:[#allocation6 + $0x108] sm:$0xff] }
 0x22d   :  { %4212 = vmatpush.msra.mxu2 %v4151_v51  ;;  %4095 = vmatmul.bf16.vlgmr.msrb.gmra.mxu3 %v14061_v26  ;;  %v4147_v26 = vld [vmem:[#allocation6 + $0x158] sm:$0xff]  ;;  %v4104_v51 = vld [vmem:[#allocation6] sm:$0xff] }
 0x22e   :  { %4173 = vmatpush.msra.mxu0 %v4118_v52  ;;  %4193 = vmatpush.msra.mxu1 %v4134_v53  ;;  %v4136_v52 = vld [vmem:[#allocation6 + $0x100] sm:$0xff]  ;;  %v4100_v53 = vmax.f32 %v14092_v31, 0.0  ;;  %v4155_v29 = vld [vmem:[#allocation6 + $0x198] sm:$0xff] }
 0x22f   :  { %4213 = vmatpush.msra.mxu2 %v4150_v45  ;;  %v3875_v16 = vpop.f32.mrf.mxu2  ;;  %v3851_v25 = vpop.f32.mrf.mxu0  ;;  %v4101_v45 = vmax.f32 %v14128_v50, 0.0 }
 0x230   :  { %4174 = vmatpush.msra.mxu0 %v4117_v55  ;;  %4194 = vmatpush.msra.mxu1 %v4133_v56  ;;  %v3888_v21 = vpop.f32.mrf.mxu3  ;;  %v3864_v28 = vpop.f32.mrf.mxu1  ;;  %v3876_v44 = vadd.f32 %v3875_v16, %v3863_v22  ;;  %v703_v56 = vperm.slane %v14134_v11, 3  ;;  %v4162_v16 = vld [vmem:[#allocation6 + $0x1d0] sm:$0xff]  ;;  %v4153_v22 = vld [vmem:[#allocation6 + $0x188] sm:$0xff] }
 0x231   :  { %4214 = vmatpush.msra.mxu2 %v4149_v57  ;;  %v4157_v28 = vld [vmem:[#allocation6 + $0x1a8] sm:$0xff] }
 0x232   :  { %4175 = vmatpush.msra.mxu0 %v4116_v4  ;;  %4195 = vmatpush.msra.mxu1 %v4132_v59  ;;  %v3889_v61 = vadd.f32 %v3888_v21, %v3876_v44  ;;  %v4159_v21 = vld [vmem:[#allocation6 + $0x1b8] sm:$0xff] }
 0x233   :  { %4215 = vmatpush.msra.mxu2 %v4148_v13 }
 0x234   :  { %4176 = vmatpush.msra.mxu0 %v4115_v20  ;;  %4196 = vmatpush.msra.mxu1 %v4131_v19  ;;  %v4102_v55 = vmax.f32 %v3889_v61, 0.0 }
 0x235   :  { %4216 = vmatpush.msra.mxu2 %v4147_v26 }
 0x236   :  { %4177 = vmatpush.msra.mxu0 %v4114_v0  ;;  %4197 = vmatpush.msra.mxu1 %v4130_v30 }
 0x237   :  { %4217 = vmatpush.msra.mxu2 %v4146_v7  ;;  %v3877_v40 = vpop.f32.mrf.mxu2  ;;  %v4167_v7 = vld [vmem:[#allocation6 + $0x1f8] sm:$0xff] }
 0x238   :  { %4178 = vmatpush.msra.mxu0 %v4113_v38  ;;  %4198 = vmatpush.msra.mxu1 %v4129_v10  ;;  %v3890_v43 = vpop.f32.mrf.mxu3  ;;  %v4166_v38 = vld [vmem:[#allocation6 + $0x1f0] sm:$0xff] }
 0x239   :  { %4218 = vmatpush.msra.mxu2 %v4145_v12  ;;  %4232 = vmatpush.msra.mxu3 %v4167_v7  ;;  %v4164_v12 = vld [vmem:[#allocation6 + $0x1e0] sm:$0xff] }
 0x23a   :  { %4179 = vmatpush.msra.mxu0 %v4112_v9  ;;  %4199 = vmatpush.msra.mxu1 %v4128_v14  ;;  %v4163_v14 = vld [vmem:[#allocation6 + $0x1d8] sm:$0xff] }
 0x23b   :  { %4219 = vmatpush.msra.mxu2 %v4144_v15  ;;  %4233 = vmatpush.msra.mxu3 %v4166_v38  ;;  %v4312_v7 = vld [vmem:[#allocation9 + $0x198] sm:$0xff]  ;;  %v4305_v38 = vld [vmem:[#allocation9 + $0x160] sm:$0xff] }
 0x23c   :  { %4180 = vmatpush.msra.mxu0 %v4111_v39  ;;  %4200 = vmatpush.msra.mxu1 %v4127_v17  ;;  %v4161_v39 = vld [vmem:[#allocation6 + $0x1c8] sm:$0xff]  ;;  %v4160_v17 = vld [vmem:[#allocation6 + $0x1c0] sm:$0xff] }
 0x23d   :  { %4220 = vmatpush.msra.mxu2 %v4143_v60  ;;  %4234 = vmatpush.msra.mxu3 %v4165_v8  ;;  %v4308_v8 = vld [vmem:[#allocation9 + $0x178] sm:$0xff] }
 0x23e   :  { %4181 = vmatpush.msra.mxu0 %v4110_v34  ;;  %4201 = vmatpush.msra.mxu1 %v4126_v33  ;;  %v4156_v34 = vld [vmem:[#allocation6 + $0x1a0] sm:$0xff] }
 0x23f   :  { %4221 = vmatpush.msra.mxu2 %v4142_v18  ;;  %4235 = vmatpush.msra.mxu3 %v4164_v12  ;;  %v4301_v12 = vld [vmem:[#allocation9 + $0x140] sm:$0xff] }
 0x240   :  { %4182 = vmatpush.msra.mxu0 %v4109_v32  ;;  %4202 = vmatpush.msra.mxu1 %v4125_v35 }
 0x241   :  { %4222 = vmatpush.msra.mxu2 %v4141_v36  ;;  %4236 = vmatpush.msra.mxu3 %v4163_v14  ;;  %v4154_v36 = vld [vmem:[#allocation6 + $0x190] sm:$0xff] }
 0x242   :  { %4183 = vmatpush.msra.mxu0 %v4108_v37  ;;  %4203 = vmatpush.msra.mxu1 %v4124_v3  ;;  %v4303_v14 = vld [vmem:[#allocation9 + $0x150] sm:$0xff] }
 0x243   :  { %4223 = vmatpush.msra.mxu2 %v4140_v23  ;;  %4237 = vmatpush.msra.mxu3 %v4162_v16  ;;  %v4152_v23 = vld [vmem:[#allocation6 + $0x180] sm:$0xff] }
 0x244   :  { %4184 = vmatpush.msra.mxu0 %v4107_v27  ;;  %4204 = vmatpush.msra.mxu1 %v4123_v42  ;;  %v4297_v16 = vld [vmem:[#allocation9 + $0x120] sm:$0xff] }
 0x245   :  { %4224 = vmatpush.msra.mxu2 %v4139_v62  ;;  %4238 = vmatpush.msra.mxu3 %v4161_v39  ;;  %v4298_v39 = vld [vmem:[#allocation9 + $0x128] sm:$0xff] }
 0x246   :  { %4185 = vmatpush.msra.mxu0 %v4106_v46  ;;  %4205 = vmatpush.msra.mxu1 %v4122_v47 }
 0x247   :  { %4225 = vmatpush.msra.mxu2 %v4138_v63  ;;  %v3901_v58 = vpop.f32.mrf.mxu0  ;;  %4239 = vmatpush.msra.mxu3 %v4160_v17  ;;  %v4299_v17 = vld [vmem:[#allocation9 + $0x130] sm:$0xff] }
 0x248   :  { %4186 = vmatpush.msra.mxu0 %v4105_v48  ;;  %4206 = vmatpush.msra.mxu1 %v4121_v49  ;;  %v3902_v57 = vadd.f32 %v3901_v58, %v703_v56  ;;  %v3914_v4 = vpop.f32.mrf.mxu1 }
 0x249   :  { %4226 = vmatpush.msra.mxu2 %v4137_v41  ;;  %4240 = vmatpush.msra.mxu3 %v4159_v21  ;;  %v4300_v21 = vld [vmem:[#allocation9 + $0x138] sm:$0xff] }
 0x24a   :  { %4187 = vmatpush.msra.mxu0 %v4104_v51  ;;  %4207 = vmatpush.msra.mxu1 %v4120_v54  ;;  %v3915_v59 = vadd.f32 %v3914_v4, %v3902_v57  ;;  %v4321_v57 = vld [vmem:[#allocation9 + $0x1e0] sm:$0xff]  ;;  %v4322_v4 = vld [vmem:[#allocation9 + $0x1e8] sm:$0xff] }
 0x24b   :  { %4227 = vmatpush.msra.mxu2 %v4136_v52  ;;  %4188 = vmatmul.f32.vlgmr.msra.gmra.mxu0 %v4100_v53 }
 0x24c   :  { %4208 = vmatmul.f32.vlgmr.msra.gmra.mxu1 %v4101_v45  ;;  %4228 = vmatmul.f32.vlgmr.msra.gmra.mxu2 %v4102_v55 }
 0x24d   :  { %4241 = vmatpush.msra.mxu3 %v4158_v24  ;;  %4335 = vmatpush.msrb.mxu0 %v4321_v57  ;;  %v4294_v24 = vld [vmem:[#allocation9 + $0x108] sm:$0xff]  ;;  %v4272_v57 = vld [vmem:[#allocation9 + $0x58] sm:$0xff] }
 0x24e   :  { %4355 = vmatpush.msrb.mxu1 %v4322_v4  ;;  %v4265_v4 = vld [vmem:[#allocation9 + $0x20] sm:$0xff] }
 0x24f   :  { %v3927_v1 = vpop.f32.mrf.mxu2  ;;  %v3903_v19 = vpop.f32.mrf.mxu0  ;;  %4242 = vmatpush.msra.mxu3 %v4157_v28  ;;  %v4296_v28 = vld [vmem:[#allocation9 + $0x118] sm:$0xff] }
 0x250   :  { %v3928_v13 = vadd.f32 %v3927_v1, %v3915_v59  ;;  %v3940_v20 = vpop.f32.mrf.mxu3  ;;  %v3916_v6 = vpop.f32.mrf.mxu1  ;;  %v4323_v59 = vld [vmem:[#allocation9 + $0x1f0] sm:$0xff]  ;;  %v4324_v1 = vld [vmem:[#allocation9 + $0x1f8] sm:$0xff] }
 0x251   :  { %4243 = vmatpush.msra.mxu3 %v4156_v34  ;;  %4375 = vmatpush.msrb.mxu2 %v4323_v59  ;;  %v4320_v19 = vld [vmem:[#allocation9 + $0x1d8] sm:$0xff]  ;;  %v4313_v6 = vld [vmem:[#allocation9 + $0x1a0] sm:$0xff]  ;;  %v4266_v59 = vld [vmem:[#allocation9 + $0x28] sm:$0xff] }
 0x252   :  { %v3941_v31 = vadd.f32 %v3940_v20, %v3928_v13  ;;  %v4317_v13 = vld [vmem:[#allocation9 + $0x1c0] sm:$0xff]  ;;  %v4318_v20 = vld [vmem:[#allocation9 + $0x1c8] sm:$0xff]  ;;  %v13628_v34 = vld [vmem:[#allocation7] ss:$0 sm:$0xff] }
 0x253   :  { %4244 = vmatpush.msra.mxu3 %v4155_v29  ;;  %4336 = vmatpush.msrb.mxu0 %v4317_v13  ;;  %v4268_v13 = vld [vmem:[#allocation9 + $0x38] sm:$0xff] }
 0x254   :  { %4356 = vmatpush.msrb.mxu1 %v4318_v20  ;;  %v4261_v20 = vld [vmem:[#allocation9] sm:$0xff] }
 0x255   :  { %4245 = vmatpush.msra.mxu3 %v4154_v36  ;;  %4337 = vmatpush.msrb.mxu0 %v4313_v6  ;;  %v4264_v6 = vld [vmem:[#allocation9 + $0x18] sm:$0xff] }
 0x257   :  { %v3929_v50 = vpop.f32.mrf.mxu2  ;;  %4246 = vmatpush.msra.mxu3 %v4153_v22  ;;  %v4289_v22 = vld [vmem:[#allocation9 + $0xe0] sm:$0xff] }
 0x258   :  { %v3942_v26 = vpop.f32.mrf.mxu3  ;;  %v4314_v50 = vld [vmem:[#allocation9 + $0x1a8] sm:$0xff] }
 0x259   :  { %4247 = vmatpush.msra.mxu3 %v4152_v23  ;;  %v4315_v26 = vld [vmem:[#allocation9 + $0x1b0] sm:$0xff]  ;;  %4357 = vmatpush.msrb.mxu1 %v4314_v50  ;;  %v4290_v23 = vld [vmem:[#allocation9 + $0xe8] sm:$0xff]  ;;  %v10990_v50 = vld [vmem:[#allocation12 + $0x380] sm:$0xf] }
 0x25b   :  { %4395 = vmatpush.msrb.mxu3 %v4324_v1  ;;  %v4267_v1 = vld [vmem:[#allocation9 + $0x30] sm:$0xff] }
 0x25d   :  { %4396 = vmatpush.msrb.mxu3 %v4320_v19  ;;  %v4263_v19 = vld [vmem:[#allocation9 + $0x10] sm:$0xff] }
 0x267   :  { %v3953_v2 = vpop.f32.mrf.mxu0 }
 0x268   :  { %v3966_v0 = vpop.f32.mrf.mxu1  ;;  %v3954_v33 = vadd.f32 %v3953_v2, %v3941_v31  ;;  %v4319_v31 = vld [vmem:[#allocation9 + $0x1d0] sm:$0xff]  ;;  %v4316_v2 = vld [vmem:[#allocation9 + $0x1b8] sm:$0xff] }
 0x269   :  { %4376 = vmatpush.msrb.mxu2 %v4319_v31  ;;  %4397 = vmatpush.msrb.mxu3 %v4316_v2  ;;  %v4262_v31 = vld [vmem:[#allocation9 + $0x8] sm:$0xff]  ;;  %v11502_v2 = vld [vmem:[#allocation12 + $0x780] sm:$0xf] }
 0x26a   :  { %v3967_v3 = vadd.f32 %v3966_v0, %v3954_v33  ;;  %v4309_v0 = vld [vmem:[#allocation9 + $0x180] sm:$0xff] }
 0x26b   :  { %4377 = vmatpush.msrb.mxu2 %v4315_v26  ;;  %4338 = vmatpush.msrb.mxu0 %v4309_v0  ;;  %v13220_v26 = vld [vmem:[#allocation12 + $0x3bc] sm:$0xf0] }
 0x26c   :  { %4398 = vmatpush.msrb.mxu3 %v4312_v7  ;;  %v10991_v0 = vor.u32 %v13220_v26, %v10990_v50  ;;  %v13204_v7 = vld [vmem:[#allocation12 + $0x33c] sm:$0xf0] }
 0x26d   :  { %4339 = vmatpush.msrb.mxu0 %v4305_v38  ;;  %v13268_v50 = vld [vmem:[#allocation12 + $0x53c] sm:$0xf0] }
 0x26e   :  { %4399 = vmatpush.msrb.mxu3 %v4308_v8  ;;  %v12014_v8 = vld [vmem:[#allocation12 + $0xb80] sm:$0xf] }
 0x26f   :  { %v3979_v30 = vpop.f32.mrf.mxu2  ;;  %v3955_v10 = vpop.f32.mrf.mxu0  ;;  %4340 = vmatpush.msrb.mxu0 %v4301_v12 }
 0x270   :  { %v3992_v5 = vpop.f32.mrf.mxu3  ;;  %v3968_v11 = vpop.f32.mrf.mxu1  ;;  %v3980_v40 = vadd.f32 %v3979_v30, %v3967_v3  ;;  %v4310_v30 = vld [vmem:[#allocation9 + $0x188] sm:$0xff] }
 0x271   :  { %v4306_v10 = vld [vmem:[#allocation9 + $0x168] sm:$0xff]  ;;  %4358 = vmatpush.msrb.mxu1 %v4310_v30  ;;  %v4307_v11 = vld [vmem:[#allocation9 + $0x170] sm:$0xff]  ;;  %4341 = vmatpush.msrb.mxu0 %v4297_v16  ;;  %v13348_v30 = vld [vmem:[#allocation12 + $0x7bc] sm:$0xf0] }
 0x272   :  { %v3993_v43 = vadd.f32 %v3992_v5, %v3980_v40  ;;  %v4311_v5 = vld [vmem:[#allocation9 + $0x190] sm:$0xff]  ;;  %v11503_v38 = vor.u32 %v13348_v30, %v11502_v2  ;;  %v11694_v30 = vld [vmem:[#allocation12 + $0x900] sm:$0xf] }
 0x273   :  { %4378 = vmatpush.msrb.mxu2 %v4311_v5  ;;  %4359 = vmatpush.msrb.mxu1 %v4306_v10  ;;  %v4291_v40 = vld [vmem:[#allocation9 + $0xf0] sm:$0xff]  ;;  %v10926_v5 = vld [vmem:[#allocation12 + $0x300] sm:$0xf] }
 0x274   :  { %v11438_v10 = vld [vmem:[#allocation12 + $0x700] sm:$0xf]  ;;  %v10927_v12 = vor.u32 %v13204_v7, %v10926_v5 }
 0x275   :  { %4379 = vmatpush.msrb.mxu2 %v4307_v11  ;;  %v13332_v11 = vld [vmem:[#allocation12 + $0x73c] sm:$0xf0] }
 0x276   :  { %v11439_v16 = vor.u32 %v13332_v11, %v11438_v10  ;;  %v13396_v7 = vld [vmem:[#allocation12 + $0x93c] sm:$0xf0] }
 0x277   :  { %v3981_v9 = vpop.f32.mrf.mxu2  ;;  %4380 = vmatpush.msrb.mxu2 %v4303_v14  ;;  %v12526_v14 = vld [vmem:[#allocation12 + $0xf80] sm:$0xf] }
 0x278   :  { %v3994_v15 = vpop.f32.mrf.mxu3  ;;  %v4302_v9 = vld [vmem:[#allocation9 + $0x148] sm:$0xff]  ;;  %v13524_v10 = vld [vmem:[#allocation12 + $0xd3c] sm:$0xf0] }
 0x279   :  { %v4304_v15 = vld [vmem:[#allocation9 + $0x158] sm:$0xff]  ;;  %4360 = vmatpush.msrb.mxu1 %v4302_v9  ;;  %4381 = vmatpush.msrb.mxu2 %v4299_v17  ;;  %v13476_v9 = vld [vmem:[#allocation12 + $0xbbc] sm:$0xf0] }
 0x27a   :  { %4400 = vmatpush.msrb.mxu3 %v4304_v15  ;;  %v13604_v15 = vld [vmem:[#allocation12 + $0xfbc] sm:$0xf0] }
 0x27b   :  { %4361 = vmatpush.msrb.mxu1 %v4298_v39  ;;  %v12015_v39 = vor.u32 %v13476_v9, %v12014_v8  ;;  %v12527_v17 = vor.u32 %v13604_v15, %v12526_v14  ;;  %v10606_v8 = vld [vmem:[#allocation12 + $0x80] sm:$0xf]  ;;  %v11695_v15 = vor.u32 %v13396_v7, %v11694_v30  ;;  %v13436_v30 = vld [vmem:[#allocation12 + $0xa84] sm:$0xf] }
 0x27c   :  { %4401 = vmatpush.msrb.mxu3 %v4300_v21  ;;  %v10862_v21 = vld [vmem:[#allocation12 + $0x280] sm:$0xf]  ;;  %v13564_v7 = vld [vmem:[#allocation12 + $0xe84] sm:$0xf] }
 0x27d   :  { %4362 = vmatpush.msrb.mxu1 %v4294_v24  ;;  %v11374_v24 = vld [vmem:[#allocation12 + $0x680] sm:$0xf] }
 0x27e   :  { %4402 = vmatpush.msrb.mxu3 %v4296_v28  ;;  %v11950_v28 = vld [vmem:[#allocation12 + $0xb00] sm:$0xf] }
 0x27f   :  { %4363 = vmatpush.msrb.mxu1 %v4290_v23  ;;  %v11886_v23 = vld [vmem:[#allocation12 + $0xa80] sm:$0xf] }
 0x280   :  { %v11118_v9 = vld [vmem:[#allocation12 + $0x480] sm:$0xf] }
 0x281   :  { %v13252_v14 = vld [vmem:[#allocation12 + $0x4bc] sm:$0xf0] }
 0x287   :  { %v4005_v25 = vpop.f32.mrf.mxu0 }
 0x288   :  { %v4018_v60 = vpop.f32.mrf.mxu1  ;;  %v4006_v44 = vadd.f32 %v4005_v25, %v3993_v43  ;;  %v4293_v25 = vld [vmem:[#allocation9 + $0x100] sm:$0xff]  ;;  %v4286_v43 = vld [vmem:[#allocation9 + $0xc8] sm:$0xff] }
 0x289   :  { %4342 = vmatpush.msrb.mxu0 %v4293_v25  ;;  %4364 = vmatpush.msrb.mxu1 %v4286_v43  ;;  %v13188_v25 = vld [vmem:[#allocation12 + $0x2bc] sm:$0xf0] }
 0x28a   :  { %v4019_v62 = vadd.f32 %v4018_v60, %v4006_v44  ;;  %v4295_v60 = vld [vmem:[#allocation9 + $0x110] sm:$0xff]  ;;  %v13300_v43 = vld [vmem:[#allocation12 + $0x63c] sm:$0xf0] }
 0x28b   :  { %4382 = vmatpush.msrb.mxu2 %v4295_v60  ;;  %4343 = vmatpush.msrb.mxu0 %v4289_v22  ;;  %v4287_v44 = vld [vmem:[#allocation9 + $0xd0] sm:$0xff]  ;;  %v13316_v60 = vld [vmem:[#allocation12 + $0x6bc] sm:$0xf0] }
 0x28c   :  { %v11375_v22 = vor.u32 %v13316_v60, %v11374_v24  ;;  %v13508_v24 = vld [vmem:[#allocation12 + $0xcbc] sm:$0xf0]  ;;  %v4255_v60 = vld [vmem:[%s14450_s1] sm:$0xff] }
 0x28d   :  { %4383 = vmatpush.msrb.mxu2 %v4291_v40  ;;  %v13444_v40 = vld [vmem:[#allocation12 + $0xabc] sm:$0xf0] }
 0x28f   :  { %v4031_v18 = vpop.f32.mrf.mxu2  ;;  %v4007_v35 = vpop.f32.mrf.mxu0  ;;  %4384 = vmatpush.msrb.mxu2 %v4287_v44  ;;  %v13572_v44 = vld [vmem:[#allocation12 + $0xebc] sm:$0xf0] }
 0x290   :  { %v4044_v32 = vpop.f32.mrf.mxu3  ;;  %v4020_v37 = vpop.f32.mrf.mxu1  ;;  %v4032_v46 = vadd.f32 %v4031_v18, %v4019_v62  ;;  %v4288_v62 = vld [vmem:[#allocation9 + $0xd8] sm:$0xff] }
 0x292   :  { %v4045_v47 = vadd.f32 %v4044_v32, %v4032_v46  ;;  %v4281_v46 = vld [vmem:[#allocation9 + $0xa0] sm:$0xff] }
 0x297   :  { %v4033_v27 = vpop.f32.mrf.mxu2 }
 0x298   :  { %v4046_v42 = vpop.f32.mrf.mxu3  ;;  %v4292_v27 = vld [vmem:[#allocation9 + $0xf8] sm:$0xff] }
 0x299   :  { %4403 = vmatpush.msrb.mxu3 %v4292_v27  ;;  %v4285_v42 = vld [vmem:[#allocation9 + $0xc0] sm:$0xff] }
 0x29a   :  { %4344 = vmatpush.msrb.mxu0 %v4285_v42  ;;  %v12398_v27 = vld [vmem:[#allocation12 + $0xe80] sm:$0xf] }
 0x29b   :  { %4404 = vmatpush.msrb.mxu3 %v4288_v62  ;;  %v11310_v42 = vld [vmem:[#allocation12 + $0x600] sm:$0xf]  ;;  %v11887_v62 = vor.u32 %v13444_v40, %v11886_v23 }
 0x29c   :  { %4345 = vmatpush.msrb.mxu0 %v4281_v46  ;;  %v12399_v46 = vor.u32 %v13572_v44, %v12398_v27  ;;  %v11504_v27 = vld [vmem:[#allocation12 + $0x7c0] sm:$0xf0]  ;;  %v12078_v44 = vld [vmem:[#allocation12 + $0xc00] sm:$0xf] }
 0x2a7   :  { %v4057_v63 = vpop.f32.mrf.mxu0 }
 0x2a8   :  { %v4070_v48 = vpop.f32.mrf.mxu1  ;;  %v4058_v49 = vadd.f32 %v4057_v63, %v4045_v47  ;;  %v4282_v47 = vld [vmem:[#allocation9 + $0xa8] sm:$0xff]  ;;  %v4283_v63 = vld [vmem:[#allocation9 + $0xb0] sm:$0xff] }
 0x2a9   :  { %4365 = vmatpush.msrb.mxu1 %v4282_v47  ;;  %4385 = vmatpush.msrb.mxu2 %v4283_v63  ;;  %v11822_v47 = vld [vmem:[#allocation12 + $0xa00] sm:$0xf] }
 0x2aa   :  { %v4071_v61 = vadd.f32 %v4070_v48, %v4058_v49  ;;  %v4284_v48 = vld [vmem:[#allocation9 + $0xb8] sm:$0xff]  ;;  %v4277_v49 = vld [vmem:[#allocation9 + $0x80] sm:$0xff] }
 0x2ab   :  { %4405 = vmatpush.msrb.mxu3 %v4284_v48  ;;  %4346 = vmatpush.msrb.mxu0 %v4277_v49  ;;  %v13428_v48 = vld [vmem:[#allocation12 + $0xa3c] sm:$0xf0] }
 0x2ac   :  { %v12334_v49 = vld [vmem:[#allocation12 + $0xe00] sm:$0xf] }
 0x2af   :  { %v4083_v41 = vpop.f32.mrf.mxu2  ;;  %v4059_v52 = vpop.f32.mrf.mxu0 }
 0x2b0   :  { %v4096_v51 = vpop.f32.mrf.mxu3  ;;  %v4084_v54 = vadd.f32 %v4083_v41, %v4071_v61  ;;  %v4072_v53 = vpop.f32.mrf.mxu1  ;;  %v4278_v61 = vld [vmem:[#allocation9 + $0x88] sm:$0xff]  ;;  %v4279_v41 = vld [vmem:[#allocation9 + $0x90] sm:$0xff] }
 0x2b1   :  { %4366 = vmatpush.msrb.mxu1 %v4278_v61  ;;  %4386 = vmatpush.msrb.mxu2 %v4279_v41  ;;  %v4274_v52 = vld [vmem:[#allocation9 + $0x68] sm:$0xff]  ;;  %v4275_v53 = vld [vmem:[#allocation9 + $0x70] sm:$0xff]  ;;  %v13556_v61 = vld [vmem:[#allocation12 + $0xe3c] sm:$0xf0]  ;;  %v11311_v41 = vor.u32 %v13300_v43, %v11310_v42 }
 0x2b2   :  { %v4097_v45 = vadd.f32 %v4096_v51, %v4084_v54  ;;  %v4280_v51 = vld [vmem:[#allocation9 + $0x98] sm:$0xff]  ;;  %v4273_v54 = vld [vmem:[#allocation9 + $0x60] sm:$0xff] }
 0x2b3   :  { %4406 = vmatpush.msrb.mxu3 %v4280_v51  ;;  %4347 = vmatpush.msrb.mxu0 %v4273_v54  ;;  %v10734_v51 = vld [vmem:[#allocation12 + $0x180] sm:$0xf] }
 0x2b4   :  { %v4103_v55 = vmax.f32 %v4097_v45, 0.0  ;;  %4367 = vmatpush.msrb.mxu1 %v4274_v52  ;;  %v4276_v45 = vld [vmem:[#allocation9 + $0x78] sm:$0xff]  ;;  %4387 = vmatpush.msrb.mxu2 %v4275_v53  ;;  %v13156_v54 = vld [vmem:[#allocation12 + $0x1bc] sm:$0xf0] }
 0x2b5   :  { %4407 = vmatpush.msrb.mxu3 %v4276_v45  ;;  %v11246_v52 = vld [vmem:[#allocation12 + $0x580] sm:$0xf]  ;;  %v11823_v45 = vor.u32 %v13428_v48, %v11822_v47 }
 0x2b6   :  { %4248 = vmatmul.f32.vlgmr.msra.gmra.mxu3 %v4103_v55  ;;  %v4269_v55 = vld [vmem:[#allocation9 + $0x40] sm:$0xff] }
 0x2b7   :  { %v4085_v56 = vpop.f32.mrf.mxu2  ;;  %4348 = vmatpush.msrb.mxu0 %v4269_v55  ;;  %4408 = vmatpush.msrb.mxu3 %v4272_v57  ;;  %v13284_v53 = vld [vmem:[#allocation12 + $0x5bc] sm:$0xf0]  ;;  %v12335_v55 = vor.u32 %v13556_v61, %v12334_v49  ;;  %v10735_v57 = vor.u32 %v13156_v54, %v10734_v51  ;;  %v12016_v49 = vld [vmem:[#allocation12 + $0xbc0] sm:$0xf0] }
 0x2b8   :  { %v4098_v58 = vpop.f32.mrf.mxu3  ;;  %v4270_v56 = vld [vmem:[#allocation9 + $0x48] sm:$0xff]  ;;  %v11566_v42 = vld [vmem:[#allocation12 + $0x800] sm:$0xf] }
 0x2b9   :  { %v4271_v58 = vld [vmem:[#allocation9 + $0x50] sm:$0xff]  ;;  %4368 = vmatpush.msrb.mxu1 %v4270_v56  ;;  %4349 = vmatpush.msrb.mxu0 %v4265_v4  ;;  %v11758_v56 = vld [vmem:[#allocation12 + $0x980] sm:$0xf]  ;;  %v13596_v61 = vld [vmem:[#allocation12 + $0xf84] sm:$0xf] }
 0x2ba   :  { %4388 = vmatpush.msrb.mxu2 %v4271_v58  ;;  %4409 = vmatpush.msrb.mxu3 %v4268_v13  ;;  %v13412_v4 = vld [vmem:[#allocation12 + $0x9bc] sm:$0xf0] }
 0x2bb   :  { %4369 = vmatpush.msrb.mxu1 %v4266_v59  ;;  %4350 = vmatpush.msrb.mxu0 %v4261_v20  ;;  %v12270_v59 = vld [vmem:[#allocation12 + $0xd80] sm:$0xf]  ;;  %v11247_v20 = vor.u32 %v13284_v53, %v11246_v52  ;;  %v11759_v2 = vor.u32 %v13412_v4, %v11758_v56  ;;  %v13196_v52 = vld [vmem:[#allocation12 + $0x304] sm:$0xf] }
 0x2bc   :  { %4389 = vmatpush.msrb.mxu2 %v4267_v1  ;;  %4410 = vmatpush.msrb.mxu3 %v4264_v6  ;;  %v13540_v1 = vld [vmem:[#allocation12 + $0xdbc] sm:$0xf0]  ;;  %v10928_v53 = vld [vmem:[#allocation12 + $0x340] sm:$0xf0] }
 0x2bd   :  { %4370 = vmatpush.msrb.mxu1 %v4262_v31  ;;  %7531 = vmatpush.bf16.msra.mxu0 %v10991_v0  ;;  %v10670_v31 = vld [vmem:[#allocation12 + $0x100] sm:$0xf]  ;;  %v12271_v0 = vor.u32 %v13540_v1, %v12270_v59  ;;  %v13452_v4 = vld [vmem:[#allocation12 + $0xb04] sm:$0xf] }
 0x2be   :  { %4390 = vmatpush.msrb.mxu2 %v4263_v19  ;;  %7570 = vmatpush.bf16.msra.mxu3 %v12527_v17  ;;  %v13140_v19 = vld [vmem:[#allocation12 + $0x13c] sm:$0xf0]  ;;  %v11952_v59 = vld [vmem:[#allocation12 + $0xb40] sm:$0xf0] }
 0x2bf   :  { %7544 = vmatpush.bf16.msra.mxu1 %v11503_v38  ;;  %v11182_v6 = vld [vmem:[#allocation12 + $0x500] sm:$0xf]  ;;  %v10671_v5 = vor.u32 %v13140_v19, %v10670_v31  ;;  %v13580_v1 = vld [vmem:[#allocation12 + $0xf04] sm:$0xf] }
 0x2c0   :  { %7557 = vmatpush.bf16.msra.mxu2 %v12015_v39  ;;  %v12206_v38 = vld [vmem:[#allocation12 + $0xd00] sm:$0xf]  ;;  %v11183_v11 = vor.u32 %v13268_v50, %v11182_v6  ;;  %v13180_v19 = vld [vmem:[#allocation12 + $0x284] sm:$0xf] }
 0x2c1   :  { %7532 = vmatpush.bf16.msra.mxu0 %v10927_v12  ;;  %v13124_v12 = vld [vmem:[#allocation12 + $0xbc] sm:$0xf0]  ;;  %v10864_v6 = vld [vmem:[#allocation12 + $0x2c0] sm:$0xf0] }
 0x2c2   :  { %v11630_v39 = vld [vmem:[#allocation12 + $0x880] sm:$0xf]  ;;  %v10607_v17 = vor.u32 %v13124_v12, %v10606_v8  ;;  %v13308_v50 = vld [vmem:[#allocation12 + $0x684] sm:$0xf] }
 0x2c3   :  { %7545 = vmatpush.bf16.msra.mxu1 %v11439_v16  ;;  %v12207_v16 = vor.u32 %v13524_v10, %v12206_v38  ;;  %v13364_v43 = vld [vmem:[#allocation12 + $0x83c] sm:$0xf0]  ;;  %v12400_v38 = vld [vmem:[#allocation12 + $0xec0] sm:$0xf0]  ;;  %v10867_v10 = vor.u32 %v13180_v19, %v10864_v6 }
 0x2c4   :  { %v11567_v56 = vor.u32 %v13364_v43, %v11566_v42  ;;  %v13164_v8 = vld [vmem:[#allocation12 + $0x204] sm:$0xf] }
 0x2c5   :  { %v10800_v12 = vld [vmem:[#allocation12 + $0x240] sm:$0xf0] }
 0x2c6   :  { %v13404_v43 = vld [vmem:[#allocation12 + $0x984] sm:$0xf] }
 0x2c7   :  { %7546 = vmatpush.bf16.msra.mxu1 %v11375_v22  ;;  %v13500_v6 = vld [vmem:[#allocation12 + $0xc84] sm:$0xf] }
 0x2c8   :  { %v4189_v33 = vpop.f32.mrf.mxu0 }
 0x2c9   :  { %v4190_v29 = vadd.f32 %v13628_v34, %v4189_v33  ;;  %v4209_v18 = vpop.f32.mrf.mxu1  ;;  %v13460_v34 = vld [vmem:[#allocation12 + $0xb3c] sm:$0xf0] }
 0x2ca   :  { %v11951_v33 = vor.u32 %v13460_v34, %v11950_v28  ;;  %v11119_v28 = vor.u32 %v13252_v14, %v11118_v9  ;;  %v10542_v34 = vld [vmem:[#allocation12] sm:$0xf]  ;;  %v13292_v9 = vld [vmem:[#allocation12 + $0x604] sm:$0xf] }
 0x2cb   :  { %v4210_v35 = vadd.f32 %v4209_v18, %v4190_v29  ;;  %v12462_v29 = vld [vmem:[#allocation12 + $0xf00] sm:$0xf]  ;;  %7547 = vmatpush.bf16.msra.mxu1 %v11311_v41  ;;  %v12528_v41 = vld [vmem:[#allocation12 + $0xfc0] sm:$0xf0] }
 0x2cc   :  { %v13588_v18 = vld [vmem:[#allocation12 + $0xf3c] sm:$0xf0]  ;;  %7558 = vmatpush.bf16.msra.mxu2 %v11951_v33  ;;  %v11312_v14 = vld [vmem:[#allocation12 + $0x640] sm:$0xf0] }
 0x2cd   :  { %v13108_v33 = vld [vmem:[#allocation12 + $0x3c] sm:$0xf0] }
 0x2cf   :  { %v4229_v32 = vpop.f32.mrf.mxu2  ;;  %7548 = vmatpush.bf16.msra.mxu1 %v11247_v20  ;;  %v10931_v20 = vor.u32 %v13196_v52, %v10928_v53  ;;  %v13388_v52 = vld [vmem:[#allocation12 + $0x904] sm:$0xf] }
 0x2d0   :  { %v4230_v36 = vadd.f32 %v4229_v32, %v4210_v35  ;;  %v10863_v32 = vor.u32 %v13188_v25, %v10862_v21  ;;  %v12463_v35 = vor.u32 %v13588_v18, %v12462_v29  ;;  %7559 = vmatpush.bf16.msra.mxu2 %v11887_v62  ;;  %v13380_v21 = vld [vmem:[#allocation12 + $0x8bc] sm:$0xf0]  ;;  %v11696_v53 = vld [vmem:[#allocation12 + $0x940] sm:$0xf0] }
 0x2d1   :  { %v12142_v25 = vld [vmem:[#allocation12 + $0xc80] sm:$0xf]  ;;  %v11631_v22 = vor.u32 %v13380_v21, %v11630_v39  ;;  %v13420_v39 = vld [vmem:[#allocation12 + $0xa04] sm:$0xf] }
 0x2d2   :  { %7571 = vmatpush.bf16.msra.mxu3 %v12463_v35  ;;  %7533 = vmatpush.bf16.msra.mxu0 %v10863_v32  ;;  %v11054_v29 = vld [vmem:[#allocation12 + $0x400] sm:$0xf]  ;;  %v13212_v35 = vld [vmem:[#allocation12 + $0x384] sm:$0xf]  ;;  %v12143_v23 = vor.u32 %v13508_v24, %v12142_v25  ;;  %v10803_v24 = vor.u32 %v13164_v8, %v10800_v12 }
 0x2d3   :  { %7549 = vmatpush.bf16.msra.mxu1 %v11183_v11  ;;  %v13236_v18 = vld [vmem:[#allocation12 + $0x43c] sm:$0xf0]  ;;  %v13548_v21 = vld [vmem:[#allocation12 + $0xe04] sm:$0xf] }
 0x2d4   :  { %7560 = vmatpush.bf16.msra.mxu2 %v11823_v45  ;;  %v13492_v62 = vld [vmem:[#allocation12 + $0xc3c] sm:$0xf0]  ;;  %v11055_v48 = vor.u32 %v13236_v18, %v11054_v29  ;;  %v13324_v45 = vld [vmem:[#allocation12 + $0x704] sm:$0xf] }
 0x2d5   :  { %v12336_v25 = vld [vmem:[#allocation12 + $0xe40] sm:$0xf0] }
 0x2d6   :  { %7572 = vmatpush.bf16.msra.mxu3 %v12399_v46  ;;  %v13468_v46 = vld [vmem:[#allocation12 + $0xb84] sm:$0xf] }
 0x2d7   :  { %7550 = vmatpush.bf16.msra.mxu1 %v11119_v28  ;;  %v13148_v28 = vld [vmem:[#allocation12 + $0x184] sm:$0xf] }
 0x2d8   :  { %7561 = vmatpush.bf16.msra.mxu2 %v11759_v2  ;;  %v11955_v2 = vor.u32 %v13452_v4, %v11952_v59  ;;  %v11248_v29 = vld [vmem:[#allocation12 + $0x5c0] sm:$0xf0] }
 0x2d9   :  { %v13228_v59 = vld [vmem:[#allocation12 + $0x404] sm:$0xf] }
 0x2da   :  { %7573 = vmatpush.bf16.msra.mxu3 %v12335_v55  ;;  %v11440_v55 = vld [vmem:[#allocation12 + $0x740] sm:$0xf0] }
 0x2db   :  { %7551 = vmatpush.bf16.msra.mxu1 %v11055_v48  ;;  %v11443_v31 = vor.u32 %v13324_v45, %v11440_v55  ;;  %v13116_v48 = vld [vmem:[#allocation12 + $0x84] sm:$0xf]  ;;  %v11699_v55 = vor.u32 %v13388_v52, %v11696_v53 }
 0x2dc   :  { %7562 = vmatpush.bf16.msra.mxu2 %v11695_v15  ;;  %v13516_v45 = vld [vmem:[#allocation12 + $0xd04] sm:$0xf] }
 0x2de   :  { %7574 = vmatpush.bf16.msra.mxu3 %v12271_v0 }
 0x2e0   :  { %7563 = vmatpush.bf16.msra.mxu2 %v11631_v22  ;;  %v10672_v22 = vld [vmem:[#allocation12 + $0x140] sm:$0xf0] }
 0x2e2   :  { %7575 = vmatpush.bf16.msra.mxu3 %v12207_v16  ;;  %v12403_v16 = vor.u32 %v13564_v7, %v12400_v38  ;;  %v12080_v7 = vld [vmem:[#allocation12 + $0xc40] sm:$0xf0] }
 0x2e4   :  { %7564 = vmatpush.bf16.msra.mxu2 %v11567_v56  ;;  %v12208_v56 = vld [vmem:[#allocation12 + $0xd40] sm:$0xf0] }
 0x2e6   :  { %7576 = vmatpush.bf16.msra.mxu3 %v12143_v23  ;;  %v13260_v23 = vld [vmem:[#allocation12 + $0x504] sm:$0xf] }
 0x339   :  { %v4249_v37 = vpop.f32.mrf.mxu3 }
 0x33a   :  { %v14179_v3 = vadd.f32 %v4249_v37, %v4230_v36  ;;  %v10798_v36 = vld [vmem:[#allocation12 + $0x200] sm:$0xf] }
 0x33b   :  { %v13172_v37 = vld [vmem:[#allocation12 + $0x23c] sm:$0xf0] }
 0x33c   :  { %4252 = vst [vmem:[%s14460_s11] sm:$0xff] %v14179_v3  ;;  %4253 = vrot.lane.b32.xlu0 %v14179_v3, %s13884_s16  ;;  %v10799_v63 = vor.u32 %v13172_v37, %v10798_v36  ;;  %v10992_v36 = vld [vmem:[#allocation12 + $0x3c0] sm:$0xf0] }
 0x33d   :  { %v13340_v37 = vld [vmem:[#allocation12 + $0x784] sm:$0xf]  ;;  %v10995_v51 = vor.u32 %v13212_v35, %v10992_v36 }
 0x33e   :  { %7534 = vmatpush.bf16.msra.mxu0 %v10799_v63  ;;  %v10543_v63 = vor.u32 %v13108_v33, %v10542_v34  ;;  %v11507_v54 = vor.u32 %v13340_v37, %v11504_v27  ;;  %v10736_v34 = vld [vmem:[#allocation12 + $0x1c0] sm:$0xf0] }
 0x33f   :  { %v13276_v33 = vld [vmem:[#allocation12 + $0x584] sm:$0xf]  ;;  %v10739_v35 = vor.u32 %v13148_v28, %v10736_v34 }
 0x340   :  { %v11251_v36 = vor.u32 %v13276_v33, %v11248_v29  ;;  %v13132_v37 = vld [vmem:[#allocation12 + $0x104] sm:$0xf]  ;;  %v10934_v29 = vld [vmem:[#allocation12 + $0x308] sm:$0xf] }
 0x341   :  { %v10675_v27 = vor.u32 %v13132_v37, %v10672_v22  ;;  %v13333_v37 = vld [vmem:[#allocation12 + $0x744] sm:$0xf0] }
 0x342   :  { %7535 = vmatpush.bf16.msra.mxu0 %v10735_v57  ;;  %v12531_v57 = vor.u32 %v13596_v61, %v12528_v41  ;;  %v13244_v41 = vld [vmem:[#allocation12 + $0x484] sm:$0xf] }
 0x346   :  { %7536 = vmatpush.bf16.msra.mxu0 %v10671_v5  ;;  %v11888_v5 = vld [vmem:[#allocation12 + $0xac0] sm:$0xf0] }
 0x347   :  { %v11891_v15 = vor.u32 %v13436_v30, %v11888_v5  ;;  %v13484_v5 = vld [vmem:[#allocation12 + $0xc04] sm:$0xf] }
 0x348   :  { %v12083_v38 = vor.u32 %v13484_v5, %v12080_v7  ;;  %v10742_v5 = vld [vmem:[#allocation12 + $0x188] sm:$0xf] }
 0x349   :  { %v13157_v7 = vld [vmem:[#allocation12 + $0x1c4] sm:$0xf0] }
 0x34a   :  { %7537 = vmatpush.bf16.msra.mxu0 %v10607_v17  ;;  %v11824_v17 = vld [vmem:[#allocation12 + $0xa40] sm:$0xf0] }
 0x34b   :  { %v11827_v18 = vor.u32 %v13420_v39, %v11824_v17  ;;  %v13221_v39 = vld [vmem:[#allocation12 + $0x3c4] sm:$0xf0] }
 0x34c   :  { %v11510_v17 = vld [vmem:[#allocation12 + $0x788] sm:$0xf] }
 0x34e   :  { %7538 = vmatpush.bf16.msra.mxu0 %v10543_v63 }
 0x3ae   :  { %v4254_v58 = vpop.permute.xlu0 %4253 }
 0x3af   :  { %v4256_v13 = vmul.f32 0.5, %v4254_v58  ;;  %v12079_v58 = vor.u32 %v13492_v62, %v12078_v44  ;;  %v11760_v44 = vld [vmem:[#allocation12 + $0x9c0] sm:$0xf0] }
 0x3b0   :  { %v13532_v62 = vld [vmem:[#allocation12 + $0xd84] sm:$0xf] }
 0x3b1   :  { %v4257_v26 = vmul.f32 1.442695, %v4256_v13  ;;  %v12464_v13 = vld [vmem:[#allocation12 + $0xf40] sm:$0xf0]  ;;  %7577 = vmatpush.bf16.msra.mxu3 %v12079_v58  ;;  %v12211_v58 = vor.u32 %v13516_v45, %v12208_v56  ;;  %v11958_v45 = vld [vmem:[#allocation12 + $0xb08] sm:$0xf] }
 0x3b2   :  { %v12467_v0 = vor.u32 %v13580_v1, %v12464_v13  ;;  %v11056_v1 = vld [vmem:[#allocation12 + $0x440] sm:$0xf0] }
 0x3b3   :  { %13629 = vpow2.f32 %v4257_v26  ;;  %v11376_v26 = vld [vmem:[#allocation12 + $0x6c0] sm:$0xf0]  ;;  %v11059_v13 = vor.u32 %v13228_v59, %v11056_v1  ;;  %v10806_v59 = vld [vmem:[#allocation12 + $0x208] sm:$0xf] }
 0x3b4   :  { %v11379_v11 = vor.u32 %v13308_v50, %v11376_v26  ;;  %v12144_v50 = vld [vmem:[#allocation12 + $0xcc0] sm:$0xf0]  ;;  %v13173_v1 = vld [vmem:[#allocation12 + $0x244] sm:$0xf0] }
 0x3b5   :  { %v12147_v26 = vor.u32 %v13500_v6, %v12144_v50  ;;  %v11894_v6 = vld [vmem:[#allocation12 + $0xa88] sm:$0xf]  ;;  %v10807_v50 = vor.u32 %v13173_v1, %v10806_v59 }
 0x3b6   :  { %v12150_v59 = vld [vmem:[#allocation12 + $0xc88] sm:$0xf] }
 0x3b7   :  { %v13509_v1 = vld [vmem:[#allocation12 + $0xcc4] sm:$0xf0] }
 0x3b9   :  { %v13630_v32 = vpop.eup %13629 }
 0x3ba   :  { %v4259_v40 = vmul.f32 %v13630_v32, %v4255_v60  ;;  %v11315_v60 = vor.u32 %v13292_v9, %v11312_v14  ;;  %v12339_v32 = vor.u32 %v13548_v21, %v12336_v25  ;;  %v10998_v14 = vld [vmem:[#allocation12 + $0x388] sm:$0xf] }
 0x3bb   :  { %v13349_v21 = vld [vmem:[#allocation12 + $0x7c4] sm:$0xf0]  ;;  %v10999_v34 = vor.u32 %v13221_v39, %v10998_v14 }
 0x3bc   :  { %v4260_v47 = vadd.f32 %v4259_v40, %v14179_v3  ;;  %v12019_v3 = vor.u32 %v13468_v46, %v12016_v49  ;;  %v11184_v40 = vld [vmem:[#allocation12 + $0x540] sm:$0xf0]  ;;  %v11763_v46 = vor.u32 %v13404_v43, %v11760_v44  ;;  %v11511_v33 = vor.u32 %v13349_v21, %v11510_v17  ;;  %v12534_v43 = vld [vmem:[#allocation12 + $0xf88] sm:$0xf] }
 0x3bd   :  { %v11187_v42 = vor.u32 %v13260_v23, %v11184_v40  ;;  %v10608_v49 = vld [vmem:[#allocation12 + $0xc0] sm:$0xf0]  ;;  %v12342_v14 = vld [vmem:[#allocation12 + $0xe08] sm:$0xf] }
 0x3be   :  { %4351 = vmatmul.f32.vlgmr.msrb.gmra.mxu0 %v4260_v47  ;;  %4371 = vmatmul.f32.vlgmr.msrb.gmra.mxu1 %v4260_v47  ;;  %v10611_v61 = vor.u32 %v13116_v48, %v10608_v49  ;;  %v13189_v48 = vld [vmem:[#allocation12 + $0x2c4] sm:$0xf0] }
 0x3bf   :  { %4391 = vmatmul.f32.vlgmr.msrb.gmra.mxu2 %v4260_v47  ;;  %4411 = vmatmul.f32.vlgmr.msrb.gmra.mxu3 %v4260_v47  ;;  %v12272_v47 = vld [vmem:[#allocation12 + $0xdc0] sm:$0xf0]  ;;  %v11382_v49 = vld [vmem:[#allocation12 + $0x688] sm:$0xf] }
 0x3c0   :  { %7583 = vmatpush.bf16.msrb.mxu0 %v10995_v51  ;;  %7596 = vmatpush.bf16.msrb.mxu1 %v11507_v54  ;;  %v12275_v63 = vor.u32 %v13532_v62, %v12272_v47  ;;  %v11120_v51 = vld [vmem:[#allocation12 + $0x4c0] sm:$0xf0]  ;;  %v13605_v47 = vld [vmem:[#allocation12 + $0xfc4] sm:$0xf0] }
 0x3c1   :  { %7609 = vmatpush.bf16.msrb.mxu2 %v12019_v3  ;;  %7622 = vmatpush.bf16.msrb.mxu3 %v12531_v57  ;;  %v11123_v54 = vor.u32 %v13244_v41, %v11120_v51  ;;  %v13100_v3 = vld [vmem:[#allocation12 + $0x4] sm:$0xf]  ;;  %v12535_v52 = vor.u32 %v13605_v47, %v12534_v43  ;;  %v10678_v17 = vld [vmem:[#allocation12 + $0x108] sm:$0xf] }
 0x3c2   :  { %v10544_v57 = vld [vmem:[#allocation12 + $0x40] sm:$0xf0]  ;;  %v13141_v21 = vld [vmem:[#allocation12 + $0x144] sm:$0xf0] }
 0x3c3   :  { %v10547_v4 = vor.u32 %v13100_v3, %v10544_v57  ;;  %v12470_v57 = vld [vmem:[#allocation12 + $0xf08] sm:$0xf] }
 0x3c4   :  { %7584 = vmatpush.bf16.msrb.mxu0 %v10931_v20  ;;  %7597 = vmatpush.bf16.msrb.mxu1 %v11443_v31  ;;  %v13372_v20 = vld [vmem:[#allocation12 + $0x884] sm:$0xf]  ;;  %v13525_v47 = vld [vmem:[#allocation12 + $0xd44] sm:$0xf0] }
 0x3c5   :  { %7610 = vmatpush.bf16.msrb.mxu2 %v11955_v2  ;;  %7623 = vmatpush.bf16.msrb.mxu3 %v12467_v0  ;;  %v11632_v31 = vld [vmem:[#allocation12 + $0x8c0] sm:$0xf0] }
 0x3c6   :  { %v11635_v19 = vor.u32 %v13372_v20, %v11632_v31  ;;  %v13356_v2 = vld [vmem:[#allocation12 + $0x804] sm:$0xf]  ;;  %v13301_v20 = vld [vmem:[#allocation12 + $0x644] sm:$0xf0] }
 0x3c7   :  { %v11568_v0 = vld [vmem:[#allocation12 + $0x840] sm:$0xf0] }
 0x3c8   :  { %7585 = vmatpush.bf16.msrb.mxu0 %v10867_v10  ;;  %7598 = vmatpush.bf16.msrb.mxu1 %v11379_v11  ;;  %v11571_v30 = vor.u32 %v13356_v2, %v11568_v0  ;;  %v4325_v10 = vld [vmem:[#allocation10] sm:$0xf]  ;;  %v13445_v2 = vld [vmem:[#allocation12 + $0xac4] sm:$0xf0] }
 0x3c9   :  { %7611 = vmatpush.bf16.msrb.mxu2 %v11891_v15  ;;  %7624 = vmatpush.bf16.msrb.mxu3 %v12403_v16  ;;  %v4327_v11 = vperm.slane %v4325_v10, 0  ;;  %v4328_v8 = vperm.slane %v4325_v10, 1  ;;  %v4330_v28 = vperm.slane %v4325_v10, 3  ;;  %v12406_v0 = vld [vmem:[#allocation12 + $0xe88] sm:$0xf] }
 0x3cc   :  { %7586 = vmatpush.bf16.msrb.mxu0 %v10803_v24  ;;  %7599 = vmatpush.bf16.msrb.mxu1 %v11315_v60  ;;  %v4329_v60 = vperm.slane %v4325_v10, 2  ;;  %v13285_v10 = vld [vmem:[#allocation12 + $0x5c4] sm:$0xf0] }
 0x3cd   :  { %7612 = vmatpush.bf16.msrb.mxu2 %v11827_v18  ;;  %7625 = vmatpush.bf16.msrb.mxu3 %v12339_v32  ;;  %v13205_v18 = vld [vmem:[#allocation12 + $0x344] sm:$0xf0] }
 0x3ce   :  { %v10935_v40 = vor.u32 %v13205_v18, %v10934_v29  ;;  %v12278_v29 = vld [vmem:[#allocation12 + $0xd88] sm:$0xf] }
 0x3cf   :  { %v13541_v18 = vld [vmem:[#allocation12 + $0xdc4] sm:$0xf0] }
 0x3d0   :  { %7587 = vmatpush.bf16.msrb.mxu0 %v10739_v35  ;;  %7600 = vmatpush.bf16.msrb.mxu1 %v11251_v36  ;;  %v11446_v36 = vld [vmem:[#allocation12 + $0x708] sm:$0xf]  ;;  %v12279_v43 = vor.u32 %v13541_v18, %v12278_v29  ;;  %v13581_v29 = vld [vmem:[#allocation12 + $0xf0c] sm:$0xf] }
 0x3d1   :  { %7613 = vmatpush.bf16.msrb.mxu2 %v11763_v46  ;;  %7626 = vmatpush.bf16.msrb.mxu3 %v12275_v63  ;;  %v11447_v46 = vor.u32 %v13333_v37, %v11446_v36  ;;  %v10870_v63 = vld [vmem:[#allocation12 + $0x288] sm:$0xf]  ;;  %v10679_v36 = vor.u32 %v13141_v21, %v10678_v17  ;;  %v10872_v21 = vld [vmem:[#allocation12 + $0x2c8] sm:$0xf0] }
 0x3d2   :  { %v10871_v53 = vor.u32 %v13189_v48, %v10870_v63  ;;  %v12472_v18 = vld [vmem:[#allocation12 + $0xf48] sm:$0xf0] }
 0x3d4   :  { %7588 = vmatpush.bf16.msrb.mxu0 %v10675_v27  ;;  %7601 = vmatpush.bf16.msrb.mxu1 %v11187_v42  ;;  %v12022_v27 = vld [vmem:[#allocation12 + $0xb88] sm:$0xf] }
 0x3d5   :  { %7614 = vmatpush.bf16.msrb.mxu2 %v11699_v55  ;;  %7627 = vmatpush.bf16.msrb.mxu3 %v12211_v58  ;;  %v13477_v42 = vld [vmem:[#allocation12 + $0xbc4] sm:$0xf0] }
 0x3d6   :  { %v13461_v55 = vld [vmem:[#allocation12 + $0xb44] sm:$0xf0] }
 0x3d7   :  { %v11959_v31 = vor.u32 %v13461_v55, %v11958_v45  ;;  %v13341_v55 = vld [vmem:[#allocation12 + $0x78c] sm:$0xf] }
 0x3d8   :  { %7589 = vmatpush.bf16.msrb.mxu0 %v10611_v61  ;;  %7602 = vmatpush.bf16.msrb.mxu1 %v11123_v54  ;;  %v13317_v61 = vld [vmem:[#allocation12 + $0x6c4] sm:$0xf0]  ;;  %v12023_v54 = vor.u32 %v13477_v42, %v12022_v27 }
 0x3d9   :  { %7615 = vmatpush.bf16.msrb.mxu2 %v11635_v19  ;;  %7628 = vmatpush.bf16.msrb.mxu3 %v12147_v26  ;;  %v11383_v3 = vor.u32 %v13317_v61, %v11382_v49  ;;  %v13253_v27 = vld [vmem:[#allocation12 + $0x4c4] sm:$0xf0] }
 0x3da   :  { %v10550_v49 = vld [vmem:[#allocation12 + $0x8] sm:$0xf] }
 0x3db   :  { %v13109_v61 = vld [vmem:[#allocation12 + $0x44] sm:$0xf0] }
 0x3dc   :  { %7590 = vmatpush.bf16.msrb.mxu0 %v10547_v4  ;;  %7603 = vmatpush.bf16.msrb.mxu1 %v11059_v13  ;;  %v13589_v4 = vld [vmem:[#allocation12 + $0xf44] sm:$0xf0] }
 0x3dd   :  { %7616 = vmatpush.bf16.msrb.mxu2 %v11571_v30  ;;  %7629 = vmatpush.bf16.msrb.mxu3 %v12083_v38  ;;  %v11318_v13 = vld [vmem:[#allocation12 + $0x608] sm:$0xf]  ;;  %v12471_v19 = vor.u32 %v13589_v4, %v12470_v57 }
 0x3de   :  { %v11319_v26 = vor.u32 %v13301_v20, %v11318_v13  ;;  %v13573_v30 = vld [vmem:[#allocation12 + $0xec4] sm:$0xf0]  ;;  %v10551_v13 = vor.u32 %v13109_v61, %v10550_v49  ;;  %v13149_v49 = vld [vmem:[#allocation12 + $0x18c] sm:$0xf] }
 0x3df   :  { %v11254_v38 = vld [vmem:[#allocation12 + $0x588] sm:$0xf]  ;;  %v10744_v61 = vld [vmem:[#allocation12 + $0x1c8] sm:$0xf0] }
 0x3e0   :  { %v11255_v39 = vor.u32 %v13285_v10, %v11254_v38  ;;  %v11638_v57 = vld [vmem:[#allocation12 + $0x888] sm:$0xf] }
 0x3e1   :  { %v13381_v4 = vld [vmem:[#allocation12 + $0x8c4] sm:$0xf0] }
 0x3e2   :  { %v12086_v38 = vld [vmem:[#allocation12 + $0xc08] sm:$0xf] }
 0x3e3   :  { %v13493_v10 = vld [vmem:[#allocation12 + $0xc44] sm:$0xf0] }
 0x3e4   :  { %v12087_v17 = vor.u32 %v13493_v10, %v12086_v38  ;;  %v13245_v38 = vld [vmem:[#allocation12 + $0x48c] sm:$0xf] }
 0x3e5   :  { %v11128_v10 = vld [vmem:[#allocation12 + $0x4c8] sm:$0xf0] }
 0x43b   :  { %v4352_v12 = vpop.f32.mrf.mxu0  ;;  %v4372_v9 = vpop.f32.mrf.mxu1 }
 0x43c   :  { %v4353_v15 = vadd.f32 %v4352_v12, %v4327_v11  ;;  %v4373_v16 = vadd.f32 %v4372_v9, %v4328_v8  ;;  %v11895_v11 = vor.u32 %v13445_v2, %v11894_v6  ;;  %v12407_v8 = vor.u32 %v13573_v30, %v12406_v0  ;;  %v11830_v12 = vld [vmem:[#allocation12 + $0xa08] sm:$0xf]  ;;  %v13197_v6 = vld [vmem:[#allocation12 + $0x30c] sm:$0xf] }
 0x43d   :  { %v13429_v9 = vld [vmem:[#allocation12 + $0xa44] sm:$0xf0]  ;;  %v11639_v2 = vor.u32 %v13381_v4, %v11638_v57  ;;  %v12151_v0 = vor.u32 %v13509_v1, %v12150_v59  ;;  %v11448_v30 = vld [vmem:[#allocation12 + $0x748] sm:$0xf0]  ;;  %v10747_v57 = vor.u32 %v13149_v49, %v10744_v61 }
 0x43e   :  { %v4415_v25 = vmax.f32 %v4353_v15, 0.0  ;;  %v4416_v24 = vmax.f32 %v4373_v16, 0.0  ;;  %v13557_v15 = vld [vmem:[#allocation12 + $0xe44] sm:$0xf0]  ;;  %v10743_v16 = vor.u32 %v13157_v7, %v10742_v5  ;;  %v13133_v59 = vld [vmem:[#allocation12 + $0x10c] sm:$0xf] }
 0x43f   :  { %v11574_v5 = vld [vmem:[#allocation12 + $0x808] sm:$0xf]  ;;  %v10680_v1 = vld [vmem:[#allocation12 + $0x148] sm:$0xf0] }
 0x440   :  { %v14191_v32 = vpack.c.bf16 %v4415_v25, %v4415_v25  ;;  %v14193_v35 = vpack.c.bf16 %v4416_v24, %v4416_v24  ;;  %v11190_v25 = vld [vmem:[#allocation12 + $0x508] sm:$0xf]  ;;  %v13357_v49 = vld [vmem:[#allocation12 + $0x80c] sm:$0xf] }
 0x441   :  { %v13269_v24 = vld [vmem:[#allocation12 + $0x544] sm:$0xf0]  ;;  %v11576_v61 = vld [vmem:[#allocation12 + $0x848] sm:$0xf0] }
 0x442   :  { %v4392_v22 = vpop.f32.mrf.mxu2  ;;  %v4412_v23 = vpop.f32.mrf.mxu3  ;;  %7539 = vmatmul.bf16.vlgmr.msra.gmra.mxu0 %v14191_v32  ;;  %7552 = vmatmul.bf16.vlgmr.msra.gmra.mxu1 %v14193_v35  ;;  %v11191_v37 = vor.u32 %v13269_v24, %v11190_v25  ;;  %v13365_v7 = vld [vmem:[#allocation12 + $0x844] sm:$0xf0]  ;;  %v13309_v25 = vld [vmem:[#allocation12 + $0x68c] sm:$0xf] }
 0x443   :  { %v4393_v44 = vadd.f32 %v4392_v22, %v4329_v60  ;;  %v4413_v62 = vadd.f32 %v4412_v23, %v4330_v28  ;;  %7635 = vmatpush.bf16.msra.mxu0 %v10999_v34  ;;  %7648 = vmatpush.bf16.msra.mxu1 %v11511_v33  ;;  %v11831_v60 = vor.u32 %v13429_v9, %v11830_v12  ;;  %v11766_v34 = vld [vmem:[#allocation12 + $0x988] sm:$0xf]  ;;  %v13597_v12 = vld [vmem:[#allocation12 + $0xf8c] sm:$0xf] }
 0x444   :  { %v12343_v28 = vor.u32 %v13557_v15, %v12342_v14  ;;  %v13413_v33 = vld [vmem:[#allocation12 + $0x9c4] sm:$0xf0]  ;;  %v12536_v9 = vld [vmem:[#allocation12 + $0xfc8] sm:$0xf0] }
 0x445   :  { %v4417_v41 = vmax.f32 %v4393_v44, 0.0  ;;  %v4418_v51 = vmax.f32 %v4413_v62, 0.0  ;;  %v10614_v22 = vld [vmem:[#allocation12 + $0x88] sm:$0xf]  ;;  %v11767_v42 = vor.u32 %v13413_v33, %v11766_v34  ;;  %v11384_v24 = vld [vmem:[#allocation12 + $0x6c8] sm:$0xf0] }
 0x446   :  { %v13125_v23 = vld [vmem:[#allocation12 + $0xc4] sm:$0xf0]  ;;  %v13453_v34 = vld [vmem:[#allocation12 + $0xb0c] sm:$0xf] }
 0x447   :  { %v14197_v56 = vpack.c.bf16 %v4417_v41, %v4417_v41  ;;  %v14199_v58 = vpack.c.bf16 %v4418_v51, %v4418_v51  ;;  %7636 = vmatpush.bf16.msra.mxu0 %v10935_v40  ;;  %7649 = vmatpush.bf16.msra.mxu1 %v11447_v46  ;;  %v11126_v40 = vld [vmem:[#allocation12 + $0x488] sm:$0xf]  ;;  %v10615_v63 = vor.u32 %v13125_v23, %v10614_v22  ;;  %v11960_v33 = vld [vmem:[#allocation12 + $0xb48] sm:$0xf0] }
 0x448   :  { %v11702_v44 = vld [vmem:[#allocation12 + $0x908] sm:$0xf]  ;;  %v11127_v48 = vor.u32 %v13253_v27, %v11126_v40  ;;  %v13165_v22 = vld [vmem:[#allocation12 + $0x20c] sm:$0xf] }
 0x449   :  { %7565 = vmatmul.bf16.vlgmr.msra.gmra.mxu2 %v14197_v56  ;;  %7578 = vmatmul.bf16.vlgmr.msra.gmra.mxu3 %v14199_v58  ;;  %v13397_v62 = vld [vmem:[#allocation12 + $0x944] sm:$0xf0]  ;;  %v10808_v23 = vld [vmem:[#allocation12 + $0x248] sm:$0xf0] }
 0x44a   :  { %7661 = vmatpush.bf16.msra.mxu2 %v12023_v54  ;;  %7674 = vmatpush.bf16.msra.mxu3 %v12535_v52  ;;  %v12214_v46 = vld [vmem:[#allocation12 + $0xd08] sm:$0xf]  ;;  %v13213_v54 = vld [vmem:[#allocation12 + $0x38c] sm:$0xf] }
 0x44b   :  { %7637 = vmatpush.bf16.msra.mxu0 %v10871_v53  ;;  %7650 = vmatpush.bf16.msra.mxu1 %v11383_v3  ;;  %v11062_v41 = vld [vmem:[#allocation12 + $0x408] sm:$0xf]  ;;  %v11000_v52 = vld [vmem:[#allocation12 + $0x3c8] sm:$0xf0]  ;;  %v11703_v53 = vor.u32 %v13397_v62, %v11702_v44  ;;  %v12215_v45 = vor.u32 %v13525_v47, %v12214_v46 }
 0x44c   :  { %v13237_v51 = vld [vmem:[#allocation12 + $0x444] sm:$0xf0]  ;;  %v11512_v3 = vld [vmem:[#allocation12 + $0x7c8] sm:$0xf0] }
 0x44d   :  { %v11063_v20 = vor.u32 %v13237_v51, %v11062_v41  ;;  %v13293_v40 = vld [vmem:[#allocation12 + $0x60c] sm:$0xf] }
 0x44e   :  { %7662 = vmatpush.bf16.msra.mxu2 %v11959_v31  ;;  %7675 = vmatpush.bf16.msra.mxu3 %v12471_v19  ;;  %v11003_v31 = vor.u32 %v13213_v54, %v11000_v52  ;;  %v11515_v19 = vor.u32 %v13341_v55, %v11512_v3  ;;  %v11320_v27 = vld [vmem:[#allocation12 + $0x648] sm:$0xf0] }
 0x44f   :  { %7638 = vmatpush.bf16.msra.mxu0 %v10807_v50  ;;  %7651 = vmatpush.bf16.msra.mxu1 %v11319_v26  ;;  %v10936_v50 = vld [vmem:[#allocation12 + $0x348] sm:$0xf0] }
 0x450   :  { %v13325_v26 = vld [vmem:[#allocation12 + $0x70c] sm:$0xf]  ;;  %v10939_v14 = vor.u32 %v13197_v6, %v10936_v50 }
 0x451   :  { %v11451_v15 = vor.u32 %v13325_v26, %v11448_v30  ;;  %v13437_v44 = vld [vmem:[#allocation12 + $0xa8c] sm:$0xf] }
 0x452   :  { %7663 = vmatpush.bf16.msra.mxu2 %v11895_v11  ;;  %7676 = vmatpush.bf16.msra.mxu3 %v12407_v8  ;;  %v13469_v11 = vld [vmem:[#allocation12 + $0xb8c] sm:$0xf] }
 0x453   :  { %7591 = vmatmul.bf16.vlgmr.msrb.gmra.mxu0 %v14191_v32  ;;  %7604 = vmatmul.bf16.vlgmr.msrb.gmra.mxu1 %v14193_v35  ;;  %v12024_v8 = vld [vmem:[#allocation12 + $0xbc8] sm:$0xf0] }
 0x454   :  { %7639 = vmatpush.bf16.msra.mxu0 %v10743_v16  ;;  %7652 = vmatpush.bf16.msra.mxu1 %v11255_v39  ;;  %v13181_v16 = vld [vmem:[#allocation12 + $0x28c] sm:$0xf]  ;;  %v11575_v39 = vor.u32 %v13365_v7, %v11574_v5 }
 0x455   :  { %v11896_v62 = vld [vmem:[#allocation12 + $0xac8] sm:$0xf0] }
 0x456   :  { %7664 = vmatpush.bf16.msra.mxu2 %v11831_v60  ;;  %7677 = vmatpush.bf16.msra.mxu3 %v12343_v28  ;;  %v12027_v60 = vor.u32 %v13469_v11, %v12024_v8  ;;  %v12539_v28 = vor.u32 %v13597_v12, %v12536_v9  ;;  %v13565_v46 = vld [vmem:[#allocation12 + $0xe8c] sm:$0xf]  ;;  %v11899_v54 = vor.u32 %v13437_v44, %v11896_v62  ;;  %v10942_v44 = vld [vmem:[#allocation12 + $0x310] sm:$0xf] }
 0x457   :  { %v12408_v47 = vld [vmem:[#allocation12 + $0xec8] sm:$0xf0]  ;;  %v13206_v62 = vld [vmem:[#allocation12 + $0x34c] sm:$0xf0] }
 0x458   :  { %7640 = vmatpush.bf16.msra.mxu0 %v10679_v36  ;;  %7653 = vmatpush.bf16.msra.mxu1 %v11191_v37  ;;  %v10875_v36 = vor.u32 %v13181_v16, %v10872_v21  ;;  %v11387_v37 = vor.u32 %v13309_v25, %v11384_v24  ;;  %v13277_v41 = vld [vmem:[#allocation12 + $0x58c] sm:$0xf]  ;;  %v12411_v52 = vor.u32 %v13565_v46, %v12408_v47  ;;  %v11454_v46 = vld [vmem:[#allocation12 + $0x710] sm:$0xf] }
 0x459   :  { %7617 = vmatmul.bf16.vlgmr.msrb.gmra.mxu2 %v14197_v56  ;;  %7630 = vmatmul.bf16.vlgmr.msrb.gmra.mxu3 %v14199_v58  ;;  %v11256_v51 = vld [vmem:[#allocation12 + $0x5c8] sm:$0xf0] }
 0x45a   :  { %7665 = vmatpush.bf16.msra.mxu2 %v11767_v42  ;;  %7678 = vmatpush.bf16.msra.mxu3 %v12279_v43  ;;  %v11963_v42 = vor.u32 %v13453_v34, %v11960_v33  ;;  %v12475_v43 = vor.u32 %v13581_v29, %v12472_v18  ;;  %v13549_v55 = vld [vmem:[#allocation12 + $0xe0c] sm:$0xf]  ;;  %v11259_v4 = vor.u32 %v13277_v41, %v11256_v51  ;;  %v11518_v29 = vld [vmem:[#allocation12 + $0x790] sm:$0xf] }
 0x45b   :  { %v12344_v3 = vld [vmem:[#allocation12 + $0xe48] sm:$0xf0]  ;;  %v13350_v18 = vld [vmem:[#allocation12 + $0x7cc] sm:$0xf0] }
 0x45c   :  { %7641 = vmatpush.bf16.msra.mxu0 %v10615_v63  ;;  %7654 = vmatpush.bf16.msra.mxu1 %v11127_v48  ;;  %v10811_v63 = vor.u32 %v13165_v22, %v10808_v23  ;;  %v11323_v48 = vor.u32 %v13293_v40, %v11320_v27  ;;  %v13405_v6 = vld [vmem:[#allocation12 + $0x98c] sm:$0xf] }
 0x45d   :  { %v11768_v50 = vld [vmem:[#allocation12 + $0x9c8] sm:$0xf0] }
 0x45e   :  { %7666 = vmatpush.bf16.msra.mxu2 %v11703_v53  ;;  %7679 = vmatpush.bf16.msra.mxu3 %v12215_v45  ;;  %v13421_v53 = vld [vmem:[#allocation12 + $0xa0c] sm:$0xf]  ;;  %v11771_v11 = vor.u32 %v13405_v6, %v11768_v50  ;;  %v11966_v6 = vld [vmem:[#allocation12 + $0xb10] sm:$0xf] }
 0x45f   :  { %v11832_v45 = vld [vmem:[#allocation12 + $0xa48] sm:$0xf0]  ;;  %v13462_v50 = vld [vmem:[#allocation12 + $0xb4c] sm:$0xf0] }
 0x460   :  { %7642 = vmatpush.bf16.msra.mxu0 %v10551_v13  ;;  %7655 = vmatpush.bf16.msra.mxu1 %v11063_v20  ;;  %v13261_v13 = vld [vmem:[#allocation12 + $0x50c] sm:$0xf] }
 0x461   :  { %v11192_v20 = vld [vmem:[#allocation12 + $0x548] sm:$0xf0] }
 0x462   :  { %7667 = vmatpush.bf16.msra.mxu2 %v11639_v2  ;;  %7680 = vmatpush.bf16.msra.mxu3 %v12151_v0  ;;  %v13533_v26 = vld [vmem:[#allocation12 + $0xd8c] sm:$0xf]  ;;  %v10683_v0 = vor.u32 %v13133_v59, %v10680_v1  ;;  %v11195_v30 = vor.u32 %v13261_v13, %v11192_v20  ;;  %v10878_v59 = vld [vmem:[#allocation12 + $0x290] sm:$0xf] }
 0x463   :  { %7643 = vmatmul.bf16.vlgmr.msra.gmra.mxu0 %v14191_v32  ;;  %7656 = vmatmul.bf16.vlgmr.msra.gmra.mxu1 %v14193_v35  ;;  %v12280_v2 = vld [vmem:[#allocation12 + $0xdc8] sm:$0xf0]  ;;  %v13190_v1 = vld [vmem:[#allocation12 + $0x2cc] sm:$0xf0] }
 0x464   :  { %7687 = vmatpush.bf16.msrb.mxu0 %v11003_v31  ;;  %7700 = vmatpush.bf16.msrb.mxu1 %v11515_v19  ;;  %v11835_v31 = vor.u32 %v13421_v53, %v11832_v45  ;;  %v12347_v19 = vor.u32 %v13549_v55, %v12344_v3  ;;  %v13117_v5 = vld [vmem:[#allocation12 + $0x8c] sm:$0xf]  ;;  %v12283_v8 = vor.u32 %v13533_v26, %v12280_v2  ;;  %v12542_v53 = vld [vmem:[#allocation12 + $0xf90] sm:$0xf] }
 0x465   :  { %v10616_v7 = vld [vmem:[#allocation12 + $0xc8] sm:$0xf0]  ;;  %v13606_v45 = vld [vmem:[#allocation12 + $0xfcc] sm:$0xf0]  ;;  %v10943_v55 = vor.u32 %v13206_v62, %v10942_v44 }
 0x466   :  { %7668 = vmatpush.bf16.msra.mxu2 %v11575_v39  ;;  %7681 = vmatpush.bf16.msra.mxu3 %v12087_v17  ;;  %v13389_v12 = vld [vmem:[#allocation12 + $0x90c] sm:$0xf]  ;;  %v10619_v16 = vor.u32 %v13117_v5, %v10616_v7  ;;  %v11131_v39 = vor.u32 %v13245_v38, %v11128_v10  ;;  %v12543_v20 = vor.u32 %v13606_v45, %v12542_v53  ;;  %v12478_v26 = vld [vmem:[#allocation12 + $0xf10] sm:$0xf] }
 0x467   :  { %v11704_v9 = vld [vmem:[#allocation12 + $0x948] sm:$0xf0]  ;;  %v13590_v2 = vld [vmem:[#allocation12 + $0xf4c] sm:$0xf0]  ;;  %v11967_v38 = vor.u32 %v13462_v50, %v11966_v6  ;;  %v13214_v6 = vld [vmem:[#allocation12 + $0x394] sm:$0xf] }
 0x468   :  { %7688 = vmatpush.bf16.msrb.mxu0 %v10939_v14  ;;  %7701 = vmatpush.bf16.msrb.mxu1 %v11451_v15  ;;  %v13517_v14 = vld [vmem:[#allocation12 + $0xd0c] sm:$0xf]  ;;  %v11707_v34 = vor.u32 %v13389_v12, %v11704_v9  ;;  %v10814_v5 = vld [vmem:[#allocation12 + $0x210] sm:$0xf]  ;;  %v12479_v10 = vor.u32 %v13590_v2, %v12478_v26  ;;  %v11008_v50 = vld [vmem:[#allocation12 + $0x3d0] sm:$0xf0] }
 0x469   :  { %7669 = vmatmul.bf16.vlgmr.msra.gmra.mxu2 %v14197_v56  ;;  %7682 = vmatmul.bf16.vlgmr.msra.gmra.mxu3 %v14199_v58  ;;  %v12216_v15 = vld [vmem:[#allocation12 + $0xd48] sm:$0xf0]  ;;  %v13174_v7 = vld [vmem:[#allocation12 + $0x24c] sm:$0xf0]  ;;  %v13342_v26 = vld [vmem:[#allocation12 + $0x794] sm:$0xf] }
 0x46a   :  { %7713 = vmatpush.bf16.msrb.mxu2 %v12027_v60  ;;  %7726 = vmatpush.bf16.msrb.mxu3 %v12539_v28  ;;  %v13101_v17 = vld [vmem:[#allocation12 + $0xc] sm:$0xf]  ;;  %v11006_v60 = vld [vmem:[#allocation12 + $0x390] sm:$0xf]  ;;  %v12219_v33 = vor.u32 %v13517_v14, %v12216_v15  ;;  %v11520_v2 = vld [vmem:[#allocation12 + $0x7d0] sm:$0xf0] }
 0x46b   :  { %v10552_v21 = vld [vmem:[#allocation12 + $0x48] sm:$0xf0]  ;;  %v13222_v28 = vld [vmem:[#allocation12 + $0x3cc] sm:$0xf0] }
 0x46c   :  { %7689 = vmatpush.bf16.msrb.mxu0 %v10875_v36  ;;  %7702 = vmatpush.bf16.msrb.mxu1 %v11387_v37  ;;  %v13229_v25 = vld [vmem:[#allocation12 + $0x40c] sm:$0xf]  ;;  %v10555_v40 = vor.u32 %v13101_v17, %v10552_v21  ;;  %v11902_v12 = vld [vmem:[#allocation12 + $0xa90] sm:$0xf] }
 0x46d   :  { %v11064_v24 = vld [vmem:[#allocation12 + $0x448] sm:$0xf0]  ;;  %v13446_v9 = vld [vmem:[#allocation12 + $0xacc] sm:$0xf0] }
 0x46e   :  { %7714 = vmatpush.bf16.msrb.mxu2 %v11963_v42  ;;  %7727 = vmatpush.bf16.msrb.mxu3 %v12475_v43  ;;  %v13373_v36 = vld [vmem:[#allocation12 + $0x88c] sm:$0xf]  ;;  %v11067_v27 = vor.u32 %v13229_v25, %v11064_v24  ;;  %v11007_v42 = vor.u32 %v13222_v28, %v11006_v60  ;;  %v11519_v43 = vor.u32 %v13350_v18, %v11518_v29  ;;  %v12414_v14 = vld [vmem:[#allocation12 + $0xe90] sm:$0xf] }
 0x46f   :  { %v11640_v37 = vld [vmem:[#allocation12 + $0x8c8] sm:$0xf0]  ;;  %v13574_v15 = vld [vmem:[#allocation12 + $0xecc] sm:$0xf0]  ;;  %v11903_v25 = vor.u32 %v13446_v9, %v11902_v12  ;;  %v13198_v12 = vld [vmem:[#allocation12 + $0x314] sm:$0xf] }
 0x470   :  { %7690 = vmatpush.bf16.msrb.mxu0 %v10811_v63  ;;  %7703 = vmatpush.bf16.msrb.mxu1 %v11323_v48  ;;  %v13501_v22 = vld [vmem:[#allocation12 + $0xc8c] sm:$0xf]  ;;  %v11643_v47 = vor.u32 %v13373_v36, %v11640_v37  ;;  %v13334_v48 = vld [vmem:[#allocation12 + $0x74c] sm:$0xf0]  ;;  %v12415_v24 = vor.u32 %v13574_v15, %v12414_v14  ;;  %v10944_v9 = vld [vmem:[#allocation12 + $0x350] sm:$0xf0] }
 0x471   :  { %v12152_v23 = vld [vmem:[#allocation12 + $0xcc8] sm:$0xf0]  ;;  %v11455_v3 = vor.u32 %v13334_v48, %v11454_v46  ;;  %v10750_v17 = vld [vmem:[#allocation12 + $0x190] sm:$0xf]  ;;  %v13326_v14 = vld [vmem:[#allocation12 + $0x714] sm:$0xf] }
 0x472   :  { %7715 = vmatpush.bf16.msrb.mxu2 %v11899_v54  ;;  %7728 = vmatpush.bf16.msrb.mxu3 %v12411_v52  ;;  %v12155_v63 = vor.u32 %v13501_v22, %v12152_v23  ;;  %v13485_v41 = vld [vmem:[#allocation12 + $0xc0c] sm:$0xf]  ;;  %v12030_v54 = vld [vmem:[#allocation12 + $0xb90] sm:$0xf] }
 0x473   :  { %v12088_v51 = vld [vmem:[#allocation12 + $0xc48] sm:$0xf0]  ;;  %v13478_v52 = vld [vmem:[#allocation12 + $0xbcc] sm:$0xf0] }
 0x474   :  { %7691 = vmatpush.bf16.msrb.mxu0 %v10747_v57  ;;  %7704 = vmatpush.bf16.msrb.mxu1 %v11259_v4  ;;  %v11579_v57 = vor.u32 %v13357_v49, %v11576_v61  ;;  %v12091_v4 = vor.u32 %v13485_v41, %v12088_v51  ;;  %v12031_v13 = vor.u32 %v13478_v52, %v12030_v54  ;;  %v13158_v21 = vld [vmem:[#allocation12 + $0x1cc] sm:$0xf0] }
 0x475   :  { %v11262_v60 = vld [vmem:[#allocation12 + $0x590] sm:$0xf]  ;;  %v10751_v36 = vor.u32 %v13158_v21, %v10750_v17 }
 0x476   :  { %7716 = vmatpush.bf16.msrb.mxu2 %v11835_v31  ;;  %7729 = vmatpush.bf16.msrb.mxu3 %v12347_v19  ;;  %v11390_v31 = vld [vmem:[#allocation12 + $0x690] sm:$0xf] }
 0x477   :  { %v13318_v19 = vld [vmem:[#allocation12 + $0x6cc] sm:$0xf0] }
 0x478   :  { %7692 = vmatpush.bf16.msrb.mxu0 %v10683_v0  ;;  %7705 = vmatpush.bf16.msrb.mxu1 %v11195_v30  ;;  %v10879_v0 = vor.u32 %v13190_v1, %v10878_v59  ;;  %v11391_v30 = vor.u32 %v13318_v19, %v11390_v31  ;;  %v13286_v28 = vld [vmem:[#allocation12 + $0x5cc] sm:$0xf0] }
 0x479   :  { %v12350_v29 = vld [vmem:[#allocation12 + $0xe10] sm:$0xf]  ;;  %v11263_v37 = vor.u32 %v13286_v28, %v11262_v60  ;;  %v13470_v60 = vld [vmem:[#allocation12 + $0xb94] sm:$0xf] }
 0x47a   :  { %7717 = vmatpush.bf16.msrb.mxu2 %v11771_v11  ;;  %7730 = vmatpush.bf16.msrb.mxu3 %v12283_v8  ;;  %v11326_v11 = vld [vmem:[#allocation12 + $0x610] sm:$0xf]  ;;  %v12032_v28 = vld [vmem:[#allocation12 + $0xbd0] sm:$0xf0] }
 0x47b   :  { %v13302_v8 = vld [vmem:[#allocation12 + $0x64c] sm:$0xf0] }
 0x47c   :  { %7693 = vmatpush.bf16.msrb.mxu0 %v10619_v16  ;;  %7706 = vmatpush.bf16.msrb.mxu1 %v11131_v39  ;;  %v10815_v16 = vor.u32 %v13174_v7, %v10814_v5  ;;  %v11327_v39 = vor.u32 %v13302_v8, %v11326_v11  ;;  %v13558_v18 = vld [vmem:[#allocation12 + $0xe4c] sm:$0xf0]  ;;  %v11011_v11 = vor.u32 %v13214_v6, %v11008_v50  ;;  %v13422_v6 = vld [vmem:[#allocation12 + $0xa14] sm:$0xf] }
 0x47d   :  { %v10686_v22 = vld [vmem:[#allocation12 + $0x110] sm:$0xf]  ;;  %v11523_v8 = vor.u32 %v13342_v26, %v11520_v2  ;;  %v11840_v50 = vld [vmem:[#allocation12 + $0xa50] sm:$0xf0] }
 0x47e   :  { %7718 = vmatpush.bf16.msrb.mxu2 %v11707_v34  ;;  %7731 = vmatpush.bf16.msrb.mxu3 %v12219_v33  ;;  %v11838_v34 = vld [vmem:[#allocation12 + $0xa10] sm:$0xf]  ;;  %v13550_v26 = vld [vmem:[#allocation12 + $0xe14] sm:$0xf] }
 0x47f   :  { %v13430_v33 = vld [vmem:[#allocation12 + $0xa4c] sm:$0xf0]  ;;  %v12352_v2 = vld [vmem:[#allocation12 + $0xe50] sm:$0xf0] }
 0x480   :  { %7694 = vmatpush.bf16.msrb.mxu0 %v10555_v40  ;;  %7707 = vmatpush.bf16.msrb.mxu1 %v11067_v27  ;;  %v13142_v23 = vld [vmem:[#allocation12 + $0x14c] sm:$0xf0]  ;;  %v11839_v40 = vor.u32 %v13430_v33, %v11838_v34  ;;  %v12351_v27 = vor.u32 %v13558_v18, %v12350_v29  ;;  %v13598_v34 = vld [vmem:[#allocation12 + $0xf94] sm:$0xf]  ;;  %v10947_v29 = vor.u32 %v13198_v12, %v10944_v9 }
 0x481   :  { %v11774_v44 = vld [vmem:[#allocation12 + $0x990] sm:$0xf]  ;;  %v12544_v33 = vld [vmem:[#allocation12 + $0xfd0] sm:$0xf0] }
 0x482   :  { %7719 = vmatpush.bf16.msrb.mxu2 %v11643_v47  ;;  %7732 = vmatpush.bf16.msrb.mxu3 %v12155_v63  ;;  %v13414_v62 = vld [vmem:[#allocation12 + $0x9cc] sm:$0xf0]  ;;  %v10687_v63 = vor.u32 %v13142_v23, %v10686_v22  ;;  %v13182_v22 = vld [vmem:[#allocation12 + $0x294] sm:$0xf] }
 0x483   :  { %7695 = vmatmul.bf16.vlgmr.msrb.gmra.mxu0 %v14191_v32  ;;  %7708 = vmatmul.bf16.vlgmr.msrb.gmra.mxu1 %v14193_v35  ;;  %v12286_v46 = vld [vmem:[#allocation12 + $0xd90] sm:$0xf]  ;;  %v11775_v41 = vor.u32 %v13414_v62, %v11774_v44  ;;  %v10880_v23 = vld [vmem:[#allocation12 + $0x2d0] sm:$0xf0] }
 0x484   :  { %7739 = vmatpush.bf16.msra.mxu0 %v11007_v42  ;;  %7752 = vmatpush.bf16.msra.mxu1 %v11519_v43  ;;  %v11198_v42 = vld [vmem:[#allocation12 + $0x510] sm:$0xf]  ;;  %v13454_v44 = vld [vmem:[#allocation12 + $0xb14] sm:$0xf] }
 0x485   :  { %v13270_v43 = vld [vmem:[#allocation12 + $0x54c] sm:$0xf0]  ;;  %v11968_v62 = vld [vmem:[#allocation12 + $0xb50] sm:$0xf0] }
 0x486   :  { %7720 = vmatpush.bf16.msrb.mxu2 %v11579_v57  ;;  %7733 = vmatpush.bf16.msrb.mxu3 %v12091_v4  ;;  %v13542_v47 = vld [vmem:[#allocation12 + $0xdcc] sm:$0xf0]  ;;  %v11199_v48 = vor.u32 %v13270_v43, %v11198_v42  ;;  %v13310_v42 = vld [vmem:[#allocation12 + $0x694] sm:$0xf] }
 0x487   :  { %v10622_v49 = vld [vmem:[#allocation12 + $0x90] sm:$0xf]  ;;  %v12287_v51 = vor.u32 %v13542_v47, %v12286_v46  ;;  %v11392_v43 = vld [vmem:[#allocation12 + $0x6d0] sm:$0xf0] }
 0x488   :  { %7740 = vmatpush.bf16.msra.mxu0 %v10943_v55  ;;  %7753 = vmatpush.bf16.msra.mxu1 %v11455_v3  ;;  %v13126_v61 = vld [vmem:[#allocation12 + $0xcc] sm:$0xf0]  ;;  %v13582_v46 = vld [vmem:[#allocation12 + $0xf14] sm:$0xf] }
 0x489   :  { %7721 = vmatmul.bf16.vlgmr.msrb.gmra.mxu2 %v14197_v56  ;;  %7734 = vmatmul.bf16.vlgmr.msrb.gmra.mxu3 %v14199_v58  ;;  %v11134_v54 = vld [vmem:[#allocation12 + $0x490] sm:$0xf]  ;;  %v10623_v57 = vor.u32 %v13126_v61, %v10622_v49  ;;  %v12480_v47 = vld [vmem:[#allocation12 + $0xf50] sm:$0xf0] }
 0x48a   :  { %7765 = vmatpush.bf16.msra.mxu2 %v12031_v13  ;;  %7778 = vmatpush.bf16.msra.mxu3 %v12543_v20  ;;  %v13254_v52 = vld [vmem:[#allocation12 + $0x4cc] sm:$0xf0]  ;;  %v13166_v49 = vld [vmem:[#allocation12 + $0x214] sm:$0xf] }
 0x48b   :  { %v11710_v53 = vld [vmem:[#allocation12 + $0x910] sm:$0xf]  ;;  %v11135_v4 = vor.u32 %v13254_v52, %v11134_v54  ;;  %v10816_v61 = vld [vmem:[#allocation12 + $0x250] sm:$0xf0] }
 0x48c   :  { %7741 = vmatpush.bf16.msra.mxu0 %v10879_v0  ;;  %7754 = vmatpush.bf16.msra.mxu1 %v11391_v30  ;;  %v13398_v45 = vld [vmem:[#allocation12 + $0x94c] sm:$0xf0]  ;;  %v13294_v54 = vld [vmem:[#allocation12 + $0x614] sm:$0xf] }
 0x48d   :  { %v12222_v55 = vld [vmem:[#allocation12 + $0xd10] sm:$0xf]  ;;  %v11711_v20 = vor.u32 %v13398_v45, %v11710_v53  ;;  %v11328_v52 = vld [vmem:[#allocation12 + $0x650] sm:$0xf0] }
 0x48e   :  { %7766 = vmatpush.bf16.msra.mxu2 %v11967_v38  ;;  %7779 = vmatpush.bf16.msra.mxu3 %v12479_v10  ;;  %v13526_v3 = vld [vmem:[#allocation12 + $0xd4c] sm:$0xf0]  ;;  %v13438_v53 = vld [vmem:[#allocation12 + $0xa94] sm:$0xf] }
 0x48f   :  { %v10558_v59 = vld [vmem:[#allocation12 + $0x10] sm:$0xf]  ;;  %v12223_v31 = vor.u32 %v13526_v3, %v12222_v55  ;;  %v11904_v45 = vld [vmem:[#allocation12 + $0xad0] sm:$0xf0] }
 0x490   :  { %7742 = vmatpush.bf16.msra.mxu0 %v10815_v16  ;;  %7755 = vmatpush.bf16.msra.mxu1 %v11327_v39  ;;  %v13110_v1 = vld [vmem:[#allocation12 + $0x4c] sm:$0xf0]  ;;  %v11456_v39 = vld [vmem:[#allocation12 + $0x750] sm:$0xf0] }
 0x491   :  { %v11070_v13 = vld [vmem:[#allocation12 + $0x410] sm:$0xf]  ;;  %v10559_v38 = vor.u32 %v13110_v1, %v10558_v59  ;;  %v11459_v18 = vor.u32 %v13326_v14, %v11456_v39  ;;  %v13566_v55 = vld [vmem:[#allocation12 + $0xe94] sm:$0xf] }
 0x492   :  { %7767 = vmatpush.bf16.msra.mxu2 %v11903_v25  ;;  %7780 = vmatpush.bf16.msra.mxu3 %v12415_v24  ;;  %v13238_v19 = vld [vmem:[#allocation12 + $0x44c] sm:$0xf0]  ;;  %v12416_v3 = vld [vmem:[#allocation12 + $0xed0] sm:$0xf0] }
 0x493   :  { %v11646_v0 = vld [vmem:[#allocation12 + $0x890] sm:$0xf]  ;;  %v11071_v10 = vor.u32 %v13238_v19, %v11070_v13  ;;  %v13150_v59 = vld [vmem:[#allocation12 + $0x194] sm:$0xf]  ;;  %v11907_v13 = vor.u32 %v13438_v53, %v11904_v45  ;;  %v13207_v45 = vld [vmem:[#allocation12 + $0x354] sm:$0xf0] }
 0x494   :  { %7743 = vmatpush.bf16.msra.mxu0 %v10751_v36  ;;  %7756 = vmatpush.bf16.msra.mxu1 %v11263_v37  ;;  %v13382_v30 = vld [vmem:[#allocation12 + $0x8cc] sm:$0xf0]  ;;  %v10752_v1 = vld [vmem:[#allocation12 + $0x1d0] sm:$0xf0] }
 0x495   :  { %v12158_v5 = vld [vmem:[#allocation12 + $0xc90] sm:$0xf]  ;;  %v11647_v15 = vor.u32 %v13382_v30, %v11646_v0  ;;  %v11264_v19 = vld [vmem:[#allocation12 + $0x5d0] sm:$0xf0]  ;;  %v10755_v0 = vor.u32 %v13150_v59, %v10752_v1 }
 0x496   :  { %7768 = vmatpush.bf16.msra.mxu2 %v11839_v40  ;;  %7781 = vmatpush.bf16.msra.mxu3 %v12351_v27  ;;  %v13510_v7 = vld [vmem:[#allocation12 + $0xccc] sm:$0xf0]  ;;  %v12035_v40 = vor.u32 %v13470_v60, %v12032_v28  ;;  %v12547_v27 = vor.u32 %v13598_v34, %v12544_v33  ;;  %v13406_v12 = vld [vmem:[#allocation12 + $0x994] sm:$0xf] }
 0x497   :  { %v12159_v16 = vor.u32 %v13510_v7, %v12158_v5  ;;  %v11582_v17 = vld [vmem:[#allocation12 + $0x810] sm:$0xf]  ;;  %v13134_v5 = vld [vmem:[#allocation12 + $0x114] sm:$0xf] }
 0x498   :  { %7744 = vmatpush.bf16.msra.mxu0 %v10687_v63  ;;  %7757 = vmatpush.bf16.msra.mxu1 %v11199_v48  ;;  %v13366_v21 = vld [vmem:[#allocation12 + $0x84c] sm:$0xf0]  ;;  %v10883_v63 = vor.u32 %v13182_v22, %v10880_v23  ;;  %v11395_v48 = vor.u32 %v13310_v42, %v11392_v43  ;;  %v10688_v7 = vld [vmem:[#allocation12 + $0x150] sm:$0xf0] }
 0x499   :  { %v12094_v25 = vld [vmem:[#allocation12 + $0xc10] sm:$0xf]  ;;  %v11583_v36 = vor.u32 %v13366_v21, %v11582_v17  ;;  %v11776_v9 = vld [vmem:[#allocation12 + $0x9d0] sm:$0xf0] }
 0x49a   :  { %7769 = vmatpush.bf16.msra.mxu2 %v11775_v41  ;;  %7782 = vmatpush.bf16.msra.mxu3 %v12287_v51  ;;  %v13494_v24 = vld [vmem:[#allocation12 + $0xc4c] sm:$0xf0]  ;;  %v11971_v41 = vor.u32 %v13454_v44, %v11968_v62  ;;  %v12483_v51 = vor.u32 %v13582_v46, %v12480_v47  ;;  %v13534_v14 = vld [vmem:[#allocation12 + $0xd94] sm:$0xf]  ;;  %v11014_v44 = vld [vmem:[#allocation12 + $0x398] sm:$0xf] }
 0x49b   :  { %v12095_v37 = vor.u32 %v13494_v24, %v12094_v25  ;;  %v13118_v17 = vld [vmem:[#allocation12 + $0x94] sm:$0xf]  ;;  %v11779_v25 = vor.u32 %v13406_v12, %v11776_v9  ;;  %v13223_v62 = vld [vmem:[#allocation12 + $0x3d4] sm:$0xf0] }
 0x49c   :  { %7745 = vmatpush.bf16.msra.mxu0 %v10623_v57  ;;  %7758 = vmatpush.bf16.msra.mxu1 %v11135_v4  ;;  %v10819_v57 = vor.u32 %v13166_v49, %v10816_v61  ;;  %v11331_v4 = vor.u32 %v13294_v54, %v11328_v52  ;;  %v10624_v21 = vld [vmem:[#allocation12 + $0xd0] sm:$0xf0]  ;;  %v11526_v46 = vld [vmem:[#allocation12 + $0x798] sm:$0xf]  ;;  %v11015_v52 = vor.u32 %v13223_v62, %v11014_v44 }
 0x49d   :  { %v13246_v60 = vld [vmem:[#allocation12 + $0x494] sm:$0xf]  ;;  %v13351_v47 = vld [vmem:[#allocation12 + $0x7d4] sm:$0xf0] }
 0x49e   :  { %7770 = vmatpush.bf16.msra.mxu2 %v11711_v20  ;;  %7783 = vmatpush.bf16.msra.mxu3 %v12223_v31  ;;  %v12419_v20 = vor.u32 %v13566_v55, %v12416_v3  ;;  %v13278_v31 = vld [vmem:[#allocation12 + $0x594] sm:$0xf]  ;;  %v10950_v54 = vld [vmem:[#allocation12 + $0x318] sm:$0xf]  ;;  %v11527_v53 = vor.u32 %v13351_v47, %v11526_v46 }
 0x49f   :  { %v11267_v30 = vor.u32 %v13278_v31, %v11264_v19  ;;  %v11136_v28 = vld [vmem:[#allocation12 + $0x4d0] sm:$0xf0]  ;;  %v11462_v55 = vld [vmem:[#allocation12 + $0x718] sm:$0xf] }
 0x4a0   :  { %7746 = vmatpush.bf16.msra.mxu0 %v10559_v38  ;;  %7759 = vmatpush.bf16.msra.mxu1 %v11071_v10  ;;  %v11843_v38 = vor.u32 %v13422_v6, %v11840_v50  ;;  %v12355_v10 = vor.u32 %v13550_v26, %v12352_v2  ;;  %v13390_v34 = vld [vmem:[#allocation12 + $0x914] sm:$0xf]  ;;  %v13335_v3 = vld [vmem:[#allocation12 + $0x754] sm:$0xf0]  ;;  %v14219_v26 = vld [vmem:[#allocation13] sm:$0xff]  ;;  %v10951_v2 = vor.u32 %v13207_v45, %v10950_v54 }
 0x4a1   :  { %v11712_v33 = vld [vmem:[#allocation12 + $0x950] sm:$0xf0]  ;;  %v12038_v31 = vld [vmem:[#allocation12 + $0xb98] sm:$0xf]  ;;  %v4939_v9 = vperm.slane %v14219_v26, 0 }
 0x4a2   :  { %7771 = vmatpush.bf16.msra.mxu2 %v11647_v15  ;;  %7784 = vmatpush.bf16.msra.mxu3 %v12159_v16  ;;  %v12288_v15 = vld [vmem:[#allocation12 + $0xdd0] sm:$0xf0]  ;;  %v10691_v16 = vor.u32 %v13134_v5, %v10688_v7  ;;  %v13479_v19 = vld [vmem:[#allocation12 + $0xbd4] sm:$0xf0] }
 0x4a3   :  { %7747 = vmatmul.bf16.vlgmr.msra.gmra.mxu0 %v14191_v32  ;;  %7760 = vmatmul.bf16.vlgmr.msra.gmra.mxu1 %v14193_v35  ;;  %v12291_v24 = vor.u32 %v13534_v14, %v12288_v15  ;;  %v13102_v22 = vld [vmem:[#allocation12 + $0x14] sm:$0xf]  ;;  %v12550_v6 = vld [vmem:[#allocation12 + $0xf98] sm:$0xf] }
 0x4a4   :  { %7791 = vmatpush.bf16.msrb.mxu0 %v11011_v11  ;;  %7804 = vmatpush.bf16.msrb.mxu1 %v11523_v8  ;;  %v13262_v11 = vld [vmem:[#allocation12 + $0x514] sm:$0xf]  ;;  %v13607_v50 = vld [vmem:[#allocation12 + $0xfd4] sm:$0xf0] }
 0x4a5   :  { %v11200_v8 = vld [vmem:[#allocation12 + $0x550] sm:$0xf0]  ;;  %v10886_v7 = vld [vmem:[#allocation12 + $0x298] sm:$0xf] }
 0x4a6   :  { %7772 = vmatpush.bf16.msra.mxu2 %v11583_v36  ;;  %7785 = vmatpush.bf16.msra.mxu3 %v12095_v37  ;;  %v11203_v39 = vor.u32 %v13262_v11, %v11200_v8  ;;  %v10627_v36 = vor.u32 %v13118_v17, %v10624_v21  ;;  %v11139_v37 = vor.u32 %v13246_v60, %v11136_v28  ;;  %v10560_v23 = vld [vmem:[#allocation12 + $0x50] sm:$0xf0]  ;;  %v13319_v12 = vld [vmem:[#allocation12 + $0x6d4] sm:$0xf0] }
 0x4a7   :  { %v11072_v43 = vld [vmem:[#allocation12 + $0x450] sm:$0xf0]  ;;  %v12039_v11 = vor.u32 %v13479_v19, %v12038_v31  ;;  %v12551_v8 = vor.u32 %v13607_v50, %v12550_v6  ;;  %v11974_v14 = vld [vmem:[#allocation12 + $0xb18] sm:$0xf] }
 0x4a8   :  { %7792 = vmatpush.bf16.msrb.mxu0 %v10947_v29  ;;  %7805 = vmatpush.bf16.msrb.mxu1 %v11459_v18  ;;  %v13518_v29 = vld [vmem:[#allocation12 + $0xd14] sm:$0xf]  ;;  %v13463_v15 = vld [vmem:[#allocation12 + $0xb54] sm:$0xf0] }
 0x4a9   :  { %7773 = vmatmul.bf16.vlgmr.msra.gmra.mxu2 %v14197_v56  ;;  %7786 = vmatmul.bf16.vlgmr.msra.gmra.mxu3 %v14199_v58  ;;  %v12224_v18 = vld [vmem:[#allocation12 + $0xd50] sm:$0xf0]  ;;  %v10822_v60 = vld [vmem:[#allocation12 + $0x218] sm:$0xf] }
 0x4aa   :  { %7817 = vmatpush.bf16.msrb.mxu2 %v12035_v40  ;;  %7830 = vmatpush.bf16.msrb.mxu3 %v12547_v27  ;;  %v13230_v40 = vld [vmem:[#allocation12 + $0x414] sm:$0xf]  ;;  %v11715_v27 = vor.u32 %v13390_v34, %v11712_v33  ;;  %v12227_v42 = vor.u32 %v13518_v29, %v12224_v18  ;;  %v13175_v28 = vld [vmem:[#allocation12 + $0x254] sm:$0xf0]  ;;  %v11975_v33 = vor.u32 %v13463_v15, %v11974_v14  ;;  %v4940_v14 = vperm.slane %v14219_v26, 1 }
 0x4ab   :  { %v13502_v49 = vld [vmem:[#allocation12 + $0xc94] sm:$0xf]  ;;  %v11334_v18 = vld [vmem:[#allocation12 + $0x618] sm:$0xf] }
 0x4ac   :  { %7793 = vmatpush.bf16.msrb.mxu0 %v10883_v63  ;;  %7806 = vmatpush.bf16.msrb.mxu1 %v11395_v48  ;;  %v13374_v63 = vld [vmem:[#allocation12 + $0x894] sm:$0xf]  ;;  %v10758_v44 = vld [vmem:[#allocation12 + $0x198] sm:$0xf] }
 0x4ad   :  { %v11648_v48 = vld [vmem:[#allocation12 + $0x8d0] sm:$0xf0]  ;;  %v13159_v62 = vld [vmem:[#allocation12 + $0x1d4] sm:$0xf0] }
 0x4ae   :  { %7818 = vmatpush.bf16.msrb.mxu2 %v11971_v41  ;;  %7831 = vmatpush.bf16.msrb.mxu3 %v12483_v51  ;;  %v12160_v61 = vld [vmem:[#allocation12 + $0xcd0] sm:$0xf0]  ;;  %v10563_v41 = vor.u32 %v13102_v22, %v10560_v23  ;;  %v11075_v51 = vor.u32 %v13230_v40, %v11072_v43  ;;  %v13447_v22 = vld [vmem:[#allocation12 + $0xad4] sm:$0xf0]  ;;  %v10759_v54 = vor.u32 %v13159_v62, %v10758_v44 }
 0x4af   :  { %v13358_v59 = vld [vmem:[#allocation12 + $0x814] sm:$0xf]  ;;  %v12422_v23 = vld [vmem:[#allocation12 + $0xe98] sm:$0xf] }
 0x4b0   :  { %7794 = vmatpush.bf16.msrb.mxu0 %v10819_v57  ;;  %7807 = vmatpush.bf16.msrb.mxu1 %v11331_v4  ;;  %v11651_v57 = vor.u32 %v13374_v63, %v11648_v48  ;;  %v12163_v4 = vor.u32 %v13502_v49, %v12160_v61  ;;  %v11584_v1 = vld [vmem:[#allocation12 + $0x850] sm:$0xf0]  ;;  %v13575_v40 = vld [vmem:[#allocation12 + $0xed4] sm:$0xf0] }
 0x4b1   :  { %v12423_v47 = vor.u32 %v13575_v40, %v12422_v23  ;;  %v11270_v63 = vld [vmem:[#allocation12 + $0x598] sm:$0xf]  ;;  %v13343_v23 = vld [vmem:[#allocation12 + $0x79c] sm:$0xf] }
 0x4b2   :  { %7819 = vmatpush.bf16.msrb.mxu2 %v11907_v13  ;;  %7832 = vmatpush.bf16.msrb.mxu3 %v12419_v20  ;;  %v13486_v13 = vld [vmem:[#allocation12 + $0xc14] sm:$0xf]  ;;  %v13287_v48 = vld [vmem:[#allocation12 + $0x5d4] sm:$0xf0]  ;;  %v11528_v40 = vld [vmem:[#allocation12 + $0x7d8] sm:$0xf0] }
 0x4b3   :  { %v12096_v20 = vld [vmem:[#allocation12 + $0xc50] sm:$0xf0]  ;;  %v11846_v49 = vld [vmem:[#allocation12 + $0xa18] sm:$0xf] }
 0x4b4   :  { %7795 = vmatpush.bf16.msrb.mxu0 %v10755_v0  ;;  %7808 = vmatpush.bf16.msrb.mxu1 %v11267_v30  ;;  %v11463_v0 = vor.u32 %v13335_v3, %v11462_v55  ;;  %v11587_v30 = vor.u32 %v13358_v59, %v11584_v1  ;;  %v12099_v5 = vor.u32 %v13486_v13, %v12096_v20  ;;  %v13431_v61 = vld [vmem:[#allocation12 + $0xa54] sm:$0xf0] }
 0x4b5   :  { %v10694_v55 = vld [vmem:[#allocation12 + $0x118] sm:$0xf] }
 0x4b6   :  { %7820 = vmatpush.bf16.msrb.mxu2 %v11843_v38  ;;  %7833 = vmatpush.bf16.msrb.mxu3 %v12355_v10  ;;  %v13191_v38 = vld [vmem:[#allocation12 + $0x2d4] sm:$0xf0] }
 0x4b7   :  { %v11398_v10 = vld [vmem:[#allocation12 + $0x698] sm:$0xf]  ;;  %v10887_v17 = vor.u32 %v13191_v38, %v10886_v7 }
 0x4b8   :  { %7796 = vmatpush.bf16.msrb.mxu0 %v10691_v16  ;;  %7809 = vmatpush.bf16.msrb.mxu1 %v11203_v39  ;;  %v12486_v16 = vld [vmem:[#allocation12 + $0xf18] sm:$0xf]  ;;  %v11399_v21 = vor.u32 %v13319_v12, %v11398_v10 }
 0x4b9   :  { %v13591_v39 = vld [vmem:[#allocation12 + $0xf54] sm:$0xf0] }
 0x4ba   :  { %7821 = vmatpush.bf16.msrb.mxu2 %v11779_v25  ;;  %7834 = vmatpush.bf16.msrb.mxu3 %v12291_v24  ;;  %v12487_v29 = vor.u32 %v13591_v39, %v12486_v16  ;;  %v13143_v3 = vld [vmem:[#allocation12 + $0x154] sm:$0xf0] }
 0x4bb   :  { %v11206_v59 = vld [vmem:[#allocation12 + $0x518] sm:$0xf]  ;;  %v10695_v6 = vor.u32 %v13143_v3, %v10694_v55 }
 0x4bc   :  { %7797 = vmatpush.bf16.msrb.mxu0 %v10627_v36  ;;  %7810 = vmatpush.bf16.msrb.mxu1 %v11139_v37  ;;  %v13303_v36 = vld [vmem:[#allocation12 + $0x654] sm:$0xf0] }
 0x4bd   :  { %v11910_v37 = vld [vmem:[#allocation12 + $0xa98] sm:$0xf]  ;;  %v11335_v43 = vor.u32 %v13303_v36, %v11334_v18  ;;  %v13215_v36 = vld [vmem:[#allocation12 + $0x39c] sm:$0xf] }
 0x4be   :  { %7822 = vmatpush.bf16.msrb.mxu2 %v11715_v27  ;;  %7835 = vmatpush.bf16.msrb.mxu3 %v12227_v42  ;;  %v10823_v42 = vor.u32 %v13175_v28, %v10822_v60  ;;  %v11911_v46 = vor.u32 %v13447_v22, %v11910_v37  ;;  %v13271_v1 = vld [vmem:[#allocation12 + $0x554] sm:$0xf0]  ;;  %v11016_v37 = vld [vmem:[#allocation12 + $0x3d8] sm:$0xf0] }
 0x4bf   :  { %v7540_v25 = vpop.f32.mrf.mxu0  ;;  %v7553_v24 = vpop.f32.mrf.mxu1  ;;  %v11782_v13 = vld [vmem:[#allocation12 + $0x998] sm:$0xf]  ;;  %v11207_v50 = vor.u32 %v13271_v1, %v11206_v59  ;;  %v13471_v59 = vld [vmem:[#allocation12 + $0xb9c] sm:$0xf] }
 0x4c0   :  { %7798 = vmatpush.bf16.msrb.mxu0 %v10563_v41  ;;  %7811 = vmatpush.bf16.msrb.mxu1 %v11075_v51  ;;  %v7541_v34 = vadd.f32 %v7540_v25, %v4939_v9  ;;  %v12358_v41 = vld [vmem:[#allocation12 + $0xe18] sm:$0xf]  ;;  %v12040_v1 = vld [vmem:[#allocation12 + $0xbd8] sm:$0xf0] }
 0x4c1   :  { %v13559_v51 = vld [vmem:[#allocation12 + $0xe54] sm:$0xf0] }
 0x4c2   :  { %7823 = vmatpush.bf16.msrb.mxu2 %v11651_v57  ;;  %7836 = vmatpush.bf16.msrb.mxu3 %v12163_v4  ;;  %v7554_v27 = vadd.f32 %v7553_v24, %v7541_v34  ;;  %v11847_v57 = vor.u32 %v13431_v61, %v11846_v49  ;;  %v12359_v4 = vor.u32 %v13559_v51, %v12358_v41  ;;  %v13415_v20 = vld [vmem:[#allocation12 + $0x9d4] sm:$0xf0]  ;;  %v13199_v41 = vld [vmem:[#allocation12 + $0x31c] sm:$0xf] }
 0x4c3   :  { %7799 = vmatmul.bf16.vlgmr.msrb.gmra.mxu0 %v14191_v32  ;;  %7812 = vmatmul.bf16.vlgmr.msrb.gmra.mxu1 %v14193_v35  ;;  %v12294_v31 = vld [vmem:[#allocation12 + $0xd98] sm:$0xf]  ;;  %v11783_v38 = vor.u32 %v13415_v20, %v11782_v13  ;;  %v11019_v49 = vor.u32 %v13215_v36, %v11016_v37  ;;  %v11531_v61 = vor.u32 %v13343_v23, %v11528_v40  ;;  %v10952_v51 = vld [vmem:[#allocation12 + $0x358] sm:$0xf0] }
 0x4c4   :  { %7843 = vmatpush.bf16.msra.mxu0 %v11015_v52  ;;  %7856 = vmatpush.bf16.msra.mxu1 %v11527_v53  ;;  %v11271_v52 = vor.u32 %v13287_v48, %v11270_v63  ;;  %v13543_v19 = vld [vmem:[#allocation12 + $0xdd4] sm:$0xf0]  ;;  %v13599_v13 = vld [vmem:[#allocation12 + $0xf9c] sm:$0xf] }
 0x4c5   :  { %v12295_v10 = vor.u32 %v13543_v19, %v12294_v31  ;;  %v13399_v12 = vld [vmem:[#allocation12 + $0x954] sm:$0xf0]  ;;  %v12552_v20 = vld [vmem:[#allocation12 + $0xfd8] sm:$0xf0] }
 0x4c6   :  { %7824 = vmatpush.bf16.msrb.mxu2 %v11587_v30  ;;  %7837 = vmatpush.bf16.msrb.mxu3 %v12099_v5  ;;  %v11142_v30 = vld [vmem:[#allocation12 + $0x498] sm:$0xf]  ;;  %v13439_v36 = vld [vmem:[#allocation12 + $0xa9c] sm:$0xf] }
 0x4c7   :  { %v7542_v53 = vpop.f32.mrf.mxu0  ;;  %v7555_v45 = vpop.f32.mrf.mxu1  ;;  %v12230_v15 = vld [vmem:[#allocation12 + $0xd18] sm:$0xf]  ;;  %v13567_v23 = vld [vmem:[#allocation12 + $0xe9c] sm:$0xf] }
 0x4c8   :  { %7844 = vmatpush.bf16.msra.mxu0 %v10951_v2  ;;  %7857 = vmatpush.bf16.msra.mxu1 %v11463_v0  ;;  %v10630_v2 = vld [vmem:[#allocation12 + $0x98] sm:$0xf]  ;;  %v11464_v45 = vld [vmem:[#allocation12 + $0x758] sm:$0xf0] }
 0x4c9   :  { %7825 = vmatmul.bf16.vlgmr.msrb.gmra.mxu2 %v14197_v56  ;;  %7838 = vmatmul.bf16.vlgmr.msrb.gmra.mxu3 %v14199_v58  ;;  %v13127_v0 = vld [vmem:[#allocation12 + $0xd4] sm:$0xf0]  ;;  %v12424_v40 = vld [vmem:[#allocation12 + $0xed8] sm:$0xf0] }
 0x4ca   :  { %7869 = vmatpush.bf16.msra.mxu2 %v12039_v11  ;;  %7882 = vmatpush.bf16.msra.mxu3 %v12551_v8  ;;  %v13255_v11 = vld [vmem:[#allocation12 + $0x4d4] sm:$0xf0] }
 0x4cb   :  { %v11718_v8 = vld [vmem:[#allocation12 + $0x918] sm:$0xf] }
 0x4cc   :  { %7845 = vmatpush.bf16.msra.mxu0 %v10887_v17  ;;  %7858 = vmatpush.bf16.msra.mxu1 %v11399_v21  ;;  %v7566_v5 = vpop.f32.mrf.mxu2  ;;  %v7579_v7 = vpop.f32.mrf.mxu3  ;;  %v13527_v16 = vld [vmem:[#allocation12 + $0xd54] sm:$0xf0]  ;;  %v10631_v17 = vor.u32 %v13127_v0, %v10630_v2  ;;  %v11143_v21 = vor.u32 %v13255_v11, %v11142_v30  ;;  %v13183_v30 = vld [vmem:[#allocation12 + $0x29c] sm:$0xf] }
 0x4cd   :  { %v7567_v9 = vadd.f32 %v7566_v5, %v7554_v27  ;;  %v10566_v25 = vld [vmem:[#allocation12 + $0x18] sm:$0xf]  ;;  %v10888_v5 = vld [vmem:[#allocation12 + $0x2d8] sm:$0xf0] }
 0x4ce   :  { %7870 = vmatpush.bf16.msra.mxu2 %v11975_v33  ;;  %7883 = vmatpush.bf16.msra.mxu3 %v12487_v29  ;;  %v13111_v24 = vld [vmem:[#allocation12 + $0x54] sm:$0xf0]  ;;  %v11719_v33 = vor.u32 %v13399_v12, %v11718_v8  ;;  %v12231_v29 = vor.u32 %v13527_v16, %v12230_v15  ;;  %v11400_v11 = vld [vmem:[#allocation12 + $0x6d8] sm:$0xf0] }
 0x4cf   :  { %v14227_v39 = vadd.f32 %v7579_v7, %v7567_v9  ;;  %v11078_v60 = vld [vmem:[#allocation12 + $0x418] sm:$0xf]  ;;  %v12043_v7 = vor.u32 %v13471_v59, %v12040_v1  ;;  %v13455_v8 = vld [vmem:[#allocation12 + $0xb1c] sm:$0xf] }
 0x4d0   :  { %7846 = vmatpush.bf16.msra.mxu0 %v10823_v42  ;;  %7859 = vmatpush.bf16.msra.mxu1 %v11335_v43  ;;  %v7592_v28 = vpop.f32.mrf.mxu0  ;;  %v7605_v34 = vpop.f32.mrf.mxu1  ;;  %v13239_v18 = vld [vmem:[#allocation12 + $0x454] sm:$0xf0]  ;;  %v11976_v12 = vld [vmem:[#allocation12 + $0xb58] sm:$0xf0] }
 0x4d1   :  { %v7593_v22 = vadd.f32 %v7592_v28, %v4940_v14  ;;  %v11654_v27 = vld [vmem:[#allocation12 + $0x898] sm:$0xf]  ;;  %v13583_v9 = vld [vmem:[#allocation12 + $0xf1c] sm:$0xf] }
 0x4d2   :  { %7871 = vmatpush.bf16.msra.mxu2 %v11911_v46  ;;  %7884 = vmatpush.bf16.msra.mxu3 %v12423_v47  ;;  %v13383_v42 = vld [vmem:[#allocation12 + $0x8d4] sm:$0xf0]  ;;  %v10567_v46 = vor.u32 %v13111_v24, %v10566_v25  ;;  %v11079_v47 = vor.u32 %v13239_v18, %v11078_v60  ;;  %v12488_v14 = vld [vmem:[#allocation12 + $0xf58] sm:$0xf0]  ;;  %v4941_v24 = vperm.slane %v14219_v26, 2 }
 0x4d3   :  { %v12166_v43 = vld [vmem:[#allocation12 + $0xc98] sm:$0xf]  ;;  %v7606_v62 = vadd.f32 %v7605_v34, %v7593_v22  ;;  %v13167_v60 = vld [vmem:[#allocation12 + $0x21c] sm:$0xf]  ;;  %v11979_v34 = vor.u32 %v13455_v8, %v11976_v12 }
 0x4d4   :  { %7847 = vmatpush.bf16.msra.mxu0 %v10759_v54  ;;  %7860 = vmatpush.bf16.msra.mxu1 %v11271_v52  ;;  %v13511_v44 = vld [vmem:[#allocation12 + $0xcd4] sm:$0xf0]  ;;  %v7568_v63 = vpop.f32.mrf.mxu2  ;;  %v7581_v48 = vpop.f32.mrf.mxu3  ;;  %v13327_v54 = vld [vmem:[#allocation12 + $0x71c] sm:$0xf]  ;;  %v11655_v52 = vor.u32 %v13383_v42, %v11654_v27 }
 0x4d5   :  { %v12167_v53 = vor.u32 %v13511_v44, %v12166_v43  ;;  %v11590_v55 = vld [vmem:[#allocation12 + $0x818] sm:$0xf]  ;;  %v10824_v28 = vld [vmem:[#allocation12 + $0x258] sm:$0xf0]  ;;  %v12427_v48 = vor.u32 %v13567_v23, %v12424_v40  ;;  %v11022_v23 = vld [vmem:[#allocation12 + $0x3a0] sm:$0xf] }
 0x4d6   :  { %7872 = vmatpush.bf16.msra.mxu2 %v11847_v57  ;;  %7885 = vmatpush.bf16.msra.mxu3 %v12359_v4  ;;  %v13367_v3 = vld [vmem:[#allocation12 + $0x854] sm:$0xf0]  ;;  %v11336_v18 = vld [vmem:[#allocation12 + $0x658] sm:$0xf0]  ;;  %v10827_v44 = vor.u32 %v13167_v60, %v10824_v28  ;;  %v13224_v40 = vld [vmem:[#allocation12 + $0x3dc] sm:$0xf0] }
 0x4d7   :  { %v12102_v57 = vld [vmem:[#allocation12 + $0xc18] sm:$0xf]  ;;  %v11591_v2 = vor.u32 %v13367_v3, %v11590_v55  ;;  %v11912_v22 = vld [vmem:[#allocation12 + $0xad8] sm:$0xf0] }
 0x4d8   :  { %7848 = vmatpush.bf16.msra.mxu0 %v10695_v6  ;;  %7861 = vmatpush.bf16.msra.mxu1 %v11207_v50  ;;  %v13495_v4 = vld [vmem:[#allocation12 + $0xc54] sm:$0xf0]  ;;  %v7594_v31 = vpop.f32.mrf.mxu0  ;;  %v7607_v19 = vpop.f32.mrf.mxu1  ;;  %v10955_v6 = vor.u32 %v13199_v41, %v10952_v51  ;;  %v11467_v50 = vor.u32 %v13327_v54, %v11464_v45  ;;  %v11915_v63 = vor.u32 %v13439_v36, %v11912_v22  ;;  %v13423_v41 = vld [vmem:[#allocation12 + $0xa1c] sm:$0xf] }
 0x4d9   :  { %v12103_v0 = vor.u32 %v13495_v4, %v12102_v57  ;;  %v11848_v54 = vld [vmem:[#allocation12 + $0xa58] sm:$0xf0] }
 0x4da   :  { %7873 = vmatpush.bf16.msra.mxu2 %v11783_v38  ;;  %7886 = vmatpush.bf16.msra.mxu3 %v12295_v10  ;;  %v12555_v38 = vor.u32 %v13599_v13, %v12552_v20  ;;  %v13311_v10 = vld [vmem:[#allocation12 + $0x69c] sm:$0xf]  ;;  %v11851_v1 = vor.u32 %v13423_v41, %v11848_v54  ;;  %v10958_v41 = vld [vmem:[#allocation12 + $0x320] sm:$0xf] }
 0x4db   :  { %v11403_v25 = vor.u32 %v13311_v10, %v11400_v11  ;;  %v13135_v4 = vld [vmem:[#allocation12 + $0x11c] sm:$0xf]  ;;  %v11470_v54 = vld [vmem:[#allocation12 + $0x720] sm:$0xf] }
 0x4dc   :  { %7849 = vmatpush.bf16.msra.mxu0 %v10631_v17  ;;  %7862 = vmatpush.bf16.msra.mxu1 %v11143_v21  ;;  %v7618_v15 = vpop.f32.mrf.mxu2  ;;  %v7631_v16 = vpop.f32.mrf.mxu3  ;;  %v10891_v21 = vor.u32 %v13183_v30, %v10888_v5  ;;  %v10696_v59 = vld [vmem:[#allocation12 + $0x158] sm:$0xf0] }
 0x4dd   :  { %v7619_v17 = vadd.f32 %v7618_v15, %v7606_v62  ;;  %v13263_v20 = vld [vmem:[#allocation12 + $0x51c] sm:$0xf]  ;;  %v10699_v5 = vor.u32 %v13135_v4, %v10696_v59  ;;  %v12046_v59 = vld [vmem:[#allocation12 + $0xba0] sm:$0xf] }
 0x4de   :  { %7874 = vmatpush.bf16.msra.mxu2 %v11719_v33  ;;  %7887 = vmatpush.bf16.msra.mxu3 %v12231_v29  ;;  %v12491_v33 = vor.u32 %v13583_v9, %v12488_v14  ;;  %v13295_v29 = vld [vmem:[#allocation12 + $0x61c] sm:$0xf] }
 0x4df   :  { %v14232_v37 = vadd.f32 %v7631_v16, %v7619_v17  ;;  %v11339_v62 = vor.u32 %v13295_v29, %v11336_v18  ;;  %v11208_v31 = vld [vmem:[#allocation12 + $0x558] sm:$0xf0] }
 0x4e0   :  { %7850 = vmatpush.bf16.msra.mxu0 %v10567_v46  ;;  %7863 = vmatpush.bf16.msra.mxu1 %v11079_v47  ;;  %v7644_v27 = vpop.f32.mrf.mxu0  ;;  %v7657_v42 = vpop.f32.mrf.mxu1  ;;  %v13151_v46 = vld [vmem:[#allocation12 + $0x19c] sm:$0xf] }
 0x4e1   :  { %v7645_v43 = vadd.f32 %v7644_v27, %v4941_v24  ;;  %v10760_v47 = vld [vmem:[#allocation12 + $0x1d8] sm:$0xf0]  ;;  %v11534_v27 = vld [vmem:[#allocation12 + $0x7a0] sm:$0xf] }
 0x4e2   :  { %7875 = vmatpush.bf16.msra.mxu2 %v11655_v52  ;;  %7888 = vmatpush.bf16.msra.mxu3 %v12167_v53  ;;  %v13551_v52 = vld [vmem:[#allocation12 + $0xe1c] sm:$0xf]  ;;  %v10763_v3 = vor.u32 %v13151_v46, %v10760_v47 }
 0x4e3   :  { %7851 = vmatmul.bf16.vlgmr.msra.gmra.mxu0 %v14191_v32  ;;  %7864 = vmatmul.bf16.vlgmr.msra.gmra.mxu1 %v14193_v35  ;;  %v7658_v51 = vadd.f32 %v7657_v42, %v7645_v43  ;;  %v12360_v53 = vld [vmem:[#allocation12 + $0xe58] sm:$0xf0]  ;;  %v13352_v42 = vld [vmem:[#allocation12 + $0x7dc] sm:$0xf0] }
 0x4e4   :  { %7895 = vmatpush.bf16.msrb.mxu0 %v11019_v49  ;;  %7908 = vmatpush.bf16.msrb.mxu1 %v11531_v61  ;;  %v13279_v49 = vld [vmem:[#allocation12 + $0x59c] sm:$0xf]  ;;  %v7620_v45 = vpop.f32.mrf.mxu2  ;;  %v7633_v55 = vpop.f32.mrf.mxu3  ;;  %v12363_v13 = vor.u32 %v13551_v52, %v12360_v53 }
 0x4e5   :  { %v11272_v61 = vld [vmem:[#allocation12 + $0x5d8] sm:$0xf0]  ;;  %v13336_v45 = vld [vmem:[#allocation12 + $0x75c] sm:$0xf0] }
 0x4e6   :  { %7876 = vmatpush.bf16.msra.mxu2 %v11591_v2  ;;  %7889 = vmatpush.bf16.msra.mxu3 %v12103_v0  ;;  %v11275_v57 = vor.u32 %v13279_v49, %v11272_v61  ;;  %v13407_v19 = vld [vmem:[#allocation12 + $0x99c] sm:$0xf]  ;;  %v11023_v49 = vor.u32 %v13224_v40, %v11022_v23  ;;  %v11535_v61 = vor.u32 %v13352_v42, %v11534_v27  ;;  %v13576_v23 = vld [vmem:[#allocation12 + $0xedc] sm:$0xf0] }
 0x4e7   :  { %v12296_v2 = vld [vmem:[#allocation12 + $0xdd8] sm:$0xf0] }
 0x4e8   :  { %7896 = vmatpush.bf16.msrb.mxu0 %v10955_v6  ;;  %7909 = vmatpush.bf16.msrb.mxu1 %v11467_v50  ;;  %v11784_v6 = vld [vmem:[#allocation12 + $0x9d8] sm:$0xf0]  ;;  %v7646_v0 = vpop.f32.mrf.mxu0  ;;  %v7659_v30 = vpop.f32.mrf.mxu1 }
 0x4e9   :  { %7877 = vmatmul.bf16.vlgmr.msra.gmra.mxu2 %v14197_v56  ;;  %7890 = vmatmul.bf16.vlgmr.msra.gmra.mxu3 %v14199_v58  ;;  %v13535_v50 = vld [vmem:[#allocation12 + $0xd9c] sm:$0xf]  ;;  %v11787_v11 = vor.u32 %v13407_v19, %v11784_v6  ;;  %v13608_v19 = vld [vmem:[#allocation12 + $0xfdc] sm:$0xf0] }
 0x4ea   :  { %7921 = vmatpush.bf16.msrb.mxu2 %v12043_v7  ;;  %7934 = vmatpush.bf16.msrb.mxu3 %v12555_v38  ;;  %v11211_v7 = vor.u32 %v13263_v20, %v11208_v31  ;;  %v13119_v38 = vld [vmem:[#allocation12 + $0x9c] sm:$0xf]  ;;  %v12299_v8 = vor.u32 %v13535_v50, %v12296_v2  ;;  %v13480_v20 = vld [vmem:[#allocation12 + $0xbdc] sm:$0xf0]  ;;  %v11471_v50 = vor.u32 %v13336_v45, %v11470_v54 }
 0x4eb   :  { %v10632_v10 = vld [vmem:[#allocation12 + $0xd8] sm:$0xf0]  ;;  %v12558_v31 = vld [vmem:[#allocation12 + $0xfa0] sm:$0xf] }
 0x4ec   :  { %7897 = vmatpush.bf16.msrb.mxu0 %v10891_v21  ;;  %7910 = vmatpush.bf16.msrb.mxu1 %v11403_v25  ;;  %v13247_v12 = vld [vmem:[#allocation12 + $0x49c] sm:$0xf]  ;;  %v7670_v21 = vpop.f32.mrf.mxu2  ;;  %v7683_v25 = vpop.f32.mrf.mxu3  ;;  %v10635_v24 = vor.u32 %v13119_v38, %v10632_v10  ;;  %v10894_v30 = vld [vmem:[#allocation12 + $0x2a0] sm:$0xf]  ;;  %v12559_v38 = vor.u32 %v13608_v19, %v12558_v31 }
 0x4ed   :  { %v11144_v9 = vld [vmem:[#allocation12 + $0x4d8] sm:$0xf0]  ;;  %v7671_v29 = vadd.f32 %v7670_v21, %v7658_v51  ;;  %v13208_v51 = vld [vmem:[#allocation12 + $0x35c] sm:$0xf0] }
 0x4ee   :  { %7922 = vmatpush.bf16.msrb.mxu2 %v11979_v34  ;;  %7935 = vmatpush.bf16.msrb.mxu3 %v12491_v33  ;;  %v13391_v14 = vld [vmem:[#allocation12 + $0x91c] sm:$0xf]  ;;  %v11147_v60 = vor.u32 %v13247_v12, %v11144_v9  ;;  %v10959_v6 = vor.u32 %v13208_v51, %v10958_v41  ;;  %v11406_v10 = vld [vmem:[#allocation12 + $0x6a0] sm:$0xf] }
 0x4ef   :  { %v11720_v15 = vld [vmem:[#allocation12 + $0x958] sm:$0xf0]  ;;  %v13464_v12 = vld [vmem:[#allocation12 + $0xb5c] sm:$0xf0] }
 0x4f0   :  { %7898 = vmatpush.bf16.msrb.mxu0 %v10827_v44  ;;  %7911 = vmatpush.bf16.msrb.mxu1 %v11339_v62  ;;  %v13519_v16 = vld [vmem:[#allocation12 + $0xd1c] sm:$0xf]  ;;  %v11723_v18 = vor.u32 %v13391_v14, %v11720_v15  ;;  %v14236_v44 = vadd.f32 %v7683_v25, %v7671_v29  ;;  %v12494_v9 = vld [vmem:[#allocation12 + $0xf20] sm:$0xf]  ;;  %v4942_v15 = vperm.slane %v14219_v26, 3 }
 0x4f1   :  { %v12232_v17 = vld [vmem:[#allocation12 + $0xd58] sm:$0xf0]  ;;  %v13592_v14 = vld [vmem:[#allocation12 + $0xf5c] sm:$0xf0] }
 0x4f2   :  { %7923 = vmatpush.bf16.msrb.mxu2 %v11915_v63  ;;  %7936 = vmatpush.bf16.msrb.mxu3 %v12427_v48  ;;  %v13103_v28 = vld [vmem:[#allocation12 + $0x1c] sm:$0xf]  ;;  %v12235_v36 = vor.u32 %v13519_v16, %v12232_v17  ;;  %v10830_v21 = vld [vmem:[#allocation12 + $0x220] sm:$0xf] }
 0x4f3   :  { %v10568_v34 = vld [vmem:[#allocation12 + $0x58] sm:$0xf0]  ;;  %v13176_v25 = vld [vmem:[#allocation12 + $0x25c] sm:$0xf0] }
 0x4f4   :  { %7899 = vmatpush.bf16.msrb.mxu0 %v10763_v3  ;;  %7912 = vmatpush.bf16.msrb.mxu1 %v11275_v57  ;;  %v13231_v33 = vld [vmem:[#allocation12 + $0x41c] sm:$0xf]  ;;  %v10571_v63 = vor.u32 %v13103_v28, %v10568_v34  ;;  %v11342_v28 = vld [vmem:[#allocation12 + $0x620] sm:$0xf]  ;;  %v10831_v27 = vor.u32 %v13176_v25, %v10830_v21 }
 0x4f5   :  { %v11080_v22 = vld [vmem:[#allocation12 + $0x458] sm:$0xf0]  ;;  %v13304_v34 = vld [vmem:[#allocation12 + $0x65c] sm:$0xf0] }
 0x4f6   :  { %7924 = vmatpush.bf16.msrb.mxu2 %v11851_v1  ;;  %7937 = vmatpush.bf16.msrb.mxu3 %v12363_v13  ;;  %v13375_v43 = vld [vmem:[#allocation12 + $0x89c] sm:$0xf]  ;;  %v11083_v48 = vor.u32 %v13231_v33, %v11080_v22  ;;  %v7672_v1 = vpop.f32.mrf.mxu2  ;;  %v7685_v13 = vpop.f32.mrf.mxu3  ;;  %v11918_v33 = vld [vmem:[#allocation12 + $0xaa0] sm:$0xf]  ;;  %v11343_v42 = vor.u32 %v13304_v34, %v11342_v28 }
 0x4f7   :  { %v11656_v62 = vld [vmem:[#allocation12 + $0x8d8] sm:$0xf0]  ;;  %v12430_v22 = vld [vmem:[#allocation12 + $0xea0] sm:$0xf] }
 0x4f8   :  { %7900 = vmatpush.bf16.msrb.mxu0 %v10699_v5  ;;  %7913 = vmatpush.bf16.msrb.mxu1 %v11211_v7  ;;  %v13503_v46 = vld [vmem:[#allocation12 + $0xc9c] sm:$0xf]  ;;  %v11659_v52 = vor.u32 %v13375_v43, %v11656_v62  ;;  %v13192_v5 = vld [vmem:[#allocation12 + $0x2dc] sm:$0xf0]  ;;  %v12047_v7 = vor.u32 %v13480_v20, %v12046_v59 }
 0x4f9   :  { %v12168_v47 = vld [vmem:[#allocation12 + $0xcd8] sm:$0xf0]  ;;  %v10895_v16 = vor.u32 %v13192_v5, %v10894_v30  ;;  %v10766_v43 = vld [vmem:[#allocation12 + $0x1a0] sm:$0xf] }
 0x4fa   :  { %7925 = vmatpush.bf16.msrb.mxu2 %v11787_v11  ;;  %7938 = vmatpush.bf16.msrb.mxu3 %v12299_v8  ;;  %v12171_v53 = vor.u32 %v13503_v46, %v12168_v47  ;;  %v13359_v55 = vld [vmem:[#allocation12 + $0x81c] sm:$0xf]  ;;  %v13320_v11 = vld [vmem:[#allocation12 + $0x6dc] sm:$0xf0] }
 0x4fb   :  { %v11592_v3 = vld [vmem:[#allocation12 + $0x858] sm:$0xf0]  ;;  %v11982_v8 = vld [vmem:[#allocation12 + $0xb20] sm:$0xf]  ;;  %v11407_v17 = vor.u32 %v13320_v11, %v11406_v10 }
 0x4fc   :  { %7901 = vmatpush.bf16.msrb.mxu0 %v10635_v24  ;;  %7914 = vmatpush.bf16.msrb.mxu1 %v11147_v60  ;;  %v13487_v57 = vld [vmem:[#allocation12 + $0xc1c] sm:$0xf]  ;;  %v11595_v2 = vor.u32 %v13359_v55, %v11592_v3  ;;  %v11983_v24 = vor.u32 %v13464_v12, %v11982_v8  ;;  %v12495_v60 = vor.u32 %v13592_v14, %v12494_v9  ;;  %v13160_v62 = vld [vmem:[#allocation12 + $0x1dc] sm:$0xf0] }
 0x4fd   :  { %v12104_v4 = vld [vmem:[#allocation12 + $0xc58] sm:$0xf0]  ;;  %v13432_v41 = vld [vmem:[#allocation12 + $0xa5c] sm:$0xf0] }
 0x4fe   :  { %7926 = vmatpush.bf16.msrb.mxu2 %v11723_v18  ;;  %7939 = vmatpush.bf16.msrb.mxu3 %v12235_v36  ;;  %v12107_v0 = vor.u32 %v13487_v57, %v12104_v4  ;;  %v13448_v36 = vld [vmem:[#allocation12 + $0xadc] sm:$0xf0] }
 0x4ff   :  { %v11919_v47 = vor.u32 %v13448_v36, %v11918_v33  ;;  %v12366_v51 = vld [vmem:[#allocation12 + $0xe20] sm:$0xf]  ;;  %v11024_v36 = vld [vmem:[#allocation12 + $0x3e0] sm:$0xf0] }
 0x500   :  { %7902 = vmatpush.bf16.msrb.mxu0 %v10571_v63  ;;  %7915 = vmatpush.bf16.msrb.mxu1 %v11083_v48  ;;  %v7696_v29 = vpop.f32.mrf.mxu0  ;;  %v7709_v18 = vpop.f32.mrf.mxu1  ;;  %v12431_v63 = vor.u32 %v13576_v23, %v12430_v22  ;;  %v11278_v48 = vld [vmem:[#allocation12 + $0x5a0] sm:$0xf]  ;;  %v13344_v22 = vld [vmem:[#allocation12 + $0x7a4] sm:$0xf] }
 0x501   :  { %v7697_v40 = vadd.f32 %v7696_v29, %v4942_v15  ;;  %v13560_v54 = vld [vmem:[#allocation12 + $0xe5c] sm:$0xf0]  ;;  %v11536_v23 = vld [vmem:[#allocation12 + $0x7e0] sm:$0xf0] }
 0x502   :  { %7927 = vmatpush.bf16.msrb.mxu2 %v11659_v52  ;;  %7940 = vmatpush.bf16.msrb.mxu3 %v12171_v53  ;;  %v10767_v52 = vor.u32 %v13160_v62, %v10766_v43  ;;  %v10702_v45 = vld [vmem:[#allocation12 + $0x120] sm:$0xf]  ;;  %v12367_v57 = vor.u32 %v13560_v54, %v12366_v51 }
 0x503   :  { %7903 = vmatmul.bf16.vlgmr.msrb.gmra.mxu0 %v14191_v32  ;;  %7916 = vmatmul.bf16.vlgmr.msrb.gmra.mxu1 %v14193_v35  ;;  %v7710_v46 = vadd.f32 %v7709_v18, %v7697_v40  ;;  %v13144_v55 = vld [vmem:[#allocation12 + $0x15c] sm:$0xf0]  ;;  %v13216_v18 = vld [vmem:[#allocation12 + $0x3a4] sm:$0xf] }
 0x504   :  { %7947 = vmatpush.bf16.msra.mxu0 %v11023_v49  ;;  %7960 = vmatpush.bf16.msra.mxu1 %v11535_v61  ;;  %v13288_v49 = vld [vmem:[#allocation12 + $0x5dc] sm:$0xf0] }
 0x505   :  { %v11854_v61 = vld [vmem:[#allocation12 + $0xa20] sm:$0xf]  ;;  %v11279_v53 = vor.u32 %v13288_v49, %v11278_v48  ;;  %v13200_v48 = vld [vmem:[#allocation12 + $0x324] sm:$0xf] }
 0x506   :  { %7928 = vmatpush.bf16.msrb.mxu2 %v11595_v2  ;;  %7941 = vmatpush.bf16.msrb.mxu3 %v12107_v0  ;;  %v11855_v3 = vor.u32 %v13432_v41, %v11854_v61  ;;  %v11214_v4 = vld [vmem:[#allocation12 + $0x520] sm:$0xf]  ;;  %v10960_v49 = vld [vmem:[#allocation12 + $0x360] sm:$0xf0] }
 0x507   :  { %v13272_v59 = vld [vmem:[#allocation12 + $0x55c] sm:$0xf0]  ;;  %v13328_v61 = vld [vmem:[#allocation12 + $0x724] sm:$0xf] }
 0x508   :  { %7948 = vmatpush.bf16.msra.mxu0 %v10959_v6  ;;  %7961 = vmatpush.bf16.msra.mxu1 %v11471_v50  ;;  %v11790_v1 = vld [vmem:[#allocation12 + $0x9a0] sm:$0xf]  ;;  %v7698_v13 = vpop.f32.mrf.mxu0  ;;  %v7711_v20 = vpop.f32.mrf.mxu1  ;;  %v10703_v50 = vor.u32 %v13144_v55, %v10702_v45  ;;  %v11215_v2 = vor.u32 %v13272_v59, %v11214_v4  ;;  %v13472_v4 = vld [vmem:[#allocation12 + $0xba4] sm:$0xf] }
 0x509   :  { %7929 = vmatmul.bf16.vlgmr.msrb.gmra.mxu2 %v14197_v56  ;;  %7942 = vmatmul.bf16.vlgmr.msrb.gmra.mxu3 %v14199_v58  ;;  %v13416_v31 = vld [vmem:[#allocation12 + $0x9dc] sm:$0xf0]  ;;  %v12048_v59 = vld [vmem:[#allocation12 + $0xbe0] sm:$0xf0]  ;;  %v10963_v20 = vor.u32 %v13200_v48, %v10960_v49 }
 0x50a   :  { %7973 = vmatpush.bf16.msra.mxu2 %v12047_v7  ;;  %7986 = vmatpush.bf16.msra.mxu3 %v12559_v38  ;;  %v12302_v19 = vld [vmem:[#allocation12 + $0xda0] sm:$0xf]  ;;  %v11791_v5 = vor.u32 %v13416_v31, %v11790_v1  ;;  %v13600_v1 = vld [vmem:[#allocation12 + $0xfa4] sm:$0xf] }
 0x50b   :  { %v13544_v6 = vld [vmem:[#allocation12 + $0xddc] sm:$0xf0]  ;;  %v12560_v13 = vld [vmem:[#allocation12 + $0xfe0] sm:$0xf0] }
 0x50c   :  { %7949 = vmatpush.bf16.msra.mxu0 %v10895_v16  ;;  %7962 = vmatpush.bf16.msra.mxu1 %v11407_v17  ;;  %v10638_v0 = vld [vmem:[#allocation12 + $0xa0] sm:$0xf]  ;;  %v12303_v7 = vor.u32 %v13544_v6, %v12302_v19  ;;  %v7722_v8 = vpop.f32.mrf.mxu2  ;;  %v7735_v12 = vpop.f32.mrf.mxu3  ;;  %v11856_v48 = vld [vmem:[#allocation12 + $0xa60] sm:$0xf0] }
 0x50d   :  { %v13128_v30 = vld [vmem:[#allocation12 + $0xdc] sm:$0xf0]  ;;  %v7723_v16 = vadd.f32 %v7722_v8, %v7710_v46  ;;  %v12496_v8 = vld [vmem:[#allocation12 + $0xf60] sm:$0xf0] }
 0x50e   :  { %7974 = vmatpush.bf16.msra.mxu2 %v11983_v24  ;;  %7987 = vmatpush.bf16.msra.mxu3 %v12495_v60  ;;  %v11150_v38 = vld [vmem:[#allocation12 + $0x4a0] sm:$0xf]  ;;  %v10639_v17 = vor.u32 %v13128_v30, %v10638_v0  ;;  %v12051_v0 = vor.u32 %v13472_v4, %v12048_v59  ;;  %v12563_v30 = vor.u32 %v13600_v1, %v12560_v13  ;;  %v13552_v49 = vld [vmem:[#allocation12 + $0xe24] sm:$0xf] }
 0x50f   :  { %v13256_v10 = vld [vmem:[#allocation12 + $0x4dc] sm:$0xf0]  ;;  %v14243_v28 = vadd.f32 %v7735_v12, %v7723_v16  ;;  %v4943_v12 = vperm.slane %v14219_v26, 4  ;;  %v10832_v16 = vld [vmem:[#allocation12 + $0x260] sm:$0xf0] }
 0x510   :  { %7950 = vmatpush.bf16.msra.mxu0 %v10831_v27  ;;  %7963 = vmatpush.bf16.msra.mxu1 %v11343_v42  ;;  %v11726_v11 = vld [vmem:[#allocation12 + $0x920] sm:$0xf]  ;;  %v11151_v21 = vor.u32 %v13256_v10, %v11150_v38  ;;  %v13456_v38 = vld [vmem:[#allocation12 + $0xb24] sm:$0xf] }
 0x511   :  { %v13400_v9 = vld [vmem:[#allocation12 + $0x95c] sm:$0xf0]  ;;  %v11984_v10 = vld [vmem:[#allocation12 + $0xb60] sm:$0xf0] }
 0x512   :  { %7975 = vmatpush.bf16.msra.mxu2 %v11919_v47  ;;  %7988 = vmatpush.bf16.msra.mxu3 %v12431_v63  ;;  %v12238_v14 = vld [vmem:[#allocation12 + $0xd20] sm:$0xf]  ;;  %v11727_v34 = vor.u32 %v13400_v9, %v11726_v11  ;;  %v11027_v47 = vor.u32 %v13216_v18, %v11024_v36  ;;  %v11539_v63 = vor.u32 %v13344_v22, %v11536_v23  ;;  %v13584_v11 = vld [vmem:[#allocation12 + $0xf24] sm:$0xf] }
 0x513   :  { %v13528_v15 = vld [vmem:[#allocation12 + $0xd5c] sm:$0xf0]  ;;  %v13568_v18 = vld [vmem:[#allocation12 + $0xea4] sm:$0xf] }
 0x514   :  { %7951 = vmatpush.bf16.msra.mxu0 %v10767_v52  ;;  %7964 = vmatpush.bf16.msra.mxu1 %v11279_v53  ;;  %v10574_v25 = vld [vmem:[#allocation12 + $0x20] sm:$0xf]  ;;  %v12239_v33 = vor.u32 %v13528_v15, %v12238_v14  ;;  %v7724_v54 = vpop.f32.mrf.mxu2  ;;  %v7737_v52 = vpop.f32.mrf.mxu3  ;;  %v11472_v53 = vld [vmem:[#allocation12 + $0x760] sm:$0xf0] }
 0x515   :  { %v13112_v24 = vld [vmem:[#allocation12 + $0x5c] sm:$0xf0]  ;;  %v11475_v31 = vor.u32 %v13328_v61, %v11472_v53  ;;  %v13168_v15 = vld [vmem:[#allocation12 + $0x224] sm:$0xf] }
 0x516   :  { %7976 = vmatpush.bf16.msra.mxu2 %v11855_v3  ;;  %7989 = vmatpush.bf16.msra.mxu3 %v12367_v57  ;;  %v11086_v60 = vld [vmem:[#allocation12 + $0x420] sm:$0xf]  ;;  %v10575_v62 = vor.u32 %v13112_v24, %v10574_v25  ;;  %v13296_v25 = vld [vmem:[#allocation12 + $0x624] sm:$0xf]  ;;  %v10835_v22 = vor.u32 %v13168_v15, %v10832_v16 }
 0x517   :  { %v13240_v29 = vld [vmem:[#allocation12 + $0x45c] sm:$0xf0]  ;;  %v11344_v24 = vld [vmem:[#allocation12 + $0x660] sm:$0xf0] }
 0x518   :  { %7952 = vmatpush.bf16.msra.mxu0 %v10703_v50  ;;  %7965 = vmatpush.bf16.msra.mxu1 %v11215_v2  ;;  %v11662_v40 = vld [vmem:[#allocation12 + $0x8a0] sm:$0xf]  ;;  %v11087_v46 = vor.u32 %v13240_v29, %v11086_v60  ;;  %v13184_v50 = vld [vmem:[#allocation12 + $0x2a4] sm:$0xf]  ;;  %v11347_v23 = vor.u32 %v13296_v25, %v11344_v24 }
 0x519   :  { %v13384_v27 = vld [vmem:[#allocation12 + $0x8dc] sm:$0xf0]  ;;  %v10896_v2 = vld [vmem:[#allocation12 + $0x2e0] sm:$0xf0] }
 0x51a   :  { %7977 = vmatpush.bf16.msra.mxu2 %v11791_v5  ;;  %7990 = vmatpush.bf16.msra.mxu3 %v12303_v7  ;;  %v12174_v42 = vld [vmem:[#allocation12 + $0xca0] sm:$0xf]  ;;  %v11663_v41 = vor.u32 %v13384_v27, %v11662_v40  ;;  %v13312_v5 = vld [vmem:[#allocation12 + $0x6a4] sm:$0xf]  ;;  %v10899_v9 = vor.u32 %v13184_v50, %v10896_v2 }
 0x51b   :  { %v13512_v43 = vld [vmem:[#allocation12 + $0xcdc] sm:$0xf0]  ;;  %v11408_v7 = vld [vmem:[#allocation12 + $0x6e0] sm:$0xf0] }
 0x51c   :  { %7953 = vmatpush.bf16.msra.mxu0 %v10639_v17  ;;  %7966 = vmatpush.bf16.msra.mxu1 %v11151_v21  ;;  %v12175_v51 = vor.u32 %v13512_v43, %v12174_v42  ;;  %v11598_v45 = vld [vmem:[#allocation12 + $0x820] sm:$0xf]  ;;  %v11411_v14 = vor.u32 %v13312_v5, %v11408_v7  ;;  %v11987_v17 = vor.u32 %v13456_v38, %v11984_v10  ;;  %v13440_v60 = vld [vmem:[#allocation12 + $0xaa4] sm:$0xf] }
 0x51d   :  { %v13368_v55 = vld [vmem:[#allocation12 + $0x85c] sm:$0xf0]  ;;  %v12499_v21 = vor.u32 %v13584_v11, %v12496_v8  ;;  %v11920_v29 = vld [vmem:[#allocation12 + $0xae0] sm:$0xf0] }
 0x51e   :  { %7978 = vmatpush.bf16.msra.mxu2 %v11727_v34  ;;  %7991 = vmatpush.bf16.msra.mxu3 %v12239_v33  ;;  %v12110_v3 = vld [vmem:[#allocation12 + $0xc20] sm:$0xf]  ;;  %v11599_v19 = vor.u32 %v13368_v55, %v11598_v45  ;;  %v12432_v36 = vld [vmem:[#allocation12 + $0xee0] sm:$0xf0]  ;;  %v11923_v43 = vor.u32 %v13440_v60, %v11920_v29  ;;  %v13225_v29 = vld [vmem:[#allocation12 + $0x3e4] sm:$0xf0] }
 0x51f   :  { %v13496_v57 = vld [vmem:[#allocation12 + $0xc5c] sm:$0xf0]  ;;  %v13152_v40 = vld [vmem:[#allocation12 + $0x1a4] sm:$0xf] }
 0x520   :  { %7954 = vmatpush.bf16.msra.mxu0 %v10575_v62  ;;  %7967 = vmatpush.bf16.msra.mxu1 %v11087_v46  ;;  %v12111_v6 = vor.u32 %v13496_v57, %v12110_v3  ;;  %v7748_v34 = vpop.f32.mrf.mxu0  ;;  %v7761_v33 = vpop.f32.mrf.mxu1  ;;  %v10768_v27 = vld [vmem:[#allocation12 + $0x1e0] sm:$0xf0]  ;;  %v12435_v62 = vor.u32 %v13568_v18, %v12432_v36  ;;  %v11542_v18 = vld [vmem:[#allocation12 + $0x7a8] sm:$0xf] }
 0x521   :  { %v7749_v26 = vadd.f32 %v7748_v34, %v4943_v12  ;;  %v13280_v46 = vld [vmem:[#allocation12 + $0x5a4] sm:$0xf]  ;;  %v13353_v36 = vld [vmem:[#allocation12 + $0x7e4] sm:$0xf0] }
 0x522   :  { %7979 = vmatpush.bf16.msra.mxu2 %v11663_v41  ;;  %7992 = vmatpush.bf16.msra.mxu3 %v12175_v51  ;;  %v12368_v61 = vld [vmem:[#allocation12 + $0xe60] sm:$0xf0]  ;;  %v10771_v41 = vor.u32 %v13152_v40, %v10768_v27 }
 0x523   :  { %7955 = vmatmul.bf16.vlgmr.msra.gmra.mxu0 %v14191_v32  ;;  %7968 = vmatmul.bf16.vlgmr.msra.gmra.mxu1 %v14193_v35  ;;  %v7762_v42 = vadd.f32 %v7761_v33, %v7749_v26  ;;  %v13136_v54 = vld [vmem:[#allocation12 + $0x124] sm:$0xf]  ;;  %v12371_v45 = vor.u32 %v13552_v49, %v12368_v61  ;;  %v11030_v33 = vld [vmem:[#allocation12 + $0x3a8] sm:$0xf] }
 0x524   :  { %7999 = vmatpush.bf16.msrb.mxu0 %v11027_v47  ;;  %8012 = vmatpush.bf16.msrb.mxu1 %v11539_v63  ;;  %v11280_v47 = vld [vmem:[#allocation12 + $0x5e0] sm:$0xf0] }
 0x525   :  { %v13424_v63 = vld [vmem:[#allocation12 + $0xa24] sm:$0xf]  ;;  %v11283_v51 = vor.u32 %v13280_v46, %v11280_v47  ;;  %v10966_v46 = vld [vmem:[#allocation12 + $0x328] sm:$0xf] }
 0x526   :  { %7980 = vmatpush.bf16.msra.mxu2 %v11599_v19  ;;  %7993 = vmatpush.bf16.msra.mxu3 %v12111_v6  ;;  %v10704_v52 = vld [vmem:[#allocation12 + $0x160] sm:$0xf0]  ;;  %v11859_v53 = vor.u32 %v13424_v63, %v11856_v48  ;;  %v13209_v47 = vld [vmem:[#allocation12 + $0x364] sm:$0xf0] }
 0x527   :  { %v13264_v55 = vld [vmem:[#allocation12 + $0x524] sm:$0xf]  ;;  %v11478_v63 = vld [vmem:[#allocation12 + $0x728] sm:$0xf] }
 0x528   :  { %8000 = vmatpush.bf16.msrb.mxu0 %v10963_v20  ;;  %8013 = vmatpush.bf16.msrb.mxu1 %v11475_v31  ;;  %v11216_v3 = vld [vmem:[#allocation12 + $0x560] sm:$0xf0]  ;;  %v7750_v4 = vpop.f32.mrf.mxu0  ;;  %v7763_v59 = vpop.f32.mrf.mxu1  ;;  %v10707_v31 = vor.u32 %v13136_v54, %v10704_v52 }
 0x529   :  { %7981 = vmatmul.bf16.vlgmr.msra.gmra.mxu2 %v14197_v56  ;;  %7994 = vmatmul.bf16.vlgmr.msra.gmra.mxu3 %v14199_v58  ;;  %v13408_v57 = vld [vmem:[#allocation12 + $0x9a4] sm:$0xf]  ;;  %v11219_v19 = vor.u32 %v13264_v55, %v11216_v3  ;;  %v12054_v55 = vld [vmem:[#allocation12 + $0xba8] sm:$0xf]  ;;  %v10967_v59 = vor.u32 %v13209_v47, %v10966_v46 }
 0x52a   :  { %8025 = vmatpush.bf16.msrb.mxu2 %v12051_v0  ;;  %8038 = vmatpush.bf16.msrb.mxu3 %v12563_v30  ;;  %v11792_v1 = vld [vmem:[#allocation12 + $0x9e0] sm:$0xf0]  ;;  %v13481_v3 = vld [vmem:[#allocation12 + $0xbe4] sm:$0xf0] }
 0x52b   :  { %v13536_v13 = vld [vmem:[#allocation12 + $0xda4] sm:$0xf]  ;;  %v11795_v2 = vor.u32 %v13408_v57, %v11792_v1  ;;  %v12566_v57 = vld [vmem:[#allocation12 + $0xfa8] sm:$0xf] }
 0x52c   :  { %8001 = vmatpush.bf16.msrb.mxu0 %v10899_v9  ;;  %8014 = vmatpush.bf16.msrb.mxu1 %v11411_v14  ;;  %v12304_v20 = vld [vmem:[#allocation12 + $0xde0] sm:$0xf0]  ;;  %v7774_v38 = vpop.f32.mrf.mxu2  ;;  %v7787_v10 = vpop.f32.mrf.mxu3  ;;  %v13609_v4 = vld [vmem:[#allocation12 + $0xfe4] sm:$0xf0] }
 0x52d   :  { %v13120_v6 = vld [vmem:[#allocation12 + $0xa4] sm:$0xf]  ;;  %v12307_v0 = vor.u32 %v13536_v13, %v12304_v20  ;;  %v7775_v9 = vadd.f32 %v7774_v38, %v7762_v42  ;;  %v13593_v38 = vld [vmem:[#allocation12 + $0xf64] sm:$0xf0] }
 0x52e   :  { %8026 = vmatpush.bf16.msrb.mxu2 %v11987_v17  ;;  %8039 = vmatpush.bf16.msrb.mxu3 %v12499_v21  ;;  %v10640_v50 = vld [vmem:[#allocation12 + $0xe0] sm:$0xf0]  ;;  %v13289_v46 = vld [vmem:[#allocation12 + $0x5e4] sm:$0xf0] }
 0x52f   :  { %v13248_v30 = vld [vmem:[#allocation12 + $0x4a4] sm:$0xf]  ;;  %v10643_v14 = vor.u32 %v13120_v6, %v10640_v50  ;;  %v14250_v25 = vadd.f32 %v7787_v10, %v7775_v9  ;;  %v12055_v6 = vor.u32 %v13481_v3, %v12054_v55  ;;  %v12567_v50 = vor.u32 %v13609_v4, %v12566_v57  ;;  %v10838_v9 = vld [vmem:[#allocation12 + $0x228] sm:$0xf] }
 0x530   :  { %8002 = vmatpush.bf16.msrb.mxu0 %v10835_v22  ;;  %8015 = vmatpush.bf16.msrb.mxu1 %v11347_v23  ;;  %v11152_v5 = vld [vmem:[#allocation12 + $0x4e0] sm:$0xf0]  ;;  %v11862_v47 = vld [vmem:[#allocation12 + $0xa28] sm:$0xf] }
 0x531   :  { %v13392_v7 = vld [vmem:[#allocation12 + $0x924] sm:$0xf]  ;;  %v11155_v15 = vor.u32 %v13248_v30, %v11152_v5  ;;  %v11990_v30 = vld [vmem:[#allocation12 + $0xb28] sm:$0xf] }
 0x532   :  { %8027 = vmatpush.bf16.msrb.mxu2 %v11923_v43  ;;  %8040 = vmatpush.bf16.msrb.mxu3 %v12435_v62  ;;  %v11728_v11 = vld [vmem:[#allocation12 + $0x960] sm:$0xf0]  ;;  %v11031_v43 = vor.u32 %v13225_v29, %v11030_v33  ;;  %v11543_v62 = vor.u32 %v13353_v36, %v11542_v18  ;;  %v13465_v5 = vld [vmem:[#allocation12 + $0xb64] sm:$0xf0] }
 0x533   :  { %v13520_v8 = vld [vmem:[#allocation12 + $0xd24] sm:$0xf]  ;;  %v11731_v24 = vor.u32 %v13392_v7, %v11728_v11  ;;  %v12502_v7 = vld [vmem:[#allocation12 + $0xf28] sm:$0xf] }
 0x534   :  { %8003 = vmatpush.bf16.msrb.mxu0 %v10771_v41  ;;  %8016 = vmatpush.bf16.msrb.mxu1 %v11283_v51  ;;  %v12240_v12 = vld [vmem:[#allocation12 + $0xd60] sm:$0xf0]  ;;  %v7776_v61 = vpop.f32.mrf.mxu2  ;;  %v7789_v41 = vpop.f32.mrf.mxu3  ;;  %v13337_v51 = vld [vmem:[#allocation12 + $0x764] sm:$0xf0] }
 0x535   :  { %v13104_v16 = vld [vmem:[#allocation12 + $0x24] sm:$0xf]  ;;  %v12243_v60 = vor.u32 %v13520_v8, %v12240_v12  ;;  %v11479_v1 = vor.u32 %v13337_v51, %v11478_v63  ;;  %v13449_v33 = vld [vmem:[#allocation12 + $0xae4] sm:$0xf0] }
 0x536   :  { %8028 = vmatpush.bf16.msrb.mxu2 %v11859_v53  ;;  %8041 = vmatpush.bf16.msrb.mxu3 %v12371_v45  ;;  %v10576_v17 = vld [vmem:[#allocation12 + $0x60] sm:$0xf0]  ;;  %v12438_v29 = vld [vmem:[#allocation12 + $0xea8] sm:$0xf] }
 0x537   :  { %v13232_v21 = vld [vmem:[#allocation12 + $0x424] sm:$0xf]  ;;  %v10579_v27 = vor.u32 %v13104_v16, %v10576_v17  ;;  %v12503_v16 = vor.u32 %v13593_v38, %v12502_v7  ;;  %v11350_v17 = vld [vmem:[#allocation12 + $0x628] sm:$0xf] }
 0x538   :  { %8004 = vmatpush.bf16.msrb.mxu0 %v10707_v31  ;;  %8017 = vmatpush.bf16.msrb.mxu1 %v11219_v19  ;;  %v11088_v34 = vld [vmem:[#allocation12 + $0x460] sm:$0xf0]  ;;  %v10902_v31 = vld [vmem:[#allocation12 + $0x2a8] sm:$0xf] }
 0x539   :  { %v13376_v26 = vld [vmem:[#allocation12 + $0x8a4] sm:$0xf]  ;;  %v11091_v42 = vor.u32 %v13232_v21, %v11088_v34  ;;  %v13193_v19 = vld [vmem:[#allocation12 + $0x2e4] sm:$0xf0] }
 0x53a   :  { %8029 = vmatpush.bf16.msrb.mxu2 %v11795_v2  ;;  %8042 = vmatpush.bf16.msrb.mxu3 %v12307_v0  ;;  %v11664_v22 = vld [vmem:[#allocation12 + $0x8e0] sm:$0xf0]  ;;  %v11414_v2 = vld [vmem:[#allocation12 + $0x6a8] sm:$0xf]  ;;  %v10903_v8 = vor.u32 %v13193_v19, %v10902_v31 }
 0x53b   :  { %v13504_v23 = vld [vmem:[#allocation12 + $0xca4] sm:$0xf]  ;;  %v11667_v48 = vor.u32 %v13376_v26, %v11664_v22  ;;  %v13321_v0 = vld [vmem:[#allocation12 + $0x6e4] sm:$0xf0] }
 0x53c   :  { %v12176_v40 = vld [vmem:[#allocation12 + $0xce0] sm:$0xf0]  ;;  %8005 = vmatpush.bf16.msrb.mxu0 %v10643_v14  ;;  %8018 = vmatpush.bf16.msrb.mxu1 %v11155_v15  ;;  %v11415_v12 = vor.u32 %v13321_v0, %v11414_v2  ;;  %v13177_v14 = vld [vmem:[#allocation12 + $0x264] sm:$0xf0]  ;;  %v11991_v15 = vor.u32 %v13465_v5, %v11990_v30 }
 0x53d   :  { %v12179_v49 = vor.u32 %v13504_v23, %v12176_v40  ;;  %v13360_v54 = vld [vmem:[#allocation12 + $0x824] sm:$0xf]  ;;  %v13305_v21 = vld [vmem:[#allocation12 + $0x664] sm:$0xf0]  ;;  %v10839_v26 = vor.u32 %v13177_v14, %v10838_v9 }
 0x53e   :  { %8030 = vmatpush.bf16.msrb.mxu2 %v11731_v24  ;;  %8043 = vmatpush.bf16.msrb.mxu3 %v12243_v60  ;;  %v11600_v52 = vld [vmem:[#allocation12 + $0x860] sm:$0xf0]  ;;  %v11926_v24 = vld [vmem:[#allocation12 + $0xaa8] sm:$0xf]  ;;  %v11351_v22 = vor.u32 %v13305_v21, %v11350_v17 }
 0x53f   :  { %v13488_v53 = vld [vmem:[#allocation12 + $0xc24] sm:$0xf]  ;;  %v11603_v13 = vor.u32 %v13360_v54, %v11600_v52  ;;  %v13577_v18 = vld [vmem:[#allocation12 + $0xee4] sm:$0xf0] }
 0x540   :  { %v12112_v45 = vld [vmem:[#allocation12 + $0xc60] sm:$0xf0]  ;;  %8006 = vmatpush.bf16.msrb.mxu0 %v10579_v27  ;;  %8019 = vmatpush.bf16.msrb.mxu1 %v11091_v42  ;;  %v7800_v60 = vpop.f32.mrf.mxu0  ;;  %v7813_v34 = vpop.f32.mrf.mxu1  ;;  %v10774_v23 = vld [vmem:[#allocation12 + $0x1a8] sm:$0xf]  ;;  %v11927_v42 = vor.u32 %v13449_v33, %v11926_v24 }
 0x541   :  { %v12115_v20 = vor.u32 %v13488_v53, %v12112_v45  ;;  %v14254_v10 = vld [vmem:[#allocation13] sm:$0xff]  ;;  %v13161_v40 = vld [vmem:[#allocation12 + $0x1e4] sm:$0xf0] }
 0x542   :  { %8031 = vmatpush.bf16.msrb.mxu2 %v11667_v48  ;;  %8044 = vmatpush.bf16.msrb.mxu3 %v12179_v49  ;;  %v4944_v11 = vperm.slane %v14254_v10, 5  ;;  %v13433_v63 = vld [vmem:[#allocation12 + $0xa64] sm:$0xf0]  ;;  %v10775_v61 = vor.u32 %v13161_v40, %v10774_v23 }
 0x543   :  { %8007 = vmatmul.bf16.vlgmr.msrb.gmra.mxu0 %v14191_v32  ;;  %8020 = vmatmul.bf16.vlgmr.msrb.gmra.mxu1 %v14193_v35  ;;  %v12374_v48 = vld [vmem:[#allocation12 + $0xe28] sm:$0xf]  ;;  %v11863_v52 = vor.u32 %v13433_v63, %v11862_v47  ;;  %v13201_v47 = vld [vmem:[#allocation12 + $0x32c] sm:$0xf] }
 0x544   :  { %8051 = vmatpush.bf16.msra.mxu0 %v11031_v43  ;;  %8064 = vmatpush.bf16.msra.mxu1 %v11543_v62  ;;  %v7801_v36 = vadd.f32 %v7800_v60, %v4944_v11  ;;  %v12439_v43 = vor.u32 %v13577_v18, %v12438_v29  ;;  %v11286_v62 = vld [vmem:[#allocation12 + $0x5a8] sm:$0xf]  ;;  %v13217_v29 = vld [vmem:[#allocation12 + $0x3ac] sm:$0xf] }
 0x545   :  { %v13561_v49 = vld [vmem:[#allocation12 + $0xe64] sm:$0xf0]  ;;  %v11287_v41 = vor.u32 %v13289_v46, %v11286_v62  ;;  %v11032_v18 = vld [vmem:[#allocation12 + $0x3e8] sm:$0xf0] }
 0x546   :  { %8032 = vmatpush.bf16.msrb.mxu2 %v11603_v13  ;;  %8045 = vmatpush.bf16.msrb.mxu3 %v12115_v20  ;;  %v7814_v27 = vadd.f32 %v7813_v34, %v7801_v36  ;;  %v10710_v51 = vld [vmem:[#allocation12 + $0x128] sm:$0xf]  ;;  %v12375_v53 = vor.u32 %v13561_v49, %v12374_v48  ;;  %v13345_v36 = vld [vmem:[#allocation12 + $0x7ac] sm:$0xf]  ;;  %v11035_v62 = vor.u32 %v13217_v29, %v11032_v18 }
 0x547   :  { %v13145_v54 = vld [vmem:[#allocation12 + $0x164] sm:$0xf0]  ;;  %v10968_v63 = vld [vmem:[#allocation12 + $0x368] sm:$0xf0] }
 0x548   :  { %8052 = vmatpush.bf16.msra.mxu0 %v10967_v59  ;;  %8065 = vmatpush.bf16.msra.mxu1 %v11479_v1  ;;  %v11222_v45 = vld [vmem:[#allocation12 + $0x528] sm:$0xf]  ;;  %v7802_v57 = vpop.f32.mrf.mxu0  ;;  %v7815_v4 = vpop.f32.mrf.mxu1  ;;  %v10711_v20 = vor.u32 %v13145_v54, %v10710_v51  ;;  %v13329_v48 = vld [vmem:[#allocation12 + $0x72c] sm:$0xf] }
 0x549   :  { %8033 = vmatmul.bf16.vlgmr.msrb.gmra.mxu2 %v14197_v56  ;;  %8046 = vmatmul.bf16.vlgmr.msrb.gmra.mxu3 %v14199_v58  ;;  %v13273_v55 = vld [vmem:[#allocation12 + $0x564] sm:$0xf0]  ;;  %v11480_v54 = vld [vmem:[#allocation12 + $0x768] sm:$0xf0] }
 0x54a   :  { %8077 = vmatpush.bf16.msra.mxu2 %v12055_v6  ;;  %8090 = vmatpush.bf16.msra.mxu3 %v12567_v50  ;;  %v11798_v3 = vld [vmem:[#allocation12 + $0x9a8] sm:$0xf]  ;;  %v11223_v31 = vor.u32 %v13273_v55, %v11222_v45  ;;  %v12056_v57 = vld [vmem:[#allocation12 + $0xbe8] sm:$0xf0] }
 0x54b   :  { %v13417_v59 = vld [vmem:[#allocation12 + $0x9e4] sm:$0xf0]  ;;  %v13601_v4 = vld [vmem:[#allocation12 + $0xfac] sm:$0xf] }
 0x54c   :  { %8053 = vmatpush.bf16.msra.mxu0 %v10903_v8  ;;  %8066 = vmatpush.bf16.msra.mxu1 %v11415_v12  ;;  %v12310_v1 = vld [vmem:[#allocation12 + $0xda8] sm:$0xf]  ;;  %v11799_v50 = vor.u32 %v13417_v59, %v11798_v3  ;;  %v7826_v7 = vpop.f32.mrf.mxu2  ;;  %v7839_v38 = vpop.f32.mrf.mxu3  ;;  %v13473_v3 = vld [vmem:[#allocation12 + $0xbac] sm:$0xf] }
 0x54d   :  { %v13545_v13 = vld [vmem:[#allocation12 + $0xde4] sm:$0xf0]  ;;  %v7827_v9 = vadd.f32 %v7826_v7, %v7814_v27  ;;  %v12568_v59 = vld [vmem:[#allocation12 + $0xfe8] sm:$0xf0] }
 0x54e   :  { %8078 = vmatpush.bf16.msra.mxu2 %v11991_v15  ;;  %8091 = vmatpush.bf16.msra.mxu3 %v12503_v16  ;;  %v10646_v19 = vld [vmem:[#allocation12 + $0xa8] sm:$0xf]  ;;  %v12311_v2 = vor.u32 %v13545_v13, %v12310_v1  ;;  %v10971_v1 = vor.u32 %v13201_v47, %v10968_v63  ;;  %v11483_v13 = vor.u32 %v13329_v48, %v11480_v54  ;;  %v11992_v7 = vld [vmem:[#allocation12 + $0xb68] sm:$0xf0] }
 0x54f   :  { %v13129_v6 = vld [vmem:[#allocation12 + $0xe4] sm:$0xf0]  ;;  %v14259_v24 = vadd.f32 %v7839_v38, %v7827_v9  ;;  %v13585_v38 = vld [vmem:[#allocation12 + $0xf2c] sm:$0xf] }
 0x550   :  { %8054 = vmatpush.bf16.msra.mxu0 %v10839_v26  ;;  %8067 = vmatpush.bf16.msra.mxu1 %v11351_v22  ;;  %v11158_v0 = vld [vmem:[#allocation12 + $0x4a8] sm:$0xf]  ;;  %v10647_v14 = vor.u32 %v13129_v6, %v10646_v19  ;;  %v11544_v26 = vld [vmem:[#allocation12 + $0x7e8] sm:$0xf0] }
 0x551   :  { %v13257_v30 = vld [vmem:[#allocation12 + $0x4e4] sm:$0xf0]  ;;  %v11547_v46 = vor.u32 %v13345_v36, %v11544_v26  ;;  %v13185_v19 = vld [vmem:[#allocation12 + $0x2ac] sm:$0xf] }
 0x552   :  { %8079 = vmatpush.bf16.msra.mxu2 %v11927_v42  ;;  %8092 = vmatpush.bf16.msra.mxu3 %v12439_v43  ;;  %v11734_v5 = vld [vmem:[#allocation12 + $0x928] sm:$0xf]  ;;  %v11159_v15 = vor.u32 %v13257_v30, %v11158_v0  ;;  %v10904_v6 = vld [vmem:[#allocation12 + $0x2e8] sm:$0xf0] }
 0x553   :  { %v13401_v11 = vld [vmem:[#allocation12 + $0x964] sm:$0xf0]  ;;  %v13313_v0 = vld [vmem:[#allocation12 + $0x6ac] sm:$0xf] }
 0x554   :  { %8055 = vmatpush.bf16.msra.mxu0 %v10775_v61  ;;  %8068 = vmatpush.bf16.msra.mxu1 %v11287_v41  ;;  %v12246_v8 = vld [vmem:[#allocation12 + $0xd28] sm:$0xf]  ;;  %v11735_v60 = vor.u32 %v13401_v11, %v11734_v5  ;;  %v7828_v41 = vpop.f32.mrf.mxu2  ;;  %v7841_v51 = vpop.f32.mrf.mxu3  ;;  %v11416_v30 = vld [vmem:[#allocation12 + $0x6e8] sm:$0xf0] }
 0x555   :  { %v13529_v12 = vld [vmem:[#allocation12 + $0xd64] sm:$0xf0]  ;;  %v13457_v5 = vld [vmem:[#allocation12 + $0xb2c] sm:$0xf]  ;;  %v11419_v9 = vor.u32 %v13313_v0, %v11416_v30 }
 0x556   :  { %8080 = vmatpush.bf16.msra.mxu2 %v11863_v52  ;;  %8093 = vmatpush.bf16.msra.mxu3 %v12375_v53  ;;  %v10582_v16 = vld [vmem:[#allocation12 + $0x28] sm:$0xf]  ;;  %v12247_v34 = vor.u32 %v13529_v12, %v12246_v8  ;;  %v12504_v11 = vld [vmem:[#allocation12 + $0xf68] sm:$0xf0]  ;;  %v4945_v8 = vperm.slane %v14254_v10, 6  ;;  %v10907_v12 = vor.u32 %v13185_v19, %v10904_v6 }
 0x557   :  { %v13113_v17 = vld [vmem:[#allocation12 + $0x64] sm:$0xf0]  ;;  %v11928_v18 = vld [vmem:[#allocation12 + $0xae8] sm:$0xf0] }
 0x558   :  { %8056 = vmatpush.bf16.msra.mxu0 %v10711_v20  ;;  %8069 = vmatpush.bf16.msra.mxu1 %v11223_v31  ;;  %v11094_v21 = vld [vmem:[#allocation12 + $0x428] sm:$0xf]  ;;  %v10583_v42 = vor.u32 %v13113_v17, %v10582_v16  ;;  %v11995_v16 = vor.u32 %v13457_v5, %v11992_v7  ;;  %v12507_v17 = vor.u32 %v13585_v38, %v12504_v11  ;;  %v13569_v36 = vld [vmem:[#allocation12 + $0xeac] sm:$0xf] }
 0x559   :  { %v13241_v33 = vld [vmem:[#allocation12 + $0x464] sm:$0xf0]  ;;  %v12440_v26 = vld [vmem:[#allocation12 + $0xee8] sm:$0xf0] }
 0x55a   :  { %8081 = vmatpush.bf16.msra.mxu2 %v11799_v50  ;;  %8094 = vmatpush.bf16.msra.mxu3 %v12311_v2  ;;  %v11670_v22 = vld [vmem:[#allocation12 + $0x8a8] sm:$0xf]  ;;  %v11095_v43 = vor.u32 %v13241_v33, %v11094_v21  ;;  %v12059_v50 = vor.u32 %v13473_v3, %v12056_v57  ;;  %v12571_v2 = vor.u32 %v13601_v4, %v12568_v59  ;;  %v13297_v21 = vld [vmem:[#allocation12 + $0x62c] sm:$0xf] }
 0x55b   :  { %v13385_v23 = vld [vmem:[#allocation12 + $0x8e4] sm:$0xf0]  ;;  %v13281_v47 = vld [vmem:[#allocation12 + $0x5ac] sm:$0xf] }
 0x55c   :  { %v12182_v40 = vld [vmem:[#allocation12 + $0xca8] sm:$0xf]  ;;  %8057 = vmatpush.bf16.msra.mxu0 %v10647_v14  ;;  %8070 = vmatpush.bf16.msra.mxu1 %v11159_v15  ;;  %v11671_v49 = vor.u32 %v13385_v23, %v11670_v22  ;;  %v13169_v14 = vld [vmem:[#allocation12 + $0x22c] sm:$0xf] }
 0x55d   :  { %v13513_v27 = vld [vmem:[#allocation12 + $0xce4] sm:$0xf0]  ;;  %v10840_v15 = vld [vmem:[#allocation12 + $0x268] sm:$0xf0] }
 0x55e   :  { %8082 = vmatpush.bf16.msra.mxu2 %v11735_v60  ;;  %8095 = vmatpush.bf16.msra.mxu3 %v12247_v34  ;;  %v12183_v61 = vor.u32 %v13513_v27, %v12182_v40  ;;  %v11606_v52 = vld [vmem:[#allocation12 + $0x828] sm:$0xf]  ;;  %v11352_v60 = vld [vmem:[#allocation12 + $0x668] sm:$0xf0]  ;;  %v10843_v23 = vor.u32 %v13169_v14, %v10840_v15 }
 0x55f   :  { %v13369_v53 = vld [vmem:[#allocation12 + $0x864] sm:$0xf0]  ;;  %v13441_v34 = vld [vmem:[#allocation12 + $0xaac] sm:$0xf]  ;;  %v11355_v40 = vor.u32 %v13297_v21, %v11352_v60 }
 0x560   :  { %v12118_v45 = vld [vmem:[#allocation12 + $0xc28] sm:$0xf]  ;;  %8058 = vmatpush.bf16.msra.mxu0 %v10583_v42  ;;  %8071 = vmatpush.bf16.msra.mxu1 %v11095_v43  ;;  %v11607_v20 = vor.u32 %v13369_v53, %v11606_v52  ;;  %v7852_v33 = vpop.f32.mrf.mxu0  ;;  %v7865_v29 = vpop.f32.mrf.mxu1  ;;  %v13153_v27 = vld [vmem:[#allocation12 + $0x1ac] sm:$0xf] }
 0x561   :  { %v13497_v55 = vld [vmem:[#allocation12 + $0xc64] sm:$0xf0]  ;;  %v7853_v22 = vadd.f32 %v7852_v33, %v4945_v8  ;;  %v10776_v42 = vld [vmem:[#allocation12 + $0x1e8] sm:$0xf0] }
 0x562   :  { %8083 = vmatpush.bf16.msra.mxu2 %v11671_v49  ;;  %8096 = vmatpush.bf16.msra.mxu3 %v12183_v61  ;;  %v12119_v31 = vor.u32 %v13497_v55, %v12118_v45  ;;  %v11288_v63 = vld [vmem:[#allocation12 + $0x5e8] sm:$0xf0]  ;;  %v10779_v51 = vor.u32 %v13153_v27, %v10776_v42 }
 0x563   :  { %8059 = vmatmul.bf16.vlgmr.msra.gmra.mxu0 %v14191_v32  ;;  %8072 = vmatmul.bf16.vlgmr.msra.gmra.mxu1 %v14193_v35  ;;  %v7866_v43 = vadd.f32 %v7865_v29, %v7853_v22  ;;  %v13425_v48 = vld [vmem:[#allocation12 + $0xa2c] sm:$0xf]  ;;  %v11291_v54 = vor.u32 %v13281_v47, %v11288_v63  ;;  %v13226_v22 = vld [vmem:[#allocation12 + $0x3ec] sm:$0xf0] }
 0x564   :  { %8103 = vmatpush.bf16.msrb.mxu0 %v11035_v62  ;;  %8116 = vmatpush.bf16.msrb.mxu1 %v11547_v46  ;;  %v11931_v62 = vor.u32 %v13441_v34, %v11928_v18  ;;  %v12443_v46 = vor.u32 %v13569_v36, %v12440_v26  ;;  %v11864_v49 = vld [vmem:[#allocation12 + $0xa68] sm:$0xf0]  ;;  %v11038_v26 = vld [vmem:[#allocation12 + $0x3b0] sm:$0xf] }
 0x565   :  { %v13553_v61 = vld [vmem:[#allocation12 + $0xe2c] sm:$0xf]  ;;  %v11867_v45 = vor.u32 %v13425_v48, %v11864_v49  ;;  %v11039_v63 = vor.u32 %v13226_v22, %v11038_v26  ;;  %v10974_v49 = vld [vmem:[#allocation12 + $0x330] sm:$0xf] }
 0x566   :  { %8084 = vmatpush.bf16.msra.mxu2 %v11607_v20  ;;  %8097 = vmatpush.bf16.msra.mxu3 %v12119_v31  ;;  %v12376_v41 = vld [vmem:[#allocation12 + $0xe68] sm:$0xf0] }
 0x567   :  { %v13137_v52 = vld [vmem:[#allocation12 + $0x12c] sm:$0xf]  ;;  %v12379_v55 = vor.u32 %v13553_v61, %v12376_v41  ;;  %v13210_v61 = vld [vmem:[#allocation12 + $0x36c] sm:$0xf0] }
 0x568   :  { %8104 = vmatpush.bf16.msrb.mxu0 %v10971_v1  ;;  %8117 = vmatpush.bf16.msrb.mxu1 %v11483_v13  ;;  %v10712_v53 = vld [vmem:[#allocation12 + $0x168] sm:$0xf0]  ;;  %v7854_v59 = vpop.f32.mrf.mxu0  ;;  %v7867_v1 = vpop.f32.mrf.mxu1  ;;  %v11486_v41 = vld [vmem:[#allocation12 + $0x730] sm:$0xf] }
 0x569   :  { %8085 = vmatmul.bf16.vlgmr.msra.gmra.mxu2 %v14197_v56  ;;  %8098 = vmatmul.bf16.vlgmr.msra.gmra.mxu3 %v14199_v58  ;;  %v13265_v3 = vld [vmem:[#allocation12 + $0x52c] sm:$0xf]  ;;  %v10715_v19 = vor.u32 %v13137_v52, %v10712_v53  ;;  %v12062_v59 = vld [vmem:[#allocation12 + $0xbb0] sm:$0xf] }
 0x56a   :  { %8129 = vmatpush.bf16.msrb.mxu2 %v12059_v50  ;;  %8142 = vmatpush.bf16.msrb.mxu3 %v12571_v2  ;;  %v11224_v57 = vld [vmem:[#allocation12 + $0x568] sm:$0xf0]  ;;  %v13482_v1 = vld [vmem:[#allocation12 + $0xbec] sm:$0xf0] }
 0x56b   :  { %v13409_v4 = vld [vmem:[#allocation12 + $0x9ac] sm:$0xf]  ;;  %v11227_v6 = vor.u32 %v13265_v3, %v11224_v57 }
 0x56c   :  { %8105 = vmatpush.bf16.msrb.mxu0 %v10907_v12  ;;  %8118 = vmatpush.bf16.msrb.mxu1 %v11419_v9  ;;  %v11800_v13 = vld [vmem:[#allocation12 + $0x9e8] sm:$0xf0]  ;;  %v7878_v11 = vpop.f32.mrf.mxu2  ;;  %v7891_v8 = vpop.f32.mrf.mxu3 }
 0x56d   :  { %v13537_v20 = vld [vmem:[#allocation12 + $0xdac] sm:$0xf]  ;;  %v11803_v0 = vor.u32 %v13409_v4, %v11800_v13  ;;  %v7879_v15 = vadd.f32 %v7878_v11, %v7866_v43  ;;  %v12574_v13 = vld [vmem:[#allocation12 + $0xfb0] sm:$0xf] }
 0x56e   :  { %8130 = vmatpush.bf16.msrb.mxu2 %v11995_v16  ;;  %8143 = vmatpush.bf16.msrb.mxu3 %v12507_v17  ;;  %v12312_v31 = vld [vmem:[#allocation12 + $0xde8] sm:$0xf0]  ;;  %v11998_v11 = vld [vmem:[#allocation12 + $0xb30] sm:$0xf] }
 0x56f   :  { %v13121_v50 = vld [vmem:[#allocation12 + $0xac] sm:$0xf]  ;;  %v12315_v30 = vor.u32 %v13537_v20, %v12312_v31  ;;  %v14266_v33 = vadd.f32 %v7891_v8, %v7879_v15  ;;  %v13610_v20 = vld [vmem:[#allocation12 + $0xfec] sm:$0xf0]  ;;  %v10975_v31 = vor.u32 %v13210_v61, %v10974_v49 }
 0x570   :  { %8106 = vmatpush.bf16.msrb.mxu0 %v10843_v23  ;;  %8119 = vmatpush.bf16.msrb.mxu1 %v11355_v40  ;;  %v10648_v2 = vld [vmem:[#allocation12 + $0xe8] sm:$0xf0]  ;;  %v11550_v23 = vld [vmem:[#allocation12 + $0x7b0] sm:$0xf] }
 0x571   :  { %v13249_v5 = vld [vmem:[#allocation12 + $0x4ac] sm:$0xf]  ;;  %v10651_v16 = vor.u32 %v13121_v50, %v10648_v2  ;;  %v13354_v40 = vld [vmem:[#allocation12 + $0x7ec] sm:$0xf0] }
 0x572   :  { %8131 = vmatpush.bf16.msrb.mxu2 %v11931_v62  ;;  %8144 = vmatpush.bf16.msrb.mxu3 %v12443_v46  ;;  %v11160_v7 = vld [vmem:[#allocation12 + $0x4e8] sm:$0xf0]  ;;  %v11551_v48 = vor.u32 %v13354_v40, %v11550_v23  ;;  %v10910_v2 = vld [vmem:[#allocation12 + $0x2b0] sm:$0xf] }
 0x573   :  { %v13393_v38 = vld [vmem:[#allocation12 + $0x92c] sm:$0xf]  ;;  %v11163_v17 = vor.u32 %v13249_v5, %v11160_v7  ;;  %v12575_v5 = vor.u32 %v13610_v20, %v12574_v13  ;;  %v11422_v7 = vld [vmem:[#allocation12 + $0x6b0] sm:$0xf] }
 0x574   :  { %8107 = vmatpush.bf16.msrb.mxu0 %v10779_v51  ;;  %8120 = vmatpush.bf16.msrb.mxu1 %v11291_v54  ;;  %v11736_v12 = vld [vmem:[#allocation12 + $0x968] sm:$0xf0]  ;;  %v7880_v52 = vpop.f32.mrf.mxu2  ;;  %v7893_v53 = vpop.f32.mrf.mxu3  ;;  %v13466_v8 = vld [vmem:[#allocation12 + $0xb6c] sm:$0xf0] }
 0x575   :  { %v13521_v9 = vld [vmem:[#allocation12 + $0xd2c] sm:$0xf]  ;;  %v11739_v29 = vor.u32 %v13393_v38, %v11736_v12  ;;  %v13322_v38 = vld [vmem:[#allocation12 + $0x6ec] sm:$0xf0] }
 0x576   :  { %8132 = vmatpush.bf16.msrb.mxu2 %v11867_v45  ;;  %8145 = vmatpush.bf16.msrb.mxu3 %v12379_v55  ;;  %v12248_v14 = vld [vmem:[#allocation12 + $0xd68] sm:$0xf0]  ;;  %v13338_v45 = vld [vmem:[#allocation12 + $0x76c] sm:$0xf0] }
 0x577   :  { %v13105_v21 = vld [vmem:[#allocation12 + $0x2c] sm:$0xf]  ;;  %v12251_v18 = vor.u32 %v13521_v9, %v12248_v14  ;;  %v12510_v12 = vld [vmem:[#allocation12 + $0xf30] sm:$0xf]  ;;  %v4946_v14 = vperm.slane %v14254_v10, 7 }
 0x578   :  { %8108 = vmatpush.bf16.msrb.mxu0 %v10715_v19  ;;  %8121 = vmatpush.bf16.msrb.mxu1 %v11227_v6  ;;  %v10584_v60 = vld [vmem:[#allocation12 + $0x68] sm:$0xf0]  ;;  %v11487_v19 = vor.u32 %v13338_v45, %v11486_v41  ;;  %v13594_v9 = vld [vmem:[#allocation12 + $0xf6c] sm:$0xf0] }
 0x579   :  { %v13233_v34 = vld [vmem:[#allocation12 + $0x42c] sm:$0xf]  ;;  %v10587_v46 = vor.u32 %v13105_v21, %v10584_v60  ;;  %v13178_v21 = vld [vmem:[#allocation12 + $0x26c] sm:$0xf0]  ;;  %v11999_v60 = vor.u32 %v13466_v8, %v11998_v11 }
 0x57a   :  { %8133 = vmatpush.bf16.msrb.mxu2 %v11803_v0  ;;  %8146 = vmatpush.bf16.msrb.mxu3 %v12315_v30  ;;  %v11096_v36 = vld [vmem:[#allocation12 + $0x468] sm:$0xf0]  ;;  %v13194_v0 = vld [vmem:[#allocation12 + $0x2ec] sm:$0xf0]  ;;  %v12063_v30 = vor.u32 %v13482_v1, %v12062_v59 }
 0x57b   :  { %v13377_v27 = vld [vmem:[#allocation12 + $0x8ac] sm:$0xf]  ;;  %v11099_v47 = vor.u32 %v13233_v34, %v11096_v36  ;;  %v10911_v15 = vor.u32 %v13194_v0, %v10910_v2  ;;  %v12511_v34 = vor.u32 %v13594_v9, %v12510_v12  ;;  %v11934_v36 = vld [vmem:[#allocation12 + $0xab0] sm:$0xf] }
 0x57c   :  { %v11672_v42 = vld [vmem:[#allocation12 + $0x8e8] sm:$0xf0]  ;;  %8109 = vmatpush.bf16.msrb.mxu0 %v10651_v16  ;;  %8122 = vmatpush.bf16.msrb.mxu1 %v11163_v17  ;;  %v11423_v16 = vor.u32 %v13322_v38, %v11422_v7  ;;  %v10846_v17 = vld [vmem:[#allocation12 + $0x230] sm:$0xf] }
 0x57d   :  { %v13505_v43 = vld [vmem:[#allocation12 + $0xcac] sm:$0xf]  ;;  %v11675_v51 = vor.u32 %v13377_v27, %v11672_v42  ;;  %v13450_v23 = vld [vmem:[#allocation12 + $0xaec] sm:$0xf0]  ;;  %v10847_v42 = vor.u32 %v13178_v21, %v10846_v17 }
 0x57e   :  { %v12184_v62 = vld [vmem:[#allocation12 + $0xce8] sm:$0xf0]  ;;  %8134 = vmatpush.bf16.msrb.mxu2 %v11739_v29  ;;  %8147 = vmatpush.bf16.msrb.mxu3 %v12251_v18  ;;  %v11358_v29 = vld [vmem:[#allocation12 + $0x630] sm:$0xf] }
 0x57f   :  { %v12187_v54 = vor.u32 %v13505_v43, %v12184_v62  ;;  %v13361_v55 = vld [vmem:[#allocation12 + $0x82c] sm:$0xf]  ;;  %v13306_v18 = vld [vmem:[#allocation12 + $0x66c] sm:$0xf0] }
 0x580   :  { %v11608_v3 = vld [vmem:[#allocation12 + $0x868] sm:$0xf0]  ;;  %8110 = vmatpush.bf16.msrb.mxu0 %v10587_v46  ;;  %8123 = vmatpush.bf16.msrb.mxu1 %v11099_v47  ;;  %v7904_v26 = vpop.f32.mrf.mxu0  ;;  %v7917_v22 = vpop.f32.mrf.mxu1  ;;  %v12446_v40 = vld [vmem:[#allocation12 + $0xeb0] sm:$0xf]  ;;  %v11359_v43 = vor.u32 %v13306_v18, %v11358_v29 }
 0x581   :  { %v13489_v57 = vld [vmem:[#allocation12 + $0xc2c] sm:$0xf]  ;;  %v11611_v6 = vor.u32 %v13361_v55, %v11608_v3  ;;  %v13578_v27 = vld [vmem:[#allocation12 + $0xeec] sm:$0xf0]  ;;  %v7905_v10 = vadd.f32 %v7904_v26, %v4946_v14 }
 0x582   :  { %v12120_v4 = vld [vmem:[#allocation12 + $0xc68] sm:$0xf0]  ;;  %8135 = vmatpush.bf16.msrb.mxu2 %v11675_v51  ;;  %8148 = vmatpush.bf16.msrb.mxu3 %v12187_v54  ;;  %v10782_v62 = vld [vmem:[#allocation12 + $0x1b0] sm:$0xf] }
 0x583   :  { %v12123_v50 = vor.u32 %v13489_v57, %v12120_v4  ;;  %8111 = vmatmul.bf16.vlgmr.msrb.gmra.mxu0 %v14191_v32  ;;  %8124 = vmatmul.bf16.vlgmr.msrb.gmra.mxu1 %v14193_v35  ;;  %v13162_v46 = vld [vmem:[#allocation12 + $0x1ec] sm:$0xf0]  ;;  %v7918_v47 = vadd.f32 %v7917_v22, %v7905_v10  ;;  %v11040_v10 = vld [vmem:[#allocation12 + $0x3f0] sm:$0xf0] }
 0x584   :  { %8155 = vmatpush.bf16.msra.mxu0 %v11039_v63  ;;  %8168 = vmatpush.bf16.msra.mxu1 %v11551_v48  ;;  %v11935_v63 = vor.u32 %v13450_v23, %v11934_v36  ;;  %v12447_v48 = vor.u32 %v13578_v27, %v12446_v40  ;;  %v11294_v49 = vld [vmem:[#allocation12 + $0x5b0] sm:$0xf]  ;;  %v10783_v53 = vor.u32 %v13162_v46, %v10782_v62  ;;  %v13218_v27 = vld [vmem:[#allocation12 + $0x3b4] sm:$0xf] }
 0x585   :  { %v13290_v61 = vld [vmem:[#allocation12 + $0x5ec] sm:$0xf0] }
 0x586   :  { %8136 = vmatpush.bf16.msrb.mxu2 %v11611_v6  ;;  %8149 = vmatpush.bf16.msrb.mxu3 %v12123_v50  ;;  %v11870_v41 = vld [vmem:[#allocation12 + $0xa30] sm:$0xf]  ;;  %v11295_v45 = vor.u32 %v13290_v61, %v11294_v49  ;;  %v11043_v61 = vor.u32 %v13218_v27, %v11040_v10  ;;  %v13442_v27 = vld [vmem:[#allocation12 + $0xab4] sm:$0xf] }
 0x587   :  { %v13434_v51 = vld [vmem:[#allocation12 + $0xa6c] sm:$0xf0] }
 0x588   :  { %8156 = vmatpush.bf16.msra.mxu0 %v10975_v31  ;;  %8169 = vmatpush.bf16.msra.mxu1 %v11487_v19  ;;  %v12382_v54 = vld [vmem:[#allocation12 + $0xe30] sm:$0xf]  ;;  %v11871_v57 = vor.u32 %v13434_v51, %v11870_v41  ;;  %v7906_v20 = vpop.f32.mrf.mxu0  ;;  %v7919_v31 = vpop.f32.mrf.mxu1  ;;  %v13202_v51 = vld [vmem:[#allocation12 + $0x334] sm:$0xf] }
 0x589   :  { %8137 = vmatmul.bf16.vlgmr.msrb.gmra.mxu2 %v14197_v56  ;;  %8150 = vmatmul.bf16.vlgmr.msrb.gmra.mxu3 %v14199_v58  ;;  %v13562_v52 = vld [vmem:[#allocation12 + $0xe6c] sm:$0xf0]  ;;  %v13474_v20 = vld [vmem:[#allocation12 + $0xbb4] sm:$0xf] }
 0x58a   :  { %8181 = vmatpush.bf16.msra.mxu2 %v12063_v30  ;;  %8194 = vmatpush.bf16.msra.mxu3 %v12575_v5  ;;  %v10718_v55 = vld [vmem:[#allocation12 + $0x130] sm:$0xf]  ;;  %v12383_v4 = vor.u32 %v13562_v52, %v12382_v54  ;;  %v10976_v54 = vld [vmem:[#allocation12 + $0x370] sm:$0xf0] }
 0x58b   :  { %v13146_v3 = vld [vmem:[#allocation12 + $0x16c] sm:$0xf0]  ;;  %v13330_v52 = vld [vmem:[#allocation12 + $0x734] sm:$0xf] }
 0x58c   :  { %8157 = vmatpush.bf16.msra.mxu0 %v10911_v15  ;;  %8170 = vmatpush.bf16.msra.mxu1 %v11423_v16  ;;  %v11230_v59 = vld [vmem:[#allocation12 + $0x530] sm:$0xf]  ;;  %v10719_v2 = vor.u32 %v13146_v3, %v10718_v55  ;;  %v7930_v9 = vpop.f32.mrf.mxu2  ;;  %v7943_v14 = vpop.f32.mrf.mxu3  ;;  %v12064_v31 = vld [vmem:[#allocation12 + $0xbf0] sm:$0xf0] }
 0x58d   :  { %v13274_v1 = vld [vmem:[#allocation12 + $0x56c] sm:$0xf0]  ;;  %v7931_v21 = vadd.f32 %v7930_v9, %v7918_v47  ;;  %v11424_v9 = vld [vmem:[#allocation12 + $0x6f0] sm:$0xf0] }
 0x58e   :  { %8182 = vmatpush.bf16.msra.mxu2 %v11999_v60  ;;  %8195 = vmatpush.bf16.msra.mxu3 %v12511_v34  ;;  %v11806_v13 = vld [vmem:[#allocation12 + $0x9b0] sm:$0xf]  ;;  %v11231_v0 = vor.u32 %v13274_v1, %v11230_v59 }
 0x58f   :  { %v13418_v19 = vld [vmem:[#allocation12 + $0x9ec] sm:$0xf0]  ;;  %v14273_v26 = vadd.f32 %v7943_v14, %v7931_v21  ;;  %v13458_v14 = vld [vmem:[#allocation12 + $0xb34] sm:$0xf] }
 0x590   :  { %8158 = vmatpush.bf16.msra.mxu0 %v10847_v42  ;;  %8171 = vmatpush.bf16.msra.mxu1 %v11359_v43  ;;  %v12318_v6 = vld [vmem:[#allocation12 + $0xdb0] sm:$0xf]  ;;  %v11807_v7 = vor.u32 %v13418_v19, %v11806_v13  ;;  %v13346_v42 = vld [vmem:[#allocation12 + $0x7b4] sm:$0xf] }
 0x591   :  { %v13546_v50 = vld [vmem:[#allocation12 + $0xdec] sm:$0xf0]  ;;  %v11552_v43 = vld [vmem:[#allocation12 + $0x7f0] sm:$0xf0] }
 0x592   :  { %8183 = vmatpush.bf16.msra.mxu2 %v11935_v63  ;;  %8196 = vmatpush.bf16.msra.mxu3 %v12447_v48  ;;  %v10654_v30 = vld [vmem:[#allocation12 + $0xb0] sm:$0xf]  ;;  %v12319_v38 = vor.u32 %v13546_v50, %v12318_v6  ;;  %v11555_v41 = vor.u32 %v13346_v42, %v11552_v43  ;;  %v13602_v19 = vld [vmem:[#allocation12 + $0xfb4] sm:$0xf]  ;;  %v10979_v50 = vor.u32 %v13202_v51, %v10976_v54 }
 0x593   :  { %v13130_v5 = vld [vmem:[#allocation12 + $0xec] sm:$0xf0]  ;;  %v12576_v6 = vld [vmem:[#allocation12 + $0xff0] sm:$0xf0] }
 0x594   :  { %8159 = vmatpush.bf16.msra.mxu0 %v10783_v53  ;;  %8172 = vmatpush.bf16.msra.mxu1 %v11295_v45  ;;  %v11166_v11 = vld [vmem:[#allocation12 + $0x4b0] sm:$0xf]  ;;  %v10655_v60 = vor.u32 %v13130_v5, %v10654_v30  ;;  %v7932_v55 = vpop.f32.mrf.mxu2  ;;  %v7945_v3 = vpop.f32.mrf.mxu3  ;;  %v13186_v5 = vld [vmem:[#allocation12 + $0x2b4] sm:$0xf] }
 0x595   :  { %v13258_v8 = vld [vmem:[#allocation12 + $0x4ec] sm:$0xf0]  ;;  %v11936_v43 = vld [vmem:[#allocation12 + $0xaf0] sm:$0xf0] }
 0x596   :  { %8184 = vmatpush.bf16.msra.mxu2 %v11871_v57  ;;  %8197 = vmatpush.bf16.msra.mxu3 %v12383_v4  ;;  %v11742_v12 = vld [vmem:[#allocation12 + $0x930] sm:$0xf]  ;;  %v11167_v34 = vor.u32 %v13258_v8, %v11166_v11  ;;  %v11488_v57 = vld [vmem:[#allocation12 + $0x770] sm:$0xf0]  ;;  %v12067_v11 = vor.u32 %v13474_v20, %v12064_v31  ;;  %v12579_v8 = vor.u32 %v13602_v19, %v12576_v6 }
 0x597   :  { %v13402_v15 = vld [vmem:[#allocation12 + $0x96c] sm:$0xf0]  ;;  %v11939_v51 = vor.u32 %v13442_v27, %v11936_v43  ;;  %v11872_v55 = vld [vmem:[#allocation12 + $0xa70] sm:$0xf0] }
 0x598   :  { %v12254_v16 = vld [vmem:[#allocation12 + $0xd30] sm:$0xf]  ;;  %8160 = vmatpush.bf16.msra.mxu0 %v10719_v2  ;;  %8173 = vmatpush.bf16.msra.mxu1 %v11231_v0  ;;  %v11743_v22 = vor.u32 %v13402_v15, %v11742_v12  ;;  %v11491_v2 = vor.u32 %v13330_v52, %v11488_v57  ;;  %v13314_v12 = vld [vmem:[#allocation12 + $0x6b4] sm:$0xf] }
 0x599   :  { %v13530_v17 = vld [vmem:[#allocation12 + $0xd6c] sm:$0xf0]  ;;  %v12000_v15 = vld [vmem:[#allocation12 + $0xb70] sm:$0xf0] }
 0x59a   :  { %v10590_v29 = vld [vmem:[#allocation12 + $0x30] sm:$0xf]  ;;  %8185 = vmatpush.bf16.msra.mxu2 %v11807_v7  ;;  %8198 = vmatpush.bf16.msra.mxu3 %v12319_v38  ;;  %v12255_v23 = vor.u32 %v13530_v17, %v12254_v16  ;;  %v10912_v7 = vld [vmem:[#allocation12 + $0x2f0] sm:$0xf0]  ;;  %v14275_v38 = vld [vmem:[#allocation13 + $0x8] sm:$0xff] }
 0x59b   :  { %v13114_v18 = vld [vmem:[#allocation12 + $0x6c] sm:$0xf0]  ;;  %v13586_v16 = vld [vmem:[#allocation12 + $0xf34] sm:$0xf]  ;;  %v4947_v21 = vperm.slane %v14275_v38, 0 }
 0x59c   :  { %v11102_v36 = vld [vmem:[#allocation12 + $0x430] sm:$0xf]  ;;  %8161 = vmatpush.bf16.msra.mxu0 %v10655_v60  ;;  %8174 = vmatpush.bf16.msra.mxu1 %v11167_v34  ;;  %v10591_v48 = vor.u32 %v13114_v18, %v10590_v29  ;;  %v12512_v17 = vld [vmem:[#allocation12 + $0xf70] sm:$0xf0]  ;;  %v10915_v60 = vor.u32 %v13186_v5, %v10912_v7  ;;  %v11427_v34 = vor.u32 %v13314_v12, %v11424_v9 }
 0x59d   :  { %v13242_v40 = vld [vmem:[#allocation12 + $0x46c] sm:$0xf0]  ;;  %v13170_v29 = vld [vmem:[#allocation12 + $0x234] sm:$0xf] }
 0x59e   :  { %v11678_v62 = vld [vmem:[#allocation12 + $0x8b0] sm:$0xf]  ;;  %v11103_v49 = vor.u32 %v13242_v40, %v11102_v36  ;;  %8186 = vmatpush.bf16.msra.mxu2 %v11743_v22  ;;  %8199 = vmatpush.bf16.msra.mxu3 %v12255_v23  ;;  %v10848_v18 = vld [vmem:[#allocation12 + $0x270] sm:$0xf0]  ;;  %v12003_v36 = vor.u32 %v13458_v14, %v12000_v15  ;;  %v12515_v22 = vor.u32 %v13586_v16, %v12512_v17 }
 0x59f   :  { %v13386_v46 = vld [vmem:[#allocation12 + $0x8ec] sm:$0xf0]  ;;  %v13298_v23 = vld [vmem:[#allocation12 + $0x634] sm:$0xf] }
 0x5a0   :  { %v12190_v47 = vld [vmem:[#allocation12 + $0xcb0] sm:$0xf]  ;;  %v11679_v53 = vor.u32 %v13386_v46, %v11678_v62  ;;  %8162 = vmatpush.bf16.msra.mxu0 %v10591_v48  ;;  %8175 = vmatpush.bf16.msra.mxu1 %v11103_v49  ;;  %v11360_v40 = vld [vmem:[#allocation12 + $0x670] sm:$0xf0]  ;;  %v7956_v10 = vpop.f32.mrf.mxu0  ;;  %v7969_v42 = vpop.f32.mrf.mxu1 }
 0x5a1   :  { %v13514_v63 = vld [vmem:[#allocation12 + $0xcec] sm:$0xf0]  ;;  %v13570_v62 = vld [vmem:[#allocation12 + $0xeb4] sm:$0xf]  ;;  %v11363_v48 = vor.u32 %v13298_v23, %v11360_v40 }
 0x5a2   :  { %v12191_v45 = vor.u32 %v13514_v63, %v12190_v47  ;;  %v11614_v4 = vld [vmem:[#allocation12 + $0x830] sm:$0xf]  ;;  %8187 = vmatpush.bf16.msra.mxu2 %v11679_v53  ;;  %v12448_v46 = vld [vmem:[#allocation12 + $0xef0] sm:$0xf0]  ;;  %v7957_v47 = vadd.f32 %v7956_v10, %v4947_v21  ;;  %v10851_v63 = vor.u32 %v13170_v29, %v10848_v18 }
 0x5a3   :  { %v13370_v59 = vld [vmem:[#allocation12 + $0x86c] sm:$0xf0]  ;;  %8163 = vmatmul.bf16.vlgmr.msra.gmra.mxu0 %v14191_v32  ;;  %8176 = vmatmul.bf16.vlgmr.msra.gmra.mxu1 %v14193_v35  ;;  %v13154_v49 = vld [vmem:[#allocation12 + $0x1b4] sm:$0xf]  ;;  %v12451_v54 = vor.u32 %v13570_v62, %v12448_v46 }
 0x5a4   :  { %v12126_v1 = vld [vmem:[#allocation12 + $0xc30] sm:$0xf]  ;;  %8207 = vmatpush.bf16.msrb.mxu0 %v11043_v61  ;;  %8220 = vmatpush.bf16.msrb.mxu1 %v11555_v41  ;;  %v11615_v0 = vor.u32 %v13370_v59, %v11614_v4  ;;  %v10784_v61 = vld [vmem:[#allocation12 + $0x1f0] sm:$0xf0]  ;;  %v7970_v41 = vadd.f32 %v7969_v42, %v7957_v47 }
 0x5a5   :  { %v13498_v13 = vld [vmem:[#allocation12 + $0xc6c] sm:$0xf0]  ;;  %8200 = vmatpush.bf16.msra.mxu3 %v12191_v45  ;;  %v13282_v52 = vld [vmem:[#allocation12 + $0x5b4] sm:$0xf]  ;;  %v10787_v4 = vor.u32 %v13154_v49, %v10784_v61  ;;  %v11558_v49 = vld [vmem:[#allocation12 + $0x7b8] sm:$0xf] }
 0x5a6   :  { %v12127_v30 = vor.u32 %v13498_v13, %v12126_v1  ;;  %8188 = vmatpush.bf16.msra.mxu2 %v11615_v0  ;;  %v11296_v53 = vld [vmem:[#allocation12 + $0x5f0] sm:$0xf0]  ;;  %v13355_v61 = vld [vmem:[#allocation12 + $0x7f4] sm:$0xf0] }
 0x5a7   :  { %v13426_v45 = vld [vmem:[#allocation12 + $0xa34] sm:$0xf]  ;;  %v11299_v59 = vor.u32 %v13282_v52, %v11296_v53 }
 0x5a8   :  { %8208 = vmatpush.bf16.msrb.mxu0 %v10979_v50  ;;  %8221 = vmatpush.bf16.msrb.mxu1 %v11491_v2  ;;  %v13554_v3 = vld [vmem:[#allocation12 + $0xe34] sm:$0xf]  ;;  %v11875_v20 = vor.u32 %v13426_v45, %v11872_v55  ;;  %v7958_v2 = vpop.f32.mrf.mxu0  ;;  %v7971_v0 = vpop.f32.mrf.mxu1 }
 0x5a9   :  { %8201 = vmatpush.bf16.msra.mxu3 %v12127_v30  ;;  %8189 = vmatmul.bf16.vlgmr.msra.gmra.mxu2 %v14197_v56  ;;  %v12384_v57 = vld [vmem:[#allocation12 + $0xe70] sm:$0xf0] }
 0x5aa   :  { %8233 = vmatpush.bf16.msrb.mxu2 %v12067_v11  ;;  %v13138_v1 = vld [vmem:[#allocation12 + $0x134] sm:$0xf]  ;;  %v12387_v31 = vor.u32 %v13554_v3, %v12384_v57  ;;  %v11559_v3 = vor.u32 %v13355_v61, %v11558_v49  ;;  %v10982_v57 = vld [vmem:[#allocation12 + $0x338] sm:$0xf] }
 0x5ab   :  { %v10720_v13 = vld [vmem:[#allocation12 + $0x170] sm:$0xf0] }
 0x5ac   :  { %8202 = vmatmul.bf16.vlgmr.msra.gmra.mxu3 %v14199_v58  ;;  %8209 = vmatpush.bf16.msrb.mxu0 %v10915_v60  ;;  %v13266_v19 = vld [vmem:[#allocation12 + $0x534] sm:$0xf]  ;;  %v10723_v11 = vor.u32 %v13138_v1, %v10720_v13  ;;  %v7982_v60 = vpop.f32.mrf.mxu2 }
 0x5ad   :  { %8246 = vmatpush.bf16.msrb.mxu3 %v12579_v8  ;;  %8222 = vmatpush.bf16.msrb.mxu1 %v11427_v34  ;;  %v11232_v6 = vld [vmem:[#allocation12 + $0x570] sm:$0xf0]  ;;  %v7995_v34 = vpop.f32.mrf.mxu3 }
 0x5ae   :  { %8234 = vmatpush.bf16.msrb.mxu2 %v12003_v36  ;;  %v13410_v50 = vld [vmem:[#allocation12 + $0x9b4] sm:$0xf]  ;;  %v11235_v8 = vor.u32 %v13266_v19, %v11232_v6  ;;  %v13339_v19 = vld [vmem:[#allocation12 + $0x774] sm:$0xf0] }
 0x5af   :  { %v11808_v30 = vld [vmem:[#allocation12 + $0x9f0] sm:$0xf0] }
 0x5b0   :  { %8210 = vmatpush.bf16.msrb.mxu0 %v10851_v63  ;;  %v13538_v5 = vld [vmem:[#allocation12 + $0xdb4] sm:$0xf]  ;;  %v11811_v14 = vor.u32 %v13410_v50, %v11808_v30  ;;  %v11046_v63 = vld [vmem:[#allocation12 + $0x3b8] sm:$0xf] }
 0x5b1   :  { %8247 = vmatpush.bf16.msrb.mxu3 %v12515_v22  ;;  %8223 = vmatpush.bf16.msrb.mxu1 %v11363_v48  ;;  %v12320_v7 = vld [vmem:[#allocation12 + $0xdf0] sm:$0xf0]  ;;  %v7983_v22 = vadd.f32 %v7982_v60, %v7970_v41  ;;  %v13227_v48 = vld [vmem:[#allocation12 + $0x3f4] sm:$0xf0] }
 0x5b2   :  { %8235 = vmatpush.bf16.msrb.mxu2 %v11939_v51  ;;  %v13122_v12 = vld [vmem:[#allocation12 + $0xb4] sm:$0xf]  ;;  %v12323_v15 = vor.u32 %v13538_v5, %v12320_v7  ;;  %v11047_v55 = vor.u32 %v13227_v48, %v11046_v63  ;;  %v12070_v30 = vld [vmem:[#allocation12 + $0xbb8] sm:$0xf] }
 0x5b3   :  { %v10656_v9 = vld [vmem:[#allocation12 + $0xf0] sm:$0xf0]  ;;  %v14282_v43 = vadd.f32 %v7995_v34, %v7983_v22  ;;  %v13483_v5 = vld [vmem:[#allocation12 + $0xbf4] sm:$0xf0] }
 0x5b4   :  { %8211 = vmatpush.bf16.msrb.mxu0 %v10787_v4  ;;  %v13250_v16 = vld [vmem:[#allocation12 + $0x4b4] sm:$0xf]  ;;  %v10659_v23 = vor.u32 %v13122_v12, %v10656_v9  ;;  %v13211_v4 = vld [vmem:[#allocation12 + $0x374] sm:$0xf0] }
 0x5b5   :  { %8248 = vmatpush.bf16.msrb.mxu3 %v12451_v54  ;;  %8224 = vmatpush.bf16.msrb.mxu1 %v11299_v59  ;;  %v11168_v17 = vld [vmem:[#allocation12 + $0x4f0] sm:$0xf0]  ;;  %v11494_v59 = vld [vmem:[#allocation12 + $0x738] sm:$0xf] }
 0x5b6   :  { %8236 = vmatpush.bf16.msrb.mxu2 %v11875_v20  ;;  %v13394_v21 = vld [vmem:[#allocation12 + $0x934] sm:$0xf]  ;;  %v11171_v40 = vor.u32 %v13250_v16, %v11168_v17  ;;  %v7984_v20 = vpop.f32.mrf.mxu2  ;;  %v12582_v7 = vld [vmem:[#allocation12 + $0xfb8] sm:$0xf]  ;;  %v11495_v12 = vor.u32 %v13339_v19, %v11494_v59  ;;  %v12071_v17 = vor.u32 %v13483_v5, %v12070_v30 }
 0x5b7   :  { %v11744_v29 = vld [vmem:[#allocation12 + $0x970] sm:$0xf0]  ;;  %v13195_v16 = vld [vmem:[#allocation12 + $0x2f4] sm:$0xf0] }
 0x5b8   :  { %v13522_v18 = vld [vmem:[#allocation12 + $0xd34] sm:$0xf]  ;;  %8212 = vmatpush.bf16.msrb.mxu0 %v10723_v11  ;;  %v11747_v62 = vor.u32 %v13394_v21, %v11744_v29  ;;  %v13611_v11 = vld [vmem:[#allocation12 + $0xff4] sm:$0xf0] }
 0x5b9   :  { %8249 = vmatpush.bf16.msrb.mxu3 %v12387_v31  ;;  %v12256_v36 = vld [vmem:[#allocation12 + $0xd70] sm:$0xf0]  ;;  %8225 = vmatpush.bf16.msrb.mxu1 %v11235_v8  ;;  %v7997_v31 = vpop.f32.mrf.mxu3  ;;  %v10983_v8 = vor.u32 %v13211_v4, %v10982_v57  ;;  %v12583_v21 = vor.u32 %v13611_v11, %v12582_v7  ;;  %v11430_v60 = vld [vmem:[#allocation12 + $0x6b8] sm:$0xf] }
 0x5ba   :  { %v13106_v27 = vld [vmem:[#allocation12 + $0x34] sm:$0xf]  ;;  %8237 = vmatpush.bf16.msrb.mxu2 %v11811_v14  ;;  %v12259_v46 = vor.u32 %v13522_v18, %v12256_v36  ;;  %v13323_v34 = vld [vmem:[#allocation12 + $0x6f4] sm:$0xf0] }
 0x5bb   :  { %v10592_v10 = vld [vmem:[#allocation12 + $0x70] sm:$0xf0]  ;;  %v12006_v29 = vld [vmem:[#allocation12 + $0xb38] sm:$0xf] }
 0x5bc   :  { %v13234_v42 = vld [vmem:[#allocation12 + $0x434] sm:$0xf]  ;;  %8213 = vmatpush.bf16.msrb.mxu0 %v10659_v23  ;;  %v10595_v53 = vor.u32 %v13106_v27, %v10592_v10  ;;  %v13467_v18 = vld [vmem:[#allocation12 + $0xb74] sm:$0xf0]  ;;  %v4948_v23 = vperm.slane %v14275_v38, 1  ;;  %v11431_v27 = vor.u32 %v13323_v34, %v11430_v60 }
 0x5bd   :  { %8250 = vmatpush.bf16.msrb.mxu3 %v12323_v15  ;;  %v11104_v47 = vld [vmem:[#allocation12 + $0x470] sm:$0xf0]  ;;  %8226 = vmatpush.bf16.msrb.mxu1 %v11171_v40  ;;  %v10918_v15 = vld [vmem:[#allocation12 + $0x2b8] sm:$0xf] }
 0x5be   :  { %v13378_v51 = vld [vmem:[#allocation12 + $0x8b4] sm:$0xf]  ;;  %v11107_v45 = vor.u32 %v13234_v42, %v11104_v47  ;;  %8238 = vmatpush.bf16.msrb.mxu2 %v11747_v62  ;;  %v12518_v36 = vld [vmem:[#allocation12 + $0xf38] sm:$0xf]  ;;  %v10919_v40 = vor.u32 %v13195_v16, %v10918_v15  ;;  %v12007_v62 = vor.u32 %v13467_v18, %v12006_v29 }
 0x5bf   :  { %v11680_v41 = vld [vmem:[#allocation12 + $0x8f0] sm:$0xf0]  ;;  %v13595_v22 = vld [vmem:[#allocation12 + $0xf74] sm:$0xf0] }
 0x5c0   :  { %v13506_v54 = vld [vmem:[#allocation12 + $0xcb4] sm:$0xf]  ;;  %v11683_v1 = vor.u32 %v13378_v51, %v11680_v41  ;;  %8214 = vmatpush.bf16.msrb.mxu0 %v10595_v53  ;;  %v10854_v10 = vld [vmem:[#allocation12 + $0x238] sm:$0xf]  ;;  %v8008_v49 = vpop.f32.mrf.mxu0  ;;  %v8021_v61 = vpop.f32.mrf.mxu1 }
 0x5c1   :  { %v12192_v52 = vld [vmem:[#allocation12 + $0xcf0] sm:$0xf0]  ;;  %8251 = vmatpush.bf16.msrb.mxu3 %v12259_v46  ;;  %8227 = vmatpush.bf16.msrb.mxu1 %v11107_v45  ;;  %v13179_v42 = vld [vmem:[#allocation12 + $0x274] sm:$0xf0]  ;;  %v12519_v46 = vor.u32 %v13595_v22, %v12518_v36 }
 0x5c2   :  { %v12195_v13 = vor.u32 %v13506_v54, %v12192_v52  ;;  %v13362_v6 = vld [vmem:[#allocation12 + $0x834] sm:$0xf]  ;;  %8239 = vmatpush.bf16.msrb.mxu2 %v11683_v1  ;;  %v11366_v47 = vld [vmem:[#allocation12 + $0x638] sm:$0xf]  ;;  %v8009_v52 = vadd.f32 %v8008_v49, %v4948_v23  ;;  %v10855_v53 = vor.u32 %v13179_v42, %v10854_v10 }
 0x5c3   :  { %v11616_v50 = vld [vmem:[#allocation12 + $0x870] sm:$0xf0]  ;;  %8215 = vmatmul.bf16.vlgmr.msrb.gmra.mxu0 %v14191_v32  ;;  %v13307_v63 = vld [vmem:[#allocation12 + $0x674] sm:$0xf0] }
 0x5c4   :  { %v13490_v2 = vld [vmem:[#allocation12 + $0xc34] sm:$0xf]  ;;  %8259 = vmatpush.bf16.msra.mxu0 %v11047_v55  ;;  %v11619_v9 = vor.u32 %v13362_v6, %v11616_v50  ;;  %8228 = vmatmul.bf16.vlgmr.msrb.gmra.mxu1 %v14193_v35  ;;  %v11942_v48 = vld [vmem:[#allocation12 + $0xab8] sm:$0xf]  ;;  %v11367_v45 = vor.u32 %v13307_v63, %v11366_v47  ;;  %v8022_v57 = vadd.f32 %v8021_v61, %v8009_v52 }
 0x5c5   :  { %v12128_v0 = vld [vmem:[#allocation12 + $0xc70] sm:$0xf0]  ;;  %8272 = vmatpush.bf16.msra.mxu1 %v11559_v3  ;;  %8252 = vmatpush.bf16.msrb.mxu3 %v12195_v13  ;;  %v13451_v51 = vld [vmem:[#allocation12 + $0xaf4] sm:$0xf0] }
 0x5c6   :  { %v12131_v14 = vor.u32 %v13490_v2, %v12128_v0  ;;  %8240 = vmatpush.bf16.msrb.mxu2 %v11619_v9  ;;  %v12454_v41 = vld [vmem:[#allocation12 + $0xeb8] sm:$0xf]  ;;  %v11943_v4 = vor.u32 %v13451_v51, %v11942_v48 }
 0x5c7   :  { %v13579_v54 = vld [vmem:[#allocation12 + $0xef4] sm:$0xf0] }
 0x5c8   :  { %8260 = vmatpush.bf16.msra.mxu0 %v10983_v8  ;;  %v10790_v55 = vld [vmem:[#allocation12 + $0x1b8] sm:$0xf]  ;;  %v12455_v59 = vor.u32 %v13579_v54, %v12454_v41  ;;  %v8010_v9 = vpop.f32.mrf.mxu0 }
 0x5c9   :  { %8273 = vmatpush.bf16.msra.mxu1 %v11495_v12  ;;  %8253 = vmatpush.bf16.msrb.mxu3 %v12131_v14  ;;  %v13163_v3 = vld [vmem:[#allocation12 + $0x1f4] sm:$0xf0]  ;;  %v8023_v14 = vpop.f32.mrf.mxu1 }
 0x5ca   :  { %8285 = vmatpush.bf16.msra.mxu2 %v12071_v17  ;;  %v11302_v1 = vld [vmem:[#allocation12 + $0x5b8] sm:$0xf]  ;;  %v10791_v50 = vor.u32 %v13163_v3, %v10790_v55  ;;  %v11048_v55 = vld [vmem:[#allocation12 + $0x3f8] sm:$0xf0] }
 0x5cb   :  { %8241 = vmatmul.bf16.vlgmr.msrb.gmra.mxu2 %v14197_v56  ;;  %v13291_v13 = vld [vmem:[#allocation12 + $0x5f4] sm:$0xf0]  ;;  %v13347_v3 = vld [vmem:[#allocation12 + $0x7bc] sm:$0xf] }
 0x5cc   :  { %8254 = vmatmul.bf16.vlgmr.msrb.gmra.mxu3 %v14199_v58  ;;  %8261 = vmatpush.bf16.msra.mxu0 %v10919_v40  ;;  %v11878_v20 = vld [vmem:[#allocation12 + $0xa38] sm:$0xf]  ;;  %v11303_v2 = vor.u32 %v13291_v13, %v11302_v1  ;;  %v8047_v10 = vpop.f32.mrf.mxu3 }
 0x5cd   :  { %8298 = vmatpush.bf16.msra.mxu3 %v12583_v21  ;;  %8274 = vmatpush.bf16.msra.mxu1 %v11431_v27  ;;  %v13435_v31 = vld [vmem:[#allocation12 + $0xa74] sm:$0xf0]  ;;  %v8034_v27 = vpop.f32.mrf.mxu2 }
 0x5ce   :  { %8286 = vmatpush.bf16.msra.mxu2 %v12007_v62  ;;  %v12390_v19 = vld [vmem:[#allocation12 + $0xe38] sm:$0xf]  ;;  %v11879_v5 = vor.u32 %v13435_v31, %v11878_v20  ;;  %v8035_v47 = vadd.f32 %v8034_v27, %v8022_v57 }
 0x5cf   :  { %v13563_v6 = vld [vmem:[#allocation12 + $0xe74] sm:$0xf0] }
 0x5d0   :  { %8262 = vmatpush.bf16.msra.mxu0 %v10855_v53  ;;  %v10726_v0 = vld [vmem:[#allocation12 + $0x138] sm:$0xf]  ;;  %v12391_v7 = vor.u32 %v13563_v6, %v12390_v19  ;;  %v14289_v41 = vadd.f32 %v8047_v10, %v8035_v47  ;;  %v13315_v10 = vld [vmem:[#allocation12 + $0x6bc] sm:$0xf] }
 0x5d1   :  { %8299 = vmatpush.bf16.msra.mxu3 %v12519_v46  ;;  %8275 = vmatpush.bf16.msra.mxu1 %v11367_v45  ;;  %v13147_v30 = vld [vmem:[#allocation12 + $0x174] sm:$0xf0]  ;;  %v13219_v45 = vld [vmem:[#allocation12 + $0x3bc] sm:$0xf] }
 0x5d2   :  { %8287 = vmatpush.bf16.msra.mxu2 %v11943_v4  ;;  %v11238_v11 = vld [vmem:[#allocation12 + $0x538] sm:$0xf]  ;;  %v10727_v21 = vor.u32 %v13147_v30, %v10726_v0  ;;  %v11560_v4 = vld [vmem:[#allocation12 + $0x7f8] sm:$0xf0]  ;;  %v11051_v19 = vor.u32 %v13219_v45, %v11048_v55 }
 0x5d3   :  { %v13275_v8 = vld [vmem:[#allocation12 + $0x574] sm:$0xf0]  ;;  %v11563_v6 = vor.u32 %v13347_v3, %v11560_v4  ;;  %v13331_v0 = vld [vmem:[#allocation12 + $0x73c] sm:$0xf] }
 0x5d4   :  { %v11814_v12 = vld [vmem:[#allocation12 + $0x9b8] sm:$0xf]  ;;  %8263 = vmatpush.bf16.msra.mxu0 %v10791_v50  ;;  %v11239_v60 = vor.u32 %v13275_v8, %v11238_v11  ;;  %v13203_v50 = vld [vmem:[#allocation12 + $0x33c] sm:$0xf]  ;;  %v8049_v11 = vpop.f32.mrf.mxu3 }
 0x5d5   :  { %8300 = vmatpush.bf16.msra.mxu3 %v12455_v59  ;;  %v13419_v15 = vld [vmem:[#allocation12 + $0x9f4] sm:$0xf0]  ;;  %8276 = vmatpush.bf16.msra.mxu1 %v11303_v2  ;;  %v10984_v2 = vld [vmem:[#allocation12 + $0x378] sm:$0xf0] }
 0x5d6   :  { %v12326_v16 = vld [vmem:[#allocation12 + $0xdb8] sm:$0xf]  ;;  %8288 = vmatpush.bf16.msra.mxu2 %v11879_v5  ;;  %v11815_v18 = vor.u32 %v13419_v15, %v11814_v12  ;;  %v11496_v8 = vld [vmem:[#allocation12 + $0x778] sm:$0xf0] }
 0x5d7   :  { %v13547_v17 = vld [vmem:[#allocation12 + $0xdf4] sm:$0xf0]  ;;  %v13587_v47 = vld [vmem:[#allocation12 + $0xf3c] sm:$0xf] }
 0x5d8   :  { %v10662_v34 = vld [vmem:[#allocation12 + $0xb8] sm:$0xf]  ;;  %v12327_v36 = vor.u32 %v13547_v17, %v12326_v16  ;;  %8264 = vmatpush.bf16.msra.mxu0 %v10727_v21  ;;  %v13475_v16 = vld [vmem:[#allocation12 + $0xbbc] sm:$0xf] }
 0x5d9   :  { %v13131_v29 = vld [vmem:[#allocation12 + $0xf4] sm:$0xf0]  ;;  %8301 = vmatpush.bf16.msra.mxu3 %v12391_v7  ;;  %8277 = vmatpush.bf16.msra.mxu1 %v11239_v60  ;;  %v8036_v7 = vpop.f32.mrf.mxu2  ;;  %v12072_v17 = vld [vmem:[#allocation12 + $0xbf8] sm:$0xf0] }
 0x5da   :  { %v11174_v22 = vld [vmem:[#allocation12 + $0x4b8] sm:$0xf]  ;;  %v10663_v63 = vor.u32 %v13131_v29, %v10662_v34  ;;  %8289 = vmatpush.bf16.msra.mxu2 %v11815_v18  ;;  %v13603_v21 = vld [vmem:[#allocation12 + $0xfbc] sm:$0xf]  ;;  %v10987_v34 = vor.u32 %v13203_v50, %v10984_v2  ;;  %v11499_v29 = vor.u32 %v13331_v0, %v11496_v8 }
 0x5db   :  { %v13259_v23 = vld [vmem:[#allocation12 + $0x4f4] sm:$0xf0]  ;;  %v12584_v60 = vld [vmem:[#allocation12 + $0xff8] sm:$0xf0] }
 0x5dc   :  { %v11750_v40 = vld [vmem:[#allocation12 + $0x938] sm:$0xf]  ;;  %v11175_v48 = vor.u32 %v13259_v23, %v11174_v22  ;;  %8265 = vmatpush.bf16.msra.mxu0 %v10663_v63  ;;  %v13187_v22 = vld [vmem:[#allocation12 + $0x2bc] sm:$0xf]  ;;  %v12587_v27 = vor.u32 %v13603_v21, %v12584_v60 }
 0x5dd   :  { %v13403_v42 = vld [vmem:[#allocation12 + $0x974] sm:$0xf0]  ;;  %8302 = vmatpush.bf16.msra.mxu3 %v12327_v36  ;;  %v10920_v23 = vld [vmem:[#allocation12 + $0x2f8] sm:$0xf0] }
 0x5de   :  { %v12262_v62 = vld [vmem:[#allocation12 + $0xd38] sm:$0xf]  ;;  %v11751_v54 = vor.u32 %v13403_v42, %v11750_v40  ;;  %8278 = vmatpush.bf16.msra.mxu1 %v11175_v48  ;;  %v12075_v40 = vor.u32 %v13475_v16, %v12072_v17  ;;  %v11432_v42 = vld [vmem:[#allocation12 + $0x6f8] sm:$0xf0]  ;;  %v4949_v48 = vperm.slane %v14275_v38, 2 }
 0x5df   :  { %v13531_v46 = vld [vmem:[#allocation12 + $0xd74] sm:$0xf0]  ;;  %v12520_v63 = vld [vmem:[#allocation12 + $0xf78] sm:$0xf0] }
 0x5e0   :  { %v10598_v49 = vld [vmem:[#allocation12 + $0x38] sm:$0xf]  ;;  %v12263_v52 = vor.u32 %v13531_v46, %v12262_v62  ;;  %8290 = vmatpush.bf16.msra.mxu2 %v11751_v54  ;;  %v13459_v62 = vld [vmem:[#allocation12 + $0xb3c] sm:$0xf]  ;;  %v8060_v4 = vpop.f32.mrf.mxu0 }
 0x5e1   :  { %v13115_v61 = vld [vmem:[#allocation12 + $0x74] sm:$0xf0]  ;;  %v12008_v46 = vld [vmem:[#allocation12 + $0xb78] sm:$0xf0] }
 0x5e2   :  { %v11110_v51 = vld [vmem:[#allocation12 + $0x438] sm:$0xf]  ;;  %v10599_v20 = vor.u32 %v13115_v61, %v10598_v49  ;;  %8303 = vmatpush.bf16.msra.mxu3 %v12263_v52  ;;  %v10923_v49 = vor.u32 %v13187_v22, %v10920_v23  ;;  %v11435_v61 = vor.u32 %v13315_v10, %v11432_v42  ;;  %v10856_v54 = vld [vmem:[#allocation12 + $0x278] sm:$0xf0]  ;;  %v12011_v52 = vor.u32 %v13459_v62, %v12008_v46 }
 0x5e3   :  { %v13243_v53 = vld [vmem:[#allocation12 + $0x474] sm:$0xf0]  ;;  %v13299_v45 = vld [vmem:[#allocation12 + $0x63c] sm:$0xf] }
 0x5e4   :  { %v11686_v59 = vld [vmem:[#allocation12 + $0x8b8] sm:$0xf]  ;;  %v11111_v31 = vor.u32 %v13243_v53, %v11110_v51  ;;  %8266 = vmatpush.bf16.msra.mxu0 %v10599_v20  ;;  %v13171_v51 = vld [vmem:[#allocation12 + $0x23c] sm:$0xf]  ;;  %v12523_v53 = vor.u32 %v13587_v47, %v12520_v63  ;;  %v8061_v20 = vadd.f32 %v8060_v4, %v4949_v48 }
 0x5e5   :  { %v13387_v57 = vld [vmem:[#allocation12 + $0x8f4] sm:$0xf0]  ;;  %v11368_v55 = vld [vmem:[#allocation12 + $0x678] sm:$0xf0] }
 0x5e6   :  { %v12198_v1 = vld [vmem:[#allocation12 + $0xcb8] sm:$0xf]  ;;  %v11687_v30 = vor.u32 %v13387_v57, %v11686_v59  ;;  %8279 = vmatpush.bf16.msra.mxu1 %v11111_v31  ;;  %v13443_v3 = vld [vmem:[#allocation12 + $0xabc] sm:$0xf]  ;;  %v8073_v59 = vpop.f32.mrf.mxu1  ;;  %v10859_v31 = vor.u32 %v13171_v51, %v10856_v54 }
 0x5e7   :  { %v13515_v13 = vld [vmem:[#allocation12 + $0xcf4] sm:$0xf0]  ;;  %8267 = vmatmul.bf16.vlgmr.msra.gmra.mxu0 %v14191_v32  ;;  %v11944_v57 = vld [vmem:[#allocation12 + $0xaf8] sm:$0xf0]  ;;  %v8074_v2 = vadd.f32 %v8073_v59, %v8061_v20 }
 0x5e8   :  { %v12199_v5 = vor.u32 %v13515_v13, %v12198_v1  ;;  %v11622_v12 = vld [vmem:[#allocation12 + $0x838] sm:$0xf]  ;;  %8311 = vmatpush.bf16.msrb.mxu0 %v11051_v19  ;;  %8291 = vmatpush.bf16.msra.mxu2 %v11687_v30  ;;  %v13571_v1 = vld [vmem:[#allocation12 + $0xebc] sm:$0xf]  ;;  %v11371_v19 = vor.u32 %v13299_v45, %v11368_v55  ;;  %v11947_v0 = vor.u32 %v13443_v3, %v11944_v57 }
 0x5e9   :  { %v13371_v9 = vld [vmem:[#allocation12 + $0x874] sm:$0xf0]  ;;  %8280 = vmatmul.bf16.vlgmr.msra.gmra.mxu1 %v14193_v35  ;;  %v12456_v13 = vld [vmem:[#allocation12 + $0xef8] sm:$0xf0] }
 0x5ea   :  { %v12134_v14 = vld [vmem:[#allocation12 + $0xc38] sm:$0xf]  ;;  %8324 = vmatpush.bf16.msrb.mxu1 %v11563_v6  ;;  %8304 = vmatpush.bf16.msra.mxu3 %v12199_v5  ;;  %v11623_v18 = vor.u32 %v13371_v9, %v11622_v12  ;;  %v13155_v6 = vld [vmem:[#allocation12 + $0x1bc] sm:$0xf]  ;;  %v12459_v30 = vor.u32 %v13571_v1, %v12456_v13 }
 0x5eb   :  { %v13499_v15 = vld [vmem:[#allocation12 + $0xc74] sm:$0xf0]  ;;  %v10792_v50 = vld [vmem:[#allocation12 + $0x1f8] sm:$0xf0] }
 0x5ec   :  { %v12135_v36 = vor.u32 %v13499_v15, %v12134_v14  ;;  %8312 = vmatpush.bf16.msrb.mxu0 %v10987_v34  ;;  %8292 = vmatpush.bf16.msra.mxu2 %v11623_v18  ;;  %v13283_v5 = vld [vmem:[#allocation12 + $0x5bc] sm:$0xf]  ;;  %v10795_v14 = vor.u32 %v13155_v6, %v10792_v50  ;;  %v8086_v51 = vpop.f32.mrf.mxu2  ;;  %v8099_v54 = vpop.f32.mrf.mxu3 }
 0x5ed   :  { %v11304_v7 = vld [vmem:[#allocation12 + $0x5f8] sm:$0xf0]  ;;  %v8087_v55 = vadd.f32 %v8086_v51, %v8074_v2 }
 0x5ee   :  { %8325 = vmatpush.bf16.msrb.mxu1 %v11499_v29  ;;  %8305 = vmatpush.bf16.msra.mxu3 %v12135_v36  ;;  %v13427_v11 = vld [vmem:[#allocation12 + $0xa3c] sm:$0xf]  ;;  %v11307_v15 = vor.u32 %v13283_v5, %v11304_v7  ;;  %v8062_v36 = vpop.f32.mrf.mxu0  ;;  %v8075_v22 = vpop.f32.mrf.mxu1 }
 0x5ef   :  { %8293 = vmatmul.bf16.vlgmr.msra.gmra.mxu2 %v14197_v56  ;;  %v11880_v8 = vld [vmem:[#allocation12 + $0xa78] sm:$0xf0]  ;;  %v14296_v1 = vadd.f32 %v8099_v54, %v8087_v55 }
 0x5f0   :  { %8337 = vmatpush.bf16.msrb.mxu2 %v12075_v40  ;;  %8313 = vmatpush.bf16.msrb.mxu0 %v10923_v49  ;;  %v13555_v12 = vld [vmem:[#allocation12 + $0xe3c] sm:$0xf]  ;;  %v11883_v21 = vor.u32 %v13427_v11, %v11880_v8 }
 0x5f1   :  { %8306 = vmatmul.bf16.vlgmr.msra.gmra.mxu3 %v14199_v58  ;;  %v12392_v9 = vld [vmem:[#allocation12 + $0xe78] sm:$0xf0] }
 0x5f2   :  { %8350 = vmatpush.bf16.msrb.mxu3 %v12587_v27  ;;  %8326 = vmatpush.bf16.msrb.mxu1 %v11435_v61  ;;  %v13139_v16 = vld [vmem:[#allocation12 + $0x13c] sm:$0xf]  ;;  %v12395_v60 = vor.u32 %v13555_v12, %v12392_v9 }
 0x5f3   :  { %v10728_v17 = vld [vmem:[#allocation12 + $0x178] sm:$0xf0] }
 0x5f4   :  { %8338 = vmatpush.bf16.msrb.mxu2 %v12011_v52  ;;  %8314 = vmatpush.bf16.msrb.mxu0 %v10859_v31  ;;  %v13267_v34 = vld [vmem:[#allocation12 + $0x53c] sm:$0xf]  ;;  %v10731_v10 = vor.u32 %v13139_v16, %v10728_v17  ;;  %v8088_v12 = vpop.f32.mrf.mxu2  ;;  %v8101_v9 = vpop.f32.mrf.mxu3 }
 0x5f5   :  { %v11240_v29 = vld [vmem:[#allocation12 + $0x578] sm:$0xf0]  ;;  %v4952_v9 = vperm.slane %v14275_v38, 5 }
 0x5f6   :  { %8351 = vmatpush.bf16.msrb.mxu3 %v12523_v53  ;;  %8327 = vmatpush.bf16.msrb.mxu1 %v11371_v19  ;;  %v13411_v18 = vld [vmem:[#allocation12 + $0x9bc] sm:$0xf]  ;;  %v11243_v42 = vor.u32 %v13267_v34, %v11240_v29 }
 0x5f7   :  { %v11816_v23 = vld [vmem:[#allocation12 + $0x9f8] sm:$0xf0] }
 0x5f8   :  { %8339 = vmatpush.bf16.msrb.mxu2 %v11947_v0  ;;  %v13539_v40 = vld [vmem:[#allocation12 + $0xdbc] sm:$0xf]  ;;  %8315 = vmatpush.bf16.msrb.mxu0 %v10795_v14  ;;  %v11819_v47 = vor.u32 %v13411_v18, %v11816_v23 }
 0x5f9   :  { %v12328_v27 = vld [vmem:[#allocation12 + $0xdf8] sm:$0xf0] }
 0x5fa   :  { %8352 = vmatpush.bf16.msrb.mxu3 %v12459_v30  ;;  %8328 = vmatpush.bf16.msrb.mxu1 %v11307_v15  ;;  %v13123_v62 = vld [vmem:[#allocation12 + $0xbc] sm:$0xf]  ;;  %v12331_v63 = vor.u32 %v13539_v40, %v12328_v27 }
 0x5fb   :  { %v10664_v46 = vld [vmem:[#allocation12 + $0xf8] sm:$0xf0] }
 0x5fc   :  { %8340 = vmatpush.bf16.msrb.mxu2 %v11883_v21  ;;  %v13251_v48 = vld [vmem:[#allocation12 + $0x4bc] sm:$0xf]  ;;  %8316 = vmatpush.bf16.msrb.mxu0 %v10731_v10  ;;  %v10667_v3 = vor.u32 %v13123_v62, %v10664_v46  ;;  %v4951_v62 = vperm.slane %v14275_v38, 4 }
 0x5fd   :  { %v11176_v49 = vld [vmem:[#allocation12 + $0x4f8] sm:$0xf0] }
 0x5fe   :  { %8353 = vmatpush.bf16.msrb.mxu3 %v12395_v60  ;;  %v13395_v61 = vld [vmem:[#allocation12 + $0x93c] sm:$0xf]  ;;  %8329 = vmatpush.bf16.msrb.mxu1 %v11243_v42  ;;  %v11179_v4 = vor.u32 %v13251_v48, %v11176_v49  ;;  %v4950_v60 = vperm.slane %v14275_v38, 3 }
 0x5ff   :  { %v11752_v52 = vld [vmem:[#allocation12 + $0x978] sm:$0xf0] }
 0x600   :  { %v13523_v53 = vld [vmem:[#allocation12 + $0xd3c] sm:$0xf]  ;;  %8341 = vmatpush.bf16.msrb.mxu2 %v11819_v47  ;;  %v11755_v13 = vor.u32 %v13395_v61, %v11752_v52  ;;  %8317 = vmatpush.bf16.msrb.mxu0 %v10667_v3  ;;  %v8112_v34 = vpop.f32.mrf.mxu0  ;;  %v8125_v29 = vpop.f32.mrf.mxu1 }
 0x601   :  { %v12264_v45 = vld [vmem:[#allocation12 + $0xd78] sm:$0xf0]  ;;  %v8113_v18 = vadd.f32 %v8112_v34, %v4950_v60 }
 0x602   :  { %v13107_v59 = vld [vmem:[#allocation12 + $0x3c] sm:$0xf]  ;;  %8354 = vmatpush.bf16.msrb.mxu3 %v12331_v63  ;;  %v12267_v20 = vor.u32 %v13523_v53, %v12264_v45  ;;  %8330 = vmatpush.bf16.msrb.mxu1 %v11179_v4 }
 0x603   :  { %v10600_v57 = vld [vmem:[#allocation12 + $0x78] sm:$0xf0]  ;;  %v8126_v36 = vadd.f32 %v8125_v29, %v8113_v18 }
 0x604   :  { %v13235_v31 = vld [vmem:[#allocation12 + $0x43c] sm:$0xf]  ;;  %v10603_v2 = vor.u32 %v13107_v59, %v10600_v57  ;;  %8342 = vmatpush.bf16.msrb.mxu2 %v11755_v13 }
 0x605   :  { %v11112_v19 = vld [vmem:[#allocation12 + $0x478] sm:$0xf0] }
 0x606   :  { %v13379_v6 = vld [vmem:[#allocation12 + $0x8bc] sm:$0xf]  ;;  %v11115_v5 = vor.u32 %v13235_v31, %v11112_v19  ;;  %8355 = vmatpush.bf16.msrb.mxu3 %v12267_v20  ;;  %8318 = vmatpush.bf16.msrb.mxu0 %v10603_v2  ;;  %v8363_v2 = vmax.f32 %v14227_v39, %v14232_v37 }
 0x607   :  { %v11688_v50 = vld [vmem:[#allocation12 + $0x8f8] sm:$0xf0] }
 0x608   :  { %v13507_v0 = vld [vmem:[#allocation12 + $0xcbc] sm:$0xf]  ;;  %v11691_v7 = vor.u32 %v13379_v6, %v11688_v50  ;;  %8331 = vmatpush.bf16.msrb.mxu1 %v11115_v5  ;;  %v8114_v22 = vpop.f32.mrf.mxu0  ;;  %v8127_v23 = vpop.f32.mrf.mxu1  ;;  %v8364_v5 = vmax.f32 %v14236_v44, %v8363_v2 }
 0x609   :  { %v12200_v30 = vld [vmem:[#allocation12 + $0xcf8] sm:$0xf0]  ;;  %8319 = vmatmul.bf16.vlgmr.msrb.gmra.mxu0 %v14191_v32  ;;  %v4954_v22 = vperm.slane %v14275_v38, 7 }
 0x60a   :  { %v12203_v11 = vor.u32 %v13507_v0, %v12200_v30  ;;  %v13363_v8 = vld [vmem:[#allocation12 + $0x83c] sm:$0xf]  ;;  %8343 = vmatpush.bf16.msrb.mxu2 %v11691_v7 }
 0x60b   :  { %v11624_v14 = vld [vmem:[#allocation12 + $0x878] sm:$0xf0]  ;;  %8332 = vmatmul.bf16.vlgmr.msrb.gmra.mxu1 %v14193_v35 }
 0x60c   :  { %v13491_v15 = vld [vmem:[#allocation12 + $0xc3c] sm:$0xf]  ;;  %8356 = vmatpush.bf16.msrb.mxu3 %v12203_v11  ;;  %v11627_v17 = vor.u32 %v13363_v8, %v11624_v14  ;;  %v8138_v40 = vpop.f32.mrf.mxu2  ;;  %v8151_v27 = vpop.f32.mrf.mxu3  ;;  %v8365_v8 = vmax.f32 %v14243_v28, %v8364_v5 }
 0x60d   :  { %v12136_v16 = vld [vmem:[#allocation12 + $0xc78] sm:$0xf0]  ;;  %v8139_v10 = vadd.f32 %v8138_v40, %v8126_v36 }
 0x60e   :  { %v12139_v21 = vor.u32 %v13491_v15, %v12136_v16  ;;  %8344 = vmatpush.bf16.msrb.mxu2 %v11627_v17  ;;  %v8366_v12 = vmax.f32 %v14250_v25, %v8365_v8  ;;  %v4953_v15 = vperm.slane %v14275_v38, 6 }
 0x60f   :  { %v14303_v32 = vadd.f32 %v8151_v27, %v8139_v10 }
 0x610   :  { %8357 = vmatpush.bf16.msrb.mxu3 %v12139_v21  ;;  %v8367_v14 = vmax.f32 %v14259_v24, %v8366_v12 }
 0x611   :  { %8345 = vmatmul.bf16.vlgmr.msrb.gmra.mxu2 %v14197_v56 }
 0x612   :  { %v8368_v16 = vmax.f32 %v14266_v33, %v8367_v14 }
 0x613   :  { %8358 = vmatmul.bf16.vlgmr.msrb.gmra.mxu3 %v14199_v58 }
 0x614   :  { %v8140_v35 = vpop.f32.mrf.mxu2  ;;  %v8153_v42 = vpop.f32.mrf.mxu3  ;;  %v8369_v21 = vmax.f32 %v14273_v26, %v8368_v16 }
 0x616   :  { %v8370_v18 = vmax.f32 %v14282_v43, %v8369_v21 }
 0x618   :  { %v8371_v23 = vmax.f32 %v14289_v41, %v8370_v18 }
 0x61a   :  { %v8372_v10 = vmax.f32 %v14296_v1, %v8371_v23 }
 0x620   :  { %v8164_v46 = vpop.f32.mrf.mxu0  ;;  %v8177_v47 = vpop.f32.mrf.mxu1 }
 0x621   :  { %v8165_v56 = vadd.f32 %v8164_v46, %v4951_v62  ;;  %v8373_v62 = vmax.f32 %v14303_v32, %v8372_v10 }
 0x623   :  { %v8178_v63 = vadd.f32 %v8177_v47, %v8165_v56 }
 0x628   :  { %v8166_v58 = vpop.f32.mrf.mxu0  ;;  %v8179_v48 = vpop.f32.mrf.mxu1 }
 0x62c   :  { %v8190_v49 = vpop.f32.mrf.mxu2 }
 0x62d   :  { %v8191_v51 = vadd.f32 %v8190_v49, %v8178_v63 }
 0x62f   :  { %v8203_v61 = vpop.f32.mrf.mxu3 }
 0x630   :  { %v14306_v54 = vadd.f32 %v8203_v61, %v8191_v51 }
 0x632   :  { %v8374_v63 = vmax.f32 %v14306_v54, %v8373_v62 }
 0x634   :  { %v8192_v52 = vpop.f32.mrf.mxu2 }
 0x637   :  { %v8205_v53 = vpop.f32.mrf.mxu3 }
 0x640   :  { %v8216_v45 = vpop.f32.mrf.mxu0 }
 0x641   :  { %v8229_v55 = vpop.f32.mrf.mxu1  ;;  %v8217_v17 = vadd.f32 %v8216_v45, %v4952_v9 }
 0x643   :  { %v8230_v36 = vadd.f32 %v8229_v55, %v8217_v17 }
 0x648   :  { %v8218_v3 = vpop.f32.mrf.mxu0 }
 0x649   :  { %v8231_v4 = vpop.f32.mrf.mxu1 }
 0x64e   :  { %v8242_v59 = vpop.f32.mrf.mxu2 }
 0x64f   :  { %v8255_v57 = vpop.f32.mrf.mxu3  ;;  %v8243_v40 = vadd.f32 %v8242_v59, %v8230_v36 }
 0x651   :  { %v8256_v46 = vadd.f32 %v8255_v57, %v8243_v40 }
 0x653   :  { %v8375_v61 = vmax.f32 %v8256_v46, %v8374_v63 }
 0x656   :  { %v8244_v13 = vpop.f32.mrf.mxu2 }
 0x657   :  { %v8257_v20 = vpop.f32.mrf.mxu3 }
 0x664   :  { %v8268_v31 = vpop.f32.mrf.mxu0 }
 0x665   :  { %v8269_v60 = vadd.f32 %v8268_v31, %v4953_v15 }
 0x666   :  { %v8281_v19 = vpop.f32.mrf.mxu1 }
 0x667   :  { %v8282_v27 = vadd.f32 %v8281_v19, %v8269_v60 }
 0x66c   :  { %v8270_v6 = vpop.f32.mrf.mxu0 }
 0x66e   :  { %v8283_v50 = vpop.f32.mrf.mxu1 }
 0x672   :  { %v8294_v0 = vpop.f32.mrf.mxu2 }
 0x673   :  { %v8295_v35 = vadd.f32 %v8294_v0, %v8282_v27 }
 0x674   :  { %v8307_v30 = vpop.f32.mrf.mxu3 }
 0x675   :  { %v14324_v58 = vadd.f32 %v8307_v30, %v8295_v35 }
 0x677   :  { %v8376_v52 = vmax.f32 %v14324_v58, %v8375_v61 }
 0x67a   :  { %v8296_v7 = vpop.f32.mrf.mxu2 }
 0x67c   :  { %v8309_v11 = vpop.f32.mrf.mxu3 }
 0x686   :  { %v8320_v34 = vpop.f32.mrf.mxu0 }
 0x687   :  { %v8321_v42 = vadd.f32 %v8320_v34, %v4954_v22 }
 0x688   :  { %v8333_v29 = vpop.f32.mrf.mxu1 }
 0x689   :  { %v8334_v48 = vadd.f32 %v8333_v29, %v8321_v42 }
 0x68e   :  { %v8322_v47 = vpop.f32.mrf.mxu0 }
 0x690   :  { %v8335_v56 = vpop.f32.mrf.mxu1 }
 0x694   :  { %v8346_v49 = vpop.f32.mrf.mxu2 }
 0x695   :  { %v8347_v51 = vadd.f32 %v8346_v49, %v8334_v48 }
 0x696   :  { %v8359_v38 = vpop.f32.mrf.mxu3 }
 0x697   :  { %v8360_v53 = vadd.f32 %v8359_v38, %v8347_v51 }
 0x699   :  { %v8377_v45 = vmax.f32 %v8360_v53, %v8376_v52 }
 0x69b   :  { %8378 = vmax.xlane.f32.xlu0 %v8377_v45 }
 0x69c   :  { %v8348_v55 = vpop.f32.mrf.mxu2 }
 0x69e   :  { %v8361_v3 = vpop.f32.mrf.mxu3 }
 0x70e   :  { %v8379_v4 = vpop.xlane.xlu0 %8378 }
 0x70f   :  { %v14328_v59 = vsub.f32 %v14227_v39, %v8379_v4  ;;  %v14331_v57 = vsub.f32 %v14232_v37, %v8379_v4  ;;  %v14334_v13 = vsub.f32 %v14236_v44, %v8379_v4  ;;  %v14337_v20 = vsub.f32 %v14243_v28, %v8379_v4 }
 0x710   :  { %v14342_v6 = vsub.f32 %v14250_v25, %v8379_v4  ;;  %v14346_v39 = vsub.f32 %v14259_v24, %v8379_v4  ;;  %v14350_v44 = vsub.f32 %v14266_v33, %v8379_v4  ;;  %v14354_v0 = vsub.f32 %v14273_v26, %v8379_v4 }
 0x711   :  { %v8396_v31 = vmul.f32 1.442695, %v14328_v59  ;;  %v8398_v19 = vmul.f32 1.442695, %v14331_v57  ;;  %v8400_v50 = vmul.f32 1.442695, %v14334_v13  ;;  %v14358_v24 = vsub.f32 %v14282_v43, %v8379_v4 }
 0x712   :  { %v8402_v37 = vmul.f32 1.442695, %v14337_v20  ;;  %v8404_v28 = vmul.f32 1.442695, %v14342_v6  ;;  %v8406_v25 = vmul.f32 1.442695, %v14346_v39  ;;  %v14362_v11 = vsub.f32 %v14289_v41, %v8379_v4 }
 0x713   :  { %13631 = vpow2.f32 %v8396_v31  ;;  %v8408_v5 = vmul.f32 1.442695, %v14350_v44  ;;  %v8410_v26 = vmul.f32 1.442695, %v14354_v0  ;;  %v14366_v9 = vsub.f32 %v14296_v1, %v8379_v4 }
 0x714   :  { %13633 = vpow2.f32 %v8398_v19  ;;  %v8412_v43 = vmul.f32 1.442695, %v14358_v24  ;;  %v14370_v16 = vsub.f32 %v14303_v32, %v8379_v4  ;;  %v8414_v41 = vmul.f32 1.442695, %v14362_v11 }
 0x715   :  { %13635 = vpow2.f32 %v8400_v50  ;;  %v14374_v60 = vsub.f32 %v14306_v54, %v8379_v4  ;;  %v8416_v1 = vmul.f32 1.442695, %v14366_v9  ;;  %v14377_v18 = vsub.f32 %v8256_v46, %v8379_v4 }
 0x716   :  { %13637 = vpow2.f32 %v8402_v37  ;;  %v8418_v36 = vmul.f32 1.442695, %v14370_v16  ;;  %v14381_v23 = vsub.f32 %v14324_v58, %v8379_v4  ;;  %v8395_v10 = vsub.f32 %v8360_v53, %v8379_v4 }
 0x717   :  { %13639 = vpow2.f32 %v8404_v28  ;;  %v8420_v40 = vmul.f32 1.442695, %v14374_v60  ;;  %v8422_v35 = vmul.f32 1.442695, %v14377_v18 }
 0x718   :  { %13641 = vpow2.f32 %v8406_v25  ;;  %v8424_v46 = vmul.f32 1.442695, %v14381_v23  ;;  %v8426_v63 = vmul.f32 1.442695, %v8395_v10 }
 0x719   :  { %v13632_v30 = vpop.eup %13631  ;;  %13643 = vpow2.f32 %v8408_v5 }
 0x71a   :  { %v13634_v2 = vpop.eup %13633  ;;  %13645 = vpow2.f32 %v8410_v26 }
 0x71b   :  { %v8428_v7 = vadd.f32 %v13634_v2, %v13632_v30  ;;  %v13636_v33 = vpop.eup %13635  ;;  %13647 = vpow2.f32 %v8412_v43 }
 0x71c   :  { %v13638_v12 = vpop.eup %13637  ;;  %13649 = vpow2.f32 %v8414_v41 }
 0x71d   :  { %v8429_v8 = vadd.f32 %v13636_v33, %v8428_v7  ;;  %v13640_v15 = vpop.eup %13639  ;;  %13651 = vpow2.f32 %v8416_v1 }
 0x71e   :  { %v13642_v21 = vpop.eup %13641  ;;  %13653 = vpow2.f32 %v8418_v36 }
 0x71f   :  { %v8430_v14 = vadd.f32 %v13638_v12, %v8429_v8  ;;  %v13644_v29 = vpop.eup %13643  ;;  %13655 = vpow2.f32 %v8420_v40 }
 0x720   :  { %v13646_v22 = vpop.eup %13645  ;;  %13657 = vpow2.f32 %v8422_v35 }
 0x721   :  { %v8431_v17 = vadd.f32 %v13640_v15, %v8430_v14  ;;  %v13648_v27 = vpop.eup %13647  ;;  %13659 = vpow2.f32 %v8424_v46 }
 0x722   :  { %v13650_v62 = vpop.eup %13649  ;;  %13661 = vpow2.f32 %v8426_v63 }
 0x723   :  { %v8432_v34 = vadd.f32 %v13642_v21, %v8431_v17  ;;  %v13652_v56 = vpop.eup %13651 }
 0x724   :  { %v13654_v48 = vpop.eup %13653 }
 0x725   :  { %v8433_v32 = vadd.f32 %v13644_v29, %v8432_v34  ;;  %v13656_v38 = vpop.eup %13655 }
 0x726   :  { %v13658_v51 = vpop.eup %13657 }
 0x727   :  { %v8434_v54 = vadd.f32 %v13646_v22, %v8433_v32  ;;  %v13660_v53 = vpop.eup %13659 }
 0x728   :  { %v13662_v55 = vpop.eup %13661 }
 0x729   :  { %v8435_v42 = vadd.f32 %v13648_v27, %v8434_v54 }
 0x72b   :  { %v8436_v47 = vadd.f32 %v13650_v62, %v8435_v42 }
 0x72d   :  { %v8437_v58 = vadd.f32 %v13652_v56, %v8436_v47 }
 0x72f   :  { %v8438_v49 = vadd.f32 %v13654_v48, %v8437_v58 }
 0x731   :  { %v8439_v61 = vadd.f32 %v13656_v38, %v8438_v49 }
 0x733   :  { %v8440_v52 = vadd.f32 %v13658_v51, %v8439_v61 }
 0x735   :  { %v8441_v45 = vadd.f32 %v13660_v53, %v8440_v52 }
 0x737   :  { %v8442_v3 = vadd.f32 %v13662_v55, %v8441_v45 }
 0x739   :  { %8443 = vadd.xlane.f32.xlu1 %v8442_v3 }
 0x7ac   :  { %v8444_v4 = vpop.xlane.xlu1 %8443 }
 0x7ad   :  { %13663 = vlog2.f32 %v8444_v4 }
 0x7b3   :  { %v13664_v31 = vpop.eup %13663 }
 0x7b4   :  { %v8446_v19 = vmul.f32 0.6931472, %v13664_v31 }
 0x7b6   :  { %v8447_v50 = vsub.f32 %v14328_v59, %v8446_v19  ;;  %v8448_v37 = vsub.f32 %v14331_v57, %v8446_v19  ;;  %v8449_v28 = vsub.f32 %v14334_v13, %v8446_v19  ;;  %v8450_v25 = vsub.f32 %v14337_v20, %v8446_v19 }
 0x7b7   :  { %v8451_v30 = vsub.f32 %v14342_v6, %v8446_v19  ;;  %v8452_v2 = vsub.f32 %v14346_v39, %v8446_v19  ;;  %v8453_v59 = vsub.f32 %v14350_v44, %v8446_v19  ;;  %v8454_v57 = vsub.f32 %v14354_v0, %v8446_v19 }
 0x7b8   :  { %8463 = vst [vmem:[%s14459_s10] sm:$0xff] %v8447_v50  ;;  %v8455_v13 = vsub.f32 %v14358_v24, %v8446_v19  ;;  %v8456_v20 = vsub.f32 %v14362_v11, %v8446_v19  ;;  %v8457_v6 = vsub.f32 %v14366_v9, %v8446_v19  ;;  %v8458_v39 = vsub.f32 %v14370_v16, %v8446_v19 }
 0x7b9   :  { %8464 = vst [vmem:[%s14459_s10 + $0x8] sm:$0xff] %v8448_v37  ;;  %v8459_v44 = vsub.f32 %v14374_v60, %v8446_v19  ;;  %v8460_v0 = vsub.f32 %v14377_v18, %v8446_v19  ;;  %v8461_v24 = vsub.f32 %v14381_v23, %v8446_v19  ;;  %v8462_v5 = vsub.f32 %v8395_v10, %v8446_v19 }
 0x7ba   :  { %8465 = vst [vmem:[%s14459_s10 + $0x10] sm:$0xff] %v8449_v28 }
 0x7bb   :  { %8466 = vst [vmem:[%s14459_s10 + $0x18] sm:$0xff] %v8450_v25 }
 0x7bc   :  { %8467 = vst [vmem:[%s14459_s10 + $0x20] sm:$0xff] %v8451_v30 }
 0x7bd   :  { %8468 = vst [vmem:[%s14459_s10 + $0x28] sm:$0xff] %v8452_v2 }
 0x7be   :  { %8469 = vst [vmem:[%s14459_s10 + $0x30] sm:$0xff] %v8453_v59 }
 0x7bf   :  { %8470 = vst [vmem:[%s14459_s10 + $0x38] sm:$0xff] %v8454_v57 }
 0x7c0   :  { %8471 = vst [vmem:[%s14459_s10 + $0x40] sm:$0xff] %v8455_v13 }
 0x7c1   :  { %8472 = vst [vmem:[%s14459_s10 + $0x48] sm:$0xff] %v8456_v20 }
 0x7c2   :  { %8473 = vst [vmem:[%s14459_s10 + $0x50] sm:$0xff] %v8457_v6 }
 0x7c3   :  { %8474 = vst [vmem:[%s14459_s10 + $0x58] sm:$0xff] %v8458_v39 }
 0x7c4   :  { %8475 = vst [vmem:[%s14459_s10 + $0x60] sm:$0xff] %v8459_v44 }
 0x7c5   :  { %8476 = vst [vmem:[%s14459_s10 + $0x68] sm:$0xff] %v8460_v0 }
 0x7c6   :  { %8477 = vst [vmem:[%s14459_s10 + $0x70] sm:$0xff] %v8461_v24 }
 0x7c7   :  { %8478 = vst [vmem:[%s14459_s10 + $0x78] sm:$0xff] %v8462_v5 }
 0x7c8   :  { %8487 = vsyncpa [#allocation3], 1 }
 0x7c9   :  { %8488 = vsyncpa [#allocation5], 1 }
 0x7ca   :  { %8489 = vsyncpa [#allocation8], 1 }
 0x7cb   :  { %8490 = vsyncpa [#allocation11], 1 }
 0x7cc   :  { %8491 = vsyncpa [#allocation14], 1 }

</bundles_post_ra>
